<compile_context>
chip_gen: v7x
topology: tpu7x:2x2x1
jax: 0.10.0
libtpu: 0.0.40
codegen_flags: <defaults>
</compile_context>

<pallas_src>
import functools
import itertools

import numpy as np
import jax
import jax.numpy as jnp
from jax import lax
from jax.experimental import pallas as pl
from jax.experimental.pallas import tpu as pltpu

CLASS_WEIGHT = 1.0
COORD_WEIGHT = 1.0
NUM_SAMPLE_POINTS = 100
FOCAL_ALPHA = 0.25
FOCAL_GAMMA = 2.0

_LANE = 128          # TPU lane width; T is tiled with tn = 128
_SAMPLE_CHUNK = 8    # sample points processed per unrolled chunk


def _round_up(x, m):
    return ((x + m - 1) // m) * m


# --------------------------------------------------------------------------
# Pallas kernel: one (tm, tn) cost tile.
# --------------------------------------------------------------------------
def _matcher_cost_kernel(logits_ref, onehot_ref, pc_ref, basis_t_ref, tgt_ref,
                         out_ref, *, class_weight, coord_weight, alpha, gamma,
                         n_chunks, chunk, coord_bf16):
    tm, tn = out_ref.shape

    pc = pc_ref[...]                                   # (tm, 8) ctrl pts (x0 y0 x1 y1 ...)

    # ---- L1 cdist over sampled bezier points -------------------------------
    # Fully unrolled static loop: 25 chunks x 8 samples.  Per chunk one tiny
    # MXU matmul produces the pred samples (preds on sublanes, samples on
    # lanes); per sample one lane-broadcast column and one sublane-broadcast
    # row feed the VPU abs-diff accumulation into a register-resident
    # (tm, tn) f32 accumulator.
    acc = jnp.zeros((tm, tn), jnp.float32)
    for c in range(n_chunks):
        base = c * chunk
        basis_c = basis_t_ref[base:base + chunk, :]    # (chunk, 8), static aligned slice
        # (tm, 8) x (chunk, 8)^T -> (tm, chunk)
        p_chunk = lax.dot_general(pc, basis_c, (((1,), (1,)), ((), ())),
                                  preferred_element_type=jnp.float32)
        t_chunk = tgt_ref[base:base + chunk, :]        # (chunk, tn), static aligned slice

        if coord_bf16:
            # Opt-in packed-bf16 inner loop (v6e/v7x), f32 accumulation per chunk.
            p_b = p_chunk.astype(jnp.bfloat16)
            t_b = t_chunk.astype(jnp.bfloat16)
            part = jnp.zeros((tm, tn), jnp.bfloat16)
            for j in range(chunk):
                col = jnp.broadcast_to(p_b[:, j:j + 1], (tm, tn))
                row = jnp.broadcast_to(t_b[j:j + 1, :], (tm, tn))
                part = part + jnp.abs(col - row)
            acc = acc + part.astype(jnp.float32)
        else:
            for j in range(chunk):
                col = jnp.broadcast_to(p_chunk[:, j:j + 1], (tm, tn))  # lane bcast
                row = jnp.broadcast_to(t_chunk[j:j + 1, :], (tm, tn))  # sublane bcast
                acc = acc + jnp.abs(col - row)

    cost_coord = acc

    # ---- focal classification cost -----------------------------------------
    # One softplus evaluation:
    #   sp      = softplus(-x) = -log(sigmoid(x))
    #   sp + x  = softplus(x)  = -log(1 - sigmoid(x))
    #   prob    = exp(-sp)
    x = logits_ref[...].astype(jnp.float32)            # (tm, C)
    sp_neg = jnp.maximum(-x, 0.0) + jnp.log(1.0 + jnp.exp(-jnp.abs(x)))
    sp_pos = sp_neg + x
    prob = jnp.exp(-sp_neg)
    one_m = 1.0 - prob
    if gamma == 2.0:
        prob_g = prob * prob
        one_m_g = one_m * one_m
    else:
        prob_g = prob ** gamma
        one_m_g = one_m ** gamma
    pos_cost = alpha * one_m_g * sp_neg
    neg_cost = (1.0 - alpha) * prob_g * sp_pos
    # class gather as one-hot matmul: (tm, C) x (C, tn) -> (tm, tn)
    cost_class = jnp.dot(pos_cost - neg_cost, onehot_ref[...],
                         preferred_element_type=jnp.float32)

    out_ref[...] = class_weight * cost_class + coord_weight * cost_coord


def _compute_cost_matrix(pred_logits, pred_beziers, tgt_ids, tgt_beziers, *,
                         class_weight=CLASS_WEIGHT, coord_weight=COORD_WEIGHT,
                         num_sample_points=NUM_SAMPLE_POINTS,
                         alpha=FOCAL_ALPHA, gamma=FOCAL_GAMMA,
                         tn=_LANE, coord_bf16=False):
    """Returns C with shape (bs, num_queries, total_targets), float32."""
    bs, num_queries, num_classes = pred_logits.shape
    n = bs * num_queries
    t_total = int(tgt_beziers.shape[0]) if tgt_beziers.ndim else 0

    s = int(num_sample_points)
    two_s = 2 * s
    chunk = _SAMPLE_CHUNK
    two_s_pad = _round_up(two_s, chunk)
    n_chunks = two_s_pad // chunk

    # Row tile adapts to small problems (sublane blocks only need multiples of 8).
    tm = min(128, _round_up(max(n, 1), 8))
    n_pad = _round_up(max(n, 1), tm)
    t_pad = _round_up(max(t_total, 1), tn)

    logits = pred_logits.reshape(n, num_classes).astype(jnp.float32)
    pc = pred_beziers.reshape(n, 8).astype(jnp.float32)        # (N, 8) x0 y0 x1 y1 ...
    tc = tgt_beziers.reshape(t_total, 8).astype(jnp.float32)   # (T, 8)

    # cubic Bernstein basis at S sample points: (4, S)
    tt = jnp.linspace(0.0, 1.0, s, dtype=jnp.float32)
    bern = jnp.stack([(1.0 - tt) ** 3,
                      3.0 * tt * (1.0 - tt) ** 2,
                      3.0 * tt ** 2 * (1.0 - tt),
                      tt ** 3], axis=0)

    # block-diagonal basis mapping interleaved ctrl pts -> [x samples | y samples]
    # (zero-padded sample columns contribute |0-0| = 0 on both sides).
    basis = jnp.zeros((8, two_s_pad), dtype=jnp.float32)
    basis = basis.at[0::2, :s].set(bern)          # x control rows
    basis = basis.at[1::2, s:two_s].set(bern)     # y control rows
    basis_t = basis.T                             # (2S_pad, 8)

    # target sampled points, samples on rows (grid-invariant, hoisted to wrapper)
    tgt_samples = jnp.dot(tc, basis, precision=lax.Precision.HIGHEST).T  # (2S_pad, T)
    tgt_samples = jnp.pad(tgt_samples, ((0, 0), (0, t_pad - t_total)))

    # one-hot selector for the focal-cost gather: (C, T_pad)
    # TODO(synk): out-of-range target ids silently map to a zero column
    # (torch gather would error); acceptable for valid label ranges.
    onehot = jax.nn.one_hot(tgt_ids, num_classes, dtype=jnp.float32).T
    onehot = jnp.pad(onehot, ((0, 0), (0, t_pad - t_total)))

    # pad query rows up to the row tile
    logits = jnp.pad(logits, ((0, n_pad - n), (0, 0)))
    pc = jnp.pad(pc, ((0, n_pad - n), (0, 0)))

    kernel = functools.partial(
        _matcher_cost_kernel,
        class_weight=float(class_weight), coord_weight=float(coord_weight),
        alpha=float(alpha), gamma=float(gamma),
        n_chunks=n_chunks, chunk=chunk, coord_bf16=bool(coord_bf16))

    cost = pl.pallas_call(
        kernel,
        out_shape=jax.ShapeDtypeStruct((n_pad, t_pad), jnp.float32),
        grid=(n_pad // tm, t_pad // tn),
        in_specs=[
            pl.BlockSpec((tm, num_classes), lambda i, j: (i, 0)),   # logits
            pl.BlockSpec((num_classes, tn), lambda i, j: (0, j)),   # one-hot (T tile)
            pl.BlockSpec((tm, 8), lambda i, j: (i, 0)),             # pred ctrl points
            pl.BlockSpec((two_s_pad, 8), lambda i, j: (0, 0)),      # Bernstein^T (resident)
            pl.BlockSpec((two_s_pad, tn), lambda i, j: (0, j)),     # target samples (T tile)
        ],
        out_specs=pl.BlockSpec((tm, tn), lambda i, j: (i, j)),
        compiler_params=pltpu.CompilerParams(
            dimension_semantics=("parallel", "parallel")),
    )(logits, onehot, pc, basis_t, tgt_samples)

    # slice off padded query rows AND padded target columns before use
    return cost[:n, :t_total].reshape(bs, num_queries, t_total)


# --------------------------------------------------------------------------
# Host-side Hungarian assignment (sequential; no Pallas equivalent).
# --------------------------------------------------------------------------
def _linear_sum_assignment(cost):
    try:
        from scipy.optimize import linear_sum_assignment
        return linear_sum_assignment(cost)
    except Exception:
        # exact brute force for the small problems used here
        n_r, n_c = cost.shape
        if n_r < n_c:
            r_t, c_t = _linear_sum_assignment(cost.T)
            rows, cols = np.asarray(c_t), np.asarray(r_t)
            order = np.argsort(rows)
            return rows[order], cols[order]
        best_cost, best_perm = None, None
        for perm in itertools.permutations(range(n_r), n_c):
            ss = cost[np.array(perm), np.arange(n_c)].sum()
            if best_cost is None or ss < best_cost:
                best_cost, best_perm = ss, perm
        rows = np.array(best_perm)
        cols = np.arange(n_c)
        order = np.argsort(rows)
        return rows[order], cols[order]


def bezier_points_hungarian_matcher(outputs, targets):
    bs, num_queries = outputs['pred_logits'].shape[:2]
    has_bezier = 'beziers' in targets[0]
    # TODO(synk): the non-bezier 'ctrl_points' branch (raw-point cdist without
    # resampling) is not wired through the Pallas kernel; only 'beziers' path.
    key = 'beziers' if has_bezier else 'ctrl_points'
    sizes = [int(v[key].shape[0]) for v in targets]

    if sum(sizes) == 0:
        empty = (np.array([], dtype=np.int64), np.array([], dtype=np.int64))
        return [empty for _ in range(bs)]

    tgt_ids = jnp.concatenate([v['labels'] for v in targets])
    tgt_beziers = jnp.concatenate([v[key] for v in targets], axis=0)

    C = _compute_cost_matrix(outputs['pred_logits'], outputs['pred_beziers'],
                             tgt_ids, tgt_beziers)
    C = np.asarray(jax.block_until_ready(C))

    indices = []
    col = 0
    for i, size in enumerate(sizes):
        if size == 0:
            indices.append((np.array([], dtype=np.int64),
                            np.array([], dtype=np.int64)))
        else:
            r, c = _linear_sum_assignment(C[i, :, col:col + size])
            indices.append((np.asarray(r, dtype=np.int64),
                            np.asarray(c, dtype=np.int64)))
        col += size
    return indices


# --------------------------------------------------------------------------
# Pure-numpy reference of the cost matrix (verification only), faithful to
# the original torch module (sigmoid + log(. + 1e-8), full cdist).
# --------------------------------------------------------------------------
def _reference_cost_numpy(pred_logits, pred_beziers, tgt_ids, tgt_beziers,
                          num_sample_points=NUM_SAMPLE_POINTS):
    pred_logits = np.asarray(pred_logits, np.float32)
    bs, nq, C = pred_logits.shape
    prob = 1.0 / (1.0 + np.exp(-pred_logits.reshape(-1, C)))
    neg = (1 - FOCAL_ALPHA) * prob ** FOCAL_GAMMA * (-np.log(1 - prob + 1e-8))
    pos = FOCAL_ALPHA * (1 - prob) ** FOCAL_GAMMA * (-np.log(prob + 1e-8))
    ids = np.asarray(tgt_ids)
    cost_class = pos[:, ids] - neg[:, ids]

    t = np.linspace(0.0, 1.0, num_sample_points, dtype=np.float32)
    bern = np.stack([(1 - t) ** 3, 3 * t * (1 - t) ** 2,
                     3 * t ** 2 * (1 - t), t ** 3], axis=1)        # (S, 4)
    pc = np.asarray(pred_beziers, np.float32).reshape(-1, 4, 2)
    tc = np.asarray(tgt_beziers, np.float32).reshape(-1, 4, 2)
    pp = np.einsum('sk,nkd->nsd', bern, pc).reshape(pc.shape[0], -1)
    tp = np.einsum('sk,nkd->nsd', bern, tc).reshape(tc.shape[0], -1)
    cost_coord = np.abs(pp[:, None, :] - tp[None, :, :]).sum(-1)

    return (CLASS_WEIGHT * cost_class +
            COORD_WEIGHT * cost_coord).reshape(bs, nq, -1)


if __name__ == "__main__":
    key = jax.random.PRNGKey(0)
    bs, num_queries, num_classes = 2, 8, 4
    k1, k2, k3, k4, k5, k6 = jax.random.split(key, 6)

    pred_logits = jax.random.normal(k1, (bs, num_queries, num_classes),
                                    dtype=jnp.float32)
    pred_beziers = jax.random.uniform(k2, (bs, num_queries, 8),
                                      dtype=jnp.float32)
    outputs = {'pred_logits': pred_logits, 'pred_beziers': pred_beziers}

    sizes = [3, 2]
    tkeys = [(k3, k4), (k5, k6)]
    targets = []
    for nn, (ka, kb) in zip(sizes, tkeys):
        labels = jax.random.randint(ka, (nn,), 0, num_classes, dtype=jnp.int32)
        beziers = jax.random.uniform(kb, (nn, 4, 2), dtype=jnp.float32)
        targets.append({'labels': labels, 'beziers': beziers})

    # run the Pallas kernel once and verify the cost matrix
    tgt_ids = jnp.concatenate([t['labels'] for t in targets])
    tgt_beziers = jnp.concatenate([t['beziers'] for t in targets], axis=0)
    C_kernel = _compute_cost_matrix(pred_logits, pred_beziers,
                                    tgt_ids, tgt_beziers)
    jax.block_until_ready(C_kernel)

    C_ref = _reference_cost_numpy(pred_logits, pred_beziers,
                                  tgt_ids, tgt_beziers)
    # tolerance leaves headroom for reduced-precision MXU passes on the tiny
    # bezier-sampling matmuls; structural errors would be O(1) and still caught.
    assert np.allclose(np.asarray(C_kernel), C_ref, rtol=1e-2, atol=1e-2), \
        "Pallas cost matrix mismatch"

    # full matcher (kernel cost matrix + host-side Hungarian)
    indices = bezier_points_hungarian_matcher(outputs, targets)
    assert len(indices) == bs
    for (r, c), nn in zip(indices, sizes):
        assert r.shape == (nn,) and c.shape == (nn,)
        assert r.dtype == np.int64 and c.dtype == np.int64

    print("KERNEL_OK")
</pallas_src>

<mosaic_0001>
module attributes {stable_mosaic.version = 11 : i64} {
  func.func @_matcher_cost_kernel(%arg0: i32, %arg1: i32, %arg2: memref<16x4xf32, #tpu.memory_space<vmem>>, %arg3: memref<4x128xf32, #tpu.memory_space<vmem>>, %arg4: memref<16x8xf32, #tpu.memory_space<vmem>>, %arg5: memref<200x8xf32, #tpu.memory_space<vmem>>, %arg6: memref<200x128xf32, #tpu.memory_space<vmem>>, %arg7: memref<16x128xf32, #tpu.memory_space<vmem>>) attributes {dimension_semantics = [#tpu.dimension_semantics<parallel>, #tpu.dimension_semantics<parallel>], iteration_bounds = array<i64: 1, 1>, scalar_prefetch = 0 : i64, scratch_operands = 0 : i64, tpu.core_type = #tpu.core_type<tc>, window_params = [{transform_indices = @transform_0, window_bounds = array<i64: 16, 4>}, {transform_indices = @transform_1, window_bounds = array<i64: 4, 128>}, {transform_indices = @transform_2, window_bounds = array<i64: 16, 8>}, {pipeline_mode = #tpu.pipeline_mode<synchronous>, transform_indices = @transform_3, window_bounds = array<i64: 200, 8>}, {transform_indices = @transform_4, window_bounds = array<i64: 200, 128>}, {transform_indices = @transform_5, window_bounds = array<i64: 16, 128>}]} {
    %c0 = arith.constant 0 : index
    %c0_0 = arith.constant 0 : index
    %0 = vector.load %arg4[%c0, %c0_0] : memref<16x8xf32, #tpu.memory_space<vmem>>, vector<16x8xf32>
    %cst = arith.constant 0.000000e+00 : f32
    %1 = vector.broadcast %cst : f32 to vector<16x128xf32>
    %c0_1 = arith.constant 0 : index
    %c0_2 = arith.constant 0 : index
    %2 = vector.load %arg5[%c0_1, %c0_2] : memref<200x8xf32, #tpu.memory_space<vmem>>, vector<8x8xf32>
    %cst_3 = arith.constant dense<0.000000e+00> : vector<16x8xf32>
    %3 = tpu.matmul %0, %2, %cst_3 {dimension_numbers = #tpu.dot_dimension_numbers<[1], [1], [0], [0], [0, 0, 1, 0], [], []>} : vector<16x8xf32>, vector<8x8xf32>, vector<16x8xf32> -> vector<16x8xf32>
    %c0_4 = arith.constant 0 : index
    %c0_5 = arith.constant 0 : index
    %4 = vector.load %arg6[%c0_4, %c0_5] : memref<200x128xf32, #tpu.memory_space<vmem>>, vector<8x128xf32>
    %5 = vector.extract_strided_slice %3 {offsets = [0, 0], sizes = [16, 1], strides = [1, 1]} : vector<16x8xf32> to vector<16x1xf32>
    %6 = vector.shape_cast %5 : vector<16x1xf32> to vector<16x1xf32>
    %7 = vector.broadcast %6 : vector<16x1xf32> to vector<16x128xf32>
    %8 = vector.extract_strided_slice %4 {offsets = [0, 0], sizes = [1, 128], strides = [1, 1]} : vector<8x128xf32> to vector<1x128xf32>
    %9 = vector.shape_cast %8 : vector<1x128xf32> to vector<1x128xf32>
    %10 = vector.broadcast %9 : vector<1x128xf32> to vector<16x128xf32>
    %11 = arith.subf %7, %10 : vector<16x128xf32>
    %12 = math.absf %11 : vector<16x128xf32>
    %13 = arith.addf %1, %12 : vector<16x128xf32>
    %14 = vector.extract_strided_slice %3 {offsets = [0, 1], sizes = [16, 1], strides = [1, 1]} : vector<16x8xf32> to vector<16x1xf32>
    %15 = vector.shape_cast %14 : vector<16x1xf32> to vector<16x1xf32>
    %16 = vector.broadcast %15 : vector<16x1xf32> to vector<16x128xf32>
    %17 = vector.extract_strided_slice %4 {offsets = [1, 0], sizes = [1, 128], strides = [1, 1]} : vector<8x128xf32> to vector<1x128xf32>
    %18 = vector.shape_cast %17 : vector<1x128xf32> to vector<1x128xf32>
    %19 = vector.broadcast %18 : vector<1x128xf32> to vector<16x128xf32>
    %20 = arith.subf %16, %19 : vector<16x128xf32>
    %21 = math.absf %20 : vector<16x128xf32>
    %22 = arith.addf %13, %21 : vector<16x128xf32>
    %23 = vector.extract_strided_slice %3 {offsets = [0, 2], sizes = [16, 1], strides = [1, 1]} : vector<16x8xf32> to vector<16x1xf32>
    %24 = vector.shape_cast %23 : vector<16x1xf32> to vector<16x1xf32>
    %25 = vector.broadcast %24 : vector<16x1xf32> to vector<16x128xf32>
    %26 = vector.extract_strided_slice %4 {offsets = [2, 0], sizes = [1, 128], strides = [1, 1]} : vector<8x128xf32> to vector<1x128xf32>
    %27 = vector.shape_cast %26 : vector<1x128xf32> to vector<1x128xf32>
    %28 = vector.broadcast %27 : vector<1x128xf32> to vector<16x128xf32>
    %29 = arith.subf %25, %28 : vector<16x128xf32>
    %30 = math.absf %29 : vector<16x128xf32>
    %31 = arith.addf %22, %30 : vector<16x128xf32>
    %32 = vector.extract_strided_slice %3 {offsets = [0, 3], sizes = [16, 1], strides = [1, 1]} : vector<16x8xf32> to vector<16x1xf32>
    %33 = vector.shape_cast %32 : vector<16x1xf32> to vector<16x1xf32>
    %34 = vector.broadcast %33 : vector<16x1xf32> to vector<16x128xf32>
    %35 = vector.extract_strided_slice %4 {offsets = [3, 0], sizes = [1, 128], strides = [1, 1]} : vector<8x128xf32> to vector<1x128xf32>
    %36 = vector.shape_cast %35 : vector<1x128xf32> to vector<1x128xf32>
    %37 = vector.broadcast %36 : vector<1x128xf32> to vector<16x128xf32>
    %38 = arith.subf %34, %37 : vector<16x128xf32>
    %39 = math.absf %38 : vector<16x128xf32>
    %40 = arith.addf %31, %39 : vector<16x128xf32>
    %41 = vector.extract_strided_slice %3 {offsets = [0, 4], sizes = [16, 1], strides = [1, 1]} : vector<16x8xf32> to vector<16x1xf32>
    %42 = vector.shape_cast %41 : vector<16x1xf32> to vector<16x1xf32>
    %43 = vector.broadcast %42 : vector<16x1xf32> to vector<16x128xf32>
    %44 = vector.extract_strided_slice %4 {offsets = [4, 0], sizes = [1, 128], strides = [1, 1]} : vector<8x128xf32> to vector<1x128xf32>
    %45 = vector.shape_cast %44 : vector<1x128xf32> to vector<1x128xf32>
    %46 = vector.broadcast %45 : vector<1x128xf32> to vector<16x128xf32>
    %47 = arith.subf %43, %46 : vector<16x128xf32>
    %48 = math.absf %47 : vector<16x128xf32>
    %49 = arith.addf %40, %48 : vector<16x128xf32>
    %50 = vector.extract_strided_slice %3 {offsets = [0, 5], sizes = [16, 1], strides = [1, 1]} : vector<16x8xf32> to vector<16x1xf32>
    %51 = vector.shape_cast %50 : vector<16x1xf32> to vector<16x1xf32>
    %52 = vector.broadcast %51 : vector<16x1xf32> to vector<16x128xf32>
    %53 = vector.extract_strided_slice %4 {offsets = [5, 0], sizes = [1, 128], strides = [1, 1]} : vector<8x128xf32> to vector<1x128xf32>
    %54 = vector.shape_cast %53 : vector<1x128xf32> to vector<1x128xf32>
    %55 = vector.broadcast %54 : vector<1x128xf32> to vector<16x128xf32>
    %56 = arith.subf %52, %55 : vector<16x128xf32>
    %57 = math.absf %56 : vector<16x128xf32>
    %58 = arith.addf %49, %57 : vector<16x128xf32>
    %59 = vector.extract_strided_slice %3 {offsets = [0, 6], sizes = [16, 1], strides = [1, 1]} : vector<16x8xf32> to vector<16x1xf32>
    %60 = vector.shape_cast %59 : vector<16x1xf32> to vector<16x1xf32>
    %61 = vector.broadcast %60 : vector<16x1xf32> to vector<16x128xf32>
    %62 = vector.extract_strided_slice %4 {offsets = [6, 0], sizes = [1, 128], strides = [1, 1]} : vector<8x128xf32> to vector<1x128xf32>
    %63 = vector.shape_cast %62 : vector<1x128xf32> to vector<1x128xf32>
    %64 = vector.broadcast %63 : vector<1x128xf32> to vector<16x128xf32>
    %65 = arith.subf %61, %64 : vector<16x128xf32>
    %66 = math.absf %65 : vector<16x128xf32>
    %67 = arith.addf %58, %66 : vector<16x128xf32>
    %68 = vector.extract_strided_slice %3 {offsets = [0, 7], sizes = [16, 1], strides = [1, 1]} : vector<16x8xf32> to vector<16x1xf32>
    %69 = vector.shape_cast %68 : vector<16x1xf32> to vector<16x1xf32>
    %70 = vector.broadcast %69 : vector<16x1xf32> to vector<16x128xf32>
    %71 = vector.extract_strided_slice %4 {offsets = [7, 0], sizes = [1, 128], strides = [1, 1]} : vector<8x128xf32> to vector<1x128xf32>
    %72 = vector.shape_cast %71 : vector<1x128xf32> to vector<1x128xf32>
    %73 = vector.broadcast %72 : vector<1x128xf32> to vector<16x128xf32>
    %74 = arith.subf %70, %73 : vector<16x128xf32>
    %75 = math.absf %74 : vector<16x128xf32>
    %76 = arith.addf %67, %75 : vector<16x128xf32>
    %c8 = arith.constant 8 : index
    %c0_6 = arith.constant 0 : index
    %77 = vector.load %arg5[%c8, %c0_6] : memref<200x8xf32, #tpu.memory_space<vmem>>, vector<8x8xf32>
    %cst_7 = arith.constant dense<0.000000e+00> : vector<16x8xf32>
    %78 = tpu.matmul %0, %77, %cst_7 {dimension_numbers = #tpu.dot_dimension_numbers<[1], [1], [0], [0], [0, 0, 1, 0], [], []>} : vector<16x8xf32>, vector<8x8xf32>, vector<16x8xf32> -> vector<16x8xf32>
    %c8_8 = arith.constant 8 : index
    %c0_9 = arith.constant 0 : index
    %79 = vector.load %arg6[%c8_8, %c0_9] : memref<200x128xf32, #tpu.memory_space<vmem>>, vector<8x128xf32>
    %80 = vector.extract_strided_slice %78 {offsets = [0, 0], sizes = [16, 1], strides = [1, 1]} : vector<16x8xf32> to vector<16x1xf32>
    %81 = vector.shape_cast %80 : vector<16x1xf32> to vector<16x1xf32>
    %82 = vector.broadcast %81 : vector<16x1xf32> to vector<16x128xf32>
    %83 = vector.extract_strided_slice %79 {offsets = [0, 0], sizes = [1, 128], strides = [1, 1]} : vector<8x128xf32> to vector<1x128xf32>
    %84 = vector.shape_cast %83 : vector<1x128xf32> to vector<1x128xf32>
    %85 = vector.broadcast %84 : vector<1x128xf32> to vector<16x128xf32>
    %86 = arith.subf %82, %85 : vector<16x128xf32>
    %87 = math.absf %86 : vector<16x128xf32>
    %88 = arith.addf %76, %87 : vector<16x128xf32>
    %89 = vector.extract_strided_slice %78 {offsets = [0, 1], sizes = [16, 1], strides = [1, 1]} : vector<16x8xf32> to vector<16x1xf32>
    %90 = vector.shape_cast %89 : vector<16x1xf32> to vector<16x1xf32>
    %91 = vector.broadcast %90 : vector<16x1xf32> to vector<16x128xf32>
    %92 = vector.extract_strided_slice %79 {offsets = [1, 0], sizes = [1, 128], strides = [1, 1]} : vector<8x128xf32> to vector<1x128xf32>
    %93 = vector.shape_cast %92 : vector<1x128xf32> to vector<1x128xf32>
    %94 = vector.broadcast %93 : vector<1x128xf32> to vector<16x128xf32>
    %95 = arith.subf %91, %94 : vector<16x128xf32>
    %96 = math.absf %95 : vector<16x128xf32>
    %97 = arith.addf %88, %96 : vector<16x128xf32>
    %98 = vector.extract_strided_slice %78 {offsets = [0, 2], sizes = [16, 1], strides = [1, 1]} : vector<16x8xf32> to vector<16x1xf32>
    %99 = vector.shape_cast %98 : vector<16x1xf32> to vector<16x1xf32>
    %100 = vector.broadcast %99 : vector<16x1xf32> to vector<16x128xf32>
    %101 = vector.extract_strided_slice %79 {offsets = [2, 0], sizes = [1, 128], strides = [1, 1]} : vector<8x128xf32> to vector<1x128xf32>
    %102 = vector.shape_cast %101 : vector<1x128xf32> to vector<1x128xf32>
    %103 = vector.broadcast %102 : vector<1x128xf32> to vector<16x128xf32>
    %104 = arith.subf %100, %103 : vector<16x128xf32>
    %105 = math.absf %104 : vector<16x128xf32>
    %106 = arith.addf %97, %105 : vector<16x128xf32>
    %107 = vector.extract_strided_slice %78 {offsets = [0, 3], sizes = [16, 1], strides = [1, 1]} : vector<16x8xf32> to vector<16x1xf32>
    %108 = vector.shape_cast %107 : vector<16x1xf32> to vector<16x1xf32>
    %109 = vector.broadcast %108 : vector<16x1xf32> to vector<16x128xf32>
    %110 = vector.extract_strided_slice %79 {offsets = [3, 0], sizes = [1, 128], strides = [1, 1]} : vector<8x128xf32> to vector<1x128xf32>
    %111 = vector.shape_cast %110 : vector<1x128xf32> to vector<1x128xf32>
    %112 = vector.broadcast %111 : vector<1x128xf32> to vector<16x128xf32>
    %113 = arith.subf %109, %112 : vector<16x128xf32>
    %114 = math.absf %113 : vector<16x128xf32>
    %115 = arith.addf %106, %114 : vector<16x128xf32>
    %116 = vector.extract_strided_slice %78 {offsets = [0, 4], sizes = [16, 1], strides = [1, 1]} : vector<16x8xf32> to vector<16x1xf32>
    %117 = vector.shape_cast %116 : vector<16x1xf32> to vector<16x1xf32>
    %118 = vector.broadcast %117 : vector<16x1xf32> to vector<16x128xf32>
    %119 = vector.extract_strided_slice %79 {offsets = [4, 0], sizes = [1, 128], strides = [1, 1]} : vector<8x128xf32> to vector<1x128xf32>
    %120 = vector.shape_cast %119 : vector<1x128xf32> to vector<1x128xf32>
    %121 = vector.broadcast %120 : vector<1x128xf32> to vector<16x128xf32>
    %122 = arith.subf %118, %121 : vector<16x128xf32>
    %123 = math.absf %122 : vector<16x128xf32>
    %124 = arith.addf %115, %123 : vector<16x128xf32>
    %125 = vector.extract_strided_slice %78 {offsets = [0, 5], sizes = [16, 1], strides = [1, 1]} : vector<16x8xf32> to vector<16x1xf32>
    %126 = vector.shape_cast %125 : vector<16x1xf32> to vector<16x1xf32>
    %127 = vector.broadcast %126 : vector<16x1xf32> to vector<16x128xf32>
    %128 = vector.extract_strided_slice %79 {offsets = [5, 0], sizes = [1, 128], strides = [1, 1]} : vector<8x128xf32> to vector<1x128xf32>
    %129 = vector.shape_cast %128 : vector<1x128xf32> to vector<1x128xf32>
    %130 = vector.broadcast %129 : vector<1x128xf32> to vector<16x128xf32>
    %131 = arith.subf %127, %130 : vector<16x128xf32>
    %132 = math.absf %131 : vector<16x128xf32>
    %133 = arith.addf %124, %132 : vector<16x128xf32>
    %134 = vector.extract_strided_slice %78 {offsets = [0, 6], sizes = [16, 1], strides = [1, 1]} : vector<16x8xf32> to vector<16x1xf32>
    %135 = vector.shape_cast %134 : vector<16x1xf32> to vector<16x1xf32>
    %136 = vector.broadcast %135 : vector<16x1xf32> to vector<16x128xf32>
    %137 = vector.extract_strided_slice %79 {offsets = [6, 0], sizes = [1, 128], strides = [1, 1]} : vector<8x128xf32> to vector<1x128xf32>
    %138 = vector.shape_cast %137 : vector<1x128xf32> to vector<1x128xf32>
    %139 = vector.broadcast %138 : vector<1x128xf32> to vector<16x128xf32>
    %140 = arith.subf %136, %139 : vector<16x128xf32>
    %141 = math.absf %140 : vector<16x128xf32>
    %142 = arith.addf %133, %141 : vector<16x128xf32>
    %143 = vector.extract_strided_slice %78 {offsets = [0, 7], sizes = [16, 1], strides = [1, 1]} : vector<16x8xf32> to vector<16x1xf32>
    %144 = vector.shape_cast %143 : vector<16x1xf32> to vector<16x1xf32>
    %145 = vector.broadcast %144 : vector<16x1xf32> to vector<16x128xf32>
    %146 = vector.extract_strided_slice %79 {offsets = [7, 0], sizes = [1, 128], strides = [1, 1]} : vector<8x128xf32> to vector<1x128xf32>
    %147 = vector.shape_cast %146 : vector<1x128xf32> to vector<1x128xf32>
    %148 = vector.broadcast %147 : vector<1x128xf32> to vector<16x128xf32>
    %149 = arith.subf %145, %148 : vector<16x128xf32>
    %150 = math.absf %149 : vector<16x128xf32>
    %151 = arith.addf %142, %150 : vector<16x128xf32>
    %c16 = arith.constant 16 : index
    %c0_10 = arith.constant 0 : index
    %152 = vector.load %arg5[%c16, %c0_10] : memref<200x8xf32, #tpu.memory_space<vmem>>, vector<8x8xf32>
    %cst_11 = arith.constant dense<0.000000e+00> : vector<16x8xf32>
    %153 = tpu.matmul %0, %152, %cst_11 {dimension_numbers = #tpu.dot_dimension_numbers<[1], [1], [0], [0], [0, 0, 1, 0], [], []>} : vector<16x8xf32>, vector<8x8xf32>, vector<16x8xf32> -> vector<16x8xf32>
    %c16_12 = arith.constant 16 : index
    %c0_13 = arith.constant 0 : index
    %154 = vector.load %arg6[%c16_12, %c0_13] : memref<200x128xf32, #tpu.memory_space<vmem>>, vector<8x128xf32>
    %155 = vector.extract_strided_slice %153 {offsets = [0, 0], sizes = [16, 1], strides = [1, 1]} : vector<16x8xf32> to vector<16x1xf32>
    %156 = vector.shape_cast %155 : vector<16x1xf32> to vector<16x1xf32>
    %157 = vector.broadcast %156 : vector<16x1xf32> to vector<16x128xf32>
    %158 = vector.extract_strided_slice %154 {offsets = [0, 0], sizes = [1, 128], strides = [1, 1]} : vector<8x128xf32> to vector<1x128xf32>
    %159 = vector.shape_cast %158 : vector<1x128xf32> to vector<1x128xf32>
    %160 = vector.broadcast %159 : vector<1x128xf32> to vector<16x128xf32>
    %161 = arith.subf %157, %160 : vector<16x128xf32>
    %162 = math.absf %161 : vector<16x128xf32>
    %163 = arith.addf %151, %162 : vector<16x128xf32>
    %164 = vector.extract_strided_slice %153 {offsets = [0, 1], sizes = [16, 1], strides = [1, 1]} : vector<16x8xf32> to vector<16x1xf32>
    %165 = vector.shape_cast %164 : vector<16x1xf32> to vector<16x1xf32>
    %166 = vector.broadcast %165 : vector<16x1xf32> to vector<16x128xf32>
    %167 = vector.extract_strided_slice %154 {offsets = [1, 0], sizes = [1, 128], strides = [1, 1]} : vector<8x128xf32> to vector<1x128xf32>
    %168 = vector.shape_cast %167 : vector<1x128xf32> to vector<1x128xf32>
    %169 = vector.broadcast %168 : vector<1x128xf32> to vector<16x128xf32>
    %170 = arith.subf %166, %169 : vector<16x128xf32>
    %171 = math.absf %170 : vector<16x128xf32>
    %172 = arith.addf %163, %171 : vector<16x128xf32>
    %173 = vector.extract_strided_slice %153 {offsets = [0, 2], sizes = [16, 1], strides = [1, 1]} : vector<16x8xf32> to vector<16x1xf32>
    %174 = vector.shape_cast %173 : vector<16x1xf32> to vector<16x1xf32>
    %175 = vector.broadcast %174 : vector<16x1xf32> to vector<16x128xf32>
    %176 = vector.extract_strided_slice %154 {offsets = [2, 0], sizes = [1, 128], strides = [1, 1]} : vector<8x128xf32> to vector<1x128xf32>
    %177 = vector.shape_cast %176 : vector<1x128xf32> to vector<1x128xf32>
    %178 = vector.broadcast %177 : vector<1x128xf32> to vector<16x128xf32>
    %179 = arith.subf %175, %178 : vector<16x128xf32>
    %180 = math.absf %179 : vector<16x128xf32>
    %181 = arith.addf %172, %180 : vector<16x128xf32>
    %182 = vector.extract_strided_slice %153 {offsets = [0, 3], sizes = [16, 1], strides = [1, 1]} : vector<16x8xf32> to vector<16x1xf32>
    %183 = vector.shape_cast %182 : vector<16x1xf32> to vector<16x1xf32>
    %184 = vector.broadcast %183 : vector<16x1xf32> to vector<16x128xf32>
    %185 = vector.extract_strided_slice %154 {offsets = [3, 0], sizes = [1, 128], strides = [1, 1]} : vector<8x128xf32> to vector<1x128xf32>
    %186 = vector.shape_cast %185 : vector<1x128xf32> to vector<1x128xf32>
    %187 = vector.broadcast %186 : vector<1x128xf32> to vector<16x128xf32>
    %188 = arith.subf %184, %187 : vector<16x128xf32>
    %189 = math.absf %188 : vector<16x128xf32>
    %190 = arith.addf %181, %189 : vector<16x128xf32>
    %191 = vector.extract_strided_slice %153 {offsets = [0, 4], sizes = [16, 1], strides = [1, 1]} : vector<16x8xf32> to vector<16x1xf32>
    %192 = vector.shape_cast %191 : vector<16x1xf32> to vector<16x1xf32>
    %193 = vector.broadcast %192 : vector<16x1xf32> to vector<16x128xf32>
    %194 = vector.extract_strided_slice %154 {offsets = [4, 0], sizes = [1, 128], strides = [1, 1]} : vector<8x128xf32> to vector<1x128xf32>
    %195 = vector.shape_cast %194 : vector<1x128xf32> to vector<1x128xf32>
    %196 = vector.broadcast %195 : vector<1x128xf32> to vector<16x128xf32>
    %197 = arith.subf %193, %196 : vector<16x128xf32>
    %198 = math.absf %197 : vector<16x128xf32>
    %199 = arith.addf %190, %198 : vector<16x128xf32>
    %200 = vector.extract_strided_slice %153 {offsets = [0, 5], sizes = [16, 1], strides = [1, 1]} : vector<16x8xf32> to vector<16x1xf32>
    %201 = vector.shape_cast %200 : vector<16x1xf32> to vector<16x1xf32>
    %202 = vector.broadcast %201 : vector<16x1xf32> to vector<16x128xf32>
    %203 = vector.extract_strided_slice %154 {offsets = [5, 0], sizes = [1, 128], strides = [1, 1]} : vector<8x128xf32> to vector<1x128xf32>
    %204 = vector.shape_cast %203 : vector<1x128xf32> to vector<1x128xf32>
    %205 = vector.broadcast %204 : vector<1x128xf32> to vector<16x128xf32>
    %206 = arith.subf %202, %205 : vector<16x128xf32>
    %207 = math.absf %206 : vector<16x128xf32>
    %208 = arith.addf %199, %207 : vector<16x128xf32>
    %209 = vector.extract_strided_slice %153 {offsets = [0, 6], sizes = [16, 1], strides = [1, 1]} : vector<16x8xf32> to vector<16x1xf32>
    %210 = vector.shape_cast %209 : vector<16x1xf32> to vector<16x1xf32>
    %211 = vector.broadcast %210 : vector<16x1xf32> to vector<16x128xf32>
    %212 = vector.extract_strided_slice %154 {offsets = [6, 0], sizes = [1, 128], strides = [1, 1]} : vector<8x128xf32> to vector<1x128xf32>
    %213 = vector.shape_cast %212 : vector<1x128xf32> to vector<1x128xf32>
    %214 = vector.broadcast %213 : vector<1x128xf32> to vector<16x128xf32>
    %215 = arith.subf %211, %214 : vector<16x128xf32>
    %216 = math.absf %215 : vector<16x128xf32>
    %217 = arith.addf %208, %216 : vector<16x128xf32>
    %218 = vector.extract_strided_slice %153 {offsets = [0, 7], sizes = [16, 1], strides = [1, 1]} : vector<16x8xf32> to vector<16x1xf32>
    %219 = vector.shape_cast %218 : vector<16x1xf32> to vector<16x1xf32>
    %220 = vector.broadcast %219 : vector<16x1xf32> to vector<16x128xf32>
    %221 = vector.extract_strided_slice %154 {offsets = [7, 0], sizes = [1, 128], strides = [1, 1]} : vector<8x128xf32> to vector<1x128xf32>
    %222 = vector.shape_cast %221 : vector<1x128xf32> to vector<1x128xf32>
    %223 = vector.broadcast %222 : vector<1x128xf32> to vector<16x128xf32>
    %224 = arith.subf %220, %223 : vector<16x128xf32>
    %225 = math.absf %224 : vector<16x128xf32>
    %226 = arith.addf %217, %225 : vector<16x128xf32>
    %c24 = arith.constant 24 : index
    %c0_14 = arith.constant 0 : index
    %227 = vector.load %arg5[%c24, %c0_14] : memref<200x8xf32, #tpu.memory_space<vmem>>, vector<8x8xf32>
    %cst_15 = arith.constant dense<0.000000e+00> : vector<16x8xf32>
    %228 = tpu.matmul %0, %227, %cst_15 {dimension_numbers = #tpu.dot_dimension_numbers<[1], [1], [0], [0], [0, 0, 1, 0], [], []>} : vector<16x8xf32>, vector<8x8xf32>, vector<16x8xf32> -> vector<16x8xf32>
    %c24_16 = arith.constant 24 : index
    %c0_17 = arith.constant 0 : index
    %229 = vector.load %arg6[%c24_16, %c0_17] : memref<200x128xf32, #tpu.memory_space<vmem>>, vector<8x128xf32>
    %230 = vector.extract_strided_slice %228 {offsets = [0, 0], sizes = [16, 1], strides = [1, 1]} : vector<16x8xf32> to vector<16x1xf32>
    %231 = vector.shape_cast %230 : vector<16x1xf32> to vector<16x1xf32>
    %232 = vector.broadcast %231 : vector<16x1xf32> to vector<16x128xf32>
    %233 = vector.extract_strided_slice %229 {offsets = [0, 0], sizes = [1, 128], strides = [1, 1]} : vector<8x128xf32> to vector<1x128xf32>
    %234 = vector.shape_cast %233 : vector<1x128xf32> to vector<1x128xf32>
    %235 = vector.broadcast %234 : vector<1x128xf32> to vector<16x128xf32>
    %236 = arith.subf %232, %235 : vector<16x128xf32>
    %237 = math.absf %236 : vector<16x128xf32>
    %238 = arith.addf %226, %237 : vector<16x128xf32>
    %239 = vector.extract_strided_slice %228 {offsets = [0, 1], sizes = [16, 1], strides = [1, 1]} : vector<16x8xf32> to vector<16x1xf32>
    %240 = vector.shape_cast %239 : vector<16x1xf32> to vector<16x1xf32>
    %241 = vector.broadcast %240 : vector<16x1xf32> to vector<16x128xf32>
    %242 = vector.extract_strided_slice %229 {offsets = [1, 0], sizes = [1, 128], strides = [1, 1]} : vector<8x128xf32> to vector<1x128xf32>
    %243 = vector.shape_cast %242 : vector<1x128xf32> to vector<1x128xf32>
    %244 = vector.broadcast %243 : vector<1x128xf32> to vector<16x128xf32>
    %245 = arith.subf %241, %244 : vector<16x128xf32>
    %246 = math.absf %245 : vector<16x128xf32>
    %247 = arith.addf %238, %246 : vector<16x128xf32>
    %248 = vector.extract_strided_slice %228 {offsets = [0, 2], sizes = [16, 1], strides = [1, 1]} : vector<16x8xf32> to vector<16x1xf32>
    %249 = vector.shape_cast %248 : vector<16x1xf32> to vector<16x1xf32>
    %250 = vector.broadcast %249 : vector<16x1xf32> to vector<16x128xf32>
    %251 = vector.extract_strided_slice %229 {offsets = [2, 0], sizes = [1, 128], strides = [1, 1]} : vector<8x128xf32> to vector<1x128xf32>
    %252 = vector.shape_cast %251 : vector<1x128xf32> to vector<1x128xf32>
    %253 = vector.broadcast %252 : vector<1x128xf32> to vector<16x128xf32>
    %254 = arith.subf %250, %253 : vector<16x128xf32>
    %255 = math.absf %254 : vector<16x128xf32>
    %256 = arith.addf %247, %255 : vector<16x128xf32>
    %257 = vector.extract_strided_slice %228 {offsets = [0, 3], sizes = [16, 1], strides = [1, 1]} : vector<16x8xf32> to vector<16x1xf32>
    %258 = vector.shape_cast %257 : vector<16x1xf32> to vector<16x1xf32>
    %259 = vector.broadcast %258 : vector<16x1xf32> to vector<16x128xf32>
    %260 = vector.extract_strided_slice %229 {offsets = [3, 0], sizes = [1, 128], strides = [1, 1]} : vector<8x128xf32> to vector<1x128xf32>
    %261 = vector.shape_cast %260 : vector<1x128xf32> to vector<1x128xf32>
    %262 = vector.broadcast %261 : vector<1x128xf32> to vector<16x128xf32>
    %263 = arith.subf %259, %262 : vector<16x128xf32>
    %264 = math.absf %263 : vector<16x128xf32>
    %265 = arith.addf %256, %264 : vector<16x128xf32>
    %266 = vector.extract_strided_slice %228 {offsets = [0, 4], sizes = [16, 1], strides = [1, 1]} : vector<16x8xf32> to vector<16x1xf32>
    %267 = vector.shape_cast %266 : vector<16x1xf32> to vector<16x1xf32>
    %268 = vector.broadcast %267 : vector<16x1xf32> to vector<16x128xf32>
    %269 = vector.extract_strided_slice %229 {offsets = [4, 0], sizes = [1, 128], strides = [1, 1]} : vector<8x128xf32> to vector<1x128xf32>
    %270 = vector.shape_cast %269 : vector<1x128xf32> to vector<1x128xf32>
    %271 = vector.broadcast %270 : vector<1x128xf32> to vector<16x128xf32>
    %272 = arith.subf %268, %271 : vector<16x128xf32>
    %273 = math.absf %272 : vector<16x128xf32>
    %274 = arith.addf %265, %273 : vector<16x128xf32>
    %275 = vector.extract_strided_slice %228 {offsets = [0, 5], sizes = [16, 1], strides = [1, 1]} : vector<16x8xf32> to vector<16x1xf32>
    %276 = vector.shape_cast %275 : vector<16x1xf32> to vector<16x1xf32>
    %277 = vector.broadcast %276 : vector<16x1xf32> to vector<16x128xf32>
    %278 = vector.extract_strided_slice %229 {offsets = [5, 0], sizes = [1, 128], strides = [1, 1]} : vector<8x128xf32> to vector<1x128xf32>
    %279 = vector.shape_cast %278 : vector<1x128xf32> to vector<1x128xf32>
    %280 = vector.broadcast %279 : vector<1x128xf32> to vector<16x128xf32>
    %281 = arith.subf %277, %280 : vector<16x128xf32>
    %282 = math.absf %281 : vector<16x128xf32>
    %283 = arith.addf %274, %282 : vector<16x128xf32>
    %284 = vector.extract_strided_slice %228 {offsets = [0, 6], sizes = [16, 1], strides = [1, 1]} : vector<16x8xf32> to vector<16x1xf32>
    %285 = vector.shape_cast %284 : vector<16x1xf32> to vector<16x1xf32>
    %286 = vector.broadcast %285 : vector<16x1xf32> to vector<16x128xf32>
    %287 = vector.extract_strided_slice %229 {offsets = [6, 0], sizes = [1, 128], strides = [1, 1]} : vector<8x128xf32> to vector<1x128xf32>
    %288 = vector.shape_cast %287 : vector<1x128xf32> to vector<1x128xf32>
    %289 = vector.broadcast %288 : vector<1x128xf32> to vector<16x128xf32>
    %290 = arith.subf %286, %289 : vector<16x128xf32>
    %291 = math.absf %290 : vector<16x128xf32>
    %292 = arith.addf %283, %291 : vector<16x128xf32>
    %293 = vector.extract_strided_slice %228 {offsets = [0, 7], sizes = [16, 1], strides = [1, 1]} : vector<16x8xf32> to vector<16x1xf32>
    %294 = vector.shape_cast %293 : vector<16x1xf32> to vector<16x1xf32>
    %295 = vector.broadcast %294 : vector<16x1xf32> to vector<16x128xf32>
    %296 = vector.extract_strided_slice %229 {offsets = [7, 0], sizes = [1, 128], strides = [1, 1]} : vector<8x128xf32> to vector<1x128xf32>
    %297 = vector.shape_cast %296 : vector<1x128xf32> to vector<1x128xf32>
    %298 = vector.broadcast %297 : vector<1x128xf32> to vector<16x128xf32>
    %299 = arith.subf %295, %298 : vector<16x128xf32>
    %300 = math.absf %299 : vector<16x128xf32>
    %301 = arith.addf %292, %300 : vector<16x128xf32>
    %c32 = arith.constant 32 : index
    %c0_18 = arith.constant 0 : index
    %302 = vector.load %arg5[%c32, %c0_18] : memref<200x8xf32, #tpu.memory_space<vmem>>, vector<8x8xf32>
    %cst_19 = arith.constant dense<0.000000e+00> : vector<16x8xf32>
    %303 = tpu.matmul %0, %302, %cst_19 {dimension_numbers = #tpu.dot_dimension_numbers<[1], [1], [0], [0], [0, 0, 1, 0], [], []>} : vector<16x8xf32>, vector<8x8xf32>, vector<16x8xf32> -> vector<16x8xf32>
    %c32_20 = arith.constant 32 : index
    %c0_21 = arith.constant 0 : index
    %304 = vector.load %arg6[%c32_20, %c0_21] : memref<200x128xf32, #tpu.memory_space<vmem>>, vector<8x128xf32>
    %305 = vector.extract_strided_slice %303 {offsets = [0, 0], sizes = [16, 1], strides = [1, 1]} : vector<16x8xf32> to vector<16x1xf32>
    %306 = vector.shape_cast %305 : vector<16x1xf32> to vector<16x1xf32>
    %307 = vector.broadcast %306 : vector<16x1xf32> to vector<16x128xf32>
    %308 = vector.extract_strided_slice %304 {offsets = [0, 0], sizes = [1, 128], strides = [1, 1]} : vector<8x128xf32> to vector<1x128xf32>
    %309 = vector.shape_cast %308 : vector<1x128xf32> to vector<1x128xf32>
    %310 = vector.broadcast %309 : vector<1x128xf32> to vector<16x128xf32>
    %311 = arith.subf %307, %310 : vector<16x128xf32>
    %312 = math.absf %311 : vector<16x128xf32>
    %313 = arith.addf %301, %312 : vector<16x128xf32>
    %314 = vector.extract_strided_slice %303 {offsets = [0, 1], sizes = [16, 1], strides = [1, 1]} : vector<16x8xf32> to vector<16x1xf32>
    %315 = vector.shape_cast %314 : vector<16x1xf32> to vector<16x1xf32>
    %316 = vector.broadcast %315 : vector<16x1xf32> to vector<16x128xf32>
    %317 = vector.extract_strided_slice %304 {offsets = [1, 0], sizes = [1, 128], strides = [1, 1]} : vector<8x128xf32> to vector<1x128xf32>
    %318 = vector.shape_cast %317 : vector<1x128xf32> to vector<1x128xf32>
    %319 = vector.broadcast %318 : vector<1x128xf32> to vector<16x128xf32>
    %320 = arith.subf %316, %319 : vector<16x128xf32>
    %321 = math.absf %320 : vector<16x128xf32>
    %322 = arith.addf %313, %321 : vector<16x128xf32>
    %323 = vector.extract_strided_slice %303 {offsets = [0, 2], sizes = [16, 1], strides = [1, 1]} : vector<16x8xf32> to vector<16x1xf32>
    %324 = vector.shape_cast %323 : vector<16x1xf32> to vector<16x1xf32>
    %325 = vector.broadcast %324 : vector<16x1xf32> to vector<16x128xf32>
    %326 = vector.extract_strided_slice %304 {offsets = [2, 0], sizes = [1, 128], strides = [1, 1]} : vector<8x128xf32> to vector<1x128xf32>
    %327 = vector.shape_cast %326 : vector<1x128xf32> to vector<1x128xf32>
    %328 = vector.broadcast %327 : vector<1x128xf32> to vector<16x128xf32>
    %329 = arith.subf %325, %328 : vector<16x128xf32>
    %330 = math.absf %329 : vector<16x128xf32>
    %331 = arith.addf %322, %330 : vector<16x128xf32>
    %332 = vector.extract_strided_slice %303 {offsets = [0, 3], sizes = [16, 1], strides = [1, 1]} : vector<16x8xf32> to vector<16x1xf32>
    %333 = vector.shape_cast %332 : vector<16x1xf32> to vector<16x1xf32>
    %334 = vector.broadcast %333 : vector<16x1xf32> to vector<16x128xf32>
    %335 = vector.extract_strided_slice %304 {offsets = [3, 0], sizes = [1, 128], strides = [1, 1]} : vector<8x128xf32> to vector<1x128xf32>
    %336 = vector.shape_cast %335 : vector<1x128xf32> to vector<1x128xf32>
    %337 = vector.broadcast %336 : vector<1x128xf32> to vector<16x128xf32>
    %338 = arith.subf %334, %337 : vector<16x128xf32>
    %339 = math.absf %338 : vector<16x128xf32>
    %340 = arith.addf %331, %339 : vector<16x128xf32>
    %341 = vector.extract_strided_slice %303 {offsets = [0, 4], sizes = [16, 1], strides = [1, 1]} : vector<16x8xf32> to vector<16x1xf32>
    %342 = vector.shape_cast %341 : vector<16x1xf32> to vector<16x1xf32>
    %343 = vector.broadcast %342 : vector<16x1xf32> to vector<16x128xf32>
    %344 = vector.extract_strided_slice %304 {offsets = [4, 0], sizes = [1, 128], strides = [1, 1]} : vector<8x128xf32> to vector<1x128xf32>
    %345 = vector.shape_cast %344 : vector<1x128xf32> to vector<1x128xf32>
    %346 = vector.broadcast %345 : vector<1x128xf32> to vector<16x128xf32>
    %347 = arith.subf %343, %346 : vector<16x128xf32>
    %348 = math.absf %347 : vector<16x128xf32>
    %349 = arith.addf %340, %348 : vector<16x128xf32>
    %350 = vector.extract_strided_slice %303 {offsets = [0, 5], sizes = [16, 1], strides = [1, 1]} : vector<16x8xf32> to vector<16x1xf32>
    %351 = vector.shape_cast %350 : vector<16x1xf32> to vector<16x1xf32>
    %352 = vector.broadcast %351 : vector<16x1xf32> to vector<16x128xf32>
    %353 = vector.extract_strided_slice %304 {offsets = [5, 0], sizes = [1, 128], strides = [1, 1]} : vector<8x128xf32> to vector<1x128xf32>
    %354 = vector.shape_cast %353 : vector<1x128xf32> to vector<1x128xf32>
    %355 = vector.broadcast %354 : vector<1x128xf32> to vector<16x128xf32>
    %356 = arith.subf %352, %355 : vector<16x128xf32>
    %357 = math.absf %356 : vector<16x128xf32>
    %358 = arith.addf %349, %357 : vector<16x128xf32>
    %359 = vector.extract_strided_slice %303 {offsets = [0, 6], sizes = [16, 1], strides = [1, 1]} : vector<16x8xf32> to vector<16x1xf32>
    %360 = vector.shape_cast %359 : vector<16x1xf32> to vector<16x1xf32>
    %361 = vector.broadcast %360 : vector<16x1xf32> to vector<16x128xf32>
    %362 = vector.extract_strided_slice %304 {offsets = [6, 0], sizes = [1, 128], strides = [1, 1]} : vector<8x128xf32> to vector<1x128xf32>
    %363 = vector.shape_cast %362 : vector<1x128xf32> to vector<1x128xf32>
    %364 = vector.broadcast %363 : vector<1x128xf32> to vector<16x128xf32>
    %365 = arith.subf %361, %364 : vector<16x128xf32>
    %366 = math.absf %365 : vector<16x128xf32>
    %367 = arith.addf %358, %366 : vector<16x128xf32>
    %368 = vector.extract_strided_slice %303 {offsets = [0, 7], sizes = [16, 1], strides = [1, 1]} : vector<16x8xf32> to vector<16x1xf32>
    %369 = vector.shape_cast %368 : vector<16x1xf32> to vector<16x1xf32>
    %370 = vector.broadcast %369 : vector<16x1xf32> to vector<16x128xf32>
    %371 = vector.extract_strided_slice %304 {offsets = [7, 0], sizes = [1, 128], strides = [1, 1]} : vector<8x128xf32> to vector<1x128xf32>
    %372 = vector.shape_cast %371 : vector<1x128xf32> to vector<1x128xf32>
    %373 = vector.broadcast %372 : vector<1x128xf32> to vector<16x128xf32>
    %374 = arith.subf %370, %373 : vector<16x128xf32>
    %375 = math.absf %374 : vector<16x128xf32>
    %376 = arith.addf %367, %375 : vector<16x128xf32>
    %c40 = arith.constant 40 : index
    %c0_22 = arith.constant 0 : index
    %377 = vector.load %arg5[%c40, %c0_22] : memref<200x8xf32, #tpu.memory_space<vmem>>, vector<8x8xf32>
    %cst_23 = arith.constant dense<0.000000e+00> : vector<16x8xf32>
    %378 = tpu.matmul %0, %377, %cst_23 {dimension_numbers = #tpu.dot_dimension_numbers<[1], [1], [0], [0], [0, 0, 1, 0], [], []>} : vector<16x8xf32>, vector<8x8xf32>, vector<16x8xf32> -> vector<16x8xf32>
    %c40_24 = arith.constant 40 : index
    %c0_25 = arith.constant 0 : index
    %379 = vector.load %arg6[%c40_24, %c0_25] : memref<200x128xf32, #tpu.memory_space<vmem>>, vector<8x128xf32>
    %380 = vector.extract_strided_slice %378 {offsets = [0, 0], sizes = [16, 1], strides = [1, 1]} : vector<16x8xf32> to vector<16x1xf32>
    %381 = vector.shape_cast %380 : vector<16x1xf32> to vector<16x1xf32>
    %382 = vector.broadcast %381 : vector<16x1xf32> to vector<16x128xf32>
    %383 = vector.extract_strided_slice %379 {offsets = [0, 0], sizes = [1, 128], strides = [1, 1]} : vector<8x128xf32> to vector<1x128xf32>
    %384 = vector.shape_cast %383 : vector<1x128xf32> to vector<1x128xf32>
    %385 = vector.broadcast %384 : vector<1x128xf32> to vector<16x128xf32>
    %386 = arith.subf %382, %385 : vector<16x128xf32>
    %387 = math.absf %386 : vector<16x128xf32>
    %388 = arith.addf %376, %387 : vector<16x128xf32>
    %389 = vector.extract_strided_slice %378 {offsets = [0, 1], sizes = [16, 1], strides = [1, 1]} : vector<16x8xf32> to vector<16x1xf32>
    %390 = vector.shape_cast %389 : vector<16x1xf32> to vector<16x1xf32>
    %391 = vector.broadcast %390 : vector<16x1xf32> to vector<16x128xf32>
    %392 = vector.extract_strided_slice %379 {offsets = [1, 0], sizes = [1, 128], strides = [1, 1]} : vector<8x128xf32> to vector<1x128xf32>
    %393 = vector.shape_cast %392 : vector<1x128xf32> to vector<1x128xf32>
    %394 = vector.broadcast %393 : vector<1x128xf32> to vector<16x128xf32>
    %395 = arith.subf %391, %394 : vector<16x128xf32>
    %396 = math.absf %395 : vector<16x128xf32>
    %397 = arith.addf %388, %396 : vector<16x128xf32>
    %398 = vector.extract_strided_slice %378 {offsets = [0, 2], sizes = [16, 1], strides = [1, 1]} : vector<16x8xf32> to vector<16x1xf32>
    %399 = vector.shape_cast %398 : vector<16x1xf32> to vector<16x1xf32>
    %400 = vector.broadcast %399 : vector<16x1xf32> to vector<16x128xf32>
    %401 = vector.extract_strided_slice %379 {offsets = [2, 0], sizes = [1, 128], strides = [1, 1]} : vector<8x128xf32> to vector<1x128xf32>
    %402 = vector.shape_cast %401 : vector<1x128xf32> to vector<1x128xf32>
    %403 = vector.broadcast %402 : vector<1x128xf32> to vector<16x128xf32>
    %404 = arith.subf %400, %403 : vector<16x128xf32>
    %405 = math.absf %404 : vector<16x128xf32>
    %406 = arith.addf %397, %405 : vector<16x128xf32>
    %407 = vector.extract_strided_slice %378 {offsets = [0, 3], sizes = [16, 1], strides = [1, 1]} : vector<16x8xf32> to vector<16x1xf32>
    %408 = vector.shape_cast %407 : vector<16x1xf32> to vector<16x1xf32>
    %409 = vector.broadcast %408 : vector<16x1xf32> to vector<16x128xf32>
    %410 = vector.extract_strided_slice %379 {offsets = [3, 0], sizes = [1, 128], strides = [1, 1]} : vector<8x128xf32> to vector<1x128xf32>
    %411 = vector.shape_cast %410 : vector<1x128xf32> to vector<1x128xf32>
    %412 = vector.broadcast %411 : vector<1x128xf32> to vector<16x128xf32>
    %413 = arith.subf %409, %412 : vector<16x128xf32>
    %414 = math.absf %413 : vector<16x128xf32>
    %415 = arith.addf %406, %414 : vector<16x128xf32>
    %416 = vector.extract_strided_slice %378 {offsets = [0, 4], sizes = [16, 1], strides = [1, 1]} : vector<16x8xf32> to vector<16x1xf32>
    %417 = vector.shape_cast %416 : vector<16x1xf32> to vector<16x1xf32>
    %418 = vector.broadcast %417 : vector<16x1xf32> to vector<16x128xf32>
    %419 = vector.extract_strided_slice %379 {offsets = [4, 0], sizes = [1, 128], strides = [1, 1]} : vector<8x128xf32> to vector<1x128xf32>
    %420 = vector.shape_cast %419 : vector<1x128xf32> to vector<1x128xf32>
    %421 = vector.broadcast %420 : vector<1x128xf32> to vector<16x128xf32>
    %422 = arith.subf %418, %421 : vector<16x128xf32>
    %423 = math.absf %422 : vector<16x128xf32>
    %424 = arith.addf %415, %423 : vector<16x128xf32>
    %425 = vector.extract_strided_slice %378 {offsets = [0, 5], sizes = [16, 1], strides = [1, 1]} : vector<16x8xf32> to vector<16x1xf32>
    %426 = vector.shape_cast %425 : vector<16x1xf32> to vector<16x1xf32>
    %427 = vector.broadcast %426 : vector<16x1xf32> to vector<16x128xf32>
    %428 = vector.extract_strided_slice %379 {offsets = [5, 0], sizes = [1, 128], strides = [1, 1]} : vector<8x128xf32> to vector<1x128xf32>
    %429 = vector.shape_cast %428 : vector<1x128xf32> to vector<1x128xf32>
    %430 = vector.broadcast %429 : vector<1x128xf32> to vector<16x128xf32>
    %431 = arith.subf %427, %430 : vector<16x128xf32>
    %432 = math.absf %431 : vector<16x128xf32>
    %433 = arith.addf %424, %432 : vector<16x128xf32>
    %434 = vector.extract_strided_slice %378 {offsets = [0, 6], sizes = [16, 1], strides = [1, 1]} : vector<16x8xf32> to vector<16x1xf32>
    %435 = vector.shape_cast %434 : vector<16x1xf32> to vector<16x1xf32>
    %436 = vector.broadcast %435 : vector<16x1xf32> to vector<16x128xf32>
    %437 = vector.extract_strided_slice %379 {offsets = [6, 0], sizes = [1, 128], strides = [1, 1]} : vector<8x128xf32> to vector<1x128xf32>
    %438 = vector.shape_cast %437 : vector<1x128xf32> to vector<1x128xf32>
    %439 = vector.broadcast %438 : vector<1x128xf32> to vector<16x128xf32>
    %440 = arith.subf %436, %439 : vector<16x128xf32>
    %441 = math.absf %440 : vector<16x128xf32>
    %442 = arith.addf %433, %441 : vector<16x128xf32>
    %443 = vector.extract_strided_slice %378 {offsets = [0, 7], sizes = [16, 1], strides = [1, 1]} : vector<16x8xf32> to vector<16x1xf32>
    %444 = vector.shape_cast %443 : vector<16x1xf32> to vector<16x1xf32>
    %445 = vector.broadcast %444 : vector<16x1xf32> to vector<16x128xf32>
    %446 = vector.extract_strided_slice %379 {offsets = [7, 0], sizes = [1, 128], strides = [1, 1]} : vector<8x128xf32> to vector<1x128xf32>
    %447 = vector.shape_cast %446 : vector<1x128xf32> to vector<1x128xf32>
    %448 = vector.broadcast %447 : vector<1x128xf32> to vector<16x128xf32>
    %449 = arith.subf %445, %448 : vector<16x128xf32>
    %450 = math.absf %449 : vector<16x128xf32>
    %451 = arith.addf %442, %450 : vector<16x128xf32>
    %c48 = arith.constant 48 : index
    %c0_26 = arith.constant 0 : index
    %452 = vector.load %arg5[%c48, %c0_26] : memref<200x8xf32, #tpu.memory_space<vmem>>, vector<8x8xf32>
    %cst_27 = arith.constant dense<0.000000e+00> : vector<16x8xf32>
    %453 = tpu.matmul %0, %452, %cst_27 {dimension_numbers = #tpu.dot_dimension_numbers<[1], [1], [0], [0], [0, 0, 1, 0], [], []>} : vector<16x8xf32>, vector<8x8xf32>, vector<16x8xf32> -> vector<16x8xf32>
    %c48_28 = arith.constant 48 : index
    %c0_29 = arith.constant 0 : index
    %454 = vector.load %arg6[%c48_28, %c0_29] : memref<200x128xf32, #tpu.memory_space<vmem>>, vector<8x128xf32>
    %455 = vector.extract_strided_slice %453 {offsets = [0, 0], sizes = [16, 1], strides = [1, 1]} : vector<16x8xf32> to vector<16x1xf32>
    %456 = vector.shape_cast %455 : vector<16x1xf32> to vector<16x1xf32>
    %457 = vector.broadcast %456 : vector<16x1xf32> to vector<16x128xf32>
    %458 = vector.extract_strided_slice %454 {offsets = [0, 0], sizes = [1, 128], strides = [1, 1]} : vector<8x128xf32> to vector<1x128xf32>
    %459 = vector.shape_cast %458 : vector<1x128xf32> to vector<1x128xf32>
    %460 = vector.broadcast %459 : vector<1x128xf32> to vector<16x128xf32>
    %461 = arith.subf %457, %460 : vector<16x128xf32>
    %462 = math.absf %461 : vector<16x128xf32>
    %463 = arith.addf %451, %462 : vector<16x128xf32>
    %464 = vector.extract_strided_slice %453 {offsets = [0, 1], sizes = [16, 1], strides = [1, 1]} : vector<16x8xf32> to vector<16x1xf32>
    %465 = vector.shape_cast %464 : vector<16x1xf32> to vector<16x1xf32>
    %466 = vector.broadcast %465 : vector<16x1xf32> to vector<16x128xf32>
    %467 = vector.extract_strided_slice %454 {offsets = [1, 0], sizes = [1, 128], strides = [1, 1]} : vector<8x128xf32> to vector<1x128xf32>
    %468 = vector.shape_cast %467 : vector<1x128xf32> to vector<1x128xf32>
    %469 = vector.broadcast %468 : vector<1x128xf32> to vector<16x128xf32>
    %470 = arith.subf %466, %469 : vector<16x128xf32>
    %471 = math.absf %470 : vector<16x128xf32>
    %472 = arith.addf %463, %471 : vector<16x128xf32>
    %473 = vector.extract_strided_slice %453 {offsets = [0, 2], sizes = [16, 1], strides = [1, 1]} : vector<16x8xf32> to vector<16x1xf32>
    %474 = vector.shape_cast %473 : vector<16x1xf32> to vector<16x1xf32>
    %475 = vector.broadcast %474 : vector<16x1xf32> to vector<16x128xf32>
    %476 = vector.extract_strided_slice %454 {offsets = [2, 0], sizes = [1, 128], strides = [1, 1]} : vector<8x128xf32> to vector<1x128xf32>
    %477 = vector.shape_cast %476 : vector<1x128xf32> to vector<1x128xf32>
    %478 = vector.broadcast %477 : vector<1x128xf32> to vector<16x128xf32>
    %479 = arith.subf %475, %478 : vector<16x128xf32>
    %480 = math.absf %479 : vector<16x128xf32>
    %481 = arith.addf %472, %480 : vector<16x128xf32>
    %482 = vector.extract_strided_slice %453 {offsets = [0, 3], sizes = [16, 1], strides = [1, 1]} : vector<16x8xf32> to vector<16x1xf32>
    %483 = vector.shape_cast %482 : vector<16x1xf32> to vector<16x1xf32>
    %484 = vector.broadcast %483 : vector<16x1xf32> to vector<16x128xf32>
    %485 = vector.extract_strided_slice %454 {offsets = [3, 0], sizes = [1, 128], strides = [1, 1]} : vector<8x128xf32> to vector<1x128xf32>
    %486 = vector.shape_cast %485 : vector<1x128xf32> to vector<1x128xf32>
    %487 = vector.broadcast %486 : vector<1x128xf32> to vector<16x128xf32>
    %488 = arith.subf %484, %487 : vector<16x128xf32>
    %489 = math.absf %488 : vector<16x128xf32>
    %490 = arith.addf %481, %489 : vector<16x128xf32>
    %491 = vector.extract_strided_slice %453 {offsets = [0, 4], sizes = [16, 1], strides = [1, 1]} : vector<16x8xf32> to vector<16x1xf32>
    %492 = vector.shape_cast %491 : vector<16x1xf32> to vector<16x1xf32>
    %493 = vector.broadcast %492 : vector<16x1xf32> to vector<16x128xf32>
    %494 = vector.extract_strided_slice %454 {offsets = [4, 0], sizes = [1, 128], strides = [1, 1]} : vector<8x128xf32> to vector<1x128xf32>
    %495 = vector.shape_cast %494 : vector<1x128xf32> to vector<1x128xf32>
    %496 = vector.broadcast %495 : vector<1x128xf32> to vector<16x128xf32>
    %497 = arith.subf %493, %496 : vector<16x128xf32>
    %498 = math.absf %497 : vector<16x128xf32>
    %499 = arith.addf %490, %498 : vector<16x128xf32>
    %500 = vector.extract_strided_slice %453 {offsets = [0, 5], sizes = [16, 1], strides = [1, 1]} : vector<16x8xf32> to vector<16x1xf32>
    %501 = vector.shape_cast %500 : vector<16x1xf32> to vector<16x1xf32>
    %502 = vector.broadcast %501 : vector<16x1xf32> to vector<16x128xf32>
    %503 = vector.extract_strided_slice %454 {offsets = [5, 0], sizes = [1, 128], strides = [1, 1]} : vector<8x128xf32> to vector<1x128xf32>
    %504 = vector.shape_cast %503 : vector<1x128xf32> to vector<1x128xf32>
    %505 = vector.broadcast %504 : vector<1x128xf32> to vector<16x128xf32>
    %506 = arith.subf %502, %505 : vector<16x128xf32>
    %507 = math.absf %506 : vector<16x128xf32>
    %508 = arith.addf %499, %507 : vector<16x128xf32>
    %509 = vector.extract_strided_slice %453 {offsets = [0, 6], sizes = [16, 1], strides = [1, 1]} : vector<16x8xf32> to vector<16x1xf32>
    %510 = vector.shape_cast %509 : vector<16x1xf32> to vector<16x1xf32>
    %511 = vector.broadcast %510 : vector<16x1xf32> to vector<16x128xf32>
    %512 = vector.extract_strided_slice %454 {offsets = [6, 0], sizes = [1, 128], strides = [1, 1]} : vector<8x128xf32> to vector<1x128xf32>
    %513 = vector.shape_cast %512 : vector<1x128xf32> to vector<1x128xf32>
    %514 = vector.broadcast %513 : vector<1x128xf32> to vector<16x128xf32>
    %515 = arith.subf %511, %514 : vector<16x128xf32>
    %516 = math.absf %515 : vector<16x128xf32>
    %517 = arith.addf %508, %516 : vector<16x128xf32>
    %518 = vector.extract_strided_slice %453 {offsets = [0, 7], sizes = [16, 1], strides = [1, 1]} : vector<16x8xf32> to vector<16x1xf32>
    %519 = vector.shape_cast %518 : vector<16x1xf32> to vector<16x1xf32>
    %520 = vector.broadcast %519 : vector<16x1xf32> to vector<16x128xf32>
    %521 = vector.extract_strided_slice %454 {offsets = [7, 0], sizes = [1, 128], strides = [1, 1]} : vector<8x128xf32> to vector<1x128xf32>
    %522 = vector.shape_cast %521 : vector<1x128xf32> to vector<1x128xf32>
    %523 = vector.broadcast %522 : vector<1x128xf32> to vector<16x128xf32>
    %524 = arith.subf %520, %523 : vector<16x128xf32>
    %525 = math.absf %524 : vector<16x128xf32>
    %526 = arith.addf %517, %525 : vector<16x128xf32>
    %c56 = arith.constant 56 : index
    %c0_30 = arith.constant 0 : index
    %527 = vector.load %arg5[%c56, %c0_30] : memref<200x8xf32, #tpu.memory_space<vmem>>, vector<8x8xf32>
    %cst_31 = arith.constant dense<0.000000e+00> : vector<16x8xf32>
    %528 = tpu.matmul %0, %527, %cst_31 {dimension_numbers = #tpu.dot_dimension_numbers<[1], [1], [0], [0], [0, 0, 1, 0], [], []>} : vector<16x8xf32>, vector<8x8xf32>, vector<16x8xf32> -> vector<16x8xf32>
    %c56_32 = arith.constant 56 : index
    %c0_33 = arith.constant 0 : index
    %529 = vector.load %arg6[%c56_32, %c0_33] : memref<200x128xf32, #tpu.memory_space<vmem>>, vector<8x128xf32>
    %530 = vector.extract_strided_slice %528 {offsets = [0, 0], sizes = [16, 1], strides = [1, 1]} : vector<16x8xf32> to vector<16x1xf32>
    %531 = vector.shape_cast %530 : vector<16x1xf32> to vector<16x1xf32>
    %532 = vector.broadcast %531 : vector<16x1xf32> to vector<16x128xf32>
    %533 = vector.extract_strided_slice %529 {offsets = [0, 0], sizes = [1, 128], strides = [1, 1]} : vector<8x128xf32> to vector<1x128xf32>
    %534 = vector.shape_cast %533 : vector<1x128xf32> to vector<1x128xf32>
    %535 = vector.broadcast %534 : vector<1x128xf32> to vector<16x128xf32>
    %536 = arith.subf %532, %535 : vector<16x128xf32>
    %537 = math.absf %536 : vector<16x128xf32>
    %538 = arith.addf %526, %537 : vector<16x128xf32>
    %539 = vector.extract_strided_slice %528 {offsets = [0, 1], sizes = [16, 1], strides = [1, 1]} : vector<16x8xf32> to vector<16x1xf32>
    %540 = vector.shape_cast %539 : vector<16x1xf32> to vector<16x1xf32>
    %541 = vector.broadcast %540 : vector<16x1xf32> to vector<16x128xf32>
    %542 = vector.extract_strided_slice %529 {offsets = [1, 0], sizes = [1, 128], strides = [1, 1]} : vector<8x128xf32> to vector<1x128xf32>
    %543 = vector.shape_cast %542 : vector<1x128xf32> to vector<1x128xf32>
    %544 = vector.broadcast %543 : vector<1x128xf32> to vector<16x128xf32>
    %545 = arith.subf %541, %544 : vector<16x128xf32>
    %546 = math.absf %545 : vector<16x128xf32>
    %547 = arith.addf %538, %546 : vector<16x128xf32>
    %548 = vector.extract_strided_slice %528 {offsets = [0, 2], sizes = [16, 1], strides = [1, 1]} : vector<16x8xf32> to vector<16x1xf32>
    %549 = vector.shape_cast %548 : vector<16x1xf32> to vector<16x1xf32>
    %550 = vector.broadcast %549 : vector<16x1xf32> to vector<16x128xf32>
    %551 = vector.extract_strided_slice %529 {offsets = [2, 0], sizes = [1, 128], strides = [1, 1]} : vector<8x128xf32> to vector<1x128xf32>
    %552 = vector.shape_cast %551 : vector<1x128xf32> to vector<1x128xf32>
    %553 = vector.broadcast %552 : vector<1x128xf32> to vector<16x128xf32>
    %554 = arith.subf %550, %553 : vector<16x128xf32>
    %555 = math.absf %554 : vector<16x128xf32>
    %556 = arith.addf %547, %555 : vector<16x128xf32>
    %557 = vector.extract_strided_slice %528 {offsets = [0, 3], sizes = [16, 1], strides = [1, 1]} : vector<16x8xf32> to vector<16x1xf32>
    %558 = vector.shape_cast %557 : vector<16x1xf32> to vector<16x1xf32>
    %559 = vector.broadcast %558 : vector<16x1xf32> to vector<16x128xf32>
    %560 = vector.extract_strided_slice %529 {offsets = [3, 0], sizes = [1, 128], strides = [1, 1]} : vector<8x128xf32> to vector<1x128xf32>
    %561 = vector.shape_cast %560 : vector<1x128xf32> to vector<1x128xf32>
    %562 = vector.broadcast %561 : vector<1x128xf32> to vector<16x128xf32>
    %563 = arith.subf %559, %562 : vector<16x128xf32>
    %564 = math.absf %563 : vector<16x128xf32>
    %565 = arith.addf %556, %564 : vector<16x128xf32>
    %566 = vector.extract_strided_slice %528 {offsets = [0, 4], sizes = [16, 1], strides = [1, 1]} : vector<16x8xf32> to vector<16x1xf32>
    %567 = vector.shape_cast %566 : vector<16x1xf32> to vector<16x1xf32>
    %568 = vector.broadcast %567 : vector<16x1xf32> to vector<16x128xf32>
    %569 = vector.extract_strided_slice %529 {offsets = [4, 0], sizes = [1, 128], strides = [1, 1]} : vector<8x128xf32> to vector<1x128xf32>
    %570 = vector.shape_cast %569 : vector<1x128xf32> to vector<1x128xf32>
    %571 = vector.broadcast %570 : vector<1x128xf32> to vector<16x128xf32>
    %572 = arith.subf %568, %571 : vector<16x128xf32>
    %573 = math.absf %572 : vector<16x128xf32>
    %574 = arith.addf %565, %573 : vector<16x128xf32>
    %575 = vector.extract_strided_slice %528 {offsets = [0, 5], sizes = [16, 1], strides = [1, 1]} : vector<16x8xf32> to vector<16x1xf32>
    %576 = vector.shape_cast %575 : vector<16x1xf32> to vector<16x1xf32>
    %577 = vector.broadcast %576 : vector<16x1xf32> to vector<16x128xf32>
    %578 = vector.extract_strided_slice %529 {offsets = [5, 0], sizes = [1, 128], strides = [1, 1]} : vector<8x128xf32> to vector<1x128xf32>
    %579 = vector.shape_cast %578 : vector<1x128xf32> to vector<1x128xf32>
    %580 = vector.broadcast %579 : vector<1x128xf32> to vector<16x128xf32>
    %581 = arith.subf %577, %580 : vector<16x128xf32>
    %582 = math.absf %581 : vector<16x128xf32>
    %583 = arith.addf %574, %582 : vector<16x128xf32>
    %584 = vector.extract_strided_slice %528 {offsets = [0, 6], sizes = [16, 1], strides = [1, 1]} : vector<16x8xf32> to vector<16x1xf32>
    %585 = vector.shape_cast %584 : vector<16x1xf32> to vector<16x1xf32>
    %586 = vector.broadcast %585 : vector<16x1xf32> to vector<16x128xf32>
    %587 = vector.extract_strided_slice %529 {offsets = [6, 0], sizes = [1, 128], strides = [1, 1]} : vector<8x128xf32> to vector<1x128xf32>
    %588 = vector.shape_cast %587 : vector<1x128xf32> to vector<1x128xf32>
    %589 = vector.broadcast %588 : vector<1x128xf32> to vector<16x128xf32>
    %590 = arith.subf %586, %589 : vector<16x128xf32>
    %591 = math.absf %590 : vector<16x128xf32>
    %592 = arith.addf %583, %591 : vector<16x128xf32>
    %593 = vector.extract_strided_slice %528 {offsets = [0, 7], sizes = [16, 1], strides = [1, 1]} : vector<16x8xf32> to vector<16x1xf32>
    %594 = vector.shape_cast %593 : vector<16x1xf32> to vector<16x1xf32>
    %595 = vector.broadcast %594 : vector<16x1xf32> to vector<16x128xf32>
    %596 = vector.extract_strided_slice %529 {offsets = [7, 0], sizes = [1, 128], strides = [1, 1]} : vector<8x128xf32> to vector<1x128xf32>
    %597 = vector.shape_cast %596 : vector<1x128xf32> to vector<1x128xf32>
    %598 = vector.broadcast %597 : vector<1x128xf32> to vector<16x128xf32>
    %599 = arith.subf %595, %598 : vector<16x128xf32>
    %600 = math.absf %599 : vector<16x128xf32>
    %601 = arith.addf %592, %600 : vector<16x128xf32>
    %c64 = arith.constant 64 : index
    %c0_34 = arith.constant 0 : index
    %602 = vector.load %arg5[%c64, %c0_34] : memref<200x8xf32, #tpu.memory_space<vmem>>, vector<8x8xf32>
    %cst_35 = arith.constant dense<0.000000e+00> : vector<16x8xf32>
    %603 = tpu.matmul %0, %602, %cst_35 {dimension_numbers = #tpu.dot_dimension_numbers<[1], [1], [0], [0], [0, 0, 1, 0], [], []>} : vector<16x8xf32>, vector<8x8xf32>, vector<16x8xf32> -> vector<16x8xf32>
    %c64_36 = arith.constant 64 : index
    %c0_37 = arith.constant 0 : index
    %604 = vector.load %arg6[%c64_36, %c0_37] : memref<200x128xf32, #tpu.memory_space<vmem>>, vector<8x128xf32>
    %605 = vector.extract_strided_slice %603 {offsets = [0, 0], sizes = [16, 1], strides = [1, 1]} : vector<16x8xf32> to vector<16x1xf32>
    %606 = vector.shape_cast %605 : vector<16x1xf32> to vector<16x1xf32>
    %607 = vector.broadcast %606 : vector<16x1xf32> to vector<16x128xf32>
    %608 = vector.extract_strided_slice %604 {offsets = [0, 0], sizes = [1, 128], strides = [1, 1]} : vector<8x128xf32> to vector<1x128xf32>
    %609 = vector.shape_cast %608 : vector<1x128xf32> to vector<1x128xf32>
    %610 = vector.broadcast %609 : vector<1x128xf32> to vector<16x128xf32>
    %611 = arith.subf %607, %610 : vector<16x128xf32>
    %612 = math.absf %611 : vector<16x128xf32>
    %613 = arith.addf %601, %612 : vector<16x128xf32>
    %614 = vector.extract_strided_slice %603 {offsets = [0, 1], sizes = [16, 1], strides = [1, 1]} : vector<16x8xf32> to vector<16x1xf32>
    %615 = vector.shape_cast %614 : vector<16x1xf32> to vector<16x1xf32>
    %616 = vector.broadcast %615 : vector<16x1xf32> to vector<16x128xf32>
    %617 = vector.extract_strided_slice %604 {offsets = [1, 0], sizes = [1, 128], strides = [1, 1]} : vector<8x128xf32> to vector<1x128xf32>
    %618 = vector.shape_cast %617 : vector<1x128xf32> to vector<1x128xf32>
    %619 = vector.broadcast %618 : vector<1x128xf32> to vector<16x128xf32>
    %620 = arith.subf %616, %619 : vector<16x128xf32>
    %621 = math.absf %620 : vector<16x128xf32>
    %622 = arith.addf %613, %621 : vector<16x128xf32>
    %623 = vector.extract_strided_slice %603 {offsets = [0, 2], sizes = [16, 1], strides = [1, 1]} : vector<16x8xf32> to vector<16x1xf32>
    %624 = vector.shape_cast %623 : vector<16x1xf32> to vector<16x1xf32>
    %625 = vector.broadcast %624 : vector<16x1xf32> to vector<16x128xf32>
    %626 = vector.extract_strided_slice %604 {offsets = [2, 0], sizes = [1, 128], strides = [1, 1]} : vector<8x128xf32> to vector<1x128xf32>
    %627 = vector.shape_cast %626 : vector<1x128xf32> to vector<1x128xf32>
    %628 = vector.broadcast %627 : vector<1x128xf32> to vector<16x128xf32>
    %629 = arith.subf %625, %628 : vector<16x128xf32>
    %630 = math.absf %629 : vector<16x128xf32>
    %631 = arith.addf %622, %630 : vector<16x128xf32>
    %632 = vector.extract_strided_slice %603 {offsets = [0, 3], sizes = [16, 1], strides = [1, 1]} : vector<16x8xf32> to vector<16x1xf32>
    %633 = vector.shape_cast %632 : vector<16x1xf32> to vector<16x1xf32>
    %634 = vector.broadcast %633 : vector<16x1xf32> to vector<16x128xf32>
    %635 = vector.extract_strided_slice %604 {offsets = [3, 0], sizes = [1, 128], strides = [1, 1]} : vector<8x128xf32> to vector<1x128xf32>
    %636 = vector.shape_cast %635 : vector<1x128xf32> to vector<1x128xf32>
    %637 = vector.broadcast %636 : vector<1x128xf32> to vector<16x128xf32>
    %638 = arith.subf %634, %637 : vector<16x128xf32>
    %639 = math.absf %638 : vector<16x128xf32>
    %640 = arith.addf %631, %639 : vector<16x128xf32>
    %641 = vector.extract_strided_slice %603 {offsets = [0, 4], sizes = [16, 1], strides = [1, 1]} : vector<16x8xf32> to vector<16x1xf32>
    %642 = vector.shape_cast %641 : vector<16x1xf32> to vector<16x1xf32>
    %643 = vector.broadcast %642 : vector<16x1xf32> to vector<16x128xf32>
    %644 = vector.extract_strided_slice %604 {offsets = [4, 0], sizes = [1, 128], strides = [1, 1]} : vector<8x128xf32> to vector<1x128xf32>
    %645 = vector.shape_cast %644 : vector<1x128xf32> to vector<1x128xf32>
    %646 = vector.broadcast %645 : vector<1x128xf32> to vector<16x128xf32>
    %647 = arith.subf %643, %646 : vector<16x128xf32>
    %648 = math.absf %647 : vector<16x128xf32>
    %649 = arith.addf %640, %648 : vector<16x128xf32>
    %650 = vector.extract_strided_slice %603 {offsets = [0, 5], sizes = [16, 1], strides = [1, 1]} : vector<16x8xf32> to vector<16x1xf32>
    %651 = vector.shape_cast %650 : vector<16x1xf32> to vector<16x1xf32>
    %652 = vector.broadcast %651 : vector<16x1xf32> to vector<16x128xf32>
    %653 = vector.extract_strided_slice %604 {offsets = [5, 0], sizes = [1, 128], strides = [1, 1]} : vector<8x128xf32> to vector<1x128xf32>
    %654 = vector.shape_cast %653 : vector<1x128xf32> to vector<1x128xf32>
    %655 = vector.broadcast %654 : vector<1x128xf32> to vector<16x128xf32>
    %656 = arith.subf %652, %655 : vector<16x128xf32>
    %657 = math.absf %656 : vector<16x128xf32>
    %658 = arith.addf %649, %657 : vector<16x128xf32>
    %659 = vector.extract_strided_slice %603 {offsets = [0, 6], sizes = [16, 1], strides = [1, 1]} : vector<16x8xf32> to vector<16x1xf32>
    %660 = vector.shape_cast %659 : vector<16x1xf32> to vector<16x1xf32>
    %661 = vector.broadcast %660 : vector<16x1xf32> to vector<16x128xf32>
    %662 = vector.extract_strided_slice %604 {offsets = [6, 0], sizes = [1, 128], strides = [1, 1]} : vector<8x128xf32> to vector<1x128xf32>
    %663 = vector.shape_cast %662 : vector<1x128xf32> to vector<1x128xf32>
    %664 = vector.broadcast %663 : vector<1x128xf32> to vector<16x128xf32>
    %665 = arith.subf %661, %664 : vector<16x128xf32>
    %666 = math.absf %665 : vector<16x128xf32>
    %667 = arith.addf %658, %666 : vector<16x128xf32>
    %668 = vector.extract_strided_slice %603 {offsets = [0, 7], sizes = [16, 1], strides = [1, 1]} : vector<16x8xf32> to vector<16x1xf32>
    %669 = vector.shape_cast %668 : vector<16x1xf32> to vector<16x1xf32>
    %670 = vector.broadcast %669 : vector<16x1xf32> to vector<16x128xf32>
    %671 = vector.extract_strided_slice %604 {offsets = [7, 0], sizes = [1, 128], strides = [1, 1]} : vector<8x128xf32> to vector<1x128xf32>
    %672 = vector.shape_cast %671 : vector<1x128xf32> to vector<1x128xf32>
    %673 = vector.broadcast %672 : vector<1x128xf32> to vector<16x128xf32>
    %674 = arith.subf %670, %673 : vector<16x128xf32>
    %675 = math.absf %674 : vector<16x128xf32>
    %676 = arith.addf %667, %675 : vector<16x128xf32>
    %c72 = arith.constant 72 : index
    %c0_38 = arith.constant 0 : index
    %677 = vector.load %arg5[%c72, %c0_38] : memref<200x8xf32, #tpu.memory_space<vmem>>, vector<8x8xf32>
    %cst_39 = arith.constant dense<0.000000e+00> : vector<16x8xf32>
    %678 = tpu.matmul %0, %677, %cst_39 {dimension_numbers = #tpu.dot_dimension_numbers<[1], [1], [0], [0], [0, 0, 1, 0], [], []>} : vector<16x8xf32>, vector<8x8xf32>, vector<16x8xf32> -> vector<16x8xf32>
    %c72_40 = arith.constant 72 : index
    %c0_41 = arith.constant 0 : index
    %679 = vector.load %arg6[%c72_40, %c0_41] : memref<200x128xf32, #tpu.memory_space<vmem>>, vector<8x128xf32>
    %680 = vector.extract_strided_slice %678 {offsets = [0, 0], sizes = [16, 1], strides = [1, 1]} : vector<16x8xf32> to vector<16x1xf32>
    %681 = vector.shape_cast %680 : vector<16x1xf32> to vector<16x1xf32>
    %682 = vector.broadcast %681 : vector<16x1xf32> to vector<16x128xf32>
    %683 = vector.extract_strided_slice %679 {offsets = [0, 0], sizes = [1, 128], strides = [1, 1]} : vector<8x128xf32> to vector<1x128xf32>
    %684 = vector.shape_cast %683 : vector<1x128xf32> to vector<1x128xf32>
    %685 = vector.broadcast %684 : vector<1x128xf32> to vector<16x128xf32>
    %686 = arith.subf %682, %685 : vector<16x128xf32>
    %687 = math.absf %686 : vector<16x128xf32>
    %688 = arith.addf %676, %687 : vector<16x128xf32>
    %689 = vector.extract_strided_slice %678 {offsets = [0, 1], sizes = [16, 1], strides = [1, 1]} : vector<16x8xf32> to vector<16x1xf32>
    %690 = vector.shape_cast %689 : vector<16x1xf32> to vector<16x1xf32>
    %691 = vector.broadcast %690 : vector<16x1xf32> to vector<16x128xf32>
    %692 = vector.extract_strided_slice %679 {offsets = [1, 0], sizes = [1, 128], strides = [1, 1]} : vector<8x128xf32> to vector<1x128xf32>
    %693 = vector.shape_cast %692 : vector<1x128xf32> to vector<1x128xf32>
    %694 = vector.broadcast %693 : vector<1x128xf32> to vector<16x128xf32>
    %695 = arith.subf %691, %694 : vector<16x128xf32>
    %696 = math.absf %695 : vector<16x128xf32>
    %697 = arith.addf %688, %696 : vector<16x128xf32>
    %698 = vector.extract_strided_slice %678 {offsets = [0, 2], sizes = [16, 1], strides = [1, 1]} : vector<16x8xf32> to vector<16x1xf32>
    %699 = vector.shape_cast %698 : vector<16x1xf32> to vector<16x1xf32>
    %700 = vector.broadcast %699 : vector<16x1xf32> to vector<16x128xf32>
    %701 = vector.extract_strided_slice %679 {offsets = [2, 0], sizes = [1, 128], strides = [1, 1]} : vector<8x128xf32> to vector<1x128xf32>
    %702 = vector.shape_cast %701 : vector<1x128xf32> to vector<1x128xf32>
    %703 = vector.broadcast %702 : vector<1x128xf32> to vector<16x128xf32>
    %704 = arith.subf %700, %703 : vector<16x128xf32>
    %705 = math.absf %704 : vector<16x128xf32>
    %706 = arith.addf %697, %705 : vector<16x128xf32>
    %707 = vector.extract_strided_slice %678 {offsets = [0, 3], sizes = [16, 1], strides = [1, 1]} : vector<16x8xf32> to vector<16x1xf32>
    %708 = vector.shape_cast %707 : vector<16x1xf32> to vector<16x1xf32>
    %709 = vector.broadcast %708 : vector<16x1xf32> to vector<16x128xf32>
    %710 = vector.extract_strided_slice %679 {offsets = [3, 0], sizes = [1, 128], strides = [1, 1]} : vector<8x128xf32> to vector<1x128xf32>
    %711 = vector.shape_cast %710 : vector<1x128xf32> to vector<1x128xf32>
    %712 = vector.broadcast %711 : vector<1x128xf32> to vector<16x128xf32>
    %713 = arith.subf %709, %712 : vector<16x128xf32>
    %714 = math.absf %713 : vector<16x128xf32>
    %715 = arith.addf %706, %714 : vector<16x128xf32>
    %716 = vector.extract_strided_slice %678 {offsets = [0, 4], sizes = [16, 1], strides = [1, 1]} : vector<16x8xf32> to vector<16x1xf32>
    %717 = vector.shape_cast %716 : vector<16x1xf32> to vector<16x1xf32>
    %718 = vector.broadcast %717 : vector<16x1xf32> to vector<16x128xf32>
    %719 = vector.extract_strided_slice %679 {offsets = [4, 0], sizes = [1, 128], strides = [1, 1]} : vector<8x128xf32> to vector<1x128xf32>
    %720 = vector.shape_cast %719 : vector<1x128xf32> to vector<1x128xf32>
    %721 = vector.broadcast %720 : vector<1x128xf32> to vector<16x128xf32>
    %722 = arith.subf %718, %721 : vector<16x128xf32>
    %723 = math.absf %722 : vector<16x128xf32>
    %724 = arith.addf %715, %723 : vector<16x128xf32>
    %725 = vector.extract_strided_slice %678 {offsets = [0, 5], sizes = [16, 1], strides = [1, 1]} : vector<16x8xf32> to vector<16x1xf32>
    %726 = vector.shape_cast %725 : vector<16x1xf32> to vector<16x1xf32>
    %727 = vector.broadcast %726 : vector<16x1xf32> to vector<16x128xf32>
    %728 = vector.extract_strided_slice %679 {offsets = [5, 0], sizes = [1, 128], strides = [1, 1]} : vector<8x128xf32> to vector<1x128xf32>
    %729 = vector.shape_cast %728 : vector<1x128xf32> to vector<1x128xf32>
    %730 = vector.broadcast %729 : vector<1x128xf32> to vector<16x128xf32>
    %731 = arith.subf %727, %730 : vector<16x128xf32>
    %732 = math.absf %731 : vector<16x128xf32>
    %733 = arith.addf %724, %732 : vector<16x128xf32>
    %734 = vector.extract_strided_slice %678 {offsets = [0, 6], sizes = [16, 1], strides = [1, 1]} : vector<16x8xf32> to vector<16x1xf32>
    %735 = vector.shape_cast %734 : vector<16x1xf32> to vector<16x1xf32>
    %736 = vector.broadcast %735 : vector<16x1xf32> to vector<16x128xf32>
    %737 = vector.extract_strided_slice %679 {offsets = [6, 0], sizes = [1, 128], strides = [1, 1]} : vector<8x128xf32> to vector<1x128xf32>
    %738 = vector.shape_cast %737 : vector<1x128xf32> to vector<1x128xf32>
    %739 = vector.broadcast %738 : vector<1x128xf32> to vector<16x128xf32>
    %740 = arith.subf %736, %739 : vector<16x128xf32>
    %741 = math.absf %740 : vector<16x128xf32>
    %742 = arith.addf %733, %741 : vector<16x128xf32>
    %743 = vector.extract_strided_slice %678 {offsets = [0, 7], sizes = [16, 1], strides = [1, 1]} : vector<16x8xf32> to vector<16x1xf32>
    %744 = vector.shape_cast %743 : vector<16x1xf32> to vector<16x1xf32>
    %745 = vector.broadcast %744 : vector<16x1xf32> to vector<16x128xf32>
    %746 = vector.extract_strided_slice %679 {offsets = [7, 0], sizes = [1, 128], strides = [1, 1]} : vector<8x128xf32> to vector<1x128xf32>
    %747 = vector.shape_cast %746 : vector<1x128xf32> to vector<1x128xf32>
    %748 = vector.broadcast %747 : vector<1x128xf32> to vector<16x128xf32>
    %749 = arith.subf %745, %748 : vector<16x128xf32>
    %750 = math.absf %749 : vector<16x128xf32>
    %751 = arith.addf %742, %750 : vector<16x128xf32>
    %c80 = arith.constant 80 : index
    %c0_42 = arith.constant 0 : index
    %752 = vector.load %arg5[%c80, %c0_42] : memref<200x8xf32, #tpu.memory_space<vmem>>, vector<8x8xf32>
    %cst_43 = arith.constant dense<0.000000e+00> : vector<16x8xf32>
    %753 = tpu.matmul %0, %752, %cst_43 {dimension_numbers = #tpu.dot_dimension_numbers<[1], [1], [0], [0], [0, 0, 1, 0], [], []>} : vector<16x8xf32>, vector<8x8xf32>, vector<16x8xf32> -> vector<16x8xf32>
    %c80_44 = arith.constant 80 : index
    %c0_45 = arith.constant 0 : index
    %754 = vector.load %arg6[%c80_44, %c0_45] : memref<200x128xf32, #tpu.memory_space<vmem>>, vector<8x128xf32>
    %755 = vector.extract_strided_slice %753 {offsets = [0, 0], sizes = [16, 1], strides = [1, 1]} : vector<16x8xf32> to vector<16x1xf32>
    %756 = vector.shape_cast %755 : vector<16x1xf32> to vector<16x1xf32>
    %757 = vector.broadcast %756 : vector<16x1xf32> to vector<16x128xf32>
    %758 = vector.extract_strided_slice %754 {offsets = [0, 0], sizes = [1, 128], strides = [1, 1]} : vector<8x128xf32> to vector<1x128xf32>
    %759 = vector.shape_cast %758 : vector<1x128xf32> to vector<1x128xf32>
    %760 = vector.broadcast %759 : vector<1x128xf32> to vector<16x128xf32>
    %761 = arith.subf %757, %760 : vector<16x128xf32>
    %762 = math.absf %761 : vector<16x128xf32>
    %763 = arith.addf %751, %762 : vector<16x128xf32>
    %764 = vector.extract_strided_slice %753 {offsets = [0, 1], sizes = [16, 1], strides = [1, 1]} : vector<16x8xf32> to vector<16x1xf32>
    %765 = vector.shape_cast %764 : vector<16x1xf32> to vector<16x1xf32>
    %766 = vector.broadcast %765 : vector<16x1xf32> to vector<16x128xf32>
    %767 = vector.extract_strided_slice %754 {offsets = [1, 0], sizes = [1, 128], strides = [1, 1]} : vector<8x128xf32> to vector<1x128xf32>
    %768 = vector.shape_cast %767 : vector<1x128xf32> to vector<1x128xf32>
    %769 = vector.broadcast %768 : vector<1x128xf32> to vector<16x128xf32>
    %770 = arith.subf %766, %769 : vector<16x128xf32>
    %771 = math.absf %770 : vector<16x128xf32>
    %772 = arith.addf %763, %771 : vector<16x128xf32>
    %773 = vector.extract_strided_slice %753 {offsets = [0, 2], sizes = [16, 1], strides = [1, 1]} : vector<16x8xf32> to vector<16x1xf32>
    %774 = vector.shape_cast %773 : vector<16x1xf32> to vector<16x1xf32>
    %775 = vector.broadcast %774 : vector<16x1xf32> to vector<16x128xf32>
    %776 = vector.extract_strided_slice %754 {offsets = [2, 0], sizes = [1, 128], strides = [1, 1]} : vector<8x128xf32> to vector<1x128xf32>
    %777 = vector.shape_cast %776 : vector<1x128xf32> to vector<1x128xf32>
    %778 = vector.broadcast %777 : vector<1x128xf32> to vector<16x128xf32>
    %779 = arith.subf %775, %778 : vector<16x128xf32>
    %780 = math.absf %779 : vector<16x128xf32>
    %781 = arith.addf %772, %780 : vector<16x128xf32>
    %782 = vector.extract_strided_slice %753 {offsets = [0, 3], sizes = [16, 1], strides = [1, 1]} : vector<16x8xf32> to vector<16x1xf32>
    %783 = vector.shape_cast %782 : vector<16x1xf32> to vector<16x1xf32>
    %784 = vector.broadcast %783 : vector<16x1xf32> to vector<16x128xf32>
    %785 = vector.extract_strided_slice %754 {offsets = [3, 0], sizes = [1, 128], strides = [1, 1]} : vector<8x128xf32> to vector<1x128xf32>
    %786 = vector.shape_cast %785 : vector<1x128xf32> to vector<1x128xf32>
    %787 = vector.broadcast %786 : vector<1x128xf32> to vector<16x128xf32>
    %788 = arith.subf %784, %787 : vector<16x128xf32>
    %789 = math.absf %788 : vector<16x128xf32>
    %790 = arith.addf %781, %789 : vector<16x128xf32>
    %791 = vector.extract_strided_slice %753 {offsets = [0, 4], sizes = [16, 1], strides = [1, 1]} : vector<16x8xf32> to vector<16x1xf32>
    %792 = vector.shape_cast %791 : vector<16x1xf32> to vector<16x1xf32>
    %793 = vector.broadcast %792 : vector<16x1xf32> to vector<16x128xf32>
    %794 = vector.extract_strided_slice %754 {offsets = [4, 0], sizes = [1, 128], strides = [1, 1]} : vector<8x128xf32> to vector<1x128xf32>
    %795 = vector.shape_cast %794 : vector<1x128xf32> to vector<1x128xf32>
    %796 = vector.broadcast %795 : vector<1x128xf32> to vector<16x128xf32>
    %797 = arith.subf %793, %796 : vector<16x128xf32>
    %798 = math.absf %797 : vector<16x128xf32>
    %799 = arith.addf %790, %798 : vector<16x128xf32>
    %800 = vector.extract_strided_slice %753 {offsets = [0, 5], sizes = [16, 1], strides = [1, 1]} : vector<16x8xf32> to vector<16x1xf32>
    %801 = vector.shape_cast %800 : vector<16x1xf32> to vector<16x1xf32>
    %802 = vector.broadcast %801 : vector<16x1xf32> to vector<16x128xf32>
    %803 = vector.extract_strided_slice %754 {offsets = [5, 0], sizes = [1, 128], strides = [1, 1]} : vector<8x128xf32> to vector<1x128xf32>
    %804 = vector.shape_cast %803 : vector<1x128xf32> to vector<1x128xf32>
    %805 = vector.broadcast %804 : vector<1x128xf32> to vector<16x128xf32>
    %806 = arith.subf %802, %805 : vector<16x128xf32>
    %807 = math.absf %806 : vector<16x128xf32>
    %808 = arith.addf %799, %807 : vector<16x128xf32>
    %809 = vector.extract_strided_slice %753 {offsets = [0, 6], sizes = [16, 1], strides = [1, 1]} : vector<16x8xf32> to vector<16x1xf32>
    %810 = vector.shape_cast %809 : vector<16x1xf32> to vector<16x1xf32>
    %811 = vector.broadcast %810 : vector<16x1xf32> to vector<16x128xf32>
    %812 = vector.extract_strided_slice %754 {offsets = [6, 0], sizes = [1, 128], strides = [1, 1]} : vector<8x128xf32> to vector<1x128xf32>
    %813 = vector.shape_cast %812 : vector<1x128xf32> to vector<1x128xf32>
    %814 = vector.broadcast %813 : vector<1x128xf32> to vector<16x128xf32>
    %815 = arith.subf %811, %814 : vector<16x128xf32>
    %816 = math.absf %815 : vector<16x128xf32>
    %817 = arith.addf %808, %816 : vector<16x128xf32>
    %818 = vector.extract_strided_slice %753 {offsets = [0, 7], sizes = [16, 1], strides = [1, 1]} : vector<16x8xf32> to vector<16x1xf32>
    %819 = vector.shape_cast %818 : vector<16x1xf32> to vector<16x1xf32>
    %820 = vector.broadcast %819 : vector<16x1xf32> to vector<16x128xf32>
    %821 = vector.extract_strided_slice %754 {offsets = [7, 0], sizes = [1, 128], strides = [1, 1]} : vector<8x128xf32> to vector<1x128xf32>
    %822 = vector.shape_cast %821 : vector<1x128xf32> to vector<1x128xf32>
    %823 = vector.broadcast %822 : vector<1x128xf32> to vector<16x128xf32>
    %824 = arith.subf %820, %823 : vector<16x128xf32>
    %825 = math.absf %824 : vector<16x128xf32>
    %826 = arith.addf %817, %825 : vector<16x128xf32>
    %c88 = arith.constant 88 : index
    %c0_46 = arith.constant 0 : index
    %827 = vector.load %arg5[%c88, %c0_46] : memref<200x8xf32, #tpu.memory_space<vmem>>, vector<8x8xf32>
    %cst_47 = arith.constant dense<0.000000e+00> : vector<16x8xf32>
    %828 = tpu.matmul %0, %827, %cst_47 {dimension_numbers = #tpu.dot_dimension_numbers<[1], [1], [0], [0], [0, 0, 1, 0], [], []>} : vector<16x8xf32>, vector<8x8xf32>, vector<16x8xf32> -> vector<16x8xf32>
    %c88_48 = arith.constant 88 : index
    %c0_49 = arith.constant 0 : index
    %829 = vector.load %arg6[%c88_48, %c0_49] : memref<200x128xf32, #tpu.memory_space<vmem>>, vector<8x128xf32>
    %830 = vector.extract_strided_slice %828 {offsets = [0, 0], sizes = [16, 1], strides = [1, 1]} : vector<16x8xf32> to vector<16x1xf32>
    %831 = vector.shape_cast %830 : vector<16x1xf32> to vector<16x1xf32>
    %832 = vector.broadcast %831 : vector<16x1xf32> to vector<16x128xf32>
    %833 = vector.extract_strided_slice %829 {offsets = [0, 0], sizes = [1, 128], strides = [1, 1]} : vector<8x128xf32> to vector<1x128xf32>
    %834 = vector.shape_cast %833 : vector<1x128xf32> to vector<1x128xf32>
    %835 = vector.broadcast %834 : vector<1x128xf32> to vector<16x128xf32>
    %836 = arith.subf %832, %835 : vector<16x128xf32>
    %837 = math.absf %836 : vector<16x128xf32>
    %838 = arith.addf %826, %837 : vector<16x128xf32>
    %839 = vector.extract_strided_slice %828 {offsets = [0, 1], sizes = [16, 1], strides = [1, 1]} : vector<16x8xf32> to vector<16x1xf32>
    %840 = vector.shape_cast %839 : vector<16x1xf32> to vector<16x1xf32>
    %841 = vector.broadcast %840 : vector<16x1xf32> to vector<16x128xf32>
    %842 = vector.extract_strided_slice %829 {offsets = [1, 0], sizes = [1, 128], strides = [1, 1]} : vector<8x128xf32> to vector<1x128xf32>
    %843 = vector.shape_cast %842 : vector<1x128xf32> to vector<1x128xf32>
    %844 = vector.broadcast %843 : vector<1x128xf32> to vector<16x128xf32>
    %845 = arith.subf %841, %844 : vector<16x128xf32>
    %846 = math.absf %845 : vector<16x128xf32>
    %847 = arith.addf %838, %846 : vector<16x128xf32>
    %848 = vector.extract_strided_slice %828 {offsets = [0, 2], sizes = [16, 1], strides = [1, 1]} : vector<16x8xf32> to vector<16x1xf32>
    %849 = vector.shape_cast %848 : vector<16x1xf32> to vector<16x1xf32>
    %850 = vector.broadcast %849 : vector<16x1xf32> to vector<16x128xf32>
    %851 = vector.extract_strided_slice %829 {offsets = [2, 0], sizes = [1, 128], strides = [1, 1]} : vector<8x128xf32> to vector<1x128xf32>
    %852 = vector.shape_cast %851 : vector<1x128xf32> to vector<1x128xf32>
    %853 = vector.broadcast %852 : vector<1x128xf32> to vector<16x128xf32>
    %854 = arith.subf %850, %853 : vector<16x128xf32>
    %855 = math.absf %854 : vector<16x128xf32>
    %856 = arith.addf %847, %855 : vector<16x128xf32>
    %857 = vector.extract_strided_slice %828 {offsets = [0, 3], sizes = [16, 1], strides = [1, 1]} : vector<16x8xf32> to vector<16x1xf32>
    %858 = vector.shape_cast %857 : vector<16x1xf32> to vector<16x1xf32>
    %859 = vector.broadcast %858 : vector<16x1xf32> to vector<16x128xf32>
    %860 = vector.extract_strided_slice %829 {offsets = [3, 0], sizes = [1, 128], strides = [1, 1]} : vector<8x128xf32> to vector<1x128xf32>
    %861 = vector.shape_cast %860 : vector<1x128xf32> to vector<1x128xf32>
    %862 = vector.broadcast %861 : vector<1x128xf32> to vector<16x128xf32>
    %863 = arith.subf %859, %862 : vector<16x128xf32>
    %864 = math.absf %863 : vector<16x128xf32>
    %865 = arith.addf %856, %864 : vector<16x128xf32>
    %866 = vector.extract_strided_slice %828 {offsets = [0, 4], sizes = [16, 1], strides = [1, 1]} : vector<16x8xf32> to vector<16x1xf32>
    %867 = vector.shape_cast %866 : vector<16x1xf32> to vector<16x1xf32>
    %868 = vector.broadcast %867 : vector<16x1xf32> to vector<16x128xf32>
    %869 = vector.extract_strided_slice %829 {offsets = [4, 0], sizes = [1, 128], strides = [1, 1]} : vector<8x128xf32> to vector<1x128xf32>
    %870 = vector.shape_cast %869 : vector<1x128xf32> to vector<1x128xf32>
    %871 = vector.broadcast %870 : vector<1x128xf32> to vector<16x128xf32>
    %872 = arith.subf %868, %871 : vector<16x128xf32>
    %873 = math.absf %872 : vector<16x128xf32>
    %874 = arith.addf %865, %873 : vector<16x128xf32>
    %875 = vector.extract_strided_slice %828 {offsets = [0, 5], sizes = [16, 1], strides = [1, 1]} : vector<16x8xf32> to vector<16x1xf32>
    %876 = vector.shape_cast %875 : vector<16x1xf32> to vector<16x1xf32>
    %877 = vector.broadcast %876 : vector<16x1xf32> to vector<16x128xf32>
    %878 = vector.extract_strided_slice %829 {offsets = [5, 0], sizes = [1, 128], strides = [1, 1]} : vector<8x128xf32> to vector<1x128xf32>
    %879 = vector.shape_cast %878 : vector<1x128xf32> to vector<1x128xf32>
    %880 = vector.broadcast %879 : vector<1x128xf32> to vector<16x128xf32>
    %881 = arith.subf %877, %880 : vector<16x128xf32>
    %882 = math.absf %881 : vector<16x128xf32>
    %883 = arith.addf %874, %882 : vector<16x128xf32>
    %884 = vector.extract_strided_slice %828 {offsets = [0, 6], sizes = [16, 1], strides = [1, 1]} : vector<16x8xf32> to vector<16x1xf32>
    %885 = vector.shape_cast %884 : vector<16x1xf32> to vector<16x1xf32>
    %886 = vector.broadcast %885 : vector<16x1xf32> to vector<16x128xf32>
    %887 = vector.extract_strided_slice %829 {offsets = [6, 0], sizes = [1, 128], strides = [1, 1]} : vector<8x128xf32> to vector<1x128xf32>
    %888 = vector.shape_cast %887 : vector<1x128xf32> to vector<1x128xf32>
    %889 = vector.broadcast %888 : vector<1x128xf32> to vector<16x128xf32>
    %890 = arith.subf %886, %889 : vector<16x128xf32>
    %891 = math.absf %890 : vector<16x128xf32>
    %892 = arith.addf %883, %891 : vector<16x128xf32>
    %893 = vector.extract_strided_slice %828 {offsets = [0, 7], sizes = [16, 1], strides = [1, 1]} : vector<16x8xf32> to vector<16x1xf32>
    %894 = vector.shape_cast %893 : vector<16x1xf32> to vector<16x1xf32>
    %895 = vector.broadcast %894 : vector<16x1xf32> to vector<16x128xf32>
    %896 = vector.extract_strided_slice %829 {offsets = [7, 0], sizes = [1, 128], strides = [1, 1]} : vector<8x128xf32> to vector<1x128xf32>
    %897 = vector.shape_cast %896 : vector<1x128xf32> to vector<1x128xf32>
    %898 = vector.broadcast %897 : vector<1x128xf32> to vector<16x128xf32>
    %899 = arith.subf %895, %898 : vector<16x128xf32>
    %900 = math.absf %899 : vector<16x128xf32>
    %901 = arith.addf %892, %900 : vector<16x128xf32>
    %c96 = arith.constant 96 : index
    %c0_50 = arith.constant 0 : index
    %902 = vector.load %arg5[%c96, %c0_50] : memref<200x8xf32, #tpu.memory_space<vmem>>, vector<8x8xf32>
    %cst_51 = arith.constant dense<0.000000e+00> : vector<16x8xf32>
    %903 = tpu.matmul %0, %902, %cst_51 {dimension_numbers = #tpu.dot_dimension_numbers<[1], [1], [0], [0], [0, 0, 1, 0], [], []>} : vector<16x8xf32>, vector<8x8xf32>, vector<16x8xf32> -> vector<16x8xf32>
    %c96_52 = arith.constant 96 : index
    %c0_53 = arith.constant 0 : index
    %904 = vector.load %arg6[%c96_52, %c0_53] : memref<200x128xf32, #tpu.memory_space<vmem>>, vector<8x128xf32>
    %905 = vector.extract_strided_slice %903 {offsets = [0, 0], sizes = [16, 1], strides = [1, 1]} : vector<16x8xf32> to vector<16x1xf32>
    %906 = vector.shape_cast %905 : vector<16x1xf32> to vector<16x1xf32>
    %907 = vector.broadcast %906 : vector<16x1xf32> to vector<16x128xf32>
    %908 = vector.extract_strided_slice %904 {offsets = [0, 0], sizes = [1, 128], strides = [1, 1]} : vector<8x128xf32> to vector<1x128xf32>
    %909 = vector.shape_cast %908 : vector<1x128xf32> to vector<1x128xf32>
    %910 = vector.broadcast %909 : vector<1x128xf32> to vector<16x128xf32>
    %911 = arith.subf %907, %910 : vector<16x128xf32>
    %912 = math.absf %911 : vector<16x128xf32>
    %913 = arith.addf %901, %912 : vector<16x128xf32>
    %914 = vector.extract_strided_slice %903 {offsets = [0, 1], sizes = [16, 1], strides = [1, 1]} : vector<16x8xf32> to vector<16x1xf32>
    %915 = vector.shape_cast %914 : vector<16x1xf32> to vector<16x1xf32>
    %916 = vector.broadcast %915 : vector<16x1xf32> to vector<16x128xf32>
    %917 = vector.extract_strided_slice %904 {offsets = [1, 0], sizes = [1, 128], strides = [1, 1]} : vector<8x128xf32> to vector<1x128xf32>
    %918 = vector.shape_cast %917 : vector<1x128xf32> to vector<1x128xf32>
    %919 = vector.broadcast %918 : vector<1x128xf32> to vector<16x128xf32>
    %920 = arith.subf %916, %919 : vector<16x128xf32>
    %921 = math.absf %920 : vector<16x128xf32>
    %922 = arith.addf %913, %921 : vector<16x128xf32>
    %923 = vector.extract_strided_slice %903 {offsets = [0, 2], sizes = [16, 1], strides = [1, 1]} : vector<16x8xf32> to vector<16x1xf32>
    %924 = vector.shape_cast %923 : vector<16x1xf32> to vector<16x1xf32>
    %925 = vector.broadcast %924 : vector<16x1xf32> to vector<16x128xf32>
    %926 = vector.extract_strided_slice %904 {offsets = [2, 0], sizes = [1, 128], strides = [1, 1]} : vector<8x128xf32> to vector<1x128xf32>
    %927 = vector.shape_cast %926 : vector<1x128xf32> to vector<1x128xf32>
    %928 = vector.broadcast %927 : vector<1x128xf32> to vector<16x128xf32>
    %929 = arith.subf %925, %928 : vector<16x128xf32>
    %930 = math.absf %929 : vector<16x128xf32>
    %931 = arith.addf %922, %930 : vector<16x128xf32>
    %932 = vector.extract_strided_slice %903 {offsets = [0, 3], sizes = [16, 1], strides = [1, 1]} : vector<16x8xf32> to vector<16x1xf32>
    %933 = vector.shape_cast %932 : vector<16x1xf32> to vector<16x1xf32>
    %934 = vector.broadcast %933 : vector<16x1xf32> to vector<16x128xf32>
    %935 = vector.extract_strided_slice %904 {offsets = [3, 0], sizes = [1, 128], strides = [1, 1]} : vector<8x128xf32> to vector<1x128xf32>
    %936 = vector.shape_cast %935 : vector<1x128xf32> to vector<1x128xf32>
    %937 = vector.broadcast %936 : vector<1x128xf32> to vector<16x128xf32>
    %938 = arith.subf %934, %937 : vector<16x128xf32>
    %939 = math.absf %938 : vector<16x128xf32>
    %940 = arith.addf %931, %939 : vector<16x128xf32>
    %941 = vector.extract_strided_slice %903 {offsets = [0, 4], sizes = [16, 1], strides = [1, 1]} : vector<16x8xf32> to vector<16x1xf32>
    %942 = vector.shape_cast %941 : vector<16x1xf32> to vector<16x1xf32>
    %943 = vector.broadcast %942 : vector<16x1xf32> to vector<16x128xf32>
    %944 = vector.extract_strided_slice %904 {offsets = [4, 0], sizes = [1, 128], strides = [1, 1]} : vector<8x128xf32> to vector<1x128xf32>
    %945 = vector.shape_cast %944 : vector<1x128xf32> to vector<1x128xf32>
    %946 = vector.broadcast %945 : vector<1x128xf32> to vector<16x128xf32>
    %947 = arith.subf %943, %946 : vector<16x128xf32>
    %948 = math.absf %947 : vector<16x128xf32>
    %949 = arith.addf %940, %948 : vector<16x128xf32>
    %950 = vector.extract_strided_slice %903 {offsets = [0, 5], sizes = [16, 1], strides = [1, 1]} : vector<16x8xf32> to vector<16x1xf32>
    %951 = vector.shape_cast %950 : vector<16x1xf32> to vector<16x1xf32>
    %952 = vector.broadcast %951 : vector<16x1xf32> to vector<16x128xf32>
    %953 = vector.extract_strided_slice %904 {offsets = [5, 0], sizes = [1, 128], strides = [1, 1]} : vector<8x128xf32> to vector<1x128xf32>
    %954 = vector.shape_cast %953 : vector<1x128xf32> to vector<1x128xf32>
    %955 = vector.broadcast %954 : vector<1x128xf32> to vector<16x128xf32>
    %956 = arith.subf %952, %955 : vector<16x128xf32>
    %957 = math.absf %956 : vector<16x128xf32>
    %958 = arith.addf %949, %957 : vector<16x128xf32>
    %959 = vector.extract_strided_slice %903 {offsets = [0, 6], sizes = [16, 1], strides = [1, 1]} : vector<16x8xf32> to vector<16x1xf32>
    %960 = vector.shape_cast %959 : vector<16x1xf32> to vector<16x1xf32>
    %961 = vector.broadcast %960 : vector<16x1xf32> to vector<16x128xf32>
    %962 = vector.extract_strided_slice %904 {offsets = [6, 0], sizes = [1, 128], strides = [1, 1]} : vector<8x128xf32> to vector<1x128xf32>
    %963 = vector.shape_cast %962 : vector<1x128xf32> to vector<1x128xf32>
    %964 = vector.broadcast %963 : vector<1x128xf32> to vector<16x128xf32>
    %965 = arith.subf %961, %964 : vector<16x128xf32>
    %966 = math.absf %965 : vector<16x128xf32>
    %967 = arith.addf %958, %966 : vector<16x128xf32>
    %968 = vector.extract_strided_slice %903 {offsets = [0, 7], sizes = [16, 1], strides = [1, 1]} : vector<16x8xf32> to vector<16x1xf32>
    %969 = vector.shape_cast %968 : vector<16x1xf32> to vector<16x1xf32>
    %970 = vector.broadcast %969 : vector<16x1xf32> to vector<16x128xf32>
    %971 = vector.extract_strided_slice %904 {offsets = [7, 0], sizes = [1, 128], strides = [1, 1]} : vector<8x128xf32> to vector<1x128xf32>
    %972 = vector.shape_cast %971 : vector<1x128xf32> to vector<1x128xf32>
    %973 = vector.broadcast %972 : vector<1x128xf32> to vector<16x128xf32>
    %974 = arith.subf %970, %973 : vector<16x128xf32>
    %975 = math.absf %974 : vector<16x128xf32>
    %976 = arith.addf %967, %975 : vector<16x128xf32>
    %c104 = arith.constant 104 : index
    %c0_54 = arith.constant 0 : index
    %977 = vector.load %arg5[%c104, %c0_54] : memref<200x8xf32, #tpu.memory_space<vmem>>, vector<8x8xf32>
    %cst_55 = arith.constant dense<0.000000e+00> : vector<16x8xf32>
    %978 = tpu.matmul %0, %977, %cst_55 {dimension_numbers = #tpu.dot_dimension_numbers<[1], [1], [0], [0], [0, 0, 1, 0], [], []>} : vector<16x8xf32>, vector<8x8xf32>, vector<16x8xf32> -> vector<16x8xf32>
    %c104_56 = arith.constant 104 : index
    %c0_57 = arith.constant 0 : index
    %979 = vector.load %arg6[%c104_56, %c0_57] : memref<200x128xf32, #tpu.memory_space<vmem>>, vector<8x128xf32>
    %980 = vector.extract_strided_slice %978 {offsets = [0, 0], sizes = [16, 1], strides = [1, 1]} : vector<16x8xf32> to vector<16x1xf32>
    %981 = vector.shape_cast %980 : vector<16x1xf32> to vector<16x1xf32>
    %982 = vector.broadcast %981 : vector<16x1xf32> to vector<16x128xf32>
    %983 = vector.extract_strided_slice %979 {offsets = [0, 0], sizes = [1, 128], strides = [1, 1]} : vector<8x128xf32> to vector<1x128xf32>
    %984 = vector.shape_cast %983 : vector<1x128xf32> to vector<1x128xf32>
    %985 = vector.broadcast %984 : vector<1x128xf32> to vector<16x128xf32>
    %986 = arith.subf %982, %985 : vector<16x128xf32>
    %987 = math.absf %986 : vector<16x128xf32>
    %988 = arith.addf %976, %987 : vector<16x128xf32>
    %989 = vector.extract_strided_slice %978 {offsets = [0, 1], sizes = [16, 1], strides = [1, 1]} : vector<16x8xf32> to vector<16x1xf32>
    %990 = vector.shape_cast %989 : vector<16x1xf32> to vector<16x1xf32>
    %991 = vector.broadcast %990 : vector<16x1xf32> to vector<16x128xf32>
    %992 = vector.extract_strided_slice %979 {offsets = [1, 0], sizes = [1, 128], strides = [1, 1]} : vector<8x128xf32> to vector<1x128xf32>
    %993 = vector.shape_cast %992 : vector<1x128xf32> to vector<1x128xf32>
    %994 = vector.broadcast %993 : vector<1x128xf32> to vector<16x128xf32>
    %995 = arith.subf %991, %994 : vector<16x128xf32>
    %996 = math.absf %995 : vector<16x128xf32>
    %997 = arith.addf %988, %996 : vector<16x128xf32>
    %998 = vector.extract_strided_slice %978 {offsets = [0, 2], sizes = [16, 1], strides = [1, 1]} : vector<16x8xf32> to vector<16x1xf32>
    %999 = vector.shape_cast %998 : vector<16x1xf32> to vector<16x1xf32>
    %1000 = vector.broadcast %999 : vector<16x1xf32> to vector<16x128xf32>
    %1001 = vector.extract_strided_slice %979 {offsets = [2, 0], sizes = [1, 128], strides = [1, 1]} : vector<8x128xf32> to vector<1x128xf32>
    %1002 = vector.shape_cast %1001 : vector<1x128xf32> to vector<1x128xf32>
    %1003 = vector.broadcast %1002 : vector<1x128xf32> to vector<16x128xf32>
    %1004 = arith.subf %1000, %1003 : vector<16x128xf32>
    %1005 = math.absf %1004 : vector<16x128xf32>
    %1006 = arith.addf %997, %1005 : vector<16x128xf32>
    %1007 = vector.extract_strided_slice %978 {offsets = [0, 3], sizes = [16, 1], strides = [1, 1]} : vector<16x8xf32> to vector<16x1xf32>
    %1008 = vector.shape_cast %1007 : vector<16x1xf32> to vector<16x1xf32>
    %1009 = vector.broadcast %1008 : vector<16x1xf32> to vector<16x128xf32>
    %1010 = vector.extract_strided_slice %979 {offsets = [3, 0], sizes = [1, 128], strides = [1, 1]} : vector<8x128xf32> to vector<1x128xf32>
    %1011 = vector.shape_cast %1010 : vector<1x128xf32> to vector<1x128xf32>
    %1012 = vector.broadcast %1011 : vector<1x128xf32> to vector<16x128xf32>
    %1013 = arith.subf %1009, %1012 : vector<16x128xf32>
    %1014 = math.absf %1013 : vector<16x128xf32>
    %1015 = arith.addf %1006, %1014 : vector<16x128xf32>
    %1016 = vector.extract_strided_slice %978 {offsets = [0, 4], sizes = [16, 1], strides = [1, 1]} : vector<16x8xf32> to vector<16x1xf32>
    %1017 = vector.shape_cast %1016 : vector<16x1xf32> to vector<16x1xf32>
    %1018 = vector.broadcast %1017 : vector<16x1xf32> to vector<16x128xf32>
    %1019 = vector.extract_strided_slice %979 {offsets = [4, 0], sizes = [1, 128], strides = [1, 1]} : vector<8x128xf32> to vector<1x128xf32>
    %1020 = vector.shape_cast %1019 : vector<1x128xf32> to vector<1x128xf32>
    %1021 = vector.broadcast %1020 : vector<1x128xf32> to vector<16x128xf32>
    %1022 = arith.subf %1018, %1021 : vector<16x128xf32>
    %1023 = math.absf %1022 : vector<16x128xf32>
    %1024 = arith.addf %1015, %1023 : vector<16x128xf32>
    %1025 = vector.extract_strided_slice %978 {offsets = [0, 5], sizes = [16, 1], strides = [1, 1]} : vector<16x8xf32> to vector<16x1xf32>
    %1026 = vector.shape_cast %1025 : vector<16x1xf32> to vector<16x1xf32>
    %1027 = vector.broadcast %1026 : vector<16x1xf32> to vector<16x128xf32>
    %1028 = vector.extract_strided_slice %979 {offsets = [5, 0], sizes = [1, 128], strides = [1, 1]} : vector<8x128xf32> to vector<1x128xf32>
    %1029 = vector.shape_cast %1028 : vector<1x128xf32> to vector<1x128xf32>
    %1030 = vector.broadcast %1029 : vector<1x128xf32> to vector<16x128xf32>
    %1031 = arith.subf %1027, %1030 : vector<16x128xf32>
    %1032 = math.absf %1031 : vector<16x128xf32>
    %1033 = arith.addf %1024, %1032 : vector<16x128xf32>
    %1034 = vector.extract_strided_slice %978 {offsets = [0, 6], sizes = [16, 1], strides = [1, 1]} : vector<16x8xf32> to vector<16x1xf32>
    %1035 = vector.shape_cast %1034 : vector<16x1xf32> to vector<16x1xf32>
    %1036 = vector.broadcast %1035 : vector<16x1xf32> to vector<16x128xf32>
    %1037 = vector.extract_strided_slice %979 {offsets = [6, 0], sizes = [1, 128], strides = [1, 1]} : vector<8x128xf32> to vector<1x128xf32>
    %1038 = vector.shape_cast %1037 : vector<1x128xf32> to vector<1x128xf32>
    %1039 = vector.broadcast %1038 : vector<1x128xf32> to vector<16x128xf32>
    %1040 = arith.subf %1036, %1039 : vector<16x128xf32>
    %1041 = math.absf %1040 : vector<16x128xf32>
    %1042 = arith.addf %1033, %1041 : vector<16x128xf32>
    %1043 = vector.extract_strided_slice %978 {offsets = [0, 7], sizes = [16, 1], strides = [1, 1]} : vector<16x8xf32> to vector<16x1xf32>
    %1044 = vector.shape_cast %1043 : vector<16x1xf32> to vector<16x1xf32>
    %1045 = vector.broadcast %1044 : vector<16x1xf32> to vector<16x128xf32>
    %1046 = vector.extract_strided_slice %979 {offsets = [7, 0], sizes = [1, 128], strides = [1, 1]} : vector<8x128xf32> to vector<1x128xf32>
    %1047 = vector.shape_cast %1046 : vector<1x128xf32> to vector<1x128xf32>
    %1048 = vector.broadcast %1047 : vector<1x128xf32> to vector<16x128xf32>
    %1049 = arith.subf %1045, %1048 : vector<16x128xf32>
    %1050 = math.absf %1049 : vector<16x128xf32>
    %1051 = arith.addf %1042, %1050 : vector<16x128xf32>
    %c112 = arith.constant 112 : index
    %c0_58 = arith.constant 0 : index
    %1052 = vector.load %arg5[%c112, %c0_58] : memref<200x8xf32, #tpu.memory_space<vmem>>, vector<8x8xf32>
    %cst_59 = arith.constant dense<0.000000e+00> : vector<16x8xf32>
    %1053 = tpu.matmul %0, %1052, %cst_59 {dimension_numbers = #tpu.dot_dimension_numbers<[1], [1], [0], [0], [0, 0, 1, 0], [], []>} : vector<16x8xf32>, vector<8x8xf32>, vector<16x8xf32> -> vector<16x8xf32>
    %c112_60 = arith.constant 112 : index
    %c0_61 = arith.constant 0 : index
    %1054 = vector.load %arg6[%c112_60, %c0_61] : memref<200x128xf32, #tpu.memory_space<vmem>>, vector<8x128xf32>
    %1055 = vector.extract_strided_slice %1053 {offsets = [0, 0], sizes = [16, 1], strides = [1, 1]} : vector<16x8xf32> to vector<16x1xf32>
    %1056 = vector.shape_cast %1055 : vector<16x1xf32> to vector<16x1xf32>
    %1057 = vector.broadcast %1056 : vector<16x1xf32> to vector<16x128xf32>
    %1058 = vector.extract_strided_slice %1054 {offsets = [0, 0], sizes = [1, 128], strides = [1, 1]} : vector<8x128xf32> to vector<1x128xf32>
    %1059 = vector.shape_cast %1058 : vector<1x128xf32> to vector<1x128xf32>
    %1060 = vector.broadcast %1059 : vector<1x128xf32> to vector<16x128xf32>
    %1061 = arith.subf %1057, %1060 : vector<16x128xf32>
    %1062 = math.absf %1061 : vector<16x128xf32>
    %1063 = arith.addf %1051, %1062 : vector<16x128xf32>
    %1064 = vector.extract_strided_slice %1053 {offsets = [0, 1], sizes = [16, 1], strides = [1, 1]} : vector<16x8xf32> to vector<16x1xf32>
    %1065 = vector.shape_cast %1064 : vector<16x1xf32> to vector<16x1xf32>
    %1066 = vector.broadcast %1065 : vector<16x1xf32> to vector<16x128xf32>
    %1067 = vector.extract_strided_slice %1054 {offsets = [1, 0], sizes = [1, 128], strides = [1, 1]} : vector<8x128xf32> to vector<1x128xf32>
    %1068 = vector.shape_cast %1067 : vector<1x128xf32> to vector<1x128xf32>
    %1069 = vector.broadcast %1068 : vector<1x128xf32> to vector<16x128xf32>
    %1070 = arith.subf %1066, %1069 : vector<16x128xf32>
    %1071 = math.absf %1070 : vector<16x128xf32>
    %1072 = arith.addf %1063, %1071 : vector<16x128xf32>
    %1073 = vector.extract_strided_slice %1053 {offsets = [0, 2], sizes = [16, 1], strides = [1, 1]} : vector<16x8xf32> to vector<16x1xf32>
    %1074 = vector.shape_cast %1073 : vector<16x1xf32> to vector<16x1xf32>
    %1075 = vector.broadcast %1074 : vector<16x1xf32> to vector<16x128xf32>
    %1076 = vector.extract_strided_slice %1054 {offsets = [2, 0], sizes = [1, 128], strides = [1, 1]} : vector<8x128xf32> to vector<1x128xf32>
    %1077 = vector.shape_cast %1076 : vector<1x128xf32> to vector<1x128xf32>
    %1078 = vector.broadcast %1077 : vector<1x128xf32> to vector<16x128xf32>
    %1079 = arith.subf %1075, %1078 : vector<16x128xf32>
    %1080 = math.absf %1079 : vector<16x128xf32>
    %1081 = arith.addf %1072, %1080 : vector<16x128xf32>
    %1082 = vector.extract_strided_slice %1053 {offsets = [0, 3], sizes = [16, 1], strides = [1, 1]} : vector<16x8xf32> to vector<16x1xf32>
    %1083 = vector.shape_cast %1082 : vector<16x1xf32> to vector<16x1xf32>
    %1084 = vector.broadcast %1083 : vector<16x1xf32> to vector<16x128xf32>
    %1085 = vector.extract_strided_slice %1054 {offsets = [3, 0], sizes = [1, 128], strides = [1, 1]} : vector<8x128xf32> to vector<1x128xf32>
    %1086 = vector.shape_cast %1085 : vector<1x128xf32> to vector<1x128xf32>
    %1087 = vector.broadcast %1086 : vector<1x128xf32> to vector<16x128xf32>
    %1088 = arith.subf %1084, %1087 : vector<16x128xf32>
    %1089 = math.absf %1088 : vector<16x128xf32>
    %1090 = arith.addf %1081, %1089 : vector<16x128xf32>
    %1091 = vector.extract_strided_slice %1053 {offsets = [0, 4], sizes = [16, 1], strides = [1, 1]} : vector<16x8xf32> to vector<16x1xf32>
    %1092 = vector.shape_cast %1091 : vector<16x1xf32> to vector<16x1xf32>
    %1093 = vector.broadcast %1092 : vector<16x1xf32> to vector<16x128xf32>
    %1094 = vector.extract_strided_slice %1054 {offsets = [4, 0], sizes = [1, 128], strides = [1, 1]} : vector<8x128xf32> to vector<1x128xf32>
    %1095 = vector.shape_cast %1094 : vector<1x128xf32> to vector<1x128xf32>
    %1096 = vector.broadcast %1095 : vector<1x128xf32> to vector<16x128xf32>
    %1097 = arith.subf %1093, %1096 : vector<16x128xf32>
    %1098 = math.absf %1097 : vector<16x128xf32>
    %1099 = arith.addf %1090, %1098 : vector<16x128xf32>
    %1100 = vector.extract_strided_slice %1053 {offsets = [0, 5], sizes = [16, 1], strides = [1, 1]} : vector<16x8xf32> to vector<16x1xf32>
    %1101 = vector.shape_cast %1100 : vector<16x1xf32> to vector<16x1xf32>
    %1102 = vector.broadcast %1101 : vector<16x1xf32> to vector<16x128xf32>
    %1103 = vector.extract_strided_slice %1054 {offsets = [5, 0], sizes = [1, 128], strides = [1, 1]} : vector<8x128xf32> to vector<1x128xf32>
    %1104 = vector.shape_cast %1103 : vector<1x128xf32> to vector<1x128xf32>
    %1105 = vector.broadcast %1104 : vector<1x128xf32> to vector<16x128xf32>
    %1106 = arith.subf %1102, %1105 : vector<16x128xf32>
    %1107 = math.absf %1106 : vector<16x128xf32>
    %1108 = arith.addf %1099, %1107 : vector<16x128xf32>
    %1109 = vector.extract_strided_slice %1053 {offsets = [0, 6], sizes = [16, 1], strides = [1, 1]} : vector<16x8xf32> to vector<16x1xf32>
    %1110 = vector.shape_cast %1109 : vector<16x1xf32> to vector<16x1xf32>
    %1111 = vector.broadcast %1110 : vector<16x1xf32> to vector<16x128xf32>
    %1112 = vector.extract_strided_slice %1054 {offsets = [6, 0], sizes = [1, 128], strides = [1, 1]} : vector<8x128xf32> to vector<1x128xf32>
    %1113 = vector.shape_cast %1112 : vector<1x128xf32> to vector<1x128xf32>
    %1114 = vector.broadcast %1113 : vector<1x128xf32> to vector<16x128xf32>
    %1115 = arith.subf %1111, %1114 : vector<16x128xf32>
    %1116 = math.absf %1115 : vector<16x128xf32>
    %1117 = arith.addf %1108, %1116 : vector<16x128xf32>
    %1118 = vector.extract_strided_slice %1053 {offsets = [0, 7], sizes = [16, 1], strides = [1, 1]} : vector<16x8xf32> to vector<16x1xf32>
    %1119 = vector.shape_cast %1118 : vector<16x1xf32> to vector<16x1xf32>
    %1120 = vector.broadcast %1119 : vector<16x1xf32> to vector<16x128xf32>
    %1121 = vector.extract_strided_slice %1054 {offsets = [7, 0], sizes = [1, 128], strides = [1, 1]} : vector<8x128xf32> to vector<1x128xf32>
    %1122 = vector.shape_cast %1121 : vector<1x128xf32> to vector<1x128xf32>
    %1123 = vector.broadcast %1122 : vector<1x128xf32> to vector<16x128xf32>
    %1124 = arith.subf %1120, %1123 : vector<16x128xf32>
    %1125 = math.absf %1124 : vector<16x128xf32>
    %1126 = arith.addf %1117, %1125 : vector<16x128xf32>
    %c120 = arith.constant 120 : index
    %c0_62 = arith.constant 0 : index
    %1127 = vector.load %arg5[%c120, %c0_62] : memref<200x8xf32, #tpu.memory_space<vmem>>, vector<8x8xf32>
    %cst_63 = arith.constant dense<0.000000e+00> : vector<16x8xf32>
    %1128 = tpu.matmul %0, %1127, %cst_63 {dimension_numbers = #tpu.dot_dimension_numbers<[1], [1], [0], [0], [0, 0, 1, 0], [], []>} : vector<16x8xf32>, vector<8x8xf32>, vector<16x8xf32> -> vector<16x8xf32>
    %c120_64 = arith.constant 120 : index
    %c0_65 = arith.constant 0 : index
    %1129 = vector.load %arg6[%c120_64, %c0_65] : memref<200x128xf32, #tpu.memory_space<vmem>>, vector<8x128xf32>
    %1130 = vector.extract_strided_slice %1128 {offsets = [0, 0], sizes = [16, 1], strides = [1, 1]} : vector<16x8xf32> to vector<16x1xf32>
    %1131 = vector.shape_cast %1130 : vector<16x1xf32> to vector<16x1xf32>
    %1132 = vector.broadcast %1131 : vector<16x1xf32> to vector<16x128xf32>
    %1133 = vector.extract_strided_slice %1129 {offsets = [0, 0], sizes = [1, 128], strides = [1, 1]} : vector<8x128xf32> to vector<1x128xf32>
    %1134 = vector.shape_cast %1133 : vector<1x128xf32> to vector<1x128xf32>
    %1135 = vector.broadcast %1134 : vector<1x128xf32> to vector<16x128xf32>
    %1136 = arith.subf %1132, %1135 : vector<16x128xf32>
    %1137 = math.absf %1136 : vector<16x128xf32>
    %1138 = arith.addf %1126, %1137 : vector<16x128xf32>
    %1139 = vector.extract_strided_slice %1128 {offsets = [0, 1], sizes = [16, 1], strides = [1, 1]} : vector<16x8xf32> to vector<16x1xf32>
    %1140 = vector.shape_cast %1139 : vector<16x1xf32> to vector<16x1xf32>
    %1141 = vector.broadcast %1140 : vector<16x1xf32> to vector<16x128xf32>
    %1142 = vector.extract_strided_slice %1129 {offsets = [1, 0], sizes = [1, 128], strides = [1, 1]} : vector<8x128xf32> to vector<1x128xf32>
    %1143 = vector.shape_cast %1142 : vector<1x128xf32> to vector<1x128xf32>
    %1144 = vector.broadcast %1143 : vector<1x128xf32> to vector<16x128xf32>
    %1145 = arith.subf %1141, %1144 : vector<16x128xf32>
    %1146 = math.absf %1145 : vector<16x128xf32>
    %1147 = arith.addf %1138, %1146 : vector<16x128xf32>
    %1148 = vector.extract_strided_slice %1128 {offsets = [0, 2], sizes = [16, 1], strides = [1, 1]} : vector<16x8xf32> to vector<16x1xf32>
    %1149 = vector.shape_cast %1148 : vector<16x1xf32> to vector<16x1xf32>
    %1150 = vector.broadcast %1149 : vector<16x1xf32> to vector<16x128xf32>
    %1151 = vector.extract_strided_slice %1129 {offsets = [2, 0], sizes = [1, 128], strides = [1, 1]} : vector<8x128xf32> to vector<1x128xf32>
    %1152 = vector.shape_cast %1151 : vector<1x128xf32> to vector<1x128xf32>
    %1153 = vector.broadcast %1152 : vector<1x128xf32> to vector<16x128xf32>
    %1154 = arith.subf %1150, %1153 : vector<16x128xf32>
    %1155 = math.absf %1154 : vector<16x128xf32>
    %1156 = arith.addf %1147, %1155 : vector<16x128xf32>
    %1157 = vector.extract_strided_slice %1128 {offsets = [0, 3], sizes = [16, 1], strides = [1, 1]} : vector<16x8xf32> to vector<16x1xf32>
    %1158 = vector.shape_cast %1157 : vector<16x1xf32> to vector<16x1xf32>
    %1159 = vector.broadcast %1158 : vector<16x1xf32> to vector<16x128xf32>
    %1160 = vector.extract_strided_slice %1129 {offsets = [3, 0], sizes = [1, 128], strides = [1, 1]} : vector<8x128xf32> to vector<1x128xf32>
    %1161 = vector.shape_cast %1160 : vector<1x128xf32> to vector<1x128xf32>
    %1162 = vector.broadcast %1161 : vector<1x128xf32> to vector<16x128xf32>
    %1163 = arith.subf %1159, %1162 : vector<16x128xf32>
    %1164 = math.absf %1163 : vector<16x128xf32>
    %1165 = arith.addf %1156, %1164 : vector<16x128xf32>
    %1166 = vector.extract_strided_slice %1128 {offsets = [0, 4], sizes = [16, 1], strides = [1, 1]} : vector<16x8xf32> to vector<16x1xf32>
    %1167 = vector.shape_cast %1166 : vector<16x1xf32> to vector<16x1xf32>
    %1168 = vector.broadcast %1167 : vector<16x1xf32> to vector<16x128xf32>
    %1169 = vector.extract_strided_slice %1129 {offsets = [4, 0], sizes = [1, 128], strides = [1, 1]} : vector<8x128xf32> to vector<1x128xf32>
    %1170 = vector.shape_cast %1169 : vector<1x128xf32> to vector<1x128xf32>
    %1171 = vector.broadcast %1170 : vector<1x128xf32> to vector<16x128xf32>
    %1172 = arith.subf %1168, %1171 : vector<16x128xf32>
    %1173 = math.absf %1172 : vector<16x128xf32>
    %1174 = arith.addf %1165, %1173 : vector<16x128xf32>
    %1175 = vector.extract_strided_slice %1128 {offsets = [0, 5], sizes = [16, 1], strides = [1, 1]} : vector<16x8xf32> to vector<16x1xf32>
    %1176 = vector.shape_cast %1175 : vector<16x1xf32> to vector<16x1xf32>
    %1177 = vector.broadcast %1176 : vector<16x1xf32> to vector<16x128xf32>
    %1178 = vector.extract_strided_slice %1129 {offsets = [5, 0], sizes = [1, 128], strides = [1, 1]} : vector<8x128xf32> to vector<1x128xf32>
    %1179 = vector.shape_cast %1178 : vector<1x128xf32> to vector<1x128xf32>
    %1180 = vector.broadcast %1179 : vector<1x128xf32> to vector<16x128xf32>
    %1181 = arith.subf %1177, %1180 : vector<16x128xf32>
    %1182 = math.absf %1181 : vector<16x128xf32>
    %1183 = arith.addf %1174, %1182 : vector<16x128xf32>
    %1184 = vector.extract_strided_slice %1128 {offsets = [0, 6], sizes = [16, 1], strides = [1, 1]} : vector<16x8xf32> to vector<16x1xf32>
    %1185 = vector.shape_cast %1184 : vector<16x1xf32> to vector<16x1xf32>
    %1186 = vector.broadcast %1185 : vector<16x1xf32> to vector<16x128xf32>
    %1187 = vector.extract_strided_slice %1129 {offsets = [6, 0], sizes = [1, 128], strides = [1, 1]} : vector<8x128xf32> to vector<1x128xf32>
    %1188 = vector.shape_cast %1187 : vector<1x128xf32> to vector<1x128xf32>
    %1189 = vector.broadcast %1188 : vector<1x128xf32> to vector<16x128xf32>
    %1190 = arith.subf %1186, %1189 : vector<16x128xf32>
    %1191 = math.absf %1190 : vector<16x128xf32>
    %1192 = arith.addf %1183, %1191 : vector<16x128xf32>
    %1193 = vector.extract_strided_slice %1128 {offsets = [0, 7], sizes = [16, 1], strides = [1, 1]} : vector<16x8xf32> to vector<16x1xf32>
    %1194 = vector.shape_cast %1193 : vector<16x1xf32> to vector<16x1xf32>
    %1195 = vector.broadcast %1194 : vector<16x1xf32> to vector<16x128xf32>
    %1196 = vector.extract_strided_slice %1129 {offsets = [7, 0], sizes = [1, 128], strides = [1, 1]} : vector<8x128xf32> to vector<1x128xf32>
    %1197 = vector.shape_cast %1196 : vector<1x128xf32> to vector<1x128xf32>
    %1198 = vector.broadcast %1197 : vector<1x128xf32> to vector<16x128xf32>
    %1199 = arith.subf %1195, %1198 : vector<16x128xf32>
    %1200 = math.absf %1199 : vector<16x128xf32>
    %1201 = arith.addf %1192, %1200 : vector<16x128xf32>
    %c128 = arith.constant 128 : index
    %c0_66 = arith.constant 0 : index
    %1202 = vector.load %arg5[%c128, %c0_66] : memref<200x8xf32, #tpu.memory_space<vmem>>, vector<8x8xf32>
    %cst_67 = arith.constant dense<0.000000e+00> : vector<16x8xf32>
    %1203 = tpu.matmul %0, %1202, %cst_67 {dimension_numbers = #tpu.dot_dimension_numbers<[1], [1], [0], [0], [0, 0, 1, 0], [], []>} : vector<16x8xf32>, vector<8x8xf32>, vector<16x8xf32> -> vector<16x8xf32>
    %c128_68 = arith.constant 128 : index
    %c0_69 = arith.constant 0 : index
    %1204 = vector.load %arg6[%c128_68, %c0_69] : memref<200x128xf32, #tpu.memory_space<vmem>>, vector<8x128xf32>
    %1205 = vector.extract_strided_slice %1203 {offsets = [0, 0], sizes = [16, 1], strides = [1, 1]} : vector<16x8xf32> to vector<16x1xf32>
    %1206 = vector.shape_cast %1205 : vector<16x1xf32> to vector<16x1xf32>
    %1207 = vector.broadcast %1206 : vector<16x1xf32> to vector<16x128xf32>
    %1208 = vector.extract_strided_slice %1204 {offsets = [0, 0], sizes = [1, 128], strides = [1, 1]} : vector<8x128xf32> to vector<1x128xf32>
    %1209 = vector.shape_cast %1208 : vector<1x128xf32> to vector<1x128xf32>
    %1210 = vector.broadcast %1209 : vector<1x128xf32> to vector<16x128xf32>
    %1211 = arith.subf %1207, %1210 : vector<16x128xf32>
    %1212 = math.absf %1211 : vector<16x128xf32>
    %1213 = arith.addf %1201, %1212 : vector<16x128xf32>
    %1214 = vector.extract_strided_slice %1203 {offsets = [0, 1], sizes = [16, 1], strides = [1, 1]} : vector<16x8xf32> to vector<16x1xf32>
    %1215 = vector.shape_cast %1214 : vector<16x1xf32> to vector<16x1xf32>
    %1216 = vector.broadcast %1215 : vector<16x1xf32> to vector<16x128xf32>
    %1217 = vector.extract_strided_slice %1204 {offsets = [1, 0], sizes = [1, 128], strides = [1, 1]} : vector<8x128xf32> to vector<1x128xf32>
    %1218 = vector.shape_cast %1217 : vector<1x128xf32> to vector<1x128xf32>
    %1219 = vector.broadcast %1218 : vector<1x128xf32> to vector<16x128xf32>
    %1220 = arith.subf %1216, %1219 : vector<16x128xf32>
    %1221 = math.absf %1220 : vector<16x128xf32>
    %1222 = arith.addf %1213, %1221 : vector<16x128xf32>
    %1223 = vector.extract_strided_slice %1203 {offsets = [0, 2], sizes = [16, 1], strides = [1, 1]} : vector<16x8xf32> to vector<16x1xf32>
    %1224 = vector.shape_cast %1223 : vector<16x1xf32> to vector<16x1xf32>
    %1225 = vector.broadcast %1224 : vector<16x1xf32> to vector<16x128xf32>
    %1226 = vector.extract_strided_slice %1204 {offsets = [2, 0], sizes = [1, 128], strides = [1, 1]} : vector<8x128xf32> to vector<1x128xf32>
    %1227 = vector.shape_cast %1226 : vector<1x128xf32> to vector<1x128xf32>
    %1228 = vector.broadcast %1227 : vector<1x128xf32> to vector<16x128xf32>
    %1229 = arith.subf %1225, %1228 : vector<16x128xf32>
    %1230 = math.absf %1229 : vector<16x128xf32>
    %1231 = arith.addf %1222, %1230 : vector<16x128xf32>
    %1232 = vector.extract_strided_slice %1203 {offsets = [0, 3], sizes = [16, 1], strides = [1, 1]} : vector<16x8xf32> to vector<16x1xf32>
    %1233 = vector.shape_cast %1232 : vector<16x1xf32> to vector<16x1xf32>
    %1234 = vector.broadcast %1233 : vector<16x1xf32> to vector<16x128xf32>
    %1235 = vector.extract_strided_slice %1204 {offsets = [3, 0], sizes = [1, 128], strides = [1, 1]} : vector<8x128xf32> to vector<1x128xf32>
    %1236 = vector.shape_cast %1235 : vector<1x128xf32> to vector<1x128xf32>
    %1237 = vector.broadcast %1236 : vector<1x128xf32> to vector<16x128xf32>
    %1238 = arith.subf %1234, %1237 : vector<16x128xf32>
    %1239 = math.absf %1238 : vector<16x128xf32>
    %1240 = arith.addf %1231, %1239 : vector<16x128xf32>
    %1241 = vector.extract_strided_slice %1203 {offsets = [0, 4], sizes = [16, 1], strides = [1, 1]} : vector<16x8xf32> to vector<16x1xf32>
    %1242 = vector.shape_cast %1241 : vector<16x1xf32> to vector<16x1xf32>
    %1243 = vector.broadcast %1242 : vector<16x1xf32> to vector<16x128xf32>
    %1244 = vector.extract_strided_slice %1204 {offsets = [4, 0], sizes = [1, 128], strides = [1, 1]} : vector<8x128xf32> to vector<1x128xf32>
    %1245 = vector.shape_cast %1244 : vector<1x128xf32> to vector<1x128xf32>
    %1246 = vector.broadcast %1245 : vector<1x128xf32> to vector<16x128xf32>
    %1247 = arith.subf %1243, %1246 : vector<16x128xf32>
    %1248 = math.absf %1247 : vector<16x128xf32>
    %1249 = arith.addf %1240, %1248 : vector<16x128xf32>
    %1250 = vector.extract_strided_slice %1203 {offsets = [0, 5], sizes = [16, 1], strides = [1, 1]} : vector<16x8xf32> to vector<16x1xf32>
    %1251 = vector.shape_cast %1250 : vector<16x1xf32> to vector<16x1xf32>
    %1252 = vector.broadcast %1251 : vector<16x1xf32> to vector<16x128xf32>
    %1253 = vector.extract_strided_slice %1204 {offsets = [5, 0], sizes = [1, 128], strides = [1, 1]} : vector<8x128xf32> to vector<1x128xf32>
    %1254 = vector.shape_cast %1253 : vector<1x128xf32> to vector<1x128xf32>
    %1255 = vector.broadcast %1254 : vector<1x128xf32> to vector<16x128xf32>
    %1256 = arith.subf %1252, %1255 : vector<16x128xf32>
    %1257 = math.absf %1256 : vector<16x128xf32>
    %1258 = arith.addf %1249, %1257 : vector<16x128xf32>
    %1259 = vector.extract_strided_slice %1203 {offsets = [0, 6], sizes = [16, 1], strides = [1, 1]} : vector<16x8xf32> to vector<16x1xf32>
    %1260 = vector.shape_cast %1259 : vector<16x1xf32> to vector<16x1xf32>
    %1261 = vector.broadcast %1260 : vector<16x1xf32> to vector<16x128xf32>
    %1262 = vector.extract_strided_slice %1204 {offsets = [6, 0], sizes = [1, 128], strides = [1, 1]} : vector<8x128xf32> to vector<1x128xf32>
    %1263 = vector.shape_cast %1262 : vector<1x128xf32> to vector<1x128xf32>
    %1264 = vector.broadcast %1263 : vector<1x128xf32> to vector<16x128xf32>
    %1265 = arith.subf %1261, %1264 : vector<16x128xf32>
    %1266 = math.absf %1265 : vector<16x128xf32>
    %1267 = arith.addf %1258, %1266 : vector<16x128xf32>
    %1268 = vector.extract_strided_slice %1203 {offsets = [0, 7], sizes = [16, 1], strides = [1, 1]} : vector<16x8xf32> to vector<16x1xf32>
    %1269 = vector.shape_cast %1268 : vector<16x1xf32> to vector<16x1xf32>
    %1270 = vector.broadcast %1269 : vector<16x1xf32> to vector<16x128xf32>
    %1271 = vector.extract_strided_slice %1204 {offsets = [7, 0], sizes = [1, 128], strides = [1, 1]} : vector<8x128xf32> to vector<1x128xf32>
    %1272 = vector.shape_cast %1271 : vector<1x128xf32> to vector<1x128xf32>
    %1273 = vector.broadcast %1272 : vector<1x128xf32> to vector<16x128xf32>
    %1274 = arith.subf %1270, %1273 : vector<16x128xf32>
    %1275 = math.absf %1274 : vector<16x128xf32>
    %1276 = arith.addf %1267, %1275 : vector<16x128xf32>
    %c136 = arith.constant 136 : index
    %c0_70 = arith.constant 0 : index
    %1277 = vector.load %arg5[%c136, %c0_70] : memref<200x8xf32, #tpu.memory_space<vmem>>, vector<8x8xf32>
    %cst_71 = arith.constant dense<0.000000e+00> : vector<16x8xf32>
    %1278 = tpu.matmul %0, %1277, %cst_71 {dimension_numbers = #tpu.dot_dimension_numbers<[1], [1], [0], [0], [0, 0, 1, 0], [], []>} : vector<16x8xf32>, vector<8x8xf32>, vector<16x8xf32> -> vector<16x8xf32>
    %c136_72 = arith.constant 136 : index
    %c0_73 = arith.constant 0 : index
    %1279 = vector.load %arg6[%c136_72, %c0_73] : memref<200x128xf32, #tpu.memory_space<vmem>>, vector<8x128xf32>
    %1280 = vector.extract_strided_slice %1278 {offsets = [0, 0], sizes = [16, 1], strides = [1, 1]} : vector<16x8xf32> to vector<16x1xf32>
    %1281 = vector.shape_cast %1280 : vector<16x1xf32> to vector<16x1xf32>
    %1282 = vector.broadcast %1281 : vector<16x1xf32> to vector<16x128xf32>
    %1283 = vector.extract_strided_slice %1279 {offsets = [0, 0], sizes = [1, 128], strides = [1, 1]} : vector<8x128xf32> to vector<1x128xf32>
    %1284 = vector.shape_cast %1283 : vector<1x128xf32> to vector<1x128xf32>
    %1285 = vector.broadcast %1284 : vector<1x128xf32> to vector<16x128xf32>
    %1286 = arith.subf %1282, %1285 : vector<16x128xf32>
    %1287 = math.absf %1286 : vector<16x128xf32>
    %1288 = arith.addf %1276, %1287 : vector<16x128xf32>
    %1289 = vector.extract_strided_slice %1278 {offsets = [0, 1], sizes = [16, 1], strides = [1, 1]} : vector<16x8xf32> to vector<16x1xf32>
    %1290 = vector.shape_cast %1289 : vector<16x1xf32> to vector<16x1xf32>
    %1291 = vector.broadcast %1290 : vector<16x1xf32> to vector<16x128xf32>
    %1292 = vector.extract_strided_slice %1279 {offsets = [1, 0], sizes = [1, 128], strides = [1, 1]} : vector<8x128xf32> to vector<1x128xf32>
    %1293 = vector.shape_cast %1292 : vector<1x128xf32> to vector<1x128xf32>
    %1294 = vector.broadcast %1293 : vector<1x128xf32> to vector<16x128xf32>
    %1295 = arith.subf %1291, %1294 : vector<16x128xf32>
    %1296 = math.absf %1295 : vector<16x128xf32>
    %1297 = arith.addf %1288, %1296 : vector<16x128xf32>
    %1298 = vector.extract_strided_slice %1278 {offsets = [0, 2], sizes = [16, 1], strides = [1, 1]} : vector<16x8xf32> to vector<16x1xf32>
    %1299 = vector.shape_cast %1298 : vector<16x1xf32> to vector<16x1xf32>
    %1300 = vector.broadcast %1299 : vector<16x1xf32> to vector<16x128xf32>
    %1301 = vector.extract_strided_slice %1279 {offsets = [2, 0], sizes = [1, 128], strides = [1, 1]} : vector<8x128xf32> to vector<1x128xf32>
    %1302 = vector.shape_cast %1301 : vector<1x128xf32> to vector<1x128xf32>
    %1303 = vector.broadcast %1302 : vector<1x128xf32> to vector<16x128xf32>
    %1304 = arith.subf %1300, %1303 : vector<16x128xf32>
    %1305 = math.absf %1304 : vector<16x128xf32>
    %1306 = arith.addf %1297, %1305 : vector<16x128xf32>
    %1307 = vector.extract_strided_slice %1278 {offsets = [0, 3], sizes = [16, 1], strides = [1, 1]} : vector<16x8xf32> to vector<16x1xf32>
    %1308 = vector.shape_cast %1307 : vector<16x1xf32> to vector<16x1xf32>
    %1309 = vector.broadcast %1308 : vector<16x1xf32> to vector<16x128xf32>
    %1310 = vector.extract_strided_slice %1279 {offsets = [3, 0], sizes = [1, 128], strides = [1, 1]} : vector<8x128xf32> to vector<1x128xf32>
    %1311 = vector.shape_cast %1310 : vector<1x128xf32> to vector<1x128xf32>
    %1312 = vector.broadcast %1311 : vector<1x128xf32> to vector<16x128xf32>
    %1313 = arith.subf %1309, %1312 : vector<16x128xf32>
    %1314 = math.absf %1313 : vector<16x128xf32>
    %1315 = arith.addf %1306, %1314 : vector<16x128xf32>
    %1316 = vector.extract_strided_slice %1278 {offsets = [0, 4], sizes = [16, 1], strides = [1, 1]} : vector<16x8xf32> to vector<16x1xf32>
    %1317 = vector.shape_cast %1316 : vector<16x1xf32> to vector<16x1xf32>
    %1318 = vector.broadcast %1317 : vector<16x1xf32> to vector<16x128xf32>
    %1319 = vector.extract_strided_slice %1279 {offsets = [4, 0], sizes = [1, 128], strides = [1, 1]} : vector<8x128xf32> to vector<1x128xf32>
    %1320 = vector.shape_cast %1319 : vector<1x128xf32> to vector<1x128xf32>
    %1321 = vector.broadcast %1320 : vector<1x128xf32> to vector<16x128xf32>
    %1322 = arith.subf %1318, %1321 : vector<16x128xf32>
    %1323 = math.absf %1322 : vector<16x128xf32>
    %1324 = arith.addf %1315, %1323 : vector<16x128xf32>
    %1325 = vector.extract_strided_slice %1278 {offsets = [0, 5], sizes = [16, 1], strides = [1, 1]} : vector<16x8xf32> to vector<16x1xf32>
    %1326 = vector.shape_cast %1325 : vector<16x1xf32> to vector<16x1xf32>
    %1327 = vector.broadcast %1326 : vector<16x1xf32> to vector<16x128xf32>
    %1328 = vector.extract_strided_slice %1279 {offsets = [5, 0], sizes = [1, 128], strides = [1, 1]} : vector<8x128xf32> to vector<1x128xf32>
    %1329 = vector.shape_cast %1328 : vector<1x128xf32> to vector<1x128xf32>
    %1330 = vector.broadcast %1329 : vector<1x128xf32> to vector<16x128xf32>
    %1331 = arith.subf %1327, %1330 : vector<16x128xf32>
    %1332 = math.absf %1331 : vector<16x128xf32>
    %1333 = arith.addf %1324, %1332 : vector<16x128xf32>
    %1334 = vector.extract_strided_slice %1278 {offsets = [0, 6], sizes = [16, 1], strides = [1, 1]} : vector<16x8xf32> to vector<16x1xf32>
    %1335 = vector.shape_cast %1334 : vector<16x1xf32> to vector<16x1xf32>
    %1336 = vector.broadcast %1335 : vector<16x1xf32> to vector<16x128xf32>
    %1337 = vector.extract_strided_slice %1279 {offsets = [6, 0], sizes = [1, 128], strides = [1, 1]} : vector<8x128xf32> to vector<1x128xf32>
    %1338 = vector.shape_cast %1337 : vector<1x128xf32> to vector<1x128xf32>
    %1339 = vector.broadcast %1338 : vector<1x128xf32> to vector<16x128xf32>
    %1340 = arith.subf %1336, %1339 : vector<16x128xf32>
    %1341 = math.absf %1340 : vector<16x128xf32>
    %1342 = arith.addf %1333, %1341 : vector<16x128xf32>
    %1343 = vector.extract_strided_slice %1278 {offsets = [0, 7], sizes = [16, 1], strides = [1, 1]} : vector<16x8xf32> to vector<16x1xf32>
    %1344 = vector.shape_cast %1343 : vector<16x1xf32> to vector<16x1xf32>
    %1345 = vector.broadcast %1344 : vector<16x1xf32> to vector<16x128xf32>
    %1346 = vector.extract_strided_slice %1279 {offsets = [7, 0], sizes = [1, 128], strides = [1, 1]} : vector<8x128xf32> to vector<1x128xf32>
    %1347 = vector.shape_cast %1346 : vector<1x128xf32> to vector<1x128xf32>
    %1348 = vector.broadcast %1347 : vector<1x128xf32> to vector<16x128xf32>
    %1349 = arith.subf %1345, %1348 : vector<16x128xf32>
    %1350 = math.absf %1349 : vector<16x128xf32>
    %1351 = arith.addf %1342, %1350 : vector<16x128xf32>
    %c144 = arith.constant 144 : index
    %c0_74 = arith.constant 0 : index
    %1352 = vector.load %arg5[%c144, %c0_74] : memref<200x8xf32, #tpu.memory_space<vmem>>, vector<8x8xf32>
    %cst_75 = arith.constant dense<0.000000e+00> : vector<16x8xf32>
    %1353 = tpu.matmul %0, %1352, %cst_75 {dimension_numbers = #tpu.dot_dimension_numbers<[1], [1], [0], [0], [0, 0, 1, 0], [], []>} : vector<16x8xf32>, vector<8x8xf32>, vector<16x8xf32> -> vector<16x8xf32>
    %c144_76 = arith.constant 144 : index
    %c0_77 = arith.constant 0 : index
    %1354 = vector.load %arg6[%c144_76, %c0_77] : memref<200x128xf32, #tpu.memory_space<vmem>>, vector<8x128xf32>
    %1355 = vector.extract_strided_slice %1353 {offsets = [0, 0], sizes = [16, 1], strides = [1, 1]} : vector<16x8xf32> to vector<16x1xf32>
    %1356 = vector.shape_cast %1355 : vector<16x1xf32> to vector<16x1xf32>
    %1357 = vector.broadcast %1356 : vector<16x1xf32> to vector<16x128xf32>
    %1358 = vector.extract_strided_slice %1354 {offsets = [0, 0], sizes = [1, 128], strides = [1, 1]} : vector<8x128xf32> to vector<1x128xf32>
    %1359 = vector.shape_cast %1358 : vector<1x128xf32> to vector<1x128xf32>
    %1360 = vector.broadcast %1359 : vector<1x128xf32> to vector<16x128xf32>
    %1361 = arith.subf %1357, %1360 : vector<16x128xf32>
    %1362 = math.absf %1361 : vector<16x128xf32>
    %1363 = arith.addf %1351, %1362 : vector<16x128xf32>
    %1364 = vector.extract_strided_slice %1353 {offsets = [0, 1], sizes = [16, 1], strides = [1, 1]} : vector<16x8xf32> to vector<16x1xf32>
    %1365 = vector.shape_cast %1364 : vector<16x1xf32> to vector<16x1xf32>
    %1366 = vector.broadcast %1365 : vector<16x1xf32> to vector<16x128xf32>
    %1367 = vector.extract_strided_slice %1354 {offsets = [1, 0], sizes = [1, 128], strides = [1, 1]} : vector<8x128xf32> to vector<1x128xf32>
    %1368 = vector.shape_cast %1367 : vector<1x128xf32> to vector<1x128xf32>
    %1369 = vector.broadcast %1368 : vector<1x128xf32> to vector<16x128xf32>
    %1370 = arith.subf %1366, %1369 : vector<16x128xf32>
    %1371 = math.absf %1370 : vector<16x128xf32>
    %1372 = arith.addf %1363, %1371 : vector<16x128xf32>
    %1373 = vector.extract_strided_slice %1353 {offsets = [0, 2], sizes = [16, 1], strides = [1, 1]} : vector<16x8xf32> to vector<16x1xf32>
    %1374 = vector.shape_cast %1373 : vector<16x1xf32> to vector<16x1xf32>
    %1375 = vector.broadcast %1374 : vector<16x1xf32> to vector<16x128xf32>
    %1376 = vector.extract_strided_slice %1354 {offsets = [2, 0], sizes = [1, 128], strides = [1, 1]} : vector<8x128xf32> to vector<1x128xf32>
    %1377 = vector.shape_cast %1376 : vector<1x128xf32> to vector<1x128xf32>
    %1378 = vector.broadcast %1377 : vector<1x128xf32> to vector<16x128xf32>
    %1379 = arith.subf %1375, %1378 : vector<16x128xf32>
    %1380 = math.absf %1379 : vector<16x128xf32>
    %1381 = arith.addf %1372, %1380 : vector<16x128xf32>
    %1382 = vector.extract_strided_slice %1353 {offsets = [0, 3], sizes = [16, 1], strides = [1, 1]} : vector<16x8xf32> to vector<16x1xf32>
    %1383 = vector.shape_cast %1382 : vector<16x1xf32> to vector<16x1xf32>
    %1384 = vector.broadcast %1383 : vector<16x1xf32> to vector<16x128xf32>
    %1385 = vector.extract_strided_slice %1354 {offsets = [3, 0], sizes = [1, 128], strides = [1, 1]} : vector<8x128xf32> to vector<1x128xf32>
    %1386 = vector.shape_cast %1385 : vector<1x128xf32> to vector<1x128xf32>
    %1387 = vector.broadcast %1386 : vector<1x128xf32> to vector<16x128xf32>
    %1388 = arith.subf %1384, %1387 : vector<16x128xf32>
    %1389 = math.absf %1388 : vector<16x128xf32>
    %1390 = arith.addf %1381, %1389 : vector<16x128xf32>
    %1391 = vector.extract_strided_slice %1353 {offsets = [0, 4], sizes = [16, 1], strides = [1, 1]} : vector<16x8xf32> to vector<16x1xf32>
    %1392 = vector.shape_cast %1391 : vector<16x1xf32> to vector<16x1xf32>
    %1393 = vector.broadcast %1392 : vector<16x1xf32> to vector<16x128xf32>
    %1394 = vector.extract_strided_slice %1354 {offsets = [4, 0], sizes = [1, 128], strides = [1, 1]} : vector<8x128xf32> to vector<1x128xf32>
    %1395 = vector.shape_cast %1394 : vector<1x128xf32> to vector<1x128xf32>
    %1396 = vector.broadcast %1395 : vector<1x128xf32> to vector<16x128xf32>
    %1397 = arith.subf %1393, %1396 : vector<16x128xf32>
    %1398 = math.absf %1397 : vector<16x128xf32>
    %1399 = arith.addf %1390, %1398 : vector<16x128xf32>
    %1400 = vector.extract_strided_slice %1353 {offsets = [0, 5], sizes = [16, 1], strides = [1, 1]} : vector<16x8xf32> to vector<16x1xf32>
    %1401 = vector.shape_cast %1400 : vector<16x1xf32> to vector<16x1xf32>
    %1402 = vector.broadcast %1401 : vector<16x1xf32> to vector<16x128xf32>
    %1403 = vector.extract_strided_slice %1354 {offsets = [5, 0], sizes = [1, 128], strides = [1, 1]} : vector<8x128xf32> to vector<1x128xf32>
    %1404 = vector.shape_cast %1403 : vector<1x128xf32> to vector<1x128xf32>
    %1405 = vector.broadcast %1404 : vector<1x128xf32> to vector<16x128xf32>
    %1406 = arith.subf %1402, %1405 : vector<16x128xf32>
    %1407 = math.absf %1406 : vector<16x128xf32>
    %1408 = arith.addf %1399, %1407 : vector<16x128xf32>
    %1409 = vector.extract_strided_slice %1353 {offsets = [0, 6], sizes = [16, 1], strides = [1, 1]} : vector<16x8xf32> to vector<16x1xf32>
    %1410 = vector.shape_cast %1409 : vector<16x1xf32> to vector<16x1xf32>
    %1411 = vector.broadcast %1410 : vector<16x1xf32> to vector<16x128xf32>
    %1412 = vector.extract_strided_slice %1354 {offsets = [6, 0], sizes = [1, 128], strides = [1, 1]} : vector<8x128xf32> to vector<1x128xf32>
    %1413 = vector.shape_cast %1412 : vector<1x128xf32> to vector<1x128xf32>
    %1414 = vector.broadcast %1413 : vector<1x128xf32> to vector<16x128xf32>
    %1415 = arith.subf %1411, %1414 : vector<16x128xf32>
    %1416 = math.absf %1415 : vector<16x128xf32>
    %1417 = arith.addf %1408, %1416 : vector<16x128xf32>
    %1418 = vector.extract_strided_slice %1353 {offsets = [0, 7], sizes = [16, 1], strides = [1, 1]} : vector<16x8xf32> to vector<16x1xf32>
    %1419 = vector.shape_cast %1418 : vector<16x1xf32> to vector<16x1xf32>
    %1420 = vector.broadcast %1419 : vector<16x1xf32> to vector<16x128xf32>
    %1421 = vector.extract_strided_slice %1354 {offsets = [7, 0], sizes = [1, 128], strides = [1, 1]} : vector<8x128xf32> to vector<1x128xf32>
    %1422 = vector.shape_cast %1421 : vector<1x128xf32> to vector<1x128xf32>
    %1423 = vector.broadcast %1422 : vector<1x128xf32> to vector<16x128xf32>
    %1424 = arith.subf %1420, %1423 : vector<16x128xf32>
    %1425 = math.absf %1424 : vector<16x128xf32>
    %1426 = arith.addf %1417, %1425 : vector<16x128xf32>
    %c152 = arith.constant 152 : index
    %c0_78 = arith.constant 0 : index
    %1427 = vector.load %arg5[%c152, %c0_78] : memref<200x8xf32, #tpu.memory_space<vmem>>, vector<8x8xf32>
    %cst_79 = arith.constant dense<0.000000e+00> : vector<16x8xf32>
    %1428 = tpu.matmul %0, %1427, %cst_79 {dimension_numbers = #tpu.dot_dimension_numbers<[1], [1], [0], [0], [0, 0, 1, 0], [], []>} : vector<16x8xf32>, vector<8x8xf32>, vector<16x8xf32> -> vector<16x8xf32>
    %c152_80 = arith.constant 152 : index
    %c0_81 = arith.constant 0 : index
    %1429 = vector.load %arg6[%c152_80, %c0_81] : memref<200x128xf32, #tpu.memory_space<vmem>>, vector<8x128xf32>
    %1430 = vector.extract_strided_slice %1428 {offsets = [0, 0], sizes = [16, 1], strides = [1, 1]} : vector<16x8xf32> to vector<16x1xf32>
    %1431 = vector.shape_cast %1430 : vector<16x1xf32> to vector<16x1xf32>
    %1432 = vector.broadcast %1431 : vector<16x1xf32> to vector<16x128xf32>
    %1433 = vector.extract_strided_slice %1429 {offsets = [0, 0], sizes = [1, 128], strides = [1, 1]} : vector<8x128xf32> to vector<1x128xf32>
    %1434 = vector.shape_cast %1433 : vector<1x128xf32> to vector<1x128xf32>
    %1435 = vector.broadcast %1434 : vector<1x128xf32> to vector<16x128xf32>
    %1436 = arith.subf %1432, %1435 : vector<16x128xf32>
    %1437 = math.absf %1436 : vector<16x128xf32>
    %1438 = arith.addf %1426, %1437 : vector<16x128xf32>
    %1439 = vector.extract_strided_slice %1428 {offsets = [0, 1], sizes = [16, 1], strides = [1, 1]} : vector<16x8xf32> to vector<16x1xf32>
    %1440 = vector.shape_cast %1439 : vector<16x1xf32> to vector<16x1xf32>
    %1441 = vector.broadcast %1440 : vector<16x1xf32> to vector<16x128xf32>
    %1442 = vector.extract_strided_slice %1429 {offsets = [1, 0], sizes = [1, 128], strides = [1, 1]} : vector<8x128xf32> to vector<1x128xf32>
    %1443 = vector.shape_cast %1442 : vector<1x128xf32> to vector<1x128xf32>
    %1444 = vector.broadcast %1443 : vector<1x128xf32> to vector<16x128xf32>
    %1445 = arith.subf %1441, %1444 : vector<16x128xf32>
    %1446 = math.absf %1445 : vector<16x128xf32>
    %1447 = arith.addf %1438, %1446 : vector<16x128xf32>
    %1448 = vector.extract_strided_slice %1428 {offsets = [0, 2], sizes = [16, 1], strides = [1, 1]} : vector<16x8xf32> to vector<16x1xf32>
    %1449 = vector.shape_cast %1448 : vector<16x1xf32> to vector<16x1xf32>
    %1450 = vector.broadcast %1449 : vector<16x1xf32> to vector<16x128xf32>
    %1451 = vector.extract_strided_slice %1429 {offsets = [2, 0], sizes = [1, 128], strides = [1, 1]} : vector<8x128xf32> to vector<1x128xf32>
    %1452 = vector.shape_cast %1451 : vector<1x128xf32> to vector<1x128xf32>
    %1453 = vector.broadcast %1452 : vector<1x128xf32> to vector<16x128xf32>
    %1454 = arith.subf %1450, %1453 : vector<16x128xf32>
    %1455 = math.absf %1454 : vector<16x128xf32>
    %1456 = arith.addf %1447, %1455 : vector<16x128xf32>
    %1457 = vector.extract_strided_slice %1428 {offsets = [0, 3], sizes = [16, 1], strides = [1, 1]} : vector<16x8xf32> to vector<16x1xf32>
    %1458 = vector.shape_cast %1457 : vector<16x1xf32> to vector<16x1xf32>
    %1459 = vector.broadcast %1458 : vector<16x1xf32> to vector<16x128xf32>
    %1460 = vector.extract_strided_slice %1429 {offsets = [3, 0], sizes = [1, 128], strides = [1, 1]} : vector<8x128xf32> to vector<1x128xf32>
    %1461 = vector.shape_cast %1460 : vector<1x128xf32> to vector<1x128xf32>
    %1462 = vector.broadcast %1461 : vector<1x128xf32> to vector<16x128xf32>
    %1463 = arith.subf %1459, %1462 : vector<16x128xf32>
    %1464 = math.absf %1463 : vector<16x128xf32>
    %1465 = arith.addf %1456, %1464 : vector<16x128xf32>
    %1466 = vector.extract_strided_slice %1428 {offsets = [0, 4], sizes = [16, 1], strides = [1, 1]} : vector<16x8xf32> to vector<16x1xf32>
    %1467 = vector.shape_cast %1466 : vector<16x1xf32> to vector<16x1xf32>
    %1468 = vector.broadcast %1467 : vector<16x1xf32> to vector<16x128xf32>
    %1469 = vector.extract_strided_slice %1429 {offsets = [4, 0], sizes = [1, 128], strides = [1, 1]} : vector<8x128xf32> to vector<1x128xf32>
    %1470 = vector.shape_cast %1469 : vector<1x128xf32> to vector<1x128xf32>
    %1471 = vector.broadcast %1470 : vector<1x128xf32> to vector<16x128xf32>
    %1472 = arith.subf %1468, %1471 : vector<16x128xf32>
    %1473 = math.absf %1472 : vector<16x128xf32>
    %1474 = arith.addf %1465, %1473 : vector<16x128xf32>
    %1475 = vector.extract_strided_slice %1428 {offsets = [0, 5], sizes = [16, 1], strides = [1, 1]} : vector<16x8xf32> to vector<16x1xf32>
    %1476 = vector.shape_cast %1475 : vector<16x1xf32> to vector<16x1xf32>
    %1477 = vector.broadcast %1476 : vector<16x1xf32> to vector<16x128xf32>
    %1478 = vector.extract_strided_slice %1429 {offsets = [5, 0], sizes = [1, 128], strides = [1, 1]} : vector<8x128xf32> to vector<1x128xf32>
    %1479 = vector.shape_cast %1478 : vector<1x128xf32> to vector<1x128xf32>
    %1480 = vector.broadcast %1479 : vector<1x128xf32> to vector<16x128xf32>
    %1481 = arith.subf %1477, %1480 : vector<16x128xf32>
    %1482 = math.absf %1481 : vector<16x128xf32>
    %1483 = arith.addf %1474, %1482 : vector<16x128xf32>
    %1484 = vector.extract_strided_slice %1428 {offsets = [0, 6], sizes = [16, 1], strides = [1, 1]} : vector<16x8xf32> to vector<16x1xf32>
    %1485 = vector.shape_cast %1484 : vector<16x1xf32> to vector<16x1xf32>
    %1486 = vector.broadcast %1485 : vector<16x1xf32> to vector<16x128xf32>
    %1487 = vector.extract_strided_slice %1429 {offsets = [6, 0], sizes = [1, 128], strides = [1, 1]} : vector<8x128xf32> to vector<1x128xf32>
    %1488 = vector.shape_cast %1487 : vector<1x128xf32> to vector<1x128xf32>
    %1489 = vector.broadcast %1488 : vector<1x128xf32> to vector<16x128xf32>
    %1490 = arith.subf %1486, %1489 : vector<16x128xf32>
    %1491 = math.absf %1490 : vector<16x128xf32>
    %1492 = arith.addf %1483, %1491 : vector<16x128xf32>
    %1493 = vector.extract_strided_slice %1428 {offsets = [0, 7], sizes = [16, 1], strides = [1, 1]} : vector<16x8xf32> to vector<16x1xf32>
    %1494 = vector.shape_cast %1493 : vector<16x1xf32> to vector<16x1xf32>
    %1495 = vector.broadcast %1494 : vector<16x1xf32> to vector<16x128xf32>
    %1496 = vector.extract_strided_slice %1429 {offsets = [7, 0], sizes = [1, 128], strides = [1, 1]} : vector<8x128xf32> to vector<1x128xf32>
    %1497 = vector.shape_cast %1496 : vector<1x128xf32> to vector<1x128xf32>
    %1498 = vector.broadcast %1497 : vector<1x128xf32> to vector<16x128xf32>
    %1499 = arith.subf %1495, %1498 : vector<16x128xf32>
    %1500 = math.absf %1499 : vector<16x128xf32>
    %1501 = arith.addf %1492, %1500 : vector<16x128xf32>
    %c160 = arith.constant 160 : index
    %c0_82 = arith.constant 0 : index
    %1502 = vector.load %arg5[%c160, %c0_82] : memref<200x8xf32, #tpu.memory_space<vmem>>, vector<8x8xf32>
    %cst_83 = arith.constant dense<0.000000e+00> : vector<16x8xf32>
    %1503 = tpu.matmul %0, %1502, %cst_83 {dimension_numbers = #tpu.dot_dimension_numbers<[1], [1], [0], [0], [0, 0, 1, 0], [], []>} : vector<16x8xf32>, vector<8x8xf32>, vector<16x8xf32> -> vector<16x8xf32>
    %c160_84 = arith.constant 160 : index
    %c0_85 = arith.constant 0 : index
    %1504 = vector.load %arg6[%c160_84, %c0_85] : memref<200x128xf32, #tpu.memory_space<vmem>>, vector<8x128xf32>
    %1505 = vector.extract_strided_slice %1503 {offsets = [0, 0], sizes = [16, 1], strides = [1, 1]} : vector<16x8xf32> to vector<16x1xf32>
    %1506 = vector.shape_cast %1505 : vector<16x1xf32> to vector<16x1xf32>
    %1507 = vector.broadcast %1506 : vector<16x1xf32> to vector<16x128xf32>
    %1508 = vector.extract_strided_slice %1504 {offsets = [0, 0], sizes = [1, 128], strides = [1, 1]} : vector<8x128xf32> to vector<1x128xf32>
    %1509 = vector.shape_cast %1508 : vector<1x128xf32> to vector<1x128xf32>
    %1510 = vector.broadcast %1509 : vector<1x128xf32> to vector<16x128xf32>
    %1511 = arith.subf %1507, %1510 : vector<16x128xf32>
    %1512 = math.absf %1511 : vector<16x128xf32>
    %1513 = arith.addf %1501, %1512 : vector<16x128xf32>
    %1514 = vector.extract_strided_slice %1503 {offsets = [0, 1], sizes = [16, 1], strides = [1, 1]} : vector<16x8xf32> to vector<16x1xf32>
    %1515 = vector.shape_cast %1514 : vector<16x1xf32> to vector<16x1xf32>
    %1516 = vector.broadcast %1515 : vector<16x1xf32> to vector<16x128xf32>
    %1517 = vector.extract_strided_slice %1504 {offsets = [1, 0], sizes = [1, 128], strides = [1, 1]} : vector<8x128xf32> to vector<1x128xf32>
    %1518 = vector.shape_cast %1517 : vector<1x128xf32> to vector<1x128xf32>
    %1519 = vector.broadcast %1518 : vector<1x128xf32> to vector<16x128xf32>
    %1520 = arith.subf %1516, %1519 : vector<16x128xf32>
    %1521 = math.absf %1520 : vector<16x128xf32>
    %1522 = arith.addf %1513, %1521 : vector<16x128xf32>
    %1523 = vector.extract_strided_slice %1503 {offsets = [0, 2], sizes = [16, 1], strides = [1, 1]} : vector<16x8xf32> to vector<16x1xf32>
    %1524 = vector.shape_cast %1523 : vector<16x1xf32> to vector<16x1xf32>
    %1525 = vector.broadcast %1524 : vector<16x1xf32> to vector<16x128xf32>
    %1526 = vector.extract_strided_slice %1504 {offsets = [2, 0], sizes = [1, 128], strides = [1, 1]} : vector<8x128xf32> to vector<1x128xf32>
    %1527 = vector.shape_cast %1526 : vector<1x128xf32> to vector<1x128xf32>
    %1528 = vector.broadcast %1527 : vector<1x128xf32> to vector<16x128xf32>
    %1529 = arith.subf %1525, %1528 : vector<16x128xf32>
    %1530 = math.absf %1529 : vector<16x128xf32>
    %1531 = arith.addf %1522, %1530 : vector<16x128xf32>
    %1532 = vector.extract_strided_slice %1503 {offsets = [0, 3], sizes = [16, 1], strides = [1, 1]} : vector<16x8xf32> to vector<16x1xf32>
    %1533 = vector.shape_cast %1532 : vector<16x1xf32> to vector<16x1xf32>
    %1534 = vector.broadcast %1533 : vector<16x1xf32> to vector<16x128xf32>
    %1535 = vector.extract_strided_slice %1504 {offsets = [3, 0], sizes = [1, 128], strides = [1, 1]} : vector<8x128xf32> to vector<1x128xf32>
    %1536 = vector.shape_cast %1535 : vector<1x128xf32> to vector<1x128xf32>
    %1537 = vector.broadcast %1536 : vector<1x128xf32> to vector<16x128xf32>
    %1538 = arith.subf %1534, %1537 : vector<16x128xf32>
    %1539 = math.absf %1538 : vector<16x128xf32>
    %1540 = arith.addf %1531, %1539 : vector<16x128xf32>
    %1541 = vector.extract_strided_slice %1503 {offsets = [0, 4], sizes = [16, 1], strides = [1, 1]} : vector<16x8xf32> to vector<16x1xf32>
    %1542 = vector.shape_cast %1541 : vector<16x1xf32> to vector<16x1xf32>
    %1543 = vector.broadcast %1542 : vector<16x1xf32> to vector<16x128xf32>
    %1544 = vector.extract_strided_slice %1504 {offsets = [4, 0], sizes = [1, 128], strides = [1, 1]} : vector<8x128xf32> to vector<1x128xf32>
    %1545 = vector.shape_cast %1544 : vector<1x128xf32> to vector<1x128xf32>
    %1546 = vector.broadcast %1545 : vector<1x128xf32> to vector<16x128xf32>
    %1547 = arith.subf %1543, %1546 : vector<16x128xf32>
    %1548 = math.absf %1547 : vector<16x128xf32>
    %1549 = arith.addf %1540, %1548 : vector<16x128xf32>
    %1550 = vector.extract_strided_slice %1503 {offsets = [0, 5], sizes = [16, 1], strides = [1, 1]} : vector<16x8xf32> to vector<16x1xf32>
    %1551 = vector.shape_cast %1550 : vector<16x1xf32> to vector<16x1xf32>
    %1552 = vector.broadcast %1551 : vector<16x1xf32> to vector<16x128xf32>
    %1553 = vector.extract_strided_slice %1504 {offsets = [5, 0], sizes = [1, 128], strides = [1, 1]} : vector<8x128xf32> to vector<1x128xf32>
    %1554 = vector.shape_cast %1553 : vector<1x128xf32> to vector<1x128xf32>
    %1555 = vector.broadcast %1554 : vector<1x128xf32> to vector<16x128xf32>
    %1556 = arith.subf %1552, %1555 : vector<16x128xf32>
    %1557 = math.absf %1556 : vector<16x128xf32>
    %1558 = arith.addf %1549, %1557 : vector<16x128xf32>
    %1559 = vector.extract_strided_slice %1503 {offsets = [0, 6], sizes = [16, 1], strides = [1, 1]} : vector<16x8xf32> to vector<16x1xf32>
    %1560 = vector.shape_cast %1559 : vector<16x1xf32> to vector<16x1xf32>
    %1561 = vector.broadcast %1560 : vector<16x1xf32> to vector<16x128xf32>
    %1562 = vector.extract_strided_slice %1504 {offsets = [6, 0], sizes = [1, 128], strides = [1, 1]} : vector<8x128xf32> to vector<1x128xf32>
    %1563 = vector.shape_cast %1562 : vector<1x128xf32> to vector<1x128xf32>
    %1564 = vector.broadcast %1563 : vector<1x128xf32> to vector<16x128xf32>
    %1565 = arith.subf %1561, %1564 : vector<16x128xf32>
    %1566 = math.absf %1565 : vector<16x128xf32>
    %1567 = arith.addf %1558, %1566 : vector<16x128xf32>
    %1568 = vector.extract_strided_slice %1503 {offsets = [0, 7], sizes = [16, 1], strides = [1, 1]} : vector<16x8xf32> to vector<16x1xf32>
    %1569 = vector.shape_cast %1568 : vector<16x1xf32> to vector<16x1xf32>
    %1570 = vector.broadcast %1569 : vector<16x1xf32> to vector<16x128xf32>
    %1571 = vector.extract_strided_slice %1504 {offsets = [7, 0], sizes = [1, 128], strides = [1, 1]} : vector<8x128xf32> to vector<1x128xf32>
    %1572 = vector.shape_cast %1571 : vector<1x128xf32> to vector<1x128xf32>
    %1573 = vector.broadcast %1572 : vector<1x128xf32> to vector<16x128xf32>
    %1574 = arith.subf %1570, %1573 : vector<16x128xf32>
    %1575 = math.absf %1574 : vector<16x128xf32>
    %1576 = arith.addf %1567, %1575 : vector<16x128xf32>
    %c168 = arith.constant 168 : index
    %c0_86 = arith.constant 0 : index
    %1577 = vector.load %arg5[%c168, %c0_86] : memref<200x8xf32, #tpu.memory_space<vmem>>, vector<8x8xf32>
    %cst_87 = arith.constant dense<0.000000e+00> : vector<16x8xf32>
    %1578 = tpu.matmul %0, %1577, %cst_87 {dimension_numbers = #tpu.dot_dimension_numbers<[1], [1], [0], [0], [0, 0, 1, 0], [], []>} : vector<16x8xf32>, vector<8x8xf32>, vector<16x8xf32> -> vector<16x8xf32>
    %c168_88 = arith.constant 168 : index
    %c0_89 = arith.constant 0 : index
    %1579 = vector.load %arg6[%c168_88, %c0_89] : memref<200x128xf32, #tpu.memory_space<vmem>>, vector<8x128xf32>
    %1580 = vector.extract_strided_slice %1578 {offsets = [0, 0], sizes = [16, 1], strides = [1, 1]} : vector<16x8xf32> to vector<16x1xf32>
    %1581 = vector.shape_cast %1580 : vector<16x1xf32> to vector<16x1xf32>
    %1582 = vector.broadcast %1581 : vector<16x1xf32> to vector<16x128xf32>
    %1583 = vector.extract_strided_slice %1579 {offsets = [0, 0], sizes = [1, 128], strides = [1, 1]} : vector<8x128xf32> to vector<1x128xf32>
    %1584 = vector.shape_cast %1583 : vector<1x128xf32> to vector<1x128xf32>
    %1585 = vector.broadcast %1584 : vector<1x128xf32> to vector<16x128xf32>
    %1586 = arith.subf %1582, %1585 : vector<16x128xf32>
    %1587 = math.absf %1586 : vector<16x128xf32>
    %1588 = arith.addf %1576, %1587 : vector<16x128xf32>
    %1589 = vector.extract_strided_slice %1578 {offsets = [0, 1], sizes = [16, 1], strides = [1, 1]} : vector<16x8xf32> to vector<16x1xf32>
    %1590 = vector.shape_cast %1589 : vector<16x1xf32> to vector<16x1xf32>
    %1591 = vector.broadcast %1590 : vector<16x1xf32> to vector<16x128xf32>
    %1592 = vector.extract_strided_slice %1579 {offsets = [1, 0], sizes = [1, 128], strides = [1, 1]} : vector<8x128xf32> to vector<1x128xf32>
    %1593 = vector.shape_cast %1592 : vector<1x128xf32> to vector<1x128xf32>
    %1594 = vector.broadcast %1593 : vector<1x128xf32> to vector<16x128xf32>
    %1595 = arith.subf %1591, %1594 : vector<16x128xf32>
    %1596 = math.absf %1595 : vector<16x128xf32>
    %1597 = arith.addf %1588, %1596 : vector<16x128xf32>
    %1598 = vector.extract_strided_slice %1578 {offsets = [0, 2], sizes = [16, 1], strides = [1, 1]} : vector<16x8xf32> to vector<16x1xf32>
    %1599 = vector.shape_cast %1598 : vector<16x1xf32> to vector<16x1xf32>
    %1600 = vector.broadcast %1599 : vector<16x1xf32> to vector<16x128xf32>
    %1601 = vector.extract_strided_slice %1579 {offsets = [2, 0], sizes = [1, 128], strides = [1, 1]} : vector<8x128xf32> to vector<1x128xf32>
    %1602 = vector.shape_cast %1601 : vector<1x128xf32> to vector<1x128xf32>
    %1603 = vector.broadcast %1602 : vector<1x128xf32> to vector<16x128xf32>
    %1604 = arith.subf %1600, %1603 : vector<16x128xf32>
    %1605 = math.absf %1604 : vector<16x128xf32>
    %1606 = arith.addf %1597, %1605 : vector<16x128xf32>
    %1607 = vector.extract_strided_slice %1578 {offsets = [0, 3], sizes = [16, 1], strides = [1, 1]} : vector<16x8xf32> to vector<16x1xf32>
    %1608 = vector.shape_cast %1607 : vector<16x1xf32> to vector<16x1xf32>
    %1609 = vector.broadcast %1608 : vector<16x1xf32> to vector<16x128xf32>
    %1610 = vector.extract_strided_slice %1579 {offsets = [3, 0], sizes = [1, 128], strides = [1, 1]} : vector<8x128xf32> to vector<1x128xf32>
    %1611 = vector.shape_cast %1610 : vector<1x128xf32> to vector<1x128xf32>
    %1612 = vector.broadcast %1611 : vector<1x128xf32> to vector<16x128xf32>
    %1613 = arith.subf %1609, %1612 : vector<16x128xf32>
    %1614 = math.absf %1613 : vector<16x128xf32>
    %1615 = arith.addf %1606, %1614 : vector<16x128xf32>
    %1616 = vector.extract_strided_slice %1578 {offsets = [0, 4], sizes = [16, 1], strides = [1, 1]} : vector<16x8xf32> to vector<16x1xf32>
    %1617 = vector.shape_cast %1616 : vector<16x1xf32> to vector<16x1xf32>
    %1618 = vector.broadcast %1617 : vector<16x1xf32> to vector<16x128xf32>
    %1619 = vector.extract_strided_slice %1579 {offsets = [4, 0], sizes = [1, 128], strides = [1, 1]} : vector<8x128xf32> to vector<1x128xf32>
    %1620 = vector.shape_cast %1619 : vector<1x128xf32> to vector<1x128xf32>
    %1621 = vector.broadcast %1620 : vector<1x128xf32> to vector<16x128xf32>
    %1622 = arith.subf %1618, %1621 : vector<16x128xf32>
    %1623 = math.absf %1622 : vector<16x128xf32>
    %1624 = arith.addf %1615, %1623 : vector<16x128xf32>
    %1625 = vector.extract_strided_slice %1578 {offsets = [0, 5], sizes = [16, 1], strides = [1, 1]} : vector<16x8xf32> to vector<16x1xf32>
    %1626 = vector.shape_cast %1625 : vector<16x1xf32> to vector<16x1xf32>
    %1627 = vector.broadcast %1626 : vector<16x1xf32> to vector<16x128xf32>
    %1628 = vector.extract_strided_slice %1579 {offsets = [5, 0], sizes = [1, 128], strides = [1, 1]} : vector<8x128xf32> to vector<1x128xf32>
    %1629 = vector.shape_cast %1628 : vector<1x128xf32> to vector<1x128xf32>
    %1630 = vector.broadcast %1629 : vector<1x128xf32> to vector<16x128xf32>
    %1631 = arith.subf %1627, %1630 : vector<16x128xf32>
    %1632 = math.absf %1631 : vector<16x128xf32>
    %1633 = arith.addf %1624, %1632 : vector<16x128xf32>
    %1634 = vector.extract_strided_slice %1578 {offsets = [0, 6], sizes = [16, 1], strides = [1, 1]} : vector<16x8xf32> to vector<16x1xf32>
    %1635 = vector.shape_cast %1634 : vector<16x1xf32> to vector<16x1xf32>
    %1636 = vector.broadcast %1635 : vector<16x1xf32> to vector<16x128xf32>
    %1637 = vector.extract_strided_slice %1579 {offsets = [6, 0], sizes = [1, 128], strides = [1, 1]} : vector<8x128xf32> to vector<1x128xf32>
    %1638 = vector.shape_cast %1637 : vector<1x128xf32> to vector<1x128xf32>
    %1639 = vector.broadcast %1638 : vector<1x128xf32> to vector<16x128xf32>
    %1640 = arith.subf %1636, %1639 : vector<16x128xf32>
    %1641 = math.absf %1640 : vector<16x128xf32>
    %1642 = arith.addf %1633, %1641 : vector<16x128xf32>
    %1643 = vector.extract_strided_slice %1578 {offsets = [0, 7], sizes = [16, 1], strides = [1, 1]} : vector<16x8xf32> to vector<16x1xf32>
    %1644 = vector.shape_cast %1643 : vector<16x1xf32> to vector<16x1xf32>
    %1645 = vector.broadcast %1644 : vector<16x1xf32> to vector<16x128xf32>
    %1646 = vector.extract_strided_slice %1579 {offsets = [7, 0], sizes = [1, 128], strides = [1, 1]} : vector<8x128xf32> to vector<1x128xf32>
    %1647 = vector.shape_cast %1646 : vector<1x128xf32> to vector<1x128xf32>
    %1648 = vector.broadcast %1647 : vector<1x128xf32> to vector<16x128xf32>
    %1649 = arith.subf %1645, %1648 : vector<16x128xf32>
    %1650 = math.absf %1649 : vector<16x128xf32>
    %1651 = arith.addf %1642, %1650 : vector<16x128xf32>
    %c176 = arith.constant 176 : index
    %c0_90 = arith.constant 0 : index
    %1652 = vector.load %arg5[%c176, %c0_90] : memref<200x8xf32, #tpu.memory_space<vmem>>, vector<8x8xf32>
    %cst_91 = arith.constant dense<0.000000e+00> : vector<16x8xf32>
    %1653 = tpu.matmul %0, %1652, %cst_91 {dimension_numbers = #tpu.dot_dimension_numbers<[1], [1], [0], [0], [0, 0, 1, 0], [], []>} : vector<16x8xf32>, vector<8x8xf32>, vector<16x8xf32> -> vector<16x8xf32>
    %c176_92 = arith.constant 176 : index
    %c0_93 = arith.constant 0 : index
    %1654 = vector.load %arg6[%c176_92, %c0_93] : memref<200x128xf32, #tpu.memory_space<vmem>>, vector<8x128xf32>
    %1655 = vector.extract_strided_slice %1653 {offsets = [0, 0], sizes = [16, 1], strides = [1, 1]} : vector<16x8xf32> to vector<16x1xf32>
    %1656 = vector.shape_cast %1655 : vector<16x1xf32> to vector<16x1xf32>
    %1657 = vector.broadcast %1656 : vector<16x1xf32> to vector<16x128xf32>
    %1658 = vector.extract_strided_slice %1654 {offsets = [0, 0], sizes = [1, 128], strides = [1, 1]} : vector<8x128xf32> to vector<1x128xf32>
    %1659 = vector.shape_cast %1658 : vector<1x128xf32> to vector<1x128xf32>
    %1660 = vector.broadcast %1659 : vector<1x128xf32> to vector<16x128xf32>
    %1661 = arith.subf %1657, %1660 : vector<16x128xf32>
    %1662 = math.absf %1661 : vector<16x128xf32>
    %1663 = arith.addf %1651, %1662 : vector<16x128xf32>
    %1664 = vector.extract_strided_slice %1653 {offsets = [0, 1], sizes = [16, 1], strides = [1, 1]} : vector<16x8xf32> to vector<16x1xf32>
    %1665 = vector.shape_cast %1664 : vector<16x1xf32> to vector<16x1xf32>
    %1666 = vector.broadcast %1665 : vector<16x1xf32> to vector<16x128xf32>
    %1667 = vector.extract_strided_slice %1654 {offsets = [1, 0], sizes = [1, 128], strides = [1, 1]} : vector<8x128xf32> to vector<1x128xf32>
    %1668 = vector.shape_cast %1667 : vector<1x128xf32> to vector<1x128xf32>
    %1669 = vector.broadcast %1668 : vector<1x128xf32> to vector<16x128xf32>
    %1670 = arith.subf %1666, %1669 : vector<16x128xf32>
    %1671 = math.absf %1670 : vector<16x128xf32>
    %1672 = arith.addf %1663, %1671 : vector<16x128xf32>
    %1673 = vector.extract_strided_slice %1653 {offsets = [0, 2], sizes = [16, 1], strides = [1, 1]} : vector<16x8xf32> to vector<16x1xf32>
    %1674 = vector.shape_cast %1673 : vector<16x1xf32> to vector<16x1xf32>
    %1675 = vector.broadcast %1674 : vector<16x1xf32> to vector<16x128xf32>
    %1676 = vector.extract_strided_slice %1654 {offsets = [2, 0], sizes = [1, 128], strides = [1, 1]} : vector<8x128xf32> to vector<1x128xf32>
    %1677 = vector.shape_cast %1676 : vector<1x128xf32> to vector<1x128xf32>
    %1678 = vector.broadcast %1677 : vector<1x128xf32> to vector<16x128xf32>
    %1679 = arith.subf %1675, %1678 : vector<16x128xf32>
    %1680 = math.absf %1679 : vector<16x128xf32>
    %1681 = arith.addf %1672, %1680 : vector<16x128xf32>
    %1682 = vector.extract_strided_slice %1653 {offsets = [0, 3], sizes = [16, 1], strides = [1, 1]} : vector<16x8xf32> to vector<16x1xf32>
    %1683 = vector.shape_cast %1682 : vector<16x1xf32> to vector<16x1xf32>
    %1684 = vector.broadcast %1683 : vector<16x1xf32> to vector<16x128xf32>
    %1685 = vector.extract_strided_slice %1654 {offsets = [3, 0], sizes = [1, 128], strides = [1, 1]} : vector<8x128xf32> to vector<1x128xf32>
    %1686 = vector.shape_cast %1685 : vector<1x128xf32> to vector<1x128xf32>
    %1687 = vector.broadcast %1686 : vector<1x128xf32> to vector<16x128xf32>
    %1688 = arith.subf %1684, %1687 : vector<16x128xf32>
    %1689 = math.absf %1688 : vector<16x128xf32>
    %1690 = arith.addf %1681, %1689 : vector<16x128xf32>
    %1691 = vector.extract_strided_slice %1653 {offsets = [0, 4], sizes = [16, 1], strides = [1, 1]} : vector<16x8xf32> to vector<16x1xf32>
    %1692 = vector.shape_cast %1691 : vector<16x1xf32> to vector<16x1xf32>
    %1693 = vector.broadcast %1692 : vector<16x1xf32> to vector<16x128xf32>
    %1694 = vector.extract_strided_slice %1654 {offsets = [4, 0], sizes = [1, 128], strides = [1, 1]} : vector<8x128xf32> to vector<1x128xf32>
    %1695 = vector.shape_cast %1694 : vector<1x128xf32> to vector<1x128xf32>
    %1696 = vector.broadcast %1695 : vector<1x128xf32> to vector<16x128xf32>
    %1697 = arith.subf %1693, %1696 : vector<16x128xf32>
    %1698 = math.absf %1697 : vector<16x128xf32>
    %1699 = arith.addf %1690, %1698 : vector<16x128xf32>
    %1700 = vector.extract_strided_slice %1653 {offsets = [0, 5], sizes = [16, 1], strides = [1, 1]} : vector<16x8xf32> to vector<16x1xf32>
    %1701 = vector.shape_cast %1700 : vector<16x1xf32> to vector<16x1xf32>
    %1702 = vector.broadcast %1701 : vector<16x1xf32> to vector<16x128xf32>
    %1703 = vector.extract_strided_slice %1654 {offsets = [5, 0], sizes = [1, 128], strides = [1, 1]} : vector<8x128xf32> to vector<1x128xf32>
    %1704 = vector.shape_cast %1703 : vector<1x128xf32> to vector<1x128xf32>
    %1705 = vector.broadcast %1704 : vector<1x128xf32> to vector<16x128xf32>
    %1706 = arith.subf %1702, %1705 : vector<16x128xf32>
    %1707 = math.absf %1706 : vector<16x128xf32>
    %1708 = arith.addf %1699, %1707 : vector<16x128xf32>
    %1709 = vector.extract_strided_slice %1653 {offsets = [0, 6], sizes = [16, 1], strides = [1, 1]} : vector<16x8xf32> to vector<16x1xf32>
    %1710 = vector.shape_cast %1709 : vector<16x1xf32> to vector<16x1xf32>
    %1711 = vector.broadcast %1710 : vector<16x1xf32> to vector<16x128xf32>
    %1712 = vector.extract_strided_slice %1654 {offsets = [6, 0], sizes = [1, 128], strides = [1, 1]} : vector<8x128xf32> to vector<1x128xf32>
    %1713 = vector.shape_cast %1712 : vector<1x128xf32> to vector<1x128xf32>
    %1714 = vector.broadcast %1713 : vector<1x128xf32> to vector<16x128xf32>
    %1715 = arith.subf %1711, %1714 : vector<16x128xf32>
    %1716 = math.absf %1715 : vector<16x128xf32>
    %1717 = arith.addf %1708, %1716 : vector<16x128xf32>
    %1718 = vector.extract_strided_slice %1653 {offsets = [0, 7], sizes = [16, 1], strides = [1, 1]} : vector<16x8xf32> to vector<16x1xf32>
    %1719 = vector.shape_cast %1718 : vector<16x1xf32> to vector<16x1xf32>
    %1720 = vector.broadcast %1719 : vector<16x1xf32> to vector<16x128xf32>
    %1721 = vector.extract_strided_slice %1654 {offsets = [7, 0], sizes = [1, 128], strides = [1, 1]} : vector<8x128xf32> to vector<1x128xf32>
    %1722 = vector.shape_cast %1721 : vector<1x128xf32> to vector<1x128xf32>
    %1723 = vector.broadcast %1722 : vector<1x128xf32> to vector<16x128xf32>
    %1724 = arith.subf %1720, %1723 : vector<16x128xf32>
    %1725 = math.absf %1724 : vector<16x128xf32>
    %1726 = arith.addf %1717, %1725 : vector<16x128xf32>
    %c184 = arith.constant 184 : index
    %c0_94 = arith.constant 0 : index
    %1727 = vector.load %arg5[%c184, %c0_94] : memref<200x8xf32, #tpu.memory_space<vmem>>, vector<8x8xf32>
    %cst_95 = arith.constant dense<0.000000e+00> : vector<16x8xf32>
    %1728 = tpu.matmul %0, %1727, %cst_95 {dimension_numbers = #tpu.dot_dimension_numbers<[1], [1], [0], [0], [0, 0, 1, 0], [], []>} : vector<16x8xf32>, vector<8x8xf32>, vector<16x8xf32> -> vector<16x8xf32>
    %c184_96 = arith.constant 184 : index
    %c0_97 = arith.constant 0 : index
    %1729 = vector.load %arg6[%c184_96, %c0_97] : memref<200x128xf32, #tpu.memory_space<vmem>>, vector<8x128xf32>
    %1730 = vector.extract_strided_slice %1728 {offsets = [0, 0], sizes = [16, 1], strides = [1, 1]} : vector<16x8xf32> to vector<16x1xf32>
    %1731 = vector.shape_cast %1730 : vector<16x1xf32> to vector<16x1xf32>
    %1732 = vector.broadcast %1731 : vector<16x1xf32> to vector<16x128xf32>
    %1733 = vector.extract_strided_slice %1729 {offsets = [0, 0], sizes = [1, 128], strides = [1, 1]} : vector<8x128xf32> to vector<1x128xf32>
    %1734 = vector.shape_cast %1733 : vector<1x128xf32> to vector<1x128xf32>
    %1735 = vector.broadcast %1734 : vector<1x128xf32> to vector<16x128xf32>
    %1736 = arith.subf %1732, %1735 : vector<16x128xf32>
    %1737 = math.absf %1736 : vector<16x128xf32>
    %1738 = arith.addf %1726, %1737 : vector<16x128xf32>
    %1739 = vector.extract_strided_slice %1728 {offsets = [0, 1], sizes = [16, 1], strides = [1, 1]} : vector<16x8xf32> to vector<16x1xf32>
    %1740 = vector.shape_cast %1739 : vector<16x1xf32> to vector<16x1xf32>
    %1741 = vector.broadcast %1740 : vector<16x1xf32> to vector<16x128xf32>
    %1742 = vector.extract_strided_slice %1729 {offsets = [1, 0], sizes = [1, 128], strides = [1, 1]} : vector<8x128xf32> to vector<1x128xf32>
    %1743 = vector.shape_cast %1742 : vector<1x128xf32> to vector<1x128xf32>
    %1744 = vector.broadcast %1743 : vector<1x128xf32> to vector<16x128xf32>
    %1745 = arith.subf %1741, %1744 : vector<16x128xf32>
    %1746 = math.absf %1745 : vector<16x128xf32>
    %1747 = arith.addf %1738, %1746 : vector<16x128xf32>
    %1748 = vector.extract_strided_slice %1728 {offsets = [0, 2], sizes = [16, 1], strides = [1, 1]} : vector<16x8xf32> to vector<16x1xf32>
    %1749 = vector.shape_cast %1748 : vector<16x1xf32> to vector<16x1xf32>
    %1750 = vector.broadcast %1749 : vector<16x1xf32> to vector<16x128xf32>
    %1751 = vector.extract_strided_slice %1729 {offsets = [2, 0], sizes = [1, 128], strides = [1, 1]} : vector<8x128xf32> to vector<1x128xf32>
    %1752 = vector.shape_cast %1751 : vector<1x128xf32> to vector<1x128xf32>
    %1753 = vector.broadcast %1752 : vector<1x128xf32> to vector<16x128xf32>
    %1754 = arith.subf %1750, %1753 : vector<16x128xf32>
    %1755 = math.absf %1754 : vector<16x128xf32>
    %1756 = arith.addf %1747, %1755 : vector<16x128xf32>
    %1757 = vector.extract_strided_slice %1728 {offsets = [0, 3], sizes = [16, 1], strides = [1, 1]} : vector<16x8xf32> to vector<16x1xf32>
    %1758 = vector.shape_cast %1757 : vector<16x1xf32> to vector<16x1xf32>
    %1759 = vector.broadcast %1758 : vector<16x1xf32> to vector<16x128xf32>
    %1760 = vector.extract_strided_slice %1729 {offsets = [3, 0], sizes = [1, 128], strides = [1, 1]} : vector<8x128xf32> to vector<1x128xf32>
    %1761 = vector.shape_cast %1760 : vector<1x128xf32> to vector<1x128xf32>
    %1762 = vector.broadcast %1761 : vector<1x128xf32> to vector<16x128xf32>
    %1763 = arith.subf %1759, %1762 : vector<16x128xf32>
    %1764 = math.absf %1763 : vector<16x128xf32>
    %1765 = arith.addf %1756, %1764 : vector<16x128xf32>
    %1766 = vector.extract_strided_slice %1728 {offsets = [0, 4], sizes = [16, 1], strides = [1, 1]} : vector<16x8xf32> to vector<16x1xf32>
    %1767 = vector.shape_cast %1766 : vector<16x1xf32> to vector<16x1xf32>
    %1768 = vector.broadcast %1767 : vector<16x1xf32> to vector<16x128xf32>
    %1769 = vector.extract_strided_slice %1729 {offsets = [4, 0], sizes = [1, 128], strides = [1, 1]} : vector<8x128xf32> to vector<1x128xf32>
    %1770 = vector.shape_cast %1769 : vector<1x128xf32> to vector<1x128xf32>
    %1771 = vector.broadcast %1770 : vector<1x128xf32> to vector<16x128xf32>
    %1772 = arith.subf %1768, %1771 : vector<16x128xf32>
    %1773 = math.absf %1772 : vector<16x128xf32>
    %1774 = arith.addf %1765, %1773 : vector<16x128xf32>
    %1775 = vector.extract_strided_slice %1728 {offsets = [0, 5], sizes = [16, 1], strides = [1, 1]} : vector<16x8xf32> to vector<16x1xf32>
    %1776 = vector.shape_cast %1775 : vector<16x1xf32> to vector<16x1xf32>
    %1777 = vector.broadcast %1776 : vector<16x1xf32> to vector<16x128xf32>
    %1778 = vector.extract_strided_slice %1729 {offsets = [5, 0], sizes = [1, 128], strides = [1, 1]} : vector<8x128xf32> to vector<1x128xf32>
    %1779 = vector.shape_cast %1778 : vector<1x128xf32> to vector<1x128xf32>
    %1780 = vector.broadcast %1779 : vector<1x128xf32> to vector<16x128xf32>
    %1781 = arith.subf %1777, %1780 : vector<16x128xf32>
    %1782 = math.absf %1781 : vector<16x128xf32>
    %1783 = arith.addf %1774, %1782 : vector<16x128xf32>
    %1784 = vector.extract_strided_slice %1728 {offsets = [0, 6], sizes = [16, 1], strides = [1, 1]} : vector<16x8xf32> to vector<16x1xf32>
    %1785 = vector.shape_cast %1784 : vector<16x1xf32> to vector<16x1xf32>
    %1786 = vector.broadcast %1785 : vector<16x1xf32> to vector<16x128xf32>
    %1787 = vector.extract_strided_slice %1729 {offsets = [6, 0], sizes = [1, 128], strides = [1, 1]} : vector<8x128xf32> to vector<1x128xf32>
    %1788 = vector.shape_cast %1787 : vector<1x128xf32> to vector<1x128xf32>
    %1789 = vector.broadcast %1788 : vector<1x128xf32> to vector<16x128xf32>
    %1790 = arith.subf %1786, %1789 : vector<16x128xf32>
    %1791 = math.absf %1790 : vector<16x128xf32>
    %1792 = arith.addf %1783, %1791 : vector<16x128xf32>
    %1793 = vector.extract_strided_slice %1728 {offsets = [0, 7], sizes = [16, 1], strides = [1, 1]} : vector<16x8xf32> to vector<16x1xf32>
    %1794 = vector.shape_cast %1793 : vector<16x1xf32> to vector<16x1xf32>
    %1795 = vector.broadcast %1794 : vector<16x1xf32> to vector<16x128xf32>
    %1796 = vector.extract_strided_slice %1729 {offsets = [7, 0], sizes = [1, 128], strides = [1, 1]} : vector<8x128xf32> to vector<1x128xf32>
    %1797 = vector.shape_cast %1796 : vector<1x128xf32> to vector<1x128xf32>
    %1798 = vector.broadcast %1797 : vector<1x128xf32> to vector<16x128xf32>
    %1799 = arith.subf %1795, %1798 : vector<16x128xf32>
    %1800 = math.absf %1799 : vector<16x128xf32>
    %1801 = arith.addf %1792, %1800 : vector<16x128xf32>
    %c192 = arith.constant 192 : index
    %c0_98 = arith.constant 0 : index
    %1802 = vector.load %arg5[%c192, %c0_98] : memref<200x8xf32, #tpu.memory_space<vmem>>, vector<8x8xf32>
    %cst_99 = arith.constant dense<0.000000e+00> : vector<16x8xf32>
    %1803 = tpu.matmul %0, %1802, %cst_99 {dimension_numbers = #tpu.dot_dimension_numbers<[1], [1], [0], [0], [0, 0, 1, 0], [], []>} : vector<16x8xf32>, vector<8x8xf32>, vector<16x8xf32> -> vector<16x8xf32>
    %c192_100 = arith.constant 192 : index
    %c0_101 = arith.constant 0 : index
    %1804 = vector.load %arg6[%c192_100, %c0_101] : memref<200x128xf32, #tpu.memory_space<vmem>>, vector<8x128xf32>
    %1805 = vector.extract_strided_slice %1803 {offsets = [0, 0], sizes = [16, 1], strides = [1, 1]} : vector<16x8xf32> to vector<16x1xf32>
    %1806 = vector.shape_cast %1805 : vector<16x1xf32> to vector<16x1xf32>
    %1807 = vector.broadcast %1806 : vector<16x1xf32> to vector<16x128xf32>
    %1808 = vector.extract_strided_slice %1804 {offsets = [0, 0], sizes = [1, 128], strides = [1, 1]} : vector<8x128xf32> to vector<1x128xf32>
    %1809 = vector.shape_cast %1808 : vector<1x128xf32> to vector<1x128xf32>
    %1810 = vector.broadcast %1809 : vector<1x128xf32> to vector<16x128xf32>
    %1811 = arith.subf %1807, %1810 : vector<16x128xf32>
    %1812 = math.absf %1811 : vector<16x128xf32>
    %1813 = arith.addf %1801, %1812 : vector<16x128xf32>
    %1814 = vector.extract_strided_slice %1803 {offsets = [0, 1], sizes = [16, 1], strides = [1, 1]} : vector<16x8xf32> to vector<16x1xf32>
    %1815 = vector.shape_cast %1814 : vector<16x1xf32> to vector<16x1xf32>
    %1816 = vector.broadcast %1815 : vector<16x1xf32> to vector<16x128xf32>
    %1817 = vector.extract_strided_slice %1804 {offsets = [1, 0], sizes = [1, 128], strides = [1, 1]} : vector<8x128xf32> to vector<1x128xf32>
    %1818 = vector.shape_cast %1817 : vector<1x128xf32> to vector<1x128xf32>
    %1819 = vector.broadcast %1818 : vector<1x128xf32> to vector<16x128xf32>
    %1820 = arith.subf %1816, %1819 : vector<16x128xf32>
    %1821 = math.absf %1820 : vector<16x128xf32>
    %1822 = arith.addf %1813, %1821 : vector<16x128xf32>
    %1823 = vector.extract_strided_slice %1803 {offsets = [0, 2], sizes = [16, 1], strides = [1, 1]} : vector<16x8xf32> to vector<16x1xf32>
    %1824 = vector.shape_cast %1823 : vector<16x1xf32> to vector<16x1xf32>
    %1825 = vector.broadcast %1824 : vector<16x1xf32> to vector<16x128xf32>
    %1826 = vector.extract_strided_slice %1804 {offsets = [2, 0], sizes = [1, 128], strides = [1, 1]} : vector<8x128xf32> to vector<1x128xf32>
    %1827 = vector.shape_cast %1826 : vector<1x128xf32> to vector<1x128xf32>
    %1828 = vector.broadcast %1827 : vector<1x128xf32> to vector<16x128xf32>
    %1829 = arith.subf %1825, %1828 : vector<16x128xf32>
    %1830 = math.absf %1829 : vector<16x128xf32>
    %1831 = arith.addf %1822, %1830 : vector<16x128xf32>
    %1832 = vector.extract_strided_slice %1803 {offsets = [0, 3], sizes = [16, 1], strides = [1, 1]} : vector<16x8xf32> to vector<16x1xf32>
    %1833 = vector.shape_cast %1832 : vector<16x1xf32> to vector<16x1xf32>
    %1834 = vector.broadcast %1833 : vector<16x1xf32> to vector<16x128xf32>
    %1835 = vector.extract_strided_slice %1804 {offsets = [3, 0], sizes = [1, 128], strides = [1, 1]} : vector<8x128xf32> to vector<1x128xf32>
    %1836 = vector.shape_cast %1835 : vector<1x128xf32> to vector<1x128xf32>
    %1837 = vector.broadcast %1836 : vector<1x128xf32> to vector<16x128xf32>
    %1838 = arith.subf %1834, %1837 : vector<16x128xf32>
    %1839 = math.absf %1838 : vector<16x128xf32>
    %1840 = arith.addf %1831, %1839 : vector<16x128xf32>
    %1841 = vector.extract_strided_slice %1803 {offsets = [0, 4], sizes = [16, 1], strides = [1, 1]} : vector<16x8xf32> to vector<16x1xf32>
    %1842 = vector.shape_cast %1841 : vector<16x1xf32> to vector<16x1xf32>
    %1843 = vector.broadcast %1842 : vector<16x1xf32> to vector<16x128xf32>
    %1844 = vector.extract_strided_slice %1804 {offsets = [4, 0], sizes = [1, 128], strides = [1, 1]} : vector<8x128xf32> to vector<1x128xf32>
    %1845 = vector.shape_cast %1844 : vector<1x128xf32> to vector<1x128xf32>
    %1846 = vector.broadcast %1845 : vector<1x128xf32> to vector<16x128xf32>
    %1847 = arith.subf %1843, %1846 : vector<16x128xf32>
    %1848 = math.absf %1847 : vector<16x128xf32>
    %1849 = arith.addf %1840, %1848 : vector<16x128xf32>
    %1850 = vector.extract_strided_slice %1803 {offsets = [0, 5], sizes = [16, 1], strides = [1, 1]} : vector<16x8xf32> to vector<16x1xf32>
    %1851 = vector.shape_cast %1850 : vector<16x1xf32> to vector<16x1xf32>
    %1852 = vector.broadcast %1851 : vector<16x1xf32> to vector<16x128xf32>
    %1853 = vector.extract_strided_slice %1804 {offsets = [5, 0], sizes = [1, 128], strides = [1, 1]} : vector<8x128xf32> to vector<1x128xf32>
    %1854 = vector.shape_cast %1853 : vector<1x128xf32> to vector<1x128xf32>
    %1855 = vector.broadcast %1854 : vector<1x128xf32> to vector<16x128xf32>
    %1856 = arith.subf %1852, %1855 : vector<16x128xf32>
    %1857 = math.absf %1856 : vector<16x128xf32>
    %1858 = arith.addf %1849, %1857 : vector<16x128xf32>
    %1859 = vector.extract_strided_slice %1803 {offsets = [0, 6], sizes = [16, 1], strides = [1, 1]} : vector<16x8xf32> to vector<16x1xf32>
    %1860 = vector.shape_cast %1859 : vector<16x1xf32> to vector<16x1xf32>
    %1861 = vector.broadcast %1860 : vector<16x1xf32> to vector<16x128xf32>
    %1862 = vector.extract_strided_slice %1804 {offsets = [6, 0], sizes = [1, 128], strides = [1, 1]} : vector<8x128xf32> to vector<1x128xf32>
    %1863 = vector.shape_cast %1862 : vector<1x128xf32> to vector<1x128xf32>
    %1864 = vector.broadcast %1863 : vector<1x128xf32> to vector<16x128xf32>
    %1865 = arith.subf %1861, %1864 : vector<16x128xf32>
    %1866 = math.absf %1865 : vector<16x128xf32>
    %1867 = arith.addf %1858, %1866 : vector<16x128xf32>
    %1868 = vector.extract_strided_slice %1803 {offsets = [0, 7], sizes = [16, 1], strides = [1, 1]} : vector<16x8xf32> to vector<16x1xf32>
    %1869 = vector.shape_cast %1868 : vector<16x1xf32> to vector<16x1xf32>
    %1870 = vector.broadcast %1869 : vector<16x1xf32> to vector<16x128xf32>
    %1871 = vector.extract_strided_slice %1804 {offsets = [7, 0], sizes = [1, 128], strides = [1, 1]} : vector<8x128xf32> to vector<1x128xf32>
    %1872 = vector.shape_cast %1871 : vector<1x128xf32> to vector<1x128xf32>
    %1873 = vector.broadcast %1872 : vector<1x128xf32> to vector<16x128xf32>
    %1874 = arith.subf %1870, %1873 : vector<16x128xf32>
    %1875 = math.absf %1874 : vector<16x128xf32>
    %1876 = arith.addf %1867, %1875 : vector<16x128xf32>
    %c0_102 = arith.constant 0 : index
    %c0_103 = arith.constant 0 : index
    %1877 = vector.load %arg2[%c0_102, %c0_103] : memref<16x4xf32, #tpu.memory_space<vmem>>, vector<16x4xf32>
    %cst_104 = arith.constant 0.000000e+00 : f32
    %1878 = vector.broadcast %cst_104 : f32 to vector<16x4xf32>
    %1879 = arith.subf %1878, %1877 : vector<16x4xf32>
    %cst_105 = arith.constant 0.000000e+00 : f32
    %1880 = vector.broadcast %cst_105 : f32 to vector<16x4xf32>
    %1881 = arith.maximumf %1879, %1880 : vector<16x4xf32>
    %1882 = math.absf %1877 : vector<16x4xf32>
    %cst_106 = arith.constant 0.000000e+00 : f32
    %1883 = vector.broadcast %cst_106 : f32 to vector<16x4xf32>
    %1884 = arith.subf %1883, %1882 : vector<16x4xf32>
    %1885 = math.exp %1884 : vector<16x4xf32>
    %cst_107 = arith.constant 1.000000e+00 : f32
    %1886 = vector.broadcast %cst_107 : f32 to vector<16x4xf32>
    %1887 = arith.addf %1886, %1885 : vector<16x4xf32>
    %1888 = math.log %1887 : vector<16x4xf32>
    %1889 = arith.addf %1881, %1888 : vector<16x4xf32>
    %1890 = arith.addf %1889, %1877 : vector<16x4xf32>
    %cst_108 = arith.constant 0.000000e+00 : f32
    %1891 = vector.broadcast %cst_108 : f32 to vector<16x4xf32>
    %1892 = arith.subf %1891, %1889 : vector<16x4xf32>
    %1893 = math.exp %1892 : vector<16x4xf32>
    %cst_109 = arith.constant 1.000000e+00 : f32
    %1894 = vector.broadcast %cst_109 : f32 to vector<16x4xf32>
    %1895 = arith.subf %1894, %1893 : vector<16x4xf32>
    %1896 = arith.mulf %1893, %1893 : vector<16x4xf32>
    %1897 = arith.mulf %1895, %1895 : vector<16x4xf32>
    %cst_110 = arith.constant 2.500000e-01 : f32
    %1898 = vector.broadcast %cst_110 : f32 to vector<16x4xf32>
    %1899 = arith.mulf %1898, %1897 : vector<16x4xf32>
    %1900 = arith.mulf %1899, %1889 : vector<16x4xf32>
    %cst_111 = arith.constant 7.500000e-01 : f32
    %1901 = vector.broadcast %cst_111 : f32 to vector<16x4xf32>
    %1902 = arith.mulf %1901, %1896 : vector<16x4xf32>
    %1903 = arith.mulf %1902, %1890 : vector<16x4xf32>
    %1904 = arith.subf %1900, %1903 : vector<16x4xf32>
    %c0_112 = arith.constant 0 : index
    %c0_113 = arith.constant 0 : index
    %1905 = vector.load %arg3[%c0_112, %c0_113] : memref<4x128xf32, #tpu.memory_space<vmem>>, vector<4x128xf32>
    %cst_114 = arith.constant dense<0.000000e+00> : vector<16x128xf32>
    %1906 = tpu.matmul %1904, %1905, %cst_114 {dimension_numbers = #tpu.dot_dimension_numbers<[1], [0], [0], [1], [0, 0, 1, 1], [], []>} : vector<16x4xf32>, vector<4x128xf32>, vector<16x128xf32> -> vector<16x128xf32>
    %cst_115 = arith.constant 1.000000e+00 : f32
    %1907 = vector.broadcast %cst_115 : f32 to vector<16x128xf32>
    %1908 = arith.mulf %1907, %1906 : vector<16x128xf32>
    %cst_116 = arith.constant 1.000000e+00 : f32
    %1909 = vector.broadcast %cst_116 : f32 to vector<16x128xf32>
    %1910 = arith.mulf %1909, %1876 : vector<16x128xf32>
    %1911 = arith.addf %1908, %1910 : vector<16x128xf32>
    %c0_117 = arith.constant 0 : index
    %c0_118 = arith.constant 0 : index
    %1912 = vector.load %arg7[%c0_117, %c0_118] : memref<16x128xf32, #tpu.memory_space<vmem>>, vector<16x128xf32>
    tpu.vector_store %arg7[%c0_117, %c0_118], %1911 {strides = array<i32>} : memref<16x128xf32, #tpu.memory_space<vmem>>, vector<16x128xf32>,
    return
  }
  func.func @transform_0(%arg0: i32, %arg1: i32) -> (i32, i32) {
    %c0_i32 = arith.constant 0 : i32
    %c0_i32_0 = arith.constant 0 : i32
    return %arg0, %c0_i32 : i32, i32
  }
  func.func @transform_1(%arg0: i32, %arg1: i32) -> (i32, i32) {
    %c0_i32 = arith.constant 0 : i32
    %c0_i32_0 = arith.constant 0 : i32
    return %c0_i32, %arg1 : i32, i32
  }
  func.func @transform_2(%arg0: i32, %arg1: i32) -> (i32, i32) {
    %c0_i32 = arith.constant 0 : i32
    %c0_i32_0 = arith.constant 0 : i32
    return %arg0, %c0_i32 : i32, i32
  }
  func.func @transform_3(%arg0: i32, %arg1: i32) -> (i32, i32) {
    %c0_i32 = arith.constant 0 : i32
    %c0_i32_0 = arith.constant 0 : i32
    %c0_i32_1 = arith.constant 0 : i32
    return %c0_i32, %c0_i32_0 : i32, i32
  }
  func.func @transform_4(%arg0: i32, %arg1: i32) -> (i32, i32) {
    %c0_i32 = arith.constant 0 : i32
    %c0_i32_0 = arith.constant 0 : i32
    return %c0_i32, %arg1 : i32, i32
  }
  func.func @transform_5(%arg0: i32, %arg1: i32) -> (i32, i32) {
    %c0_i32 = arith.constant 0 : i32
    return %arg0, %arg1 : i32, i32
  }
}

</mosaic_0001>

<bundles_post_ra>
// kernel: tpu_custom_call.1
= control target key start
LH: loop header
LB: loop body
LE: loop exit
PB: predicated region body
PF: predicated region fallthrough
CT: control target
= control target key end

     0   :  { %vm24_vm0 = vcmask 64512   ;;  %s9610_s0 = inlined_call_operand.vmem [shape: f32[16,4], index: 0, kind: input, shape index: {}]   ;;  %s9611_s1 = inlined_call_operand.vmem [shape: f32[4,128], index: 1, kind: input, shape index: {}]   ;;  %s9612_s2 = inlined_call_operand.vmem [shape: f32[16,8], index: 2, kind: input, shape index: {}]   ;;  %s9613_s3 = inlined_call_operand.vmem [shape: f32[200,8], index: 3, kind: input, shape index: {}]   ;;  %s9614_s4 = inlined_call_operand.vmem [shape: f32[200,128], index: 4, kind: input, shape index: {}]   ;;  %s9615_s5 = inlined_call_operand.hbm [shape: f32[16,128], index: 5, kind: output, shape index: {}]  }
   0x1   :  { %v23_v0 = vld [vmem:[%s9613_s3] sm:$0xff]  ;;  %v256_v1 = vld [vmem:[%s9613_s3 + $0x8] sm:$0xff]  ;;  %v482_v3 = vld [vmem:[%s9613_s3 + $0x10] sm:$0xff] }
   0x2   :  { %v6460_v2 = vld [vmem:[%s9612_s2] sm:$0xff]  ;;  %5987 = vmatprep.subr.msk.mxu0 %vm24_vm0, %v23_v0  ;;  %5992 = vmatprep.subr.msk.mxu1 %vm24_vm0, %v256_v1  ;;  %v708_v4 = vld [vmem:[%s9613_s3 + $0x18] sm:$0xff]  ;;  %v6475_v5 = vld [vmem:[%s9612_s2 + $0x8] sm:$0xff] }
   0x3   :  { %5988 = vmatpush3.xpose.msk.msra.mxu0 %vm24_vm0, %v23_v0  ;;  %5993 = vmatpush3.xpose.msk.msra.mxu1 %vm24_vm0, %v256_v1  ;;  %v1160_v6 = vld [vmem:[%s9613_s3 + $0x28] sm:$0xff]  ;;  %v934_v7 = vld [vmem:[%s9613_s3 + $0x20] sm:$0xff] }
   0x4   :  { %5989 = vmatprep.mubr.msk.f32.mxu0 %vm24_vm0, %v6460_v2  ;;  %5994 = vmatprep.mubr.msk.f32.mxu1 %vm24_vm0, %v6460_v2 }
   0x5   :  { %5997 = vmatprep.subr.msk.mxu0 %vm24_vm0, %v482_v3  ;;  %6002 = vmatprep.subr.msk.mxu1 %vm24_vm0, %v708_v4 }
   0x6   :  { %5990 = vmatmul.mubr.msk.f32.vlgmr.msra.gmra.mrb[0].mxu0 %vm24_vm0, %v6475_v5  ;;  %5995 = vmatmul.mubr.msk.f32.vlgmr.msra.gmra.mrb[0].mxu1 %vm24_vm0, %v6475_v5 }
   0x7   :  { %10 = vsyncpa [#allocation3], 0  ;;  %5998 = vmatpush3.xpose.msk.msra.mxu0 %vm24_vm0, %v482_v3  ;;  %5999 = vmatprep.mubr.msk.f32.mxu0 %vm24_vm0, %v6460_v2  ;;  %v1386_v8 = vld [vmem:[%s9613_s3 + $0x30] sm:$0xff]  ;;  %v9616_v9 = vmov 1   ;;  %v1612_v10 = vld [vmem:[%s9613_s3 + $0x38] sm:$0xff]  ;;  %v9622_v26 = vmov 4  }
   0x8   :  { %6003 = vmatpush3.xpose.msk.msra.mxu1 %vm24_vm0, %v708_v4  ;;  %6004 = vmatprep.mubr.msk.f32.mxu1 %vm24_vm0, %v6460_v2  ;;  %v1838_v11 = vld [vmem:[%s9613_s3 + $0x40] sm:$0xff]  ;;  %v2064_v12 = vld [vmem:[%s9613_s3 + $0x48] sm:$0xff]  ;;  %v2290_v13 = vld [vmem:[%s9613_s3 + $0x50] sm:$0xff]  ;;  %v9630_v27 = vmov 2   ;;  %v9618_v34 = vmov 5   ;;  %v9624_v44 = vmov 7  }
   0x9   :  { %6012 = vmatprep.subr.msk.mxu1 %vm24_vm0, %v1160_v6  ;;  %6007 = vmatprep.subr.msk.mxu0 %vm24_vm0, %v934_v7  ;;  %v2516_v14 = vld [vmem:[%s9613_s3 + $0x58] sm:$0xff]  ;;  %v2742_v15 = vld [vmem:[%s9613_s3 + $0x60] sm:$0xff]  ;;  %v2968_v16 = vld [vmem:[%s9613_s3 + $0x68] sm:$0xff]  ;;  %v9628_v50 = vmov 0   ;;  %v9620_v53 = vmov 3   ;;  %v9626_v54 = vmov 6  }
   0xa   :  { %6000 = vmatmul.mubr.msk.f32.vlgmr.msra.gmra.mrb[2].mxu0 %vm24_vm0, %v6475_v5  ;;  %6134 = vset.pattern.permute.xlu0 %v9616_v9  ;;  %v3420_v17 = vld [vmem:[%s9613_s3 + $0x78] sm:$0xff]  ;;  %v3194_v18 = vld [vmem:[%s9613_s3 + $0x70] sm:$0xff]  ;;  %v3646_v19 = vld [vmem:[%s9613_s3 + $0x80] sm:$0xff]  ;;  %vm5734_vm1 = vcmask 1043456   ;;  %vm5727_vm2 = vcmask 31744  }
   0xb   :  { %6005 = vmatmul.mubr.msk.f32.vlgmr.msra.gmra.mrb[2].mxu1 %vm24_vm0, %v6475_v5  ;;  %6008 = vmatpush3.xpose.msk.msra.mxu0 %vm24_vm0, %v934_v7  ;;  %v3872_v20 = vld [vmem:[%s9613_s3 + $0x88] sm:$0xff]  ;;  %v4324_v56 = vld [vmem:[%s9613_s3 + $0x98] sm:$0xff] }
   0xc   :  { %6013 = vmatpush3.xpose.msk.msra.mxu1 %vm24_vm0, %v1160_v6  ;;  %6014 = vmatprep.mubr.msk.f32.mxu1 %vm24_vm0, %v6460_v2 }
   0xd   :  { %6009 = vmatprep.mubr.msk.f32.mxu0 %vm24_vm0, %v6460_v2  ;;  %6017 = vmatprep.subr.msk.mxu0 %vm24_vm0, %v1386_v8 }
   0xe   :  { %6010 = vmatmul.mubr.msk.f32.vlgmr.msra.gmra.mrb[4].mxu0 %vm24_vm0, %v6475_v5  ;;  %6022 = vmatprep.subr.msk.mxu1 %vm24_vm0, %v1612_v10 }
   0xf   :  { %6015 = vmatmul.mubr.msk.f32.vlgmr.msra.gmra.mrb[4].mxu1 %vm24_vm0, %v6475_v5  ;;  %6018 = vmatpush3.xpose.msk.msra.mxu0 %vm24_vm0, %v1386_v8 }
  0x10   :  { %6019 = vmatprep.mubr.msk.f32.mxu0 %vm24_vm0, %v6460_v2  ;;  %6027 = vmatprep.subr.msk.mxu0 %vm24_vm0, %v1838_v11 }
  0x11   :  { %6023 = vmatpush3.xpose.msk.msra.mxu1 %vm24_vm0, %v1612_v10  ;;  %6024 = vmatprep.mubr.msk.f32.mxu1 %vm24_vm0, %v6460_v2 }
  0x12   :  { %6020 = vmatmul.mubr.msk.f32.vlgmr.msra.gmra.mrb[6].mxu0 %vm24_vm0, %v6475_v5  ;;  %6032 = vmatprep.subr.msk.mxu1 %vm24_vm0, %v2064_v12 }
  0x13   :  { %6028 = vmatpush3.xpose.msk.msra.mxu0 %vm24_vm0, %v1838_v11  ;;  %6029 = vmatprep.mubr.msk.f32.mxu0 %vm24_vm0, %v6460_v2 }
  0x14   :  { %6025 = vmatmul.mubr.msk.f32.vlgmr.msra.gmra.mrb[6].mxu1 %vm24_vm0, %v6475_v5  ;;  %6037 = vmatprep.subr.msk.mxu0 %vm24_vm0, %v2290_v13 }
  0x15   :  { %6033 = vmatpush3.xpose.msk.msra.mxu1 %vm24_vm0, %v2064_v12  ;;  %6034 = vmatprep.mubr.msk.f32.mxu1 %vm24_vm0, %v6460_v2 }
  0x16   :  { %6030 = vmatmul.mubr.msk.f32.vlgmr.msra.gmra.mrb[8].mxu0 %vm24_vm0, %v6475_v5  ;;  %6042 = vmatprep.subr.msk.mxu1 %vm24_vm0, %v2516_v14 }
  0x17   :  { %6038 = vmatpush3.xpose.msk.msra.mxu0 %vm24_vm0, %v2290_v13  ;;  %6039 = vmatprep.mubr.msk.f32.mxu0 %vm24_vm0, %v6460_v2 }
  0x18   :  { %6035 = vmatmul.mubr.msk.f32.vlgmr.msra.gmra.mrb[8].mxu1 %vm24_vm0, %v6475_v5  ;;  %6047 = vmatprep.subr.msk.mxu0 %vm24_vm0, %v2742_v15 }
  0x19   :  { %6043 = vmatpush3.xpose.msk.msra.mxu1 %vm24_vm0, %v2516_v14  ;;  %6044 = vmatprep.mubr.msk.f32.mxu1 %vm24_vm0, %v6460_v2  ;;  %v4098_v14 = vld [vmem:[%s9613_s3 + $0x90] sm:$0xff] }
  0x1a   :  { %6040 = vmatmul.mubr.msk.f32.vlgmr.msra.gmra.mrb[10].mxu0 %vm24_vm0, %v6475_v5  ;;  %6052 = vmatprep.subr.msk.mxu1 %vm24_vm0, %v2968_v16 }
  0x1b   :  { %6048 = vmatpush3.xpose.msk.msra.mxu0 %vm24_vm0, %v2742_v15  ;;  %6049 = vmatprep.mubr.msk.f32.mxu0 %vm24_vm0, %v6460_v2 }
  0x1c   :  { %6045 = vmatmul.mubr.msk.f32.vlgmr.msra.gmra.mrb[10].mxu1 %vm24_vm0, %v6475_v5  ;;  %6128 = vset.pattern.permute.xlu1 %v9616_v9 }
  0x1d   :  { %6053 = vmatpush3.xpose.msk.msra.mxu1 %vm24_vm0, %v2968_v16  ;;  %6054 = vmatprep.mubr.msk.f32.mxu1 %vm24_vm0, %v6460_v2 }
  0x1e   :  { %6050 = vmatmul.mubr.msk.f32.vlgmr.msra.gmra.mrb[12].mxu0 %vm24_vm0, %v6475_v5  ;;  %6062 = vmatprep.subr.msk.mxu1 %vm24_vm0, %v3420_v17 }
  0x1f   :  { %6059 = vmatprep.mubr.msk.f32.mxu0 %vm24_vm0, %v6460_v2  ;;  %6057 = vmatprep.subr.msk.mxu0 %vm24_vm0, %v3194_v18 }
  0x20   :  { %6055 = vmatmul.mubr.msk.f32.vlgmr.msra.gmra.mrb[12].mxu1 %vm24_vm0, %v6475_v5  ;;  %6058 = vmatpush3.xpose.msk.msra.mxu0 %vm24_vm0, %v3194_v18 }
  0x21   :  { %6063 = vmatpush3.xpose.msk.msra.mxu1 %vm24_vm0, %v3420_v17  ;;  %6064 = vmatprep.mubr.msk.f32.mxu1 %vm24_vm0, %v6460_v2  ;;  %v4550_v17 = vld [vmem:[%s9613_s3 + $0xa0] sm:$0xff] }
  0x22   :  { %6067 = vmatprep.subr.msk.mxu0 %vm24_vm0, %v3646_v19  ;;  %6072 = vmatprep.subr.msk.mxu1 %vm24_vm0, %v3872_v20 }
  0x23   :  { %6060 = vmatmul.mubr.msk.f32.vlgmr.msra.gmra.mrb[14].mxu0 %vm24_vm0, %v6475_v5 }
  0x24   :  { %6065 = vmatmul.mubr.msk.f32.vlgmr.msra.gmra.mrb[14].mxu1 %vm24_vm0, %v6475_v5  ;;  %6068 = vmatpush3.xpose.msk.msra.mxu0 %vm24_vm0, %v3646_v19 }
  0x25   :  { %6074 = vmatprep.mubr.msk.f32.mxu1 %vm24_vm0, %v6460_v2  ;;  %6069 = vmatprep.mubr.msk.f32.mxu0 %vm24_vm0, %v6460_v2 }
  0x26   :  { %6073 = vmatpush3.xpose.msk.msra.mxu1 %vm24_vm0, %v3872_v20  ;;  %6077 = vmatprep.subr.msk.mxu0 %vm24_vm0, %v4098_v14 }
  0x27   :  { %6070 = vmatmul.mubr.msk.f32.vlgmr.msra.gmra.mrb[16].mxu0 %vm24_vm0, %v6475_v5  ;;  %6082 = vmatprep.subr.msk.mxu1 %vm24_vm0, %v4324_v56 }
  0x28   :  { %6079 = vmatprep.mubr.msk.f32.mxu0 %vm24_vm0, %v6460_v2  ;;  %6078 = vmatpush3.xpose.msk.msra.mxu0 %vm24_vm0, %v4098_v14 }
  0x29   :  { %6075 = vmatmul.mubr.msk.f32.vlgmr.msra.gmra.mrb[16].mxu1 %vm24_vm0, %v6475_v5  ;;  %6087 = vmatprep.subr.msk.mxu0 %vm24_vm0, %v4550_v17 }
  0x2a   :  { %6084 = vmatprep.mubr.msk.f32.mxu1 %vm24_vm0, %v6460_v2  ;;  %6083 = vmatpush3.xpose.msk.msra.mxu1 %vm24_vm0, %v4324_v56 }
  0x2b   :  { %6080 = vmatmul.mubr.msk.f32.vlgmr.msra.gmra.mrb[18].mxu0 %vm24_vm0, %v6475_v5 }
  0x2c   :  { %6088 = vmatpush3.xpose.msk.msra.mxu0 %vm24_vm0, %v4550_v17  ;;  %6089 = vmatprep.mubr.msk.f32.mxu0 %vm24_vm0, %v6460_v2 }
  0x2d   :  { %6085 = vmatmul.mubr.msk.f32.vlgmr.msra.gmra.mrb[18].mxu1 %vm24_vm0, %v6475_v5 }
  0x2e   :  { %6094 = vmatprep.mubr.msk.f32.mxu1 %vm24_vm0, %v6460_v2 }
  0x2f   :  { %6090 = vmatmul.mubr.msk.f32.vlgmr.msra.gmra.mrb[20].mxu0 %vm24_vm0, %v6475_v5 }
  0x30   :  { %6099 = vmatprep.mubr.msk.f32.mxu0 %vm24_vm0, %v6460_v2 }
  0xd9   :  { %v6629_v21 = vpop.f32.mrb[0].mxu0  ;;  %v6631_v22 = vpop.f32.mrb[0].mxu1 }
  0xda   :  { %361 = vperm.xlu0 %6134, %v6631_v22   ;;  %135 = vperm.xlu1 %6128, %v6629_v21   ;;  %v6635_v23 = vpop.f32.mrb[1].mxu0  ;;  %v6637_v24 = vpop.f32.mrb[1].mxu1 }
  0xdd   :  { %v6639_v25 = vpop.f32.mrb[2].mxu0 }
  0xde   :  { %6137 = vset.pattern.permute.xlu0 %v9622_v26  ;;  %6129 = vset.pattern.permute.xlu1 %v9630_v27  ;;  %v6643_v28 = vpop.f32.mrb[3].mxu0  ;;  %v6645_v29 = vpop.f32.mrb[2].mxu1 }
  0xdf   :  { %415 = vperm.xlu0 %6137, %v6631_v22   ;;  %153 = vperm.xlu1 %6129, %v6629_v21   ;;  %v6649_v30 = vpop.f32.mrb[3].mxu1 }
  0xe1   :  { %v6651_v31 = vpop.f32.mrb[4].mxu0 }
  0xe2   :  { %v6653_v32 = vpop.f32.mrb[4].mxu1  ;;  %v6655_v33 = vpop.f32.mrb[5].mxu0 }
  0xe3   :  { %6143 = vset.pattern.permute.xlu0 %v9618_v34  ;;  %6130 = vset.pattern.permute.xlu1 %v9622_v26  ;;  %v6659_v35 = vpop.f32.mrb[5].mxu1 }
  0xe4   :  { %189 = vperm.xlu1 %6130, %v6629_v21   ;;  %203 = vperm.xlu0 %6143, %v6635_v23  }
  0xe5   :  { %v6663_v36 = vpop.f32.mrb[6].mxu0 }
  0xe6   :  { %v6665_v37 = vpop.f32.mrb[7].mxu0 }
  0xe7   :  { %v6667_v38 = vpop.f32.mrb[6].mxu1 }
  0xe8   :  { %6131 = vset.pattern.permute.xlu1 %v9618_v34  ;;  %659 = vperm.xlu0 %6143, %v6639_v25   ;;  %v6671_v39 = vpop.f32.mrb[7].mxu1 }
  0xe9   :  { %207 = vperm.xlu1 %6131, %v6629_v21   ;;  %v6674_v40 = vpop.f32.mrb[8].mxu0 }
  0xea   :  { %v6676_v41 = vpop.f32.mrb[9].mxu0 }
  0xeb   :  { %v6678_v42 = vpop.f32.mrb[8].mxu1 }
  0xec   :  { %6165 = vset.pattern.permute.xlu0 %v9622_v26  ;;  %v6681_v43 = vpop.f32.mrb[9].mxu1 }
  0xed   :  { %6132 = vset.pattern.permute.xlu1 %v9624_v44  ;;  %637 = vperm.xlu0 %6165, %v6643_v28   ;;  %v6685_v45 = vpop.f32.mrb[10].mxu0 }
  0xee   :  { %243 = vperm.xlu1 %6132, %v6629_v21   ;;  %v6688_v46 = vpop.f32.mrb[11].mxu0 }
  0xef   :  { %v6690_v47 = vpop.f32.mrb[10].mxu1 }
  0xf0   :  { %v6692_v48 = vpop.f32.mrb[11].mxu1 }
  0xf1   :  { %6172 = vset.pattern.permute.xlu0 %v9618_v34  ;;  %v6695_v49 = vpop.f32.mrb[12].mxu0 }
  0xf2   :  { %6133 = vset.pattern.permute.xlu1 %v9628_v50  ;;  %881 = vperm.xlu0 %6172, %v6649_v30   ;;  %v6767_v57 = vpop.f32.mrb[13].mxu0 }
  0xf3   :  { %343 = vperm.xlu1 %6133, %v6631_v22   ;;  %v6700_v51 = vpop.f32.mrb[12].mxu1 }
  0xf4   :  { %v6702_v52 = vpop.f32.mrb[13].mxu1 }
  0xf6   :  { %1337 = vperm.xlu0 %6172, %v6653_v32   ;;  %v6770_v58 = vpop.f32.mrb[14].mxu0 }
  0xf7   :  { %6135 = vset.pattern.permute.xlu1 %v9630_v27  ;;  %v6721_v55 = vpop.f32.mrb[14].mxu1  ;;  %9690 = vst [vmem:[#allocation6_spill] sm:$0xff] %v6770_v58  ;;  %v6772_v59 = vpop.f32.mrb[15].mxu0 }
  0xf8   :  { %379 = vperm.xlu1 %6135, %v6631_v22   ;;  %9689 = vst [vmem:[#allocation5_spill] sm:$0xff] %v6721_v55  ;;  %9691 = vst [vmem:[#allocation7_spill] sm:$0xff] %v6772_v59  ;;  %v6818_v4 = vpop.f32.mrb[15].mxu1 }
  0xf9   :  { %9694 = vst [vmem:[#allocation10_spill] sm:$0xff] %v6818_v4 }
  0xfa   :  { %6191 = vset.pattern.permute.xlu0 %v9630_v27  ;;  %v6775_v60 = vpop.f32.mrb[16].mxu0 }
  0xfb   :  { %149 = vperm.xlu0 %6191, %v6635_v23   ;;  %9692 = vst [vmem:[#allocation8_spill] sm:$0xff] %v6775_v60  ;;  %v6777_v61 = vpop.f32.mrb[17].mxu0 }
  0xfc   :  { %6136 = vset.pattern.permute.xlu1 %v9620_v53  ;;  %v6823_v7 = vpop.f32.mrb[16].mxu1 }
  0xfd   :  { %397 = vperm.xlu1 %6136, %v6631_v22   ;;  %9696 = vst [vmem:[#allocation12_spill] sm:$0xff] %v6823_v7  ;;  %v6825_v8 = vpop.f32.mrb[17].mxu1 }
  0xfe   :  { %9697 = vst [vmem:[#allocation13_spill] sm:$0xff] %v6825_v8 }
  0xff   :  { %605 = vperm.xlu0 %6191, %v6639_v25  }
 0x101   :  { %6138 = vset.pattern.permute.xlu1 %v9618_v34 }
 0x102   :  { %433 = vperm.xlu1 %6138, %v6631_v22  }
 0x103   :  { %827 = vperm.xlu0 %6191, %v6649_v30  }
 0x106   :  { %6139 = vset.pattern.permute.xlu1 %v9626_v54 }
 0x107   :  { %451 = vperm.xlu1 %6139, %v6631_v22   ;;  %1283 = vperm.xlu0 %6191, %v6653_v32  }
 0x10b   :  { %6140 = vset.pattern.permute.xlu1 %v9616_v9  ;;  %1505 = vperm.xlu0 %6191, %v6665_v37  }
 0x10c   :  { %131 = vperm.xlu1 %6140, %v6635_v23  }
 0x10f   :  { %6200 = vset.pattern.permute.xlu0 %v9618_v34 }
 0x110   :  { %6141 = vset.pattern.permute.xlu1 %v9620_v53  ;;  %1559 = vperm.xlu0 %6200, %v6665_v37  }
 0x111   :  { %167 = vperm.xlu1 %6141, %v6635_v23  }
 0x114   :  { %6214 = vset.pattern.permute.xlu0 %v9630_v27 }
 0x115   :  { %6142 = vset.pattern.permute.xlu1 %v9622_v26  ;;  %1961 = vperm.xlu0 %6214, %v6674_v40  }
 0x116   :  { %185 = vperm.xlu1 %6142, %v6635_v23  }
 0x119   :  { %6215 = vset.pattern.permute.xlu0 %v9624_v44 }
 0x11a   :  { %6144 = vset.pattern.permute.xlu1 %v9626_v54  ;;  %469 = vperm.xlu0 %6215, %v6631_v22  }
 0x11b   :  { %221 = vperm.xlu1 %6144, %v6635_v23  }
 0x11e   :  { %691 = vperm.xlu0 %6215, %v6643_v28  }
 0x11f   :  { %6145 = vset.pattern.permute.xlu1 %v9624_v44 }
 0x120   :  { %239 = vperm.xlu1 %6145, %v6635_v23  }
 0x122   :  { %1147 = vperm.xlu0 %6215, %v6651_v31  }
 0x124   :  { %6146 = vset.pattern.permute.xlu1 %v9616_v9 }
 0x125   :  { %357 = vperm.xlu1 %6146, %v6637_v24  }
 0x126   :  { %1369 = vperm.xlu0 %6215, %v6659_v35  }
 0x129   :  { %6147 = vset.pattern.permute.xlu1 %v9630_v27 }
 0x12a   :  { %375 = vperm.xlu1 %6147, %v6637_v24   ;;  %1825 = vperm.xlu0 %6215, %v6667_v38  }
 0x12e   :  { %6148 = vset.pattern.permute.xlu1 %v9622_v26  ;;  %2047 = vperm.xlu0 %6215, %v6676_v41  }
 0x12f   :  { %411 = vperm.xlu1 %6148, %v6637_v24  }
 0x132   :  { %6224 = vset.pattern.permute.xlu0 %v9630_v27 }
 0x133   :  { %6149 = vset.pattern.permute.xlu1 %v9618_v34  ;;  %2183 = vperm.xlu0 %6224, %v6681_v43  }
 0x134   :  { %429 = vperm.xlu1 %6149, %v6637_v24  }
 0x137   :  { %2639 = vperm.xlu0 %6224, %v6690_v47  }
 0x138   :  { %6150 = vset.pattern.permute.xlu1 %v9624_v44 }
 0x139   :  { %465 = vperm.xlu1 %6150, %v6637_v24  }
 0x13b   :  { %6241 = vset.pattern.permute.xlu0 %v9628_v50 }
 0x13c   :  { %112 = vperm.xlu0 %6241, %v6635_v23  }
 0x13d   :  { %6151 = vset.pattern.permute.xlu1 %v9628_v50 }
 0x13e   :  { %569 = vperm.xlu1 %6151, %v6639_v25  }
 0x140   :  { %117 = vperm.xlu0 %6241, %v6629_v21  }
 0x142   :  { %6152 = vset.pattern.permute.xlu1 %v9616_v9 }
 0x143   :  { %587 = vperm.xlu1 %6152, %v6639_v25  }
 0x144   :  { %338 = vperm.xlu0 %6241, %v6637_v24  }
 0x147   :  { %6153 = vset.pattern.permute.xlu1 %v9620_v53 }
 0x148   :  { %623 = vperm.xlu1 %6153, %v6639_v25   ;;  %795 = vperm.xlu0 %6241, %v6645_v29  }
 0x14c   :  { %6154 = vset.pattern.permute.xlu1 %v9622_v26  ;;  %1016 = vperm.xlu0 %6241, %v6655_v33  }
 0x14d   :  { %641 = vperm.xlu1 %6154, %v6639_v25  }
 0x150   :  { %1473 = vperm.xlu0 %6241, %v6663_v36  }
 0x151   :  { %6155 = vset.pattern.permute.xlu1 %v9626_v54 }
 0x152   :  { %677 = vperm.xlu1 %6155, %v6639_v25  }
 0x154   :  { %1694 = vperm.xlu0 %6241, %v6671_v39  }
 0x156   :  { %6156 = vset.pattern.permute.xlu1 %v9624_v44 }
 0x157   :  { %695 = vperm.xlu1 %6156, %v6639_v25  }
 0x158   :  { %2151 = vperm.xlu0 %6241, %v6678_v42  }
 0x159   :  { %v6795_v62 = vpop.permute.xlu1 %135  ;;  %v6816_v3 = vpop.permute.xlu0 %361 }
 0x15a   :  { %9693 = vst [vmem:[#allocation9_spill] sm:$0xff] %v6816_v3 }
 0x15b   :  { %6157 = vset.pattern.permute.xlu1 %v9616_v9 }
 0x15c   :  { %813 = vperm.xlu1 %6157, %v6645_v29   ;;  %2372 = vperm.xlu0 %6241, %v6688_v46  }
 0x15e   :  { %v6800_v63 = vpop.permute.xlu1 %153  ;;  %v6832_v11 = vpop.permute.xlu0 %415 }
 0x15f   :  { %9699 = vst [vmem:[#allocation15_spill] sm:$0xff] %v6832_v11 }
 0x160   :  { %6158 = vset.pattern.permute.xlu1 %v9630_v27  ;;  %2829 = vperm.xlu0 %6241, %v6695_v49  }
 0x161   :  { %831 = vperm.xlu1 %6158, %v6645_v29  }
 0x163   :  { %v6805_v0 = vpop.permute.xlu1 %189  ;;  %v6839_v13 = vpop.permute.xlu0 %203 }
 0x164   :  { %3050 = vperm.xlu0 %6241, %v6702_v52  }
 0x165   :  { %6159 = vset.pattern.permute.xlu1 %v9622_v26 }
 0x166   :  { %867 = vperm.xlu1 %6159, %v6645_v29  }
 0x167   :  { %v6850_v16 = vpop.permute.xlu0 %659 }
 0x168   :  { %v6810_v1 = vpop.permute.xlu1 %207  ;;  %6255 = vset.pattern.permute.xlu0 %v9620_v53  ;;  %9702 = vst [vmem:[#allocation18_spill] sm:$0xff] %v6850_v16 }
 0x169   :  { %171 = vperm.xlu0 %6255, %v6629_v21  }
 0x16a   :  { %6160 = vset.pattern.permute.xlu1 %v9618_v34 }
 0x16b   :  { %885 = vperm.xlu1 %6160, %v6645_v29  }
 0x16c   :  { %v6868_v19 = vpop.permute.xlu0 %637 }
 0x16d   :  { %v6820_v6 = vpop.permute.xlu1 %243  ;;  %393 = vperm.xlu0 %6255, %v6637_v24   ;;  %9704 = vst [vmem:[#allocation20_spill] sm:$0xff] %v6868_v19 }
 0x16e   :  { %9695 = vst [vmem:[#allocation11_spill] sm:$0xff] %v6820_v6 }
 0x16f   :  { %6161 = vset.pattern.permute.xlu1 %v9624_v44 }
 0x170   :  { %921 = vperm.xlu1 %6161, %v6645_v29  }
 0x171   :  { %849 = vperm.xlu0 %6255, %v6645_v29   ;;  %v6880_v22 = vpop.permute.xlu0 %881 }
 0x172   :  { %v6830_v10 = vpop.permute.xlu1 %343  ;;  %9706 = vst [vmem:[#allocation22_spill] sm:$0xff] %v6880_v22  ;;  %v9722_v22 = vmov 1  }
 0x173   :  { %9698 = vst [vmem:[#allocation14_spill] sm:$0xff] %v6830_v10 }
 0x174   :  { %6162 = vset.pattern.permute.xlu1 %v9628_v50 }
 0x175   :  { %564 = vperm.xlu1 %6162, %v6643_v28   ;;  %1071 = vperm.xlu0 %6255, %v6655_v33   ;;  %v6889_v5 = vpop.permute.xlu0 %1337 }
 0x176   :  { %9707 = vst [vmem:[#allocation23_spill] sm:$0xff] %v6889_v5 }
 0x177   :  { %v6837_v12 = vpop.permute.xlu1 %379 }
 0x178   :  { %9700 = vst [vmem:[#allocation16_spill] sm:$0xff] %v6837_v12 }
 0x179   :  { %6163 = vset.pattern.permute.xlu1 %v9630_v27  ;;  %1527 = vperm.xlu0 %6255, %v6663_v36  }
 0x17a   :  { %601 = vperm.xlu1 %6163, %v6643_v28   ;;  %v6896_v2 = vpop.permute.xlu0 %149 }
 0x17c   :  { %v6847_v15 = vpop.permute.xlu1 %397 }
 0x17d   :  { %9701 = vst [vmem:[#allocation17_spill] sm:$0xff] %v6847_v15  ;;  %1749 = vperm.xlu0 %6255, %v6671_v39  }
 0x17e   :  { %6164 = vset.pattern.permute.xlu1 %v9620_v53  ;;  %v6904_v14 = vpop.permute.xlu0 %605 }
 0x17f   :  { %619 = vperm.xlu1 %6164, %v6643_v28   ;;  %9708 = vst [vmem:[#allocation24_spill] sm:$0xff] %v6904_v14  ;;  %v9721_v14 = vmov 0  }
 0x181   :  { %v6861_v18 = vpop.permute.xlu1 %433  ;;  %2205 = vperm.xlu0 %6255, %v6678_v42  }
 0x182   :  { %9703 = vst [vmem:[#allocation19_spill] sm:$0xff] %v6861_v18  ;;  %v9731_v18 = vmov 4  }
 0x183   :  { %6166 = vset.pattern.permute.xlu1 %v9618_v34 }
 0x184   :  { %655 = vperm.xlu1 %6166, %v6643_v28  }
 0x185   :  { %2427 = vperm.xlu0 %6255, %v6688_v46  }
 0x186   :  { %v6875_v20 = vpop.permute.xlu1 %451 }
 0x187   :  { %9705 = vst [vmem:[#allocation21_spill] sm:$0xff] %v6875_v20 }
 0x188   :  { %6167 = vset.pattern.permute.xlu1 %v9626_v54 }
 0x189   :  { %673 = vperm.xlu1 %6167, %v6643_v28   ;;  %2883 = vperm.xlu0 %6255, %v6695_v49  }
 0x18b   :  { %v6884_v23 = vpop.permute.xlu1 %131 }
 0x18d   :  { %6168 = vset.pattern.permute.xlu1 %v9628_v50  ;;  %3105 = vperm.xlu0 %6255, %v6702_v52  }
 0x18e   :  { %790 = vperm.xlu1 %6168, %v6649_v30  }
 0x190   :  { %v6891_v25 = vpop.permute.xlu1 %167 }
 0x191   :  { %3561 = vperm.xlu0 %6255, %v6721_v55  }
 0x192   :  { %6169 = vset.pattern.permute.xlu1 %v9616_v9  ;;  %v6912_v9 = vpop.permute.xlu0 %827 }
 0x193   :  { %809 = vperm.xlu1 %6169, %v6649_v30   ;;  %9709 = vst [vmem:[#allocation25_spill] sm:$0xff] %v6912_v9 }
 0x195   :  { %v6898_v56 = vpop.permute.xlu1 %185  ;;  %6276 = vset.pattern.permute.xlu0 %v9626_v54 }
 0x196   :  { %225 = vperm.xlu0 %6276, %v6629_v21  }
 0x197   :  { %6170 = vset.pattern.permute.xlu1 %v9620_v53  ;;  %v6921_v53 = vpop.permute.xlu0 %1283 }
 0x198   :  { %845 = vperm.xlu1 %6170, %v6649_v30   ;;  %9710 = vst [vmem:[#allocation26_spill] sm:$0xff] %v6921_v53  ;;  %v9715_v53 = vmov 5  }
 0x19a   :  { %v6906_v17 = vpop.permute.xlu1 %221  ;;  %447 = vperm.xlu0 %6276, %v6637_v24  }
 0x19c   :  { %6171 = vset.pattern.permute.xlu1 %v9622_v26 }
 0x19d   :  { %863 = vperm.xlu1 %6171, %v6649_v30  }
 0x19e   :  { %903 = vperm.xlu0 %6276, %v6645_v29   ;;  %v6929_v29 = vpop.permute.xlu0 %1505 }
 0x19f   :  { %v6914_v34 = vpop.permute.xlu1 %239  ;;  %9711 = vst [vmem:[#allocation27_spill] sm:$0xff] %v6929_v29  ;;  %v9718_v29 = vmov 6  }
 0x1a1   :  { %6173 = vset.pattern.permute.xlu1 %v9626_v54  ;;  %v9713_v54 = vmov 3  }
 0x1a2   :  { %899 = vperm.xlu1 %6173, %v6649_v30   ;;  %1125 = vperm.xlu0 %6276, %v6655_v33  }
 0x1a4   :  { %v6919_v21 = vpop.permute.xlu1 %357 }
 0x1a6   :  { %6174 = vset.pattern.permute.xlu1 %v9624_v44  ;;  %1581 = vperm.xlu0 %6276, %v6663_v36   ;;  %v6937_v44 = vpop.permute.xlu0 %1559 }
 0x1a7   :  { %917 = vperm.xlu1 %6174, %v6649_v30   ;;  %9712 = vst [vmem:[#allocation28_spill] sm:$0xff] %v6937_v44 }
 0x1a9   :  { %v6926_v24 = vpop.permute.xlu1 %375 }
 0x1aa   :  { %1803 = vperm.xlu0 %6276, %v6671_v39  }
 0x1ab   :  { %6175 = vset.pattern.permute.xlu1 %v9628_v50  ;;  %v6946_v50 = vpop.permute.xlu0 %1961 }
 0x1ac   :  { %1021 = vperm.xlu1 %6175, %v6651_v31   ;;  %9714 = vst [vmem:[#allocation29_spill] sm:$0xff] %v6946_v50 }
 0x1ae   :  { %v6933_v26 = vpop.permute.xlu1 %411  ;;  %2259 = vperm.xlu0 %6276, %v6678_v42  }
 0x1b0   :  { %6176 = vset.pattern.permute.xlu1 %v9630_v27  ;;  %v6953_v27 = vpop.permute.xlu0 %469 }
 0x1b1   :  { %1057 = vperm.xlu1 %6176, %v6651_v31   ;;  %9716 = vst [vmem:[#allocation30_spill] sm:$0xff] %v6953_v27 }
 0x1b2   :  { %2481 = vperm.xlu0 %6276, %v6688_v46  }
 0x1b3   :  { %v6941_v30 = vpop.permute.xlu1 %429 }
 0x1b4   :  { %v6960_v16 = vpop.permute.xlu0 %691 }
 0x1b5   :  { %6177 = vset.pattern.permute.xlu1 %v9713_v54  ;;  %9719 = vst [vmem:[#allocation32_spill] sm:$0xff] %v6960_v16 }
 0x1b6   :  { %1075 = vperm.xlu1 %6177, %v6651_v31   ;;  %2937 = vperm.xlu0 %6276, %v6695_v49  }
 0x1b8   :  { %v6948_v5 = vpop.permute.xlu1 %465  ;;  %v6968_v27 = vpop.permute.xlu0 %1147 }
 0x1b9   :  { %9723 = vst [vmem:[#allocation34_spill] sm:$0xff] %v6968_v27  ;;  %v9728_v27 = vmov 2  }
 0x1ba   :  { %6178 = vset.pattern.permute.xlu1 %v9715_v53  ;;  %3159 = vperm.xlu0 %6276, %v6702_v52  }
 0x1bb   :  { %1111 = vperm.xlu1 %6178, %v6651_v31  }
 0x1bc   :  { %v6978_v20 = vpop.permute.xlu0 %1369 }
 0x1bd   :  { %v6955_v44 = vpop.permute.xlu1 %569  ;;  %9726 = vst [vmem:[#allocation37_spill] sm:$0xff] %v6978_v20 }
 0x1be   :  { %9717 = vst [vmem:[#allocation31_spill] sm:$0xff] %v6955_v44  ;;  %3615 = vperm.xlu0 %6276, %v6721_v55  }
 0x1bf   :  { %6179 = vset.pattern.permute.xlu1 %v9718_v29 }
 0x1c0   :  { %1129 = vperm.xlu1 %6179, %v6651_v31  }
 0x1c2   :  { %v6962_v50 = vpop.permute.xlu1 %587  ;;  %3837 = vperm.xlu0 %6276, %v6777_v61  }
 0x1c3   :  { %9720 = vst [vmem:[#allocation33_spill] sm:$0xff] %v6962_v50 }
 0x1c4   :  { %6180 = vset.pattern.permute.xlu1 %v9721_v14 }
 0x1c5   :  { %1247 = vperm.xlu1 %6180, %v6653_v32  }
 0x1c6   :  { %6287 = vset.pattern.permute.xlu0 %v9722_v22 }
 0x1c7   :  { %v6970_v44 = vpop.permute.xlu1 %623  ;;  %583 = vperm.xlu0 %6287, %v6643_v28  }
 0x1c8   :  { %9724 = vst [vmem:[#allocation35_spill] sm:$0xff] %v6970_v44  ;;  %v6985_v44 = vpop.permute.xlu0 %1825 }
 0x1c9   :  { %6181 = vset.pattern.permute.xlu1 %v9722_v22  ;;  %9729 = vst [vmem:[#allocation39_spill] sm:$0xff] %v6985_v44 }
 0x1ca   :  { %1265 = vperm.xlu1 %6181, %v6653_v32  }
 0x1cb   :  { %1039 = vperm.xlu0 %6287, %v6651_v31  }
 0x1cc   :  { %v6976_v50 = vpop.permute.xlu1 %641  ;;  %v6994_v20 = vpop.permute.xlu0 %2047 }
 0x1cd   :  { %9725 = vst [vmem:[#allocation36_spill] sm:$0xff] %v6976_v50  ;;  %9732 = vst [vmem:[#allocation41_spill] sm:$0xff] %v6994_v20 }
 0x1ce   :  { %1035 = vperm.xlu1 %6181, %v6655_v33  }
 0x1cf   :  { %1261 = vperm.xlu0 %6287, %v6659_v35  }
 0x1d0   :  { %v7001_v44 = vpop.permute.xlu0 %2183 }
 0x1d1   :  { %v6982_v9 = vpop.permute.xlu1 %677  ;;  %9734 = vst [vmem:[#allocation43_spill] sm:$0xff] %v7001_v44 }
 0x1d2   :  { %9727 = vst [vmem:[#allocation38_spill] sm:$0xff] %v6982_v9  ;;  %6182 = vset.pattern.permute.xlu1 %v9728_v27  ;;  %v9736_v9 = vmov 7  }
 0x1d3   :  { %1053 = vperm.xlu1 %6182, %v6655_v33   ;;  %1717 = vperm.xlu0 %6287, %v6667_v38  }
 0x1d4   :  { %v7009_v20 = vpop.permute.xlu0 %2639 }
 0x1d5   :  { %9737 = vst [vmem:[#allocation45_spill] sm:$0xff] %v7009_v20  ;;  %v7026_v20 = vpop.f32.mrb[18].mxu1 }
 0x1d6   :  { %v6989_v28 = vpop.permute.xlu1 %695  ;;  %9741 = vst [vmem:[#allocation49_spill] sm:$0xff] %v7026_v20 }
 0x1d7   :  { %9730 = vst [vmem:[#allocation40_spill] sm:$0xff] %v6989_v28  ;;  %6183 = vset.pattern.permute.xlu1 %v9731_v18  ;;  %1939 = vperm.xlu0 %6287, %v6676_v41  }
 0x1d8   :  { %1089 = vperm.xlu1 %6183, %v6655_v33   ;;  %v7018_v11 = vpop.permute.xlu0 %112 }
 0x1db   :  { %v6996_v50 = vpop.permute.xlu1 %813  ;;  %2395 = vperm.xlu0 %6287, %v6685_v45  }
 0x1dc   :  { %9733 = vst [vmem:[#allocation42_spill] sm:$0xff] %v6996_v50  ;;  %6184 = vset.pattern.permute.xlu1 %v9715_v53 }
 0x1dd   :  { %1107 = vperm.xlu1 %6184, %v6655_v33  }
 0x1df   :  { %2617 = vperm.xlu0 %6287, %v6692_v48  }
 0x1e0   :  { %v7004_v28 = vpop.permute.xlu1 %831 }
 0x1e1   :  { %9735 = vst [vmem:[#allocation44_spill] sm:$0xff] %v7004_v28  ;;  %6185 = vset.pattern.permute.xlu1 %v9736_v9 }
 0x1e2   :  { %1143 = vperm.xlu1 %6185, %v6655_v33  }
 0x1e3   :  { %3073 = vperm.xlu0 %6287, %v6700_v51  }
 0x1e5   :  { %v7011_v50 = vpop.permute.xlu1 %867 }
 0x1e6   :  { %9738 = vst [vmem:[#allocation46_spill] sm:$0xff] %v7011_v50  ;;  %6186 = vset.pattern.permute.xlu1 %v9721_v14  ;;  %v7029_v50 = vpop.permute.xlu0 %117 }
 0x1e7   :  { %1242 = vperm.xlu1 %6186, %v6659_v35   ;;  %3295 = vperm.xlu0 %6287, %v6772_v59  }
 0x1ea   :  { %v7016_v44 = vpop.permute.xlu1 %885  ;;  %v7037_v28 = vpop.permute.xlu0 %338 }
 0x1eb   :  { %9739 = vst [vmem:[#allocation47_spill] sm:$0xff] %v7016_v44  ;;  %6187 = vset.pattern.permute.xlu1 %v9728_v27  ;;  %3751 = vperm.xlu0 %6287, %v6775_v60  }
 0x1ec   :  { %1279 = vperm.xlu1 %6187, %v6659_v35  }
 0x1ee   :  { %v7045_v15 = vpop.permute.xlu0 %795 }
 0x1ef   :  { %v7023_v33 = vpop.permute.xlu1 %921  ;;  %3973 = vperm.xlu0 %6287, %v6825_v8   ;;  %9742 = vst [vmem:[#allocation50_spill] sm:$0xff] %v7045_v15 }
 0x1f0   :  { %9740 = vst [vmem:[#allocation48_spill] sm:$0xff] %v7023_v33  ;;  %6188 = vset.pattern.permute.xlu1 %v9713_v54 }
 0x1f1   :  { %1297 = vperm.xlu1 %6188, %v6659_v35  }
 0x1f3   :  { %6291 = vset.pattern.permute.xlu0 %v9731_v18 }
 0x1f4   :  { %v7033_v44 = vpop.permute.xlu1 %564  ;;  %1093 = vperm.xlu0 %6291, %v6651_v31   ;;  %v7052_v31 = vpop.permute.xlu0 %1016 }
 0x1f5   :  { %1301 = vperm.xlu1 %6188, %v6653_v32   ;;  %9744 = vst [vmem:[#allocation52_spill] sm:$0xff] %v7052_v31 }
 0x1f8   :  { %1315 = vperm.xlu0 %6291, %v6659_v35   ;;  %v7063_v15 = vpop.permute.xlu0 %1473 }
 0x1f9   :  { %v7040_v33 = vpop.permute.xlu1 %601  ;;  %6189 = vset.pattern.permute.xlu1 %v9731_v18  ;;  %9747 = vst [vmem:[#allocation55_spill] sm:$0xff] %v7063_v15 }
 0x1fa   :  { %1319 = vperm.xlu1 %6189, %v6653_v32  }
 0x1fc   :  { %1771 = vperm.xlu0 %6291, %v6667_v38  }
 0x1fe   :  { %v7047_v16 = vpop.permute.xlu1 %619  ;;  %6190 = vset.pattern.permute.xlu1 %v9715_v53 }
 0x1ff   :  { %9743 = vst [vmem:[#allocation51_spill] sm:$0xff] %v7047_v16  ;;  %1333 = vperm.xlu1 %6190, %v6659_v35  }
 0x200   :  { %1993 = vperm.xlu0 %6291, %v6676_v41  }
 0x203   :  { %v7054_v12 = vpop.permute.xlu1 %655  ;;  %6192 = vset.pattern.permute.xlu1 %v9718_v29 }
 0x204   :  { %9745 = vst [vmem:[#allocation53_spill] sm:$0xff] %v7054_v12  ;;  %1351 = vperm.xlu1 %6192, %v6659_v35   ;;  %2449 = vperm.xlu0 %6291, %v6685_v45   ;;  %v7070_v12 = vpop.permute.xlu0 %1694 }
 0x205   :  { %9749 = vst [vmem:[#allocation57_spill] sm:$0xff] %v7070_v12 }
 0x208   :  { %v7059_v3 = vpop.permute.xlu1 %673  ;;  %1355 = vperm.xlu1 %6192, %v6653_v32   ;;  %2671 = vperm.xlu0 %6291, %v6692_v48   ;;  %v7078_v15 = vpop.permute.xlu0 %2151 }
 0x209   :  { %9746 = vst [vmem:[#allocation54_spill] sm:$0xff] %v7059_v3  ;;  %9751 = vst [vmem:[#allocation59_spill] sm:$0xff] %v7078_v15 }
 0x20c   :  { %6193 = vset.pattern.permute.xlu1 %v9736_v9  ;;  %3127 = vperm.xlu0 %6291, %v6700_v51  }
 0x20d   :  { %v7067_v31 = vpop.permute.xlu1 %790  ;;  %1373 = vperm.xlu1 %6193, %v6653_v32   ;;  %v7085_v32 = vpop.permute.xlu0 %2372 }
 0x20e   :  { %9748 = vst [vmem:[#allocation56_spill] sm:$0xff] %v7067_v31  ;;  %9753 = vst [vmem:[#allocation61_spill] sm:$0xff] %v7085_v32 }
 0x210   :  { %3349 = vperm.xlu0 %6291, %v6772_v59  }
 0x211   :  { %6194 = vset.pattern.permute.xlu1 %v9721_v14  ;;  %v7094_v15 = vpop.permute.xlu0 %2829 }
 0x212   :  { %v7074_v35 = vpop.permute.xlu1 %809  ;;  %1468 = vperm.xlu1 %6194, %v6665_v37   ;;  %9755 = vst [vmem:[#allocation63_spill] sm:$0xff] %v7094_v15 }
 0x213   :  { %9750 = vst [vmem:[#allocation58_spill] sm:$0xff] %v7074_v35 }
 0x214   :  { %3805 = vperm.xlu0 %6291, %v6775_v60  }
 0x216   :  { %6195 = vset.pattern.permute.xlu1 %v9722_v22 }
 0x217   :  { %v7081_v3 = vpop.permute.xlu1 %845  ;;  %1487 = vperm.xlu1 %6195, %v6665_v37  }
 0x218   :  { %9752 = vst [vmem:[#allocation60_spill] sm:$0xff] %v7081_v3  ;;  %4027 = vperm.xlu0 %6291, %v6825_v8  }
 0x21b   :  { %1491 = vperm.xlu1 %6195, %v6663_v36  }
 0x21c   :  { %v7088_v12 = vpop.permute.xlu1 %863  ;;  %4483 = vperm.xlu0 %6291, %v7026_v20  }
 0x21d   :  { %9754 = vst [vmem:[#allocation62_spill] sm:$0xff] %v7088_v12  ;;  %v7104_v12 = vpop.permute.xlu0 %3050 }
 0x21e   :  { %9758 = vst [vmem:[#allocation66_spill] sm:$0xff] %v7104_v12 }
 0x21f   :  { %6196 = vset.pattern.permute.xlu1 %v9728_v27 }
 0x220   :  { %1509 = vperm.xlu1 %6196, %v6663_v36   ;;  %6312 = vset.pattern.permute.xlu0 %v9715_v53 }
 0x221   :  { %v7096_v3 = vpop.permute.xlu1 %899  ;;  %2015 = vperm.xlu0 %6312, %v6674_v40  }
 0x222   :  { %9756 = vst [vmem:[#allocation64_spill] sm:$0xff] %v7096_v3  ;;  %v7111_v3 = vpop.permute.xlu0 %171 }
 0x224   :  { %6197 = vset.pattern.permute.xlu1 %v9713_v54 }
 0x225   :  { %1523 = vperm.xlu1 %6197, %v6665_v37   ;;  %2237 = vperm.xlu0 %6312, %v6681_v43  }
 0x226   :  { %v7102_v32 = vpop.permute.xlu1 %917  ;;  %v7119_v12 = vpop.permute.xlu0 %393 }
 0x227   :  { %9757 = vst [vmem:[#allocation65_spill] sm:$0xff] %v7102_v32 }
 0x229   :  { %6198 = vset.pattern.permute.xlu1 %v9731_v18  ;;  %2693 = vperm.xlu0 %6312, %v6690_v47  }
 0x22a   :  { %1541 = vperm.xlu1 %6198, %v6665_v37  }
 0x22b   :  { %v7109_v15 = vpop.permute.xlu1 %1021 }
 0x22c   :  { %9759 = vst [vmem:[#allocation67_spill] sm:$0xff] %v7109_v15  ;;  %v7127_v15 = vpop.permute.xlu0 %849 }
 0x22d   :  { %2915 = vperm.xlu0 %6312, %v6767_v57   ;;  %9762 = vst [vmem:[#allocation70_spill] sm:$0xff] %v7127_v15 }
 0x22e   :  { %1545 = vperm.xlu1 %6198, %v6663_v36  }
 0x230   :  { %v7115_v35 = vpop.permute.xlu1 %1057  ;;  %v7140_v10 = vpop.permute.xlu0 %1071 }
 0x231   :  { %9760 = vst [vmem:[#allocation68_spill] sm:$0xff] %v7115_v35  ;;  %3371 = vperm.xlu0 %6312, %v6770_v58   ;;  %9766 = vst [vmem:[#allocation74_spill] sm:$0xff] %v7140_v10 }
 0x232   :  { %6199 = vset.pattern.permute.xlu1 %v9715_v53 }
 0x233   :  { %1563 = vperm.xlu1 %6199, %v6663_v36  }
 0x235   :  { %v7122_v32 = vpop.permute.xlu1 %1075  ;;  %3593 = vperm.xlu0 %6312, %v6818_v4  }
 0x236   :  { %9761 = vst [vmem:[#allocation69_spill] sm:$0xff] %v7122_v32 }
 0x237   :  { %6201 = vset.pattern.permute.xlu1 %v9718_v29 }
 0x238   :  { %1577 = vperm.xlu1 %6201, %v6665_v37  }
 0x239   :  { %4049 = vperm.xlu0 %6312, %v6823_v7  }
 0x23a   :  { %v7130_v35 = vpop.permute.xlu1 %1111 }
 0x23b   :  { %9763 = vst [vmem:[#allocation71_spill] sm:$0xff] %v7130_v35  ;;  %v7147_v35 = vpop.permute.xlu0 %1527 }
 0x23c   :  { %6202 = vset.pattern.permute.xlu1 %v9736_v9  ;;  %9768 = vst [vmem:[#allocation76_spill] sm:$0xff] %v7147_v35 }
 0x23d   :  { %1595 = vperm.xlu1 %6202, %v6665_v37  }
 0x23f   :  { %v7134_v31 = vpop.permute.xlu1 %1129 }
 0x240   :  { %9764 = vst [vmem:[#allocation72_spill] sm:$0xff] %v7134_v31  ;;  %v7157_v31 = vpop.f32.mrb[18].mxu0 }
 0x241   :  { %1599 = vperm.xlu1 %6202, %v6663_v36   ;;  %v7153_v36 = vpop.permute.xlu0 %1749  ;;  %9772 = vst [vmem:[#allocation80_spill] sm:$0xff] %v7157_v31 }
 0x242   :  { %9770 = vst [vmem:[#allocation78_spill] sm:$0xff] %v7153_v36 }
 0x244   :  { %v7137_v32 = vpop.permute.xlu1 %1247 }
 0x245   :  { %9765 = vst [vmem:[#allocation73_spill] sm:$0xff] %v7137_v32  ;;  %6203 = vset.pattern.permute.xlu1 %v9721_v14  ;;  %v7165_v35 = vpop.permute.xlu0 %2205 }
 0x246   :  { %1699 = vperm.xlu1 %6203, %v6667_v38   ;;  %9775 = vst [vmem:[#allocation83_spill] sm:$0xff] %v7165_v35 }
 0x249   :  { %v7143_v15 = vpop.permute.xlu1 %1265 }
 0x24a   :  { %9767 = vst [vmem:[#allocation75_spill] sm:$0xff] %v7143_v15  ;;  %6204 = vset.pattern.permute.xlu1 %v9722_v22  ;;  %v7160_v15 = vpop.f32.mrb[19].mxu0 }
 0x24b   :  { %1713 = vperm.xlu1 %6204, %v6671_v39   ;;  %9773 = vst [vmem:[#allocation81_spill] sm:$0xff] %v7160_v15  ;;  %4271 = vperm.xlu0 %6312, %v7160_v15  }
 0x24d   :  { %v7149_v37 = vpop.permute.xlu1 %1035 }
 0x24e   :  { %9769 = vst [vmem:[#allocation77_spill] sm:$0xff] %v7149_v37  ;;  %v7168_v37 = vpop.f32.mrb[20].mxu0 }
 0x24f   :  { %6205 = vset.pattern.permute.xlu1 %v9728_v27  ;;  %9776 = vst [vmem:[#allocation84_spill] sm:$0xff] %v7168_v37  ;;  %4727 = vperm.xlu0 %6312, %v7168_v37  }
 0x250   :  { %1731 = vperm.xlu1 %6205, %v6671_v39  }
 0x252   :  { %v7155_v32 = vpop.permute.xlu1 %1053 }
 0x253   :  { %9771 = vst [vmem:[#allocation79_spill] sm:$0xff] %v7155_v32  ;;  %6322 = vset.pattern.permute.xlu0 %v9736_v9  ;;  %v7176_v32 = vpop.permute.xlu0 %2427 }
 0x254   :  { %1735 = vperm.xlu1 %6205, %v6667_v38   ;;  %9778 = vst [vmem:[#allocation86_spill] sm:$0xff] %v7176_v32  ;;  %2503 = vperm.xlu0 %6322, %v6685_v45  }
 0x257   :  { %v7163_v10 = vpop.permute.xlu1 %1089 }
 0x258   :  { %9774 = vst [vmem:[#allocation82_spill] sm:$0xff] %v7163_v10  ;;  %6206 = vset.pattern.permute.xlu1 %v9713_v54  ;;  %2725 = vperm.xlu0 %6322, %v6692_v48   ;;  %v7185_v10 = vpop.permute.xlu0 %2883 }
 0x259   :  { %1753 = vperm.xlu1 %6206, %v6667_v38   ;;  %9780 = vst [vmem:[#allocation88_spill] sm:$0xff] %v7185_v10 }
 0x25c   :  { %v7172_v36 = vpop.permute.xlu1 %1107  ;;  %3181 = vperm.xlu0 %6322, %v6700_v51   ;;  %v7191_v32 = vpop.permute.xlu0 %3105 }
 0x25d   :  { %9777 = vst [vmem:[#allocation85_spill] sm:$0xff] %v7172_v36  ;;  %6207 = vset.pattern.permute.xlu1 %v9731_v18  ;;  %9782 = vst [vmem:[#allocation90_spill] sm:$0xff] %v7191_v32 }
 0x25e   :  { %1767 = vperm.xlu1 %6207, %v6671_v39  }
 0x260   :  { %3403 = vperm.xlu0 %6322, %v6772_v59  }
 0x261   :  { %v7180_v35 = vpop.permute.xlu1 %1143 }
 0x262   :  { %9779 = vst [vmem:[#allocation87_spill] sm:$0xff] %v7180_v35  ;;  %6208 = vset.pattern.permute.xlu1 %v9715_v53  ;;  %v7199_v35 = vpop.permute.xlu0 %3561 }
 0x263   :  { %1785 = vperm.xlu1 %6208, %v6671_v39   ;;  %9784 = vst [vmem:[#allocation92_spill] sm:$0xff] %v7199_v35 }
 0x264   :  { %3859 = vperm.xlu0 %6322, %v6775_v60  }
 0x266   :  { %v7187_v36 = vpop.permute.xlu1 %1242 }
 0x267   :  { %9781 = vst [vmem:[#allocation89_spill] sm:$0xff] %v7187_v36  ;;  %1789 = vperm.xlu1 %6208, %v6667_v38  }
 0x268   :  { %4081 = vperm.xlu0 %6322, %v6825_v8  }
 0x26b   :  { %v7194_v19 = vpop.permute.xlu1 %1279  ;;  %6209 = vset.pattern.permute.xlu1 %v9718_v29 }
 0x26c   :  { %9783 = vst [vmem:[#allocation91_spill] sm:$0xff] %v7194_v19  ;;  %1807 = vperm.xlu1 %6209, %v6667_v38   ;;  %v7209_v19 = vpop.permute.xlu0 %225  ;;  %4537 = vperm.xlu0 %6322, %v7026_v20   ;;  %v4776_v38 = vld [vmem:[%s9613_s3 + $0xa8] sm:$0xff] }
 0x26d   :  { %6092 = vmatprep.subr.msk.mxu1 %vm24_vm0, %v4776_v38 }
 0x26e   :  { %6093 = vmatpush3.xpose.msk.msra.mxu1 %vm24_vm0, %v4776_v38 }
 0x270   :  { %v7201_v10 = vpop.permute.xlu1 %1297  ;;  %6210 = vset.pattern.permute.xlu1 %v9736_v9 }
 0x271   :  { %9785 = vst [vmem:[#allocation93_spill] sm:$0xff] %v7201_v10  ;;  %1821 = vperm.xlu1 %6210, %v6671_v39   ;;  %v7224_v39 = vld [vmem:[%s9612_s2 + $0x8] sm:$0xff] }
 0x272   :  { %6095 = vmatmul.mubr.msk.f32.vlgmr.msra.gmra.mrb[20].mxu1 %vm24_vm0, %v7224_v39 }
 0x274   :  { %v7206_v32 = vpop.permute.xlu1 %1301 }
 0x275   :  { %9786 = vst [vmem:[#allocation94_spill] sm:$0xff] %v7206_v32  ;;  %6211 = vset.pattern.permute.xlu1 %v9721_v14 }
 0x276   :  { %1920 = vperm.xlu1 %6211, %v6676_v41  }
 0x279   :  { %v7216_v35 = vpop.permute.xlu1 %1319 }
 0x27a   :  { %9787 = vst [vmem:[#allocation95_spill] sm:$0xff] %v7216_v35  ;;  %1925 = vperm.xlu1 %6211, %v6674_v40   ;;  %v6384_v35 = vld [vmem:[%s9612_s2] sm:$0xff] }
 0x27b   :  { %6104 = vmatprep.mubr.msk.f32.mxu1 %vm24_vm0, %v6384_v35 }
 0x27e   :  { %v7228_v8 = vpop.permute.xlu1 %1333  ;;  %6212 = vset.pattern.permute.xlu1 %v9722_v22 }
 0x27f   :  { %9788 = vst [vmem:[#allocation96_spill] sm:$0xff] %v7228_v8  ;;  %1943 = vperm.xlu1 %6212, %v6674_v40  }
 0x283   :  { %v7236_v38 = vpop.permute.xlu1 %1351  ;;  %6213 = vset.pattern.permute.xlu1 %v9728_v27 }
 0x284   :  { %9789 = vst [vmem:[#allocation97_spill] sm:$0xff] %v7236_v38  ;;  %1957 = vperm.xlu1 %6213, %v6676_v41  }
 0x287   :  { %v7240_v32 = vpop.permute.xlu1 %1355 }
 0x288   :  { %9790 = vst [vmem:[#allocation98_spill] sm:$0xff] %v7240_v32  ;;  %6216 = vset.pattern.permute.xlu1 %v9713_v54 }
 0x289   :  { %1975 = vperm.xlu1 %6216, %v6676_v41  }
 0x28c   :  { %v7244_v60 = vpop.permute.xlu1 %1373 }
 0x28d   :  { %9791 = vst [vmem:[#allocation99_spill] sm:$0xff] %v7244_v60  ;;  %1979 = vperm.xlu1 %6216, %v6674_v40  }
 0x291   :  { %v7247_v8 = vpop.permute.xlu1 %1468  ;;  %6217 = vset.pattern.permute.xlu1 %v9731_v18 }
 0x292   :  { %9792 = vst [vmem:[#allocation100_spill] sm:$0xff] %v7247_v8  ;;  %1997 = vperm.xlu1 %6217, %v6674_v40  }
 0x296   :  { %v7251_v38 = vpop.permute.xlu1 %1487  ;;  %6218 = vset.pattern.permute.xlu1 %v9715_v53 }
 0x297   :  { %9793 = vst [vmem:[#allocation101_spill] sm:$0xff] %v7251_v38  ;;  %2011 = vperm.xlu1 %6218, %v6676_v41  }
 0x29a   :  { %v7255_v32 = vpop.permute.xlu1 %1491 }
 0x29b   :  { %9794 = vst [vmem:[#allocation102_spill] sm:$0xff] %v7255_v32  ;;  %6219 = vset.pattern.permute.xlu1 %v9718_v29 }
 0x29c   :  { %2029 = vperm.xlu1 %6219, %v6676_v41   ;;  %v5002_v41 = vld [vmem:[%s9613_s3 + $0xb0] sm:$0xff] }
 0x29d   :  { %6097 = vmatprep.subr.msk.mxu0 %vm24_vm0, %v5002_v41 }
 0x29e   :  { %6098 = vmatpush3.xpose.msk.msra.mxu0 %vm24_vm0, %v5002_v41 }
 0x29f   :  { %v7259_v60 = vpop.permute.xlu1 %1509 }
 0x2a0   :  { %9795 = vst [vmem:[#allocation103_spill] sm:$0xff] %v7259_v60  ;;  %2033 = vperm.xlu1 %6219, %v6674_v40   ;;  %v7278_v60 = vpop.permute.xlu0 %447 }
 0x2a1   :  { %6100 = vmatmul.mubr.msk.f32.vlgmr.msra.gmra.mrb[22].mxu0 %vm24_vm0, %v7224_v39 }
 0x2a2   :  { %6109 = vmatprep.mubr.msk.f32.mxu0 %vm24_vm0, %v6384_v35 }
 0x2a4   :  { %v7262_v8 = vpop.permute.xlu1 %1523  ;;  %6220 = vset.pattern.permute.xlu1 %v9736_v9 }
 0x2a5   :  { %9796 = vst [vmem:[#allocation104_spill] sm:$0xff] %v7262_v8  ;;  %2051 = vperm.xlu1 %6220, %v6674_v40   ;;  %v7293_v8 = vpop.f32.mrb[21].mxu0 }
 0x2a6   :  { %9802 = vst [vmem:[#allocation110_spill] sm:$0xff] %v7293_v8  ;;  %4759 = vperm.xlu0 %6322, %v7293_v8  }
 0x2a9   :  { %v7266_v38 = vpop.permute.xlu1 %1541  ;;  %6221 = vset.pattern.permute.xlu1 %v9721_v14 }
 0x2aa   :  { %9797 = vst [vmem:[#allocation105_spill] sm:$0xff] %v7266_v38  ;;  %2146 = vperm.xlu1 %6221, %v6681_v43   ;;  %6324 = vset.pattern.permute.xlu0 %v9728_v27 }
 0x2ad   :  { %v7270_v32 = vpop.permute.xlu1 %1545 }
 0x2ae   :  { %9798 = vst [vmem:[#allocation106_spill] sm:$0xff] %v7270_v32  ;;  %6222 = vset.pattern.permute.xlu1 %v9722_v22  ;;  %v7287_v32 = vpop.permute.xlu0 %903  ;;  %2861 = vperm.xlu0 %6324, %v6767_v57  }
 0x2af   :  { %2165 = vperm.xlu1 %6222, %v6681_v43   ;;  %9800 = vst [vmem:[#allocation108_spill] sm:$0xff] %v7287_v32 }
 0x2b2   :  { %v7281_v40 = vpop.permute.xlu1 %1563 }
 0x2b3   :  { %9799 = vst [vmem:[#allocation107_spill] sm:$0xff] %v7281_v40  ;;  %2169 = vperm.xlu1 %6222, %v6678_v42   ;;  %v7299_v40 = vpop.permute.xlu0 %1125  ;;  %3317 = vperm.xlu0 %6324, %v6770_v58  }
 0x2b4   :  { %9804 = vst [vmem:[#allocation112_spill] sm:$0xff] %v7299_v40 }
 0x2b7   :  { %v7289_v38 = vpop.permute.xlu1 %1577  ;;  %6223 = vset.pattern.permute.xlu1 %v9728_v27 }
 0x2b8   :  { %9801 = vst [vmem:[#allocation109_spill] sm:$0xff] %v7289_v38  ;;  %2187 = vperm.xlu1 %6223, %v6678_v42   ;;  %v7308_v38 = vpop.permute.xlu0 %1581  ;;  %3539 = vperm.xlu0 %6324, %v6818_v4  }
 0x2b9   :  { %9806 = vst [vmem:[#allocation114_spill] sm:$0xff] %v7308_v38 }
 0x2bc   :  { %v7295_v41 = vpop.permute.xlu1 %1595  ;;  %6225 = vset.pattern.permute.xlu1 %v9713_v54  ;;  %v7314_v10 = vpop.permute.xlu0 %1803  ;;  %3995 = vperm.xlu0 %6324, %v6823_v7  }
 0x2bd   :  { %9803 = vst [vmem:[#allocation111_spill] sm:$0xff] %v7295_v41  ;;  %2201 = vperm.xlu1 %6225, %v6681_v43   ;;  %9808 = vst [vmem:[#allocation116_spill] sm:$0xff] %v7314_v10 }
 0x2c0   :  { %v7302_v35 = vpop.permute.xlu1 %1599  ;;  %v7322_v32 = vpop.permute.xlu0 %2259  ;;  %4217 = vperm.xlu0 %6324, %v7160_v15  }
 0x2c1   :  { %9805 = vst [vmem:[#allocation113_spill] sm:$0xff] %v7302_v35  ;;  %6226 = vset.pattern.permute.xlu1 %v9731_v18  ;;  %9810 = vst [vmem:[#allocation118_spill] sm:$0xff] %v7322_v32 }
 0x2c2   :  { %2219 = vperm.xlu1 %6226, %v6681_v43  }
 0x2c4   :  { %v7332_v10 = vpop.permute.xlu0 %2481  ;;  %4673 = vperm.xlu0 %6324, %v7168_v37  }
 0x2c5   :  { %v7310_v41 = vpop.permute.xlu1 %1699  ;;  %9813 = vst [vmem:[#allocation121_spill] sm:$0xff] %v7332_v10 }
 0x2c6   :  { %9807 = vst [vmem:[#allocation115_spill] sm:$0xff] %v7310_v41  ;;  %2223 = vperm.xlu1 %6226, %v6678_v42  }
 0x2ca   :  { %v7317_v35 = vpop.permute.xlu1 %1713  ;;  %6227 = vset.pattern.permute.xlu1 %v9715_v53 }
 0x2cb   :  { %9809 = vst [vmem:[#allocation117_spill] sm:$0xff] %v7317_v35  ;;  %2241 = vperm.xlu1 %6227, %v6678_v42  }
 0x2cf   :  { %v7324_v38 = vpop.permute.xlu1 %1731  ;;  %6228 = vset.pattern.permute.xlu1 %v9718_v29 }
 0x2d0   :  { %9811 = vst [vmem:[#allocation119_spill] sm:$0xff] %v7324_v38  ;;  %2255 = vperm.xlu1 %6228, %v6681_v43  }
 0x2d3   :  { %v7329_v41 = vpop.permute.xlu1 %1735 }
 0x2d4   :  { %9812 = vst [vmem:[#allocation120_spill] sm:$0xff] %v7329_v41  ;;  %6229 = vset.pattern.permute.xlu1 %v9736_v9 }
 0x2d5   :  { %2273 = vperm.xlu1 %6229, %v6681_v43  }
 0x2d8   :  { %v7336_v7 = vpop.permute.xlu1 %1753 }
 0x2d9   :  { %9814 = vst [vmem:[#allocation122_spill] sm:$0xff] %v7336_v7  ;;  %2277 = vperm.xlu1 %6229, %v6678_v42  }
 0x2dd   :  { %v7339_v32 = vpop.permute.xlu1 %1767  ;;  %6230 = vset.pattern.permute.xlu1 %v9721_v14 }
 0x2de   :  { %9815 = vst [vmem:[#allocation123_spill] sm:$0xff] %v7339_v32  ;;  %2377 = vperm.xlu1 %6230, %v6685_v45  }
 0x2e2   :  { %v7343_v15 = vpop.permute.xlu1 %1785  ;;  %6231 = vset.pattern.permute.xlu1 %v9722_v22 }
 0x2e3   :  { %9816 = vst [vmem:[#allocation124_spill] sm:$0xff] %v7343_v15  ;;  %2391 = vperm.xlu1 %6231, %v6688_v46  }
 0x2e6   :  { %v7347_v10 = vpop.permute.xlu1 %1789 }
 0x2e7   :  { %9817 = vst [vmem:[#allocation125_spill] sm:$0xff] %v7347_v10  ;;  %6232 = vset.pattern.permute.xlu1 %v9728_v27 }
 0x2e8   :  { %2409 = vperm.xlu1 %6232, %v6688_v46  }
 0x2eb   :  { %v7351_v43 = vpop.permute.xlu1 %1807 }
 0x2ec   :  { %9818 = vst [vmem:[#allocation126_spill] sm:$0xff] %v7351_v43  ;;  %2413 = vperm.xlu1 %6232, %v6685_v45  }
 0x2f0   :  { %v7354_v42 = vpop.permute.xlu1 %1821  ;;  %6233 = vset.pattern.permute.xlu1 %v9713_v54 }
 0x2f1   :  { %9819 = vst [vmem:[#allocation127_spill] sm:$0xff] %v7354_v42  ;;  %2431 = vperm.xlu1 %6233, %v6685_v45  }
 0x2f5   :  { %v7358_v37 = vpop.permute.xlu1 %1920  ;;  %6234 = vset.pattern.permute.xlu1 %v9731_v18 }
 0x2f6   :  { %9820 = vst [vmem:[#allocation128_spill] sm:$0xff] %v7358_v37  ;;  %2445 = vperm.xlu1 %6234, %v6688_v46  }
 0x2f9   :  { %v7362_v10 = vpop.permute.xlu1 %1925 }
 0x2fa   :  { %9821 = vst [vmem:[#allocation129_spill] sm:$0xff] %v7362_v10  ;;  %6235 = vset.pattern.permute.xlu1 %v9715_v53 }
 0x2fb   :  { %2463 = vperm.xlu1 %6235, %v6688_v46  }
 0x2fe   :  { %v7366_v43 = vpop.permute.xlu1 %1943 }
 0x2ff   :  { %9822 = vst [vmem:[#allocation130_spill] sm:$0xff] %v7366_v43  ;;  %2467 = vperm.xlu1 %6235, %v6685_v45  }
 0x303   :  { %v7369_v7 = vpop.permute.xlu1 %1957  ;;  %6236 = vset.pattern.permute.xlu1 %v9718_v29 }
 0x304   :  { %9823 = vst [vmem:[#allocation131_spill] sm:$0xff] %v7369_v7  ;;  %2485 = vperm.xlu1 %6236, %v6685_v45  }
 0x308   :  { %v7373_v41 = vpop.permute.xlu1 %1975  ;;  %6237 = vset.pattern.permute.xlu1 %v9736_v9 }
 0x309   :  { %9824 = vst [vmem:[#allocation132_spill] sm:$0xff] %v7373_v41  ;;  %2499 = vperm.xlu1 %6237, %v6688_v46  }
 0x30c   :  { %v7377_v10 = vpop.permute.xlu1 %1979 }
 0x30d   :  { %9825 = vst [vmem:[#allocation133_spill] sm:$0xff] %v7377_v10  ;;  %6238 = vset.pattern.permute.xlu1 %v9721_v14 }
 0x30e   :  { %2598 = vperm.xlu1 %6238, %v6692_v48  }
 0x311   :  { %v7381_v43 = vpop.permute.xlu1 %1997 }
 0x312   :  { %9826 = vst [vmem:[#allocation134_spill] sm:$0xff] %v7381_v43  ;;  %2603 = vperm.xlu1 %6238, %v6690_v47  }
 0x316   :  { %v7384_v7 = vpop.permute.xlu1 %2011  ;;  %6239 = vset.pattern.permute.xlu1 %v9722_v22 }
 0x317   :  { %9827 = vst [vmem:[#allocation135_spill] sm:$0xff] %v7384_v7  ;;  %2621 = vperm.xlu1 %6239, %v6690_v47  }
 0x31b   :  { %v7388_v45 = vpop.permute.xlu1 %2029  ;;  %6240 = vset.pattern.permute.xlu1 %v9728_v27 }
 0x31c   :  { %9828 = vst [vmem:[#allocation136_spill] sm:$0xff] %v7388_v45  ;;  %2635 = vperm.xlu1 %6240, %v6692_v48  }
 0x31f   :  { %v7392_v46 = vpop.permute.xlu1 %2033 }
 0x320   :  { %9829 = vst [vmem:[#allocation137_spill] sm:$0xff] %v7392_v46  ;;  %6242 = vset.pattern.permute.xlu1 %v9713_v54  ;;  %v120_v46 = vlaneseq }
 0x321   :  { %2653 = vperm.xlu1 %6242, %v6692_v48  }
 0x324   :  { %v7396_v43 = vpop.permute.xlu1 %2051 }
 0x325   :  { %9830 = vst [vmem:[#allocation138_spill] sm:$0xff] %v7396_v43  ;;  %2657 = vperm.xlu1 %6242, %v6690_v47   ;;  %v121_v43 = vshrl.u32 %v120_v46, 7 }
 0x327   :  { %v7419_v37 = vsub.s32 1, %v121_v43  ;;  %v7431_v46 = vsub.s32 2, %v121_v43  ;;  %v7443_v38 = vsub.s32 3, %v121_v43  ;;  %v7457_v40 = vsub.s32 5, %v121_v43 }
 0x328   :  { %v7474_v58 = vsub.s32 6, %v121_v43 }
 0x329   :  { %v7399_v10 = vpop.permute.xlu1 %2146  ;;  %6243 = vset.pattern.permute.xlu1 %v9731_v18  ;;  %9835 = vst [vmem:[#allocation143_spill] sm:$0xff] %v7419_v37  ;;  %9837 = vst [vmem:[#allocation145_spill] sm:$0xff] %v7431_v46 }
 0x32a   :  { %9831 = vst [vmem:[#allocation139_spill] sm:$0xff] %v7399_v10  ;;  %2675 = vperm.xlu1 %6243, %v6690_v47   ;;  %v7413_v10 = vsub.s32 0, %v121_v43 }
 0x32e   :  { %v7403_v45 = vpop.permute.xlu1 %2165  ;;  %6244 = vset.pattern.permute.xlu1 %v9715_v53 }
 0x32f   :  { %9832 = vst [vmem:[#allocation140_spill] sm:$0xff] %v7403_v45  ;;  %2689 = vperm.xlu1 %6244, %v6692_v48   ;;  %v109_v45 = vld [vmem:[%s9614_s4] sm:$0xff] }
 0x330   :  { %v7422_v42 = vrot.slane %v109_v45, %v7413_v10 }
 0x332   :  { %v7407_v7 = vpop.permute.xlu1 %2169 }
 0x333   :  { %9833 = vst [vmem:[#allocation141_spill] sm:$0xff] %v7407_v7  ;;  %6245 = vset.pattern.permute.xlu1 %v9718_v29 }
 0x334   :  { %2707 = vperm.xlu1 %6245, %v6692_v48   ;;  %v7429_v48 = vrot.slane %v109_v45, %v7419_v37 }
 0x336   :  { %v142_v15 = vsub.f32 %v6884_v23, %v7429_v48 }
 0x337   :  { %v7411_v41 = vpop.permute.xlu1 %2187 }
 0x338   :  { %9834 = vst [vmem:[#allocation142_spill] sm:$0xff] %v7411_v41  ;;  %2711 = vperm.xlu1 %6245, %v6690_v47   ;;  %v124_v41 = vsub.f32 %v7018_v11, %v7422_v42  ;;  %v144_v4 = vand.u32 2147483647, %v142_v15  ;;  %v7449_v11 = vrot.slane %v109_v45, %v7443_v38 }
 0x33a   :  { %v178_v8 = vsub.f32 %v6891_v25, %v7449_v11 }
 0x33c   :  { %v7424_v7 = vpop.permute.xlu1 %2201  ;;  %6246 = vset.pattern.permute.xlu1 %v9736_v9 }
 0x33d   :  { %9836 = vst [vmem:[#allocation144_spill] sm:$0xff] %v7424_v7  ;;  %2729 = vperm.xlu1 %6246, %v6690_v47   ;;  %v7441_v7 = vrot.slane %v109_v45, %v7431_v46  ;;  %v126_v47 = vand.u32 2147483647, %v124_v41 }
 0x33f   :  { %v160_v35 = vsub.f32 %v6896_v2, %v7441_v7  ;;  %v146_v36 = vadd.f32 %v144_v4, %v126_v47  ;;  %v7461_v2 = vpop.permute.xlu0 %2937  ;;  %v7470_v4 = vrot.slane %v109_v45, %v7457_v40  ;;  %v180_v47 = vand.u32 2147483647, %v178_v8 }
 0x340   :  { %9840 = vst [vmem:[#allocation148_spill] sm:$0xff] %v7461_v2  ;;  %v7486_v8 = vrot.slane %v109_v45, %v7474_v58 }
 0x341   :  { %v7437_v32 = vpop.permute.xlu1 %2219  ;;  %6247 = vset.pattern.permute.xlu1 %v9721_v14  ;;  %v162_v41 = vand.u32 2147483647, %v160_v35 }
 0x342   :  { %9838 = vst [vmem:[#allocation146_spill] sm:$0xff] %v7437_v32  ;;  %2824 = vperm.xlu1 %6247, %v6767_v57   ;;  %v7453_v32 = vsub.s32 4, %v121_v43  ;;  %v232_v6 = vsub.f32 %v6906_v17, %v7486_v8 }
 0x343   :  { %v164_v20 = vadd.f32 %v162_v41, %v146_v36  ;;  %v7476_v59 = vpop.permute.xlu0 %3159  ;;  %v7481_v36 = vpop.f32.mrb[19].mxu1  ;;  %v214_v41 = vsub.f32 %v6839_v13, %v7470_v4 }
 0x344   :  { %v7464_v15 = vrot.slane %v109_v45, %v7453_v32  ;;  %9842 = vst [vmem:[#allocation150_spill] sm:$0xff] %v7476_v59  ;;  %9844 = vst [vmem:[#allocation152_spill] sm:$0xff] %v7481_v36  ;;  %v234_v17 = vand.u32 2147483647, %v232_v6 }
 0x345   :  { %v7451_v23 = vpop.permute.xlu1 %2223  ;;  %v182_v25 = vadd.f32 %v180_v47, %v164_v20  ;;  %v7493_v47 = vsub.s32 7, %v121_v43 }
 0x346   :  { %9839 = vst [vmem:[#allocation147_spill] sm:$0xff] %v7451_v23  ;;  %6248 = vset.pattern.permute.xlu1 %v9722_v22  ;;  %v196_v35 = vsub.f32 %v6898_v56, %v7464_v15  ;;  %v7489_v56 = vpop.f32.mrb[20].mxu1 }
 0x347   :  { %2843 = vperm.xlu1 %6248, %v6767_v57   ;;  %9845 = vst [vmem:[#allocation153_spill] sm:$0xff] %v7489_v56  ;;  %v7491_v20 = vpop.f32.mrb[21].mxu1  ;;  %v7505_v16 = vrot.slane %v109_v45, %v7493_v47 }
 0x348   :  { %9846 = vst [vmem:[#allocation154_spill] sm:$0xff] %v7491_v20  ;;  %4895 = vperm.xlu0 %6324, %v7491_v20  }
 0x34a   :  { %v7466_v23 = vpop.permute.xlu1 %2241 }
 0x34b   :  { %9841 = vst [vmem:[#allocation149_spill] sm:$0xff] %v7466_v23  ;;  %2847 = vperm.xlu1 %6248, %v6695_v49   ;;  %v198_v23 = vand.u32 2147483647, %v196_v35  ;;  %v7501_v35 = vpop.permute.xlu0 %3615 }
 0x34c   :  { %9848 = vst [vmem:[#allocation156_spill] sm:$0xff] %v7501_v35  ;;  %6328 = vset.pattern.permute.xlu0 %v9721_v14 }
 0x34d   :  { %v200_v59 = vadd.f32 %v198_v23, %v182_v25  ;;  %v335_v23 = vld [vmem:[%s9614_s4 + $0x8] sm:$0xff]  ;;  %3507 = vperm.xlu0 %6328, %v6721_v55   ;;  %v250_v25 = vsub.f32 %v6914_v34, %v7505_v16 }
 0x34e   :  { %v7518_v45 = vrot.slane %v335_v23, %v7413_v10  ;;  %v7529_v34 = vrot.slane %v335_v23, %v7419_v37 }
 0x34f   :  { %v7478_v2 = vpop.permute.xlu1 %2255  ;;  %6249 = vset.pattern.permute.xlu1 %v9728_v27  ;;  %v252_v35 = vand.u32 2147483647, %v250_v25  ;;  %v7538_v25 = vrot.slane %v335_v23, %v7431_v46 }
 0x350   :  { %9843 = vst [vmem:[#allocation151_spill] sm:$0xff] %v7478_v2  ;;  %2865 = vperm.xlu1 %6249, %v6695_v49   ;;  %v216_v2 = vand.u32 2147483647, %v214_v41  ;;  %v350_v6 = vsub.f32 %v7037_v28, %v7518_v45  ;;  %v7541_v28 = vrot.slane %v335_v23, %v7443_v38 }
 0x351   :  { %3728 = vperm.xlu0 %6328, %v6777_v61  }
 0x352   :  { %v218_v43 = vadd.f32 %v216_v2, %v200_v59  ;;  %v7521_v2 = vpop.permute.xlu0 %3837 }
 0x353   :  { %9850 = vst [vmem:[#allocation158_spill] sm:$0xff] %v7521_v2 }
 0x354   :  { %v7498_v13 = vpop.permute.xlu1 %2273  ;;  %6250 = vset.pattern.permute.xlu1 %v9713_v54  ;;  %v236_v59 = vadd.f32 %v234_v17, %v218_v43  ;;  %v368_v43 = vsub.f32 %v6919_v21, %v7529_v34  ;;  %v352_v17 = vand.u32 2147483647, %v350_v6  ;;  %v386_v21 = vsub.f32 %v6926_v24, %v7538_v25 }
 0x355   :  { %9847 = vst [vmem:[#allocation155_spill] sm:$0xff] %v7498_v13  ;;  %2879 = vperm.xlu1 %6250, %v6767_v57   ;;  %4185 = vperm.xlu0 %6328, %v7157_v31  }
 0x356   :  { %v7535_v2 = vpop.permute.xlu0 %583 }
 0x358   :  { %v7514_v41 = vpop.permute.xlu1 %2277 }
 0x359   :  { %9849 = vst [vmem:[#allocation157_spill] sm:$0xff] %v7514_v41  ;;  %6251 = vset.pattern.permute.xlu1 %v9731_v18  ;;  %v254_v41 = vadd.f32 %v252_v35, %v236_v59  ;;  %4406 = vperm.xlu0 %6328, %v7481_v36   ;;  %v370_v35 = vand.u32 2147483647, %v368_v43  ;;  %v404_v59 = vsub.f32 %v7119_v12, %v7541_v28 }
 0x35a   :  { %2897 = vperm.xlu1 %6251, %v6767_v57   ;;  %v7552_v55 = vpop.permute.xlu0 %1039 }
 0x35b   :  { %9853 = vst [vmem:[#allocation161_spill] sm:$0xff] %v7552_v55  ;;  %v406_v43 = vand.u32 2147483647, %v404_v59 }
 0x35d   :  { %v7526_v20 = vpop.permute.xlu1 %2377  ;;  %4863 = vperm.xlu0 %6328, %v7489_v56  }
 0x35e   :  { %9851 = vst [vmem:[#allocation159_spill] sm:$0xff] %v7526_v20  ;;  %2901 = vperm.xlu1 %6251, %v6695_v49   ;;  %v354_v20 = vadd.f32 %v352_v17, %v254_v41  ;;  %v7559_v41 = vrot.slane %v335_v23, %v7453_v32  ;;  %v388_v17 = vand.u32 2147483647, %v386_v21  ;;  %v125_v21 = vsub.f32 %v7029_v50, %v7422_v42 }
 0x35f   :  { %v7586_v50 = vrot.slane %v335_v23, %v7493_v47 }
 0x360   :  { %v372_v6 = vadd.f32 %v370_v35, %v354_v20  ;;  %v422_v24 = vsub.f32 %v6933_v26, %v7559_v41  ;;  %v7567_v35 = vrot.slane %v335_v23, %v7457_v40 }
 0x362   :  { %v7543_v13 = vpop.permute.xlu1 %2391  ;;  %6252 = vset.pattern.permute.xlu1 %v9715_v53  ;;  %v390_v12 = vadd.f32 %v388_v17, %v372_v6  ;;  %v424_v59 = vand.u32 2147483647, %v422_v24  ;;  %v440_v26 = vsub.f32 %v6941_v30, %v7567_v35  ;;  %v143_v17 = vsub.f32 %v6795_v62, %v7429_v48 }
 0x363   :  { %9852 = vst [vmem:[#allocation160_spill] sm:$0xff] %v7543_v13  ;;  %2919 = vperm.xlu1 %6252, %v6695_v49   ;;  %v161_v30 = vsub.f32 %v6800_v63, %v7441_v7  ;;  %v179_v62 = vsub.f32 %v7111_v3, %v7449_v11  ;;  %v5228_v3 = vld [vmem:[%s9613_s3 + $0xb8] sm:$0xff] }
 0x364   :  { %v408_v13 = vadd.f32 %v406_v43, %v390_v12  ;;  %v127_v43 = vand.u32 2147483647, %v125_v21  ;;  %v145_v24 = vand.u32 2147483647, %v143_v17  ;;  %6102 = vmatprep.subr.msk.mxu1 %vm24_vm0, %v5228_v3 }
 0x365   :  { %v181_v11 = vand.u32 2147483647, %v179_v62  ;;  %6103 = vmatpush3.xpose.msk.msra.mxu1 %vm24_vm0, %v5228_v3 }
 0x367   :  { %v7554_v31 = vpop.permute.xlu1 %2409  ;;  %6253 = vset.pattern.permute.xlu1 %v9718_v29 }
 0x368   :  { %9854 = vst [vmem:[#allocation162_spill] sm:$0xff] %v7554_v31  ;;  %2933 = vperm.xlu1 %6253, %v6767_v57   ;;  %v7570_v31 = vrot.slane %v335_v23, %v7474_v58  ;;  %6105 = vmatmul.mubr.msk.f32.vlgmr.msra.gmra.mrb[22].mxu1 %vm24_vm0, %v7224_v39 }
 0x36a   :  { %v458_v6 = vsub.f32 %v7278_v60, %v7570_v31  ;;  %v7593_v60 = vld [vmem:[%s9614_s4 + $0x10] sm:$0xff] }
 0x36b   :  { %v7564_v20 = vpop.permute.xlu1 %2413  ;;  %v7604_v63 = vrot.slane %v7593_v60, %v7413_v10  ;;  %v7608_v7 = vrot.slane %v7593_v60, %v7419_v37 }
 0x36c   :  { %9855 = vst [vmem:[#allocation163_spill] sm:$0xff] %v7564_v20  ;;  %6254 = vset.pattern.permute.xlu1 %v9736_v9  ;;  %v426_v20 = vadd.f32 %v424_v59, %v408_v13  ;;  %v460_v42 = vand.u32 2147483647, %v458_v6  ;;  %v147_v13 = vadd.f32 %v145_v24, %v127_v43  ;;  %v197_v6 = vsub.f32 %v6805_v0, %v7464_v15 }
 0x36d   :  { %2951 = vperm.xlu1 %6254, %v6767_v57   ;;  %v442_v57 = vand.u32 2147483647, %v440_v26  ;;  %v576_v21 = vsub.f32 %v7033_v44, %v7604_v63  ;;  %v594_v59 = vsub.f32 %v7535_v2, %v7608_v7  ;;  %v7619_v26 = vpop.permute.xlu0 %1261  ;;  %v7632_v44 = vrot.slane %v7593_v60, %v7431_v46 }
 0x36e   :  { %v215_v0 = vsub.f32 %v6810_v1, %v7470_v4  ;;  %v233_v15 = vsub.f32 %v7209_v19, %v7486_v8  ;;  %v9859_v8 = vld [vmem:[#allocation51_spill] sm:$0xff] }
 0x36f   :  { %v444_v48 = vadd.f32 %v442_v57, %v426_v20  ;;  %v578_v2 = vand.u32 2147483647, %v576_v21  ;;  %v596_v24 = vand.u32 2147483647, %v594_v59  ;;  %v612_v62 = vsub.f32 %v7040_v33, %v7632_v44 }
 0x370   :  { %v7582_v55 = vpop.permute.xlu1 %2431  ;;  %v217_v1 = vand.u32 2147483647, %v215_v0  ;;  %v235_v19 = vand.u32 2147483647, %v233_v15  ;;  %v7652_v33 = vrot.slane %v7593_v60, %v7453_v32  ;;  %v9863_v0 = vld [vmem:[#allocation14_spill] sm:$0xff] }
 0x371   :  { %9856 = vst [vmem:[#allocation164_spill] sm:$0xff] %v7582_v55  ;;  %2955 = vperm.xlu1 %6254, %v6695_v49   ;;  %v476_v49 = vsub.f32 %v6948_v5, %v7586_v50  ;;  %v462_v12 = vadd.f32 %v460_v42, %v444_v48  ;;  %v163_v5 = vand.u32 2147483647, %v161_v30  ;;  %v199_v30 = vand.u32 2147483647, %v197_v6  ;;  %v7640_v48 = vpop.permute.xlu0 %1717  ;;  %v9887_v55 = vld [vmem:[#allocation21_spill] sm:$0xff] }
 0x372   :  { %v614_v4 = vand.u32 2147483647, %v612_v62  ;;  %v351_v15 = vsub.f32 %v9863_v0, %v7518_v45  ;;  %v9867_v45 = vld [vmem:[#allocation53_spill] sm:$0xff] }
 0x373   :  { %v478_v20 = vand.u32 2147483647, %v476_v49  ;;  %v165_v17 = vadd.f32 %v163_v5, %v147_v13 }
 0x374   :  { %v7667_v62 = vpop.f32.mrb[22].mxu0 }
 0x375   :  { %v7599_v23 = vpop.permute.xlu1 %2445  ;;  %6256 = vset.pattern.permute.xlu1 %v9721_v14  ;;  %v480_v43 = vadd.f32 %v478_v20, %v462_v12  ;;  %v183_v42 = vadd.f32 %v181_v11, %v165_v17  ;;  %v7647_v12 = vrot.slane %v7593_v60, %v7443_v38  ;;  %v9860_v11 = vld [vmem:[#allocation11_spill] sm:$0xff]  ;;  %v7660_v17 = vpop.permute.xlu0 %1939 }
 0x376   :  { %3055 = vperm.xlu1 %6256, %v6700_v51   ;;  %v251_v20 = vsub.f32 %v9860_v11, %v7505_v16  ;;  %9864 = vst [vmem:[#allocation11_spill] sm:$0xff] %v7667_v62  ;;  %v7671_v16 = vrot.slane %v7593_v60, %v7457_v40 }
 0x377   :  { %v580_v49 = vadd.f32 %v578_v2, %v480_v43  ;;  %v201_v13 = vadd.f32 %v199_v30, %v183_v42  ;;  %v630_v5 = vsub.f32 %v9859_v8, %v7647_v12  ;;  %v9862_v42 = vld [vmem:[#allocation20_spill] sm:$0xff] }
 0x378   :  { %v648_v2 = vsub.f32 %v9862_v42, %v7652_v33  ;;  %v253_v30 = vand.u32 2147483647, %v251_v20  ;;  %v353_v20 = vand.u32 2147483647, %v351_v15  ;;  %v9872_v15 = vld [vmem:[#allocation16_spill] sm:$0xff] }
 0x379   :  { %v598_v3 = vadd.f32 %v596_v24, %v580_v49  ;;  %v219_v21 = vadd.f32 %v217_v1, %v201_v13  ;;  %v632_v24 = vand.u32 2147483647, %v630_v5  ;;  %v7682_v8 = vpop.permute.xlu0 %2395  ;;  %v9869_v5 = vld [vmem:[#allocation9_spill] sm:$0xff] }
 0x37a   :  { %v7624_v57 = vpop.permute.xlu1 %2463  ;;  %6257 = vset.pattern.permute.xlu1 %v9722_v22  ;;  %9868 = vst [vmem:[#allocation53_spill] sm:$0xff] %v7682_v8  ;;  %v369_v11 = vsub.f32 %v9869_v5, %v7529_v34  ;;  %v9871_v34 = vld [vmem:[#allocation54_spill] sm:$0xff]  ;;  %v9875_v5 = vld [vmem:[#allocation32_spill] sm:$0xff] }
 0x37b   :  { %9857 = vst [vmem:[#allocation165_spill] sm:$0xff] %v7624_v57  ;;  %3069 = vperm.xlu1 %6257, %v6702_v52   ;;  %v616_v6 = vadd.f32 %v614_v4, %v598_v3  ;;  %v237_v43 = vadd.f32 %v235_v19, %v219_v21  ;;  %v7676_v3 = vpop.f32.mrb[23].mxu0  ;;  %v650_v19 = vand.u32 2147483647, %v648_v2  ;;  %v666_v4 = vsub.f32 %v9867_v45, %v7671_v16  ;;  %v9899_v8 = vld [vmem:[#allocation6_spill] sm:$0xff] }
 0x37c   :  { %9866 = vst [vmem:[#allocation14_spill] sm:$0xff] %v7676_v3  ;;  %5084 = vperm.xlu0 %6328, %v7676_v3   ;;  %v7688_v21 = vrot.slane %v7593_v60, %v7474_v58  ;;  %v7696_v2 = vrot.slane %v7593_v60, %v7493_v47  ;;  %v371_v0 = vand.u32 2147483647, %v369_v11  ;;  %v7709_v60 = vld [vmem:[%s9614_s4 + $0x18] sm:$0xff]  ;;  %v9876_v11 = vld [vmem:[#allocation80_spill] sm:$0xff] }
 0x37d   :  { %v634_v49 = vadd.f32 %v632_v24, %v616_v6  ;;  %v255_v1 = vadd.f32 %v253_v30, %v237_v43  ;;  %v668_v24 = vand.u32 2147483647, %v666_v4 }
 0x37e   :  { %v7642_v39 = vpop.permute.xlu1 %2467  ;;  %v684_v30 = vsub.f32 %v9871_v34, %v7688_v21 }
 0x37f   :  { %9858 = vst [vmem:[#allocation166_spill] sm:$0xff] %v7642_v39  ;;  %6258 = vset.pattern.permute.xlu1 %v9728_v27  ;;  %v652_v6 = vadd.f32 %v650_v19, %v634_v49  ;;  %v355_v43 = vadd.f32 %v353_v20, %v255_v1  ;;  %v387_v49 = vsub.f32 %v9872_v15, %v7538_v25  ;;  %v7704_v19 = vpop.permute.xlu0 %2617 }
 0x380   :  { %3087 = vperm.xlu1 %6258, %v6702_v52   ;;  %6335 = vset.pattern.permute.xlu0 %v9713_v54  ;;  %9873 = vst [vmem:[#allocation54_spill] sm:$0xff] %v7704_v19  ;;  %v702_v20 = vsub.f32 %v9875_v5, %v7696_v2  ;;  %v686_v34 = vand.u32 2147483647, %v684_v30  ;;  %v7722_v15 = vrot.slane %v7709_v60, %v7413_v10  ;;  %v9878_v5 = vld [vmem:[#allocation56_spill] sm:$0xff] }
 0x381   :  { %3783 = vperm.xlu0 %6335, %v6777_v61   ;;  %v670_v1 = vadd.f32 %v668_v24, %v652_v6  ;;  %v373_v45 = vadd.f32 %v371_v0, %v355_v43  ;;  %v389_v25 = vand.u32 2147483647, %v387_v49  ;;  %v9877_v6 = vld [vmem:[#allocation17_spill] sm:$0xff] }
 0x382   :  { %v405_v24 = vsub.f32 %v9877_v6, %v7541_v28  ;;  %v802_v30 = vsub.f32 %v9878_v5, %v7722_v15  ;;  %v9881_v28 = vld [vmem:[#allocation15_spill] sm:$0xff]  ;;  %v9882_v5 = vld [vmem:[#allocation58_spill] sm:$0xff] }
 0x383   :  { %v7658_v59 = vpop.permute.xlu1 %2485  ;;  %v688_v43 = vadd.f32 %v686_v34, %v670_v1  ;;  %v391_v0 = vadd.f32 %v389_v25, %v373_v45  ;;  %v423_v49 = vsub.f32 %v9881_v28, %v7559_v41  ;;  %v7736_v1 = vrot.slane %v7709_v60, %v7419_v37 }
 0x384   :  { %9861 = vst [vmem:[#allocation51_spill] sm:$0xff] %v7658_v59  ;;  %3091 = vperm.xlu1 %6258, %v6700_v51   ;;  %v7726_v59 = vpop.permute.xlu0 %3073  ;;  %v407_v6 = vand.u32 2147483647, %v405_v24  ;;  %v7740_v34 = vrot.slane %v7709_v60, %v7431_v46  ;;  %v804_v25 = vand.u32 2147483647, %v802_v30  ;;  %v9883_v24 = vld [vmem:[#allocation19_spill] sm:$0xff] }
 0x385   :  { %4239 = vperm.xlu0 %6335, %v9876_v11   ;;  %9879 = vst [vmem:[#allocation32_spill] sm:$0xff] %v7726_v59  ;;  %v820_v59 = vsub.f32 %v9882_v5, %v7736_v1  ;;  %v425_v41 = vand.u32 2147483647, %v423_v49  ;;  %v441_v28 = vsub.f32 %v9883_v24, %v7567_v35  ;;  %v9886_v30 = vld [vmem:[#allocation25_spill] sm:$0xff]  ;;  %v459_v35 = vsub.f32 %v9887_v55, %v7570_v31  ;;  %v9891_v31 = vld [vmem:[#allocation30_spill] sm:$0xff] }
 0x386   :  { %v7760_v24 = vrot.slane %v7709_v60, %v7443_v38 }
 0x387   :  { %v822_v5 = vand.u32 2147483647, %v820_v59  ;;  %v443_v49 = vand.u32 2147483647, %v441_v28  ;;  %v9889_v59 = vld [vmem:[#allocation60_spill] sm:$0xff] }
 0x388   :  { %v7673_v13 = vpop.permute.xlu1 %2499  ;;  %6259 = vset.pattern.permute.xlu1 %v9713_v54  ;;  %v461_v55 = vand.u32 2147483647, %v459_v35  ;;  %v9893_v35 = vld [vmem:[#allocation62_spill] sm:$0xff] }
 0x389   :  { %9865 = vst [vmem:[#allocation20_spill] sm:$0xff] %v7673_v13  ;;  %3109 = vperm.xlu1 %6259, %v6700_v51   ;;  %4461 = vperm.xlu0 %6335, %v7481_v36  }
 0x38d   :  { %v7690_v42 = vpop.permute.xlu1 %2598  ;;  %6260 = vset.pattern.permute.xlu1 %v9731_v18  ;;  %4917 = vperm.xlu0 %6335, %v7489_v56  }
 0x38e   :  { %9870 = vst [vmem:[#allocation9_spill] sm:$0xff] %v7690_v42  ;;  %3123 = vperm.xlu1 %6260, %v6702_v52  }
 0x391   :  { %v7711_v4 = vpop.permute.xlu1 %2603  ;;  %5139 = vperm.xlu0 %6335, %v7676_v3  }
 0x392   :  { %9874 = vst [vmem:[#allocation16_spill] sm:$0xff] %v7711_v4  ;;  %6261 = vset.pattern.permute.xlu1 %v9715_v53  ;;  %v704_v4 = vand.u32 2147483647, %v702_v20  ;;  %v409_v20 = vadd.f32 %v407_v6, %v391_v0  ;;  %v838_v6 = vsub.f32 %v9886_v30, %v7740_v34  ;;  %v477_v30 = vsub.f32 %v9891_v31, %v7586_v50 }
 0x393   :  { %3141 = vperm.xlu1 %6261, %v6702_v52  }
 0x394   :  { %v706_v45 = vadd.f32 %v704_v4, %v688_v43  ;;  %v7750_v43 = vpop.permute.xlu0 %3295  ;;  %v427_v0 = vadd.f32 %v425_v41, %v409_v20  ;;  %v840_v20 = vand.u32 2147483647, %v838_v6  ;;  %v856_v41 = vsub.f32 %v9889_v59, %v7760_v24  ;;  %v9894_v59 = vld [vmem:[#allocation7_spill] sm:$0xff] }
 0x395   :  { %9885 = vst [vmem:[#allocation15_spill] sm:$0xff] %v7750_v43  ;;  %6339 = vset.pattern.permute.xlu0 %v9718_v29  ;;  %v479_v31 = vand.u32 2147483647, %v477_v30  ;;  %v9900_v30 = vld [vmem:[#allocation33_spill] sm:$0xff] }
 0x396   :  { %v7728_v39 = vpop.permute.xlu1 %2621  ;;  %v806_v4 = vadd.f32 %v804_v25, %v706_v45  ;;  %4293 = vperm.xlu0 %6339, %v9876_v11  }
 0x397   :  { %9880 = vst [vmem:[#allocation17_spill] sm:$0xff] %v7728_v39  ;;  %3145 = vperm.xlu1 %6261, %v6700_v51  }
 0x398   :  { %v824_v45 = vadd.f32 %v822_v5, %v806_v4  ;;  %v7768_v28 = vpop.permute.xlu0 %3751  ;;  %v7776_v4 = vrot.slane %v7709_v60, %v7453_v32  ;;  %v7783_v5 = vrot.slane %v7709_v60, %v7457_v40 }
 0x399   :  { %9890 = vst [vmem:[#allocation19_spill] sm:$0xff] %v7768_v28  ;;  %v9895_v28 = vld [vmem:[#allocation31_spill] sm:$0xff] }
 0x39a   :  { %v874_v50 = vsub.f32 %v9893_v35, %v7776_v4  ;;  %v577_v43 = vsub.f32 %v9895_v28, %v7604_v63  ;;  %4515 = vperm.xlu0 %6339, %v7481_v36   ;;  %v7803_v63 = vrot.slane %v7709_v60, %v7474_v58 }
 0x39b   :  { %v7747_v39 = vpop.permute.xlu1 %2635  ;;  %6262 = vset.pattern.permute.xlu1 %v9718_v29 }
 0x39c   :  { %9884 = vst [vmem:[#allocation56_spill] sm:$0xff] %v7747_v39  ;;  %3163 = vperm.xlu1 %6262, %v6700_v51   ;;  %v445_v51 = vadd.f32 %v443_v49, %v427_v0  ;;  %v842_v0 = vadd.f32 %v840_v20, %v824_v45  ;;  %v858_v49 = vand.u32 2147483647, %v856_v41  ;;  %v876_v11 = vand.u32 2147483647, %v874_v50 }
 0x39d   :  { %v579_v35 = vand.u32 2147483647, %v577_v43 }
 0x39e   :  { %v463_v6 = vadd.f32 %v461_v55, %v445_v51  ;;  %v860_v45 = vadd.f32 %v858_v49, %v842_v0  ;;  %v7791_v51 = vpop.permute.xlu0 %3973  ;;  %4971 = vperm.xlu0 %6339, %v7489_v56   ;;  %v9901_v49 = vld [vmem:[#allocation64_spill] sm:$0xff] }
 0x39f   :  { %9896 = vst [vmem:[#allocation21_spill] sm:$0xff] %v7791_v51 }
 0x3a0   :  { %v7762_v25 = vpop.permute.xlu1 %2653  ;;  %6263 = vset.pattern.permute.xlu1 %v9736_v9  ;;  %v481_v20 = vadd.f32 %v479_v31, %v463_v6  ;;  %v878_v28 = vadd.f32 %v876_v11, %v860_v45  ;;  %v910_v31 = vsub.f32 %v9901_v49, %v7803_v63  ;;  %v7823_v45 = vrot.slane %v7709_v60, %v7493_v47  ;;  %v9904_v49 = vld [vmem:[#allocation65_spill] sm:$0xff] }
 0x3a1   :  { %9888 = vst [vmem:[#allocation58_spill] sm:$0xff] %v7762_v25  ;;  %3177 = vperm.xlu1 %6263, %v6702_v52   ;;  %v595_v25 = vsub.f32 %v9900_v30, %v7608_v7  ;;  %v9903_v7 = vld [vmem:[#allocation24_spill] sm:$0xff]  ;;  %v7817_v30 = vld [vmem:[%s9614_s4 + $0x20] sm:$0xff] }
 0x3a2   :  { %v581_v0 = vadd.f32 %v579_v35, %v481_v20  ;;  %v613_v43 = vsub.f32 %v9903_v7, %v7632_v44  ;;  %v7827_v35 = vrot.slane %v7817_v30, %v7413_v10  ;;  %v912_v44 = vand.u32 2147483647, %v910_v31  ;;  %v9908_v31 = vld [vmem:[#allocation52_spill] sm:$0xff] }
 0x3a3   :  { %v597_v11 = vand.u32 2147483647, %v595_v25  ;;  %v928_v7 = vsub.f32 %v9904_v49, %v7823_v45  ;;  %v9905_v25 = vld [vmem:[#allocation35_spill] sm:$0xff] }
 0x3a4   :  { %v7778_v52 = vpop.permute.xlu1 %2657  ;;  %v615_v56 = vand.u32 2147483647, %v613_v43  ;;  %v631_v51 = vsub.f32 %v9905_v25, %v7647_v12  ;;  %v1028_v43 = vsub.f32 %v9908_v31, %v7827_v35  ;;  %v9909_v12 = vld [vmem:[#allocation36_spill] sm:$0xff]  ;;  %v9913_v31 = vld [vmem:[#allocation18_spill] sm:$0xff] }
 0x3a5   :  { %9892 = vst [vmem:[#allocation25_spill] sm:$0xff] %v7778_v52  ;;  %6264 = vset.pattern.permute.xlu1 %v9721_v14  ;;  %v9898_v52 = vld [vmem:[#allocation22_spill] sm:$0xff]  ;;  %v649_v25 = vsub.f32 %v9909_v12, %v7652_v33  ;;  %v7862_v12 = vrot.slane %v7817_v30, %v7431_v46 }
 0x3a6   :  { %3276 = vperm.xlu1 %6264, %v9894_v59   ;;  %v892_v41 = vsub.f32 %v9898_v52, %v7783_v5  ;;  %v7807_v52 = vpop.permute.xlu0 %1093  ;;  %5193 = vperm.xlu0 %6339, %v7676_v3   ;;  %v633_v49 = vand.u32 2147483647, %v631_v51  ;;  %v1030_v51 = vand.u32 2147483647, %v1028_v43  ;;  %v7872_v43 = vrot.slane %v7817_v30, %v7443_v38 }
 0x3a8   :  { %v894_v6 = vand.u32 2147483647, %v892_v41  ;;  %v599_v41 = vadd.f32 %v597_v11, %v581_v0  ;;  %v9907_v0 = vld [vmem:[#allocation49_spill] sm:$0xff]  ;;  %v930_v11 = vand.u32 2147483647, %v928_v7 }
 0x3a9   :  { %v7793_v55 = vpop.permute.xlu1 %2675  ;;  %v9912_v7 = vld [vmem:[#allocation77_spill] sm:$0xff] }
 0x3aa   :  { %9897 = vst [vmem:[#allocation60_spill] sm:$0xff] %v7793_v55  ;;  %3281 = vperm.xlu1 %6264, %v9899_v8   ;;  %v896_v20 = vadd.f32 %v894_v6, %v878_v28  ;;  %6343 = vset.pattern.permute.xlu0 %v9722_v22  ;;  %v7837_v28 = vpop.permute.xlu0 %1315  ;;  %v617_v6 = vadd.f32 %v615_v56, %v599_v41  ;;  %v9911_v56 = vld [vmem:[#allocation110_spill] sm:$0xff] }
 0x3ab   :  { %4429 = vperm.xlu0 %6343, %v9907_v0  }
 0x3ac   :  { %v914_v60 = vadd.f32 %v912_v44, %v896_v20  ;;  %v7849_v20 = vrot.slane %v7817_v30, %v7419_v37  ;;  %v635_v41 = vadd.f32 %v633_v49, %v617_v6  ;;  %v9915_v49 = vld [vmem:[#allocation79_spill] sm:$0xff] }
 0x3ae   :  { %v7809_v50 = vpop.permute.xlu1 %2689  ;;  %6265 = vset.pattern.permute.xlu1 %v9722_v22  ;;  %v932_v55 = vadd.f32 %v930_v11, %v914_v60  ;;  %v7851_v44 = vpop.permute.xlu0 %1771  ;;  %v1046_v33 = vsub.f32 %v9912_v7, %v7849_v20  ;;  %v667_v60 = vsub.f32 %v9913_v31, %v7671_v16  ;;  %v651_v11 = vand.u32 2147483647, %v649_v25 }
 0x3af   :  { %9902 = vst [vmem:[#allocation30_spill] sm:$0xff] %v7809_v50  ;;  %3299 = vperm.xlu1 %6265, %v9899_v8   ;;  %4651 = vperm.xlu0 %6343, %v9911_v56   ;;  %v1064_v25 = vsub.f32 %v9915_v49, %v7862_v12  ;;  %v9919_v49 = vld [vmem:[#allocation40_spill] sm:$0xff] }
 0x3b0   :  { %v1032_v0 = vadd.f32 %v1030_v51, %v932_v55  ;;  %v653_v6 = vadd.f32 %v651_v11, %v635_v41  ;;  %v1048_v16 = vand.u32 2147483647, %v1046_v33  ;;  %v669_v7 = vand.u32 2147483647, %v667_v60  ;;  %v9916_v55 = vld [vmem:[#allocation38_spill] sm:$0xff] }
 0x3b1   :  { %v685_v51 = vsub.f32 %v9916_v55, %v7688_v21  ;;  %v9918_v41 = vld [vmem:[#allocation74_spill] sm:$0xff]  ;;  %v1066_v39 = vand.u32 2147483647, %v1064_v25  ;;  %v7885_v33 = vrot.slane %v7817_v30, %v7453_v32  ;;  %v703_v21 = vsub.f32 %v9919_v49, %v7696_v2 }
 0x3b2   :  { %v1050_v31 = vadd.f32 %v1048_v16, %v1032_v0  ;;  %v671_v50 = vadd.f32 %v669_v7, %v653_v6  ;;  %v1082_v11 = vsub.f32 %v9918_v41, %v7872_v43  ;;  %v9920_v7 = vld [vmem:[#allocation82_spill] sm:$0xff] }
 0x3b3   :  { %v7833_v36 = vpop.permute.xlu1 %2707  ;;  %6266 = vset.pattern.permute.xlu1 %v9728_v27  ;;  %v687_v60 = vand.u32 2147483647, %v685_v51  ;;  %v1100_v55 = vsub.f32 %v9920_v7, %v7885_v33  ;;  %v9922_v25 = vld [vmem:[#allocation50_spill] sm:$0xff]  ;;  %v705_v19 = vand.u32 2147483647, %v703_v21  ;;  %v7900_v51 = vrot.slane %v7817_v30, %v7457_v40 }
 0x3b4   :  { %9906 = vst [vmem:[#allocation62_spill] sm:$0xff] %v7833_v36  ;;  %3313 = vperm.xlu1 %6266, %v9894_v59   ;;  %v1068_v0 = vadd.f32 %v1066_v39, %v1050_v31  ;;  %v1084_v16 = vand.u32 2147483647, %v1082_v11  ;;  %v803_v41 = vsub.f32 %v9922_v25, %v7722_v15  ;;  %v9923_v11 = vld [vmem:[#allocation85_spill] sm:$0xff]  ;;  %v9925_v21 = vld [vmem:[#allocation42_spill] sm:$0xff] }
 0x3b5   :  { %v689_v6 = vadd.f32 %v687_v60, %v671_v50  ;;  %v7904_v50 = vrot.slane %v7817_v30, %v7474_v58  ;;  %v1102_v31 = vand.u32 2147483647, %v1100_v55  ;;  %v1118_v60 = vsub.f32 %v9923_v11, %v7900_v51 }
 0x3b6   :  { %v1086_v39 = vadd.f32 %v1084_v16, %v1068_v0  ;;  %v805_v15 = vand.u32 2147483647, %v803_v41  ;;  %v821_v7 = vsub.f32 %v9925_v21, %v7736_v1  ;;  %v9926_v0 = vld [vmem:[#allocation112_spill] sm:$0xff]  ;;  %v7922_v41 = vrot.slane %v7817_v30, %v7493_v47 }
 0x3b7   :  { %v7845_v3 = vpop.permute.xlu1 %2711  ;;  %v707_v2 = vadd.f32 %v705_v19, %v689_v6  ;;  %v1136_v6 = vsub.f32 %v9926_v0, %v7904_v50  ;;  %v1120_v16 = vand.u32 2147483647, %v1118_v60  ;;  %v9932_v0 = vld [vmem:[#allocation89_spill] sm:$0xff] }
 0x3b8   :  { %9910 = vst [vmem:[#allocation7_spill] sm:$0xff] %v7845_v3  ;;  %6267 = vset.pattern.permute.xlu1 %v9713_v54  ;;  %v7864_v3 = vpop.permute.xlu0 %1993  ;;  %5107 = vperm.xlu0 %6343, %v7667_v62   ;;  %v1104_v25 = vadd.f32 %v1102_v31, %v1086_v39  ;;  %v823_v55 = vand.u32 2147483647, %v821_v7  ;;  %v9929_v31 = vld [vmem:[#allocation87_spill] sm:$0xff] }
 0x3b9   :  { %3331 = vperm.xlu1 %6267, %v9894_v59   ;;  %v807_v19 = vadd.f32 %v805_v15, %v707_v2  ;;  %v1138_v2 = vand.u32 2147483647, %v1136_v6  ;;  %v1154_v60 = vsub.f32 %v9929_v31, %v7922_v41 }
 0x3ba   :  { %v1122_v1 = vadd.f32 %v1120_v16, %v1104_v25  ;;  %v9933_v16 = vld [vmem:[#allocation46_spill] sm:$0xff] }
 0x3bb   :  { %v825_v39 = vadd.f32 %v823_v55, %v807_v19  ;;  %v1156_v19 = vand.u32 2147483647, %v1154_v60  ;;  %v875_v55 = vsub.f32 %v9933_v16, %v7776_v4  ;;  %v9935_v60 = vld [vmem:[#allocation10_spill] sm:$0xff]  ;;  %v9936_v4 = vld [vmem:[#allocation47_spill] sm:$0xff] }
 0x3bc   :  { %v7866_v36 = vpop.permute.xlu1 %2729  ;;  %v1140_v21 = vadd.f32 %v1138_v2, %v1122_v1  ;;  %v9938_v16 = vld [vmem:[#allocation91_spill] sm:$0xff] }
 0x3bd   :  { %9914 = vst [vmem:[#allocation31_spill] sm:$0xff] %v7866_v36  ;;  %3335 = vperm.xlu1 %6267, %v9899_v8  }
 0x3be   :  { %v1158_v1 = vadd.f32 %v1156_v19, %v1140_v21 }
 0x3c1   :  { %v7878_v36 = vpop.permute.xlu1 %2824  ;;  %6268 = vset.pattern.permute.xlu1 %v9731_v18 }
 0x3c2   :  { %9917 = vst [vmem:[#allocation22_spill] sm:$0xff] %v7878_v36  ;;  %3353 = vperm.xlu1 %6268, %v9899_v8  }
 0x3c6   :  { %v7892_v36 = vpop.permute.xlu1 %2843  ;;  %6269 = vset.pattern.permute.xlu1 %v9715_v53 }
 0x3c7   :  { %9921 = vst [vmem:[#allocation6_spill] sm:$0xff] %v7892_v36  ;;  %3367 = vperm.xlu1 %6269, %v9894_v59   ;;  %v9927_v36 = vld [vmem:[#allocation44_spill] sm:$0xff] }
 0x3c8   :  { %v839_v11 = vsub.f32 %v9927_v36, %v7740_v34  ;;  %v9930_v34 = vld [vmem:[#allocation70_spill] sm:$0xff] }
 0x3c9   :  { %v857_v15 = vsub.f32 %v9930_v34, %v7760_v24  ;;  %v893_v34 = vsub.f32 %v9936_v4, %v7783_v5  ;;  %v9939_v5 = vld [vmem:[#allocation108_spill] sm:$0xff] }
 0x3ca   :  { %v7908_v49 = vpop.permute.xlu1 %2847  ;;  %v841_v36 = vand.u32 2147483647, %v839_v11 }
 0x3cb   :  { %9924 = vst [vmem:[#allocation33_spill] sm:$0xff] %v7908_v49  ;;  %6270 = vset.pattern.permute.xlu1 %v9718_v29  ;;  %v859_v24 = vand.u32 2147483647, %v857_v15  ;;  %v9943_v49 = vld [vmem:[#allocation5_spill] sm:$0xff] }
 0x3cc   :  { %3385 = vperm.xlu1 %6270, %v9894_v59   ;;  %v7928_v59 = vld [vmem:[%s9614_s4 + $0x28] sm:$0xff]  ;;  %v843_v25 = vadd.f32 %v841_v36, %v825_v39  ;;  %v877_v36 = vand.u32 2147483647, %v875_v55  ;;  %v911_v55 = vsub.f32 %v9939_v5, %v7803_v63 }
 0x3cd   :  { %v7936_v30 = vrot.slane %v7928_v59, %v7413_v10  ;;  %v7948_v11 = vrot.slane %v7928_v59, %v7419_v37  ;;  %v7960_v15 = vrot.slane %v7928_v59, %v7431_v46  ;;  %v7978_v4 = vrot.slane %v7928_v59, %v7453_v32 }
 0x3ce   :  { %v861_v2 = vadd.f32 %v859_v24, %v843_v25 }
 0x3cf   :  { %v7918_v42 = vpop.permute.xlu1 %2865  ;;  %v1254_v6 = vsub.f32 %v9932_v0, %v7936_v30  ;;  %v1290_v24 = vsub.f32 %v9938_v16, %v7960_v15 }
 0x3d0   :  { %9928 = vst [vmem:[#allocation64_spill] sm:$0xff] %v7918_v42  ;;  %3389 = vperm.xlu1 %6270, %v9899_v8   ;;  %v879_v25 = vadd.f32 %v877_v36, %v861_v2  ;;  %v913_v42 = vand.u32 2147483647, %v911_v55 }
 0x3d1   :  { %v1256_v39 = vand.u32 2147483647, %v1254_v6  ;;  %v895_v6 = vand.u32 2147483647, %v893_v34 }
 0x3d3   :  { %v1258_v21 = vadd.f32 %v1256_v39, %v1158_v1  ;;  %v897_v2 = vadd.f32 %v895_v6, %v879_v25  ;;  %v1292_v39 = vand.u32 2147483647, %v1290_v24  ;;  %v7993_v24 = vrot.slane %v7928_v59, %v7474_v58 }
 0x3d4   :  { %v7938_v7 = vpop.permute.xlu1 %2879  ;;  %6271 = vset.pattern.permute.xlu1 %v9736_v9 }
 0x3d5   :  { %9931 = vst [vmem:[#allocation24_spill] sm:$0xff] %v7938_v7  ;;  %3407 = vperm.xlu1 %6271, %v9899_v8   ;;  %v1272_v8 = vsub.f32 %v7619_v26, %v7948_v11  ;;  %v7968_v26 = vrot.slane %v7928_v59, %v7443_v38  ;;  %v915_v5 = vadd.f32 %v913_v42, %v897_v2 }
 0x3d7   :  { %v1274_v0 = vand.u32 2147483647, %v1272_v8  ;;  %v9940_v8 = vld [vmem:[#allocation93_spill] sm:$0xff] }
 0x3d8   :  { %v1308_v36 = vsub.f32 %v9940_v8, %v7968_v26 }
 0x3d9   :  { %v7950_v31 = vpop.permute.xlu1 %2897  ;;  %6272 = vset.pattern.permute.xlu1 %v9721_v14  ;;  %v1276_v1 = vadd.f32 %v1274_v0, %v1258_v21  ;;  %v7987_v21 = vrot.slane %v7928_v59, %v7457_v40  ;;  %v1326_v0 = vsub.f32 %v7837_v28, %v7978_v4  ;;  %v9947_v28 = vld [vmem:[#allocation161_spill] sm:$0xff] }
 0x3da   :  { %9934 = vst [vmem:[#allocation65_spill] sm:$0xff] %v7950_v31  ;;  %3502 = vperm.xlu1 %6272, %v9935_v60   ;;  %v1310_v25 = vand.u32 2147483647, %v1308_v36  ;;  %v1047_v8 = vsub.f32 %v9947_v28, %v7849_v20 }
 0x3db   :  { %v1294_v63 = vadd.f32 %v1292_v39, %v1276_v1  ;;  %v9946_v1 = vld [vmem:[#allocation96_spill] sm:$0xff]  ;;  %v1328_v36 = vand.u32 2147483647, %v1326_v0  ;;  %v8017_v0 = vpop.permute.xlu0 %2449 }
 0x3dc   :  { %v1344_v2 = vsub.f32 %v9946_v1, %v7987_v21  ;;  %9950 = vst [vmem:[#allocation18_spill] sm:$0xff] %v8017_v0 }
 0x3dd   :  { %v7962_v19 = vpop.permute.xlu1 %2901  ;;  %v1312_v42 = vadd.f32 %v1310_v25, %v1294_v63  ;;  %v8012_v63 = vrot.slane %v7928_v59, %v7493_v47  ;;  %v9951_v59 = vld [vmem:[#allocation68_spill] sm:$0xff] }
 0x3de   :  { %9937 = vst [vmem:[#allocation35_spill] sm:$0xff] %v7962_v19  ;;  %6273 = vset.pattern.permute.xlu1 %v9722_v22  ;;  %v9942_v19 = vld [vmem:[#allocation48_spill] sm:$0xff]  ;;  %v1346_v1 = vand.u32 2147483647, %v1344_v2  ;;  %v9952_v2 = vld [vmem:[#allocation37_spill] sm:$0xff] }
 0x3df   :  { %3521 = vperm.xlu1 %6273, %v9935_v60   ;;  %v929_v34 = vsub.f32 %v9942_v19, %v7823_v45  ;;  %v9944_v45 = vld [vmem:[#allocation67_spill] sm:$0xff]  ;;  %v1330_v25 = vadd.f32 %v1328_v36, %v1312_v42  ;;  %v1065_v42 = vsub.f32 %v9951_v59, %v7862_v12  ;;  %v1380_v36 = vsub.f32 %v9952_v2, %v8012_v63  ;;  %v9956_v12 = vld [vmem:[#allocation69_spill] sm:$0xff] }
 0x3e0   :  { %v1029_v19 = vsub.f32 %v9944_v45, %v7827_v35  ;;  %v1465_v35 = vld [vmem:[%s9614_s4 + $0x30] sm:$0xff]  ;;  %v1083_v59 = vsub.f32 %v9956_v12, %v7872_v43  ;;  %v9959_v12 = vld [vmem:[#allocation27_spill] sm:$0xff] }
 0x3e1   :  { %v931_v6 = vand.u32 2147483647, %v929_v34  ;;  %v9948_v34 = vld [vmem:[#allocation97_spill] sm:$0xff]  ;;  %v8024_v28 = vrot.slane %v1465_v35, %v7419_v37  ;;  %v1067_v7 = vand.u32 2147483647, %v1065_v42  ;;  %v8045_v2 = vrot.slane %v1465_v35, %v7431_v46 }
 0x3e2   :  { %v7980_v16 = vpop.permute.xlu1 %2919  ;;  %v1031_v45 = vand.u32 2147483647, %v1029_v19  ;;  %v8053_v43 = vrot.slane %v1465_v35, %v7453_v32 }
 0x3e3   :  { %9941 = vst [vmem:[#allocation52_spill] sm:$0xff] %v7980_v16  ;;  %3525 = vperm.xlu1 %6273, %v9943_v49   ;;  %v933_v39 = vadd.f32 %v931_v6, %v915_v5  ;;  %v1362_v16 = vsub.f32 %v9948_v34, %v7993_v24  ;;  %v1049_v5 = vand.u32 2147483647, %v1047_v8  ;;  %v8021_v6 = vrot.slane %v1465_v35, %v7413_v10 }
 0x3e4   :  { %v1348_v34 = vadd.f32 %v1346_v1, %v1330_v25  ;;  %v1101_v25 = vsub.f32 %v7807_v52, %v7885_v33  ;;  %v8042_v1 = vpop.permute.xlu0 %2671  ;;  %v1085_v52 = vand.u32 2147483647, %v1083_v59 }
 0x3e5   :  { %v1033_v20 = vadd.f32 %v1031_v45, %v933_v39  ;;  %v1364_v19 = vand.u32 2147483647, %v1362_v16  ;;  %v9953_v39 = vld [vmem:[#allocation100_spill] sm:$0xff]  ;;  %v9955_v16 = vld [vmem:[#allocation101_spill] sm:$0xff]  ;;  %9957 = vst [vmem:[#allocation38_spill] sm:$0xff] %v8042_v1 }
 0x3e6   :  { %v1480_v8 = vsub.f32 %v9953_v39, %v8021_v6  ;;  %v1498_v31 = vsub.f32 %v9955_v16, %v8024_v28  ;;  %v8050_v39 = vrot.slane %v1465_v35, %v7443_v38  ;;  %v1103_v33 = vand.u32 2147483647, %v1101_v25 }
 0x3e7   :  { %v7997_v55 = vpop.permute.xlu1 %2933  ;;  %6274 = vset.pattern.permute.xlu1 %v9728_v27  ;;  %v1051_v0 = vadd.f32 %v1049_v5, %v1033_v20  ;;  %v1382_v20 = vand.u32 2147483647, %v1380_v36 }
 0x3e8   :  { %9945 = vst [vmem:[#allocation36_spill] sm:$0xff] %v7997_v55  ;;  %3543 = vperm.xlu1 %6274, %v9943_v49   ;;  %v1482_v5 = vand.u32 2147483647, %v1480_v8  ;;  %v1500_v16 = vand.u32 2147483647, %v1498_v31  ;;  %v9961_v8 = vld [vmem:[#allocation71_spill] sm:$0xff] }
 0x3ec   :  { %v8014_v55 = vpop.permute.xlu1 %2951  ;;  %6275 = vset.pattern.permute.xlu1 %v9713_v54 }
 0x3ed   :  { %9949 = vst [vmem:[#allocation77_spill] sm:$0xff] %v8014_v55  ;;  %3557 = vperm.xlu1 %6275, %v9935_v60   ;;  %v1366_v55 = vadd.f32 %v1364_v19, %v1348_v34  ;;  %v1069_v19 = vadd.f32 %v1067_v7, %v1051_v0  ;;  %v9960_v7 = vld [vmem:[#allocation104_spill] sm:$0xff] }
 0x3ee   :  { %v1534_v0 = vsub.f32 %v9960_v7, %v8050_v39 }
 0x3ef   :  { %v1384_v42 = vadd.f32 %v1382_v20, %v1366_v55  ;;  %v1087_v1 = vadd.f32 %v1085_v52, %v1069_v19  ;;  %v8062_v55 = vpop.permute.xlu0 %3127  ;;  %v9963_v20 = vld [vmem:[#allocation105_spill] sm:$0xff]  ;;  %v9965_v19 = vld [vmem:[#allocation72_spill] sm:$0xff] }
 0x3f0   :  { %v8032_v45 = vpop.permute.xlu1 %2955  ;;  %9962 = vst [vmem:[#allocation40_spill] sm:$0xff] %v8062_v55  ;;  %v1552_v62 = vsub.f32 %v9963_v20, %v8053_v43  ;;  %v1137_v52 = vsub.f32 %v9965_v19, %v7904_v50  ;;  %v9968_v50 = vld [vmem:[#allocation28_spill] sm:$0xff]  ;;  %v9969_v20 = vld [vmem:[#allocation109_spill] sm:$0xff] }
 0x3f1   :  { %9954 = vst [vmem:[#allocation79_spill] sm:$0xff] %v8032_v45  ;;  %6277 = vset.pattern.permute.xlu1 %v9731_v18  ;;  %v1516_v45 = vsub.f32 %v9959_v12, %v8045_v2  ;;  %v1484_v36 = vadd.f32 %v1482_v5, %v1384_v42  ;;  %v1105_v59 = vadd.f32 %v1103_v33, %v1087_v1  ;;  %v1536_v42 = vand.u32 2147483647, %v1534_v0 }
 0x3f2   :  { %3575 = vperm.xlu1 %6277, %v9935_v60   ;;  %v8071_v5 = vrot.slane %v1465_v35, %v7457_v40  ;;  %v8081_v12 = vrot.slane %v1465_v35, %v7474_v58  ;;  %v1554_v33 = vand.u32 2147483647, %v1552_v62  ;;  %v9970_v62 = vld [vmem:[#allocation34_spill] sm:$0xff] }
 0x3f3   :  { %v1502_v31 = vadd.f32 %v1500_v16, %v1484_v36  ;;  %v1518_v25 = vand.u32 2147483647, %v1516_v45  ;;  %v8078_v16 = vld [vmem:[%s9614_s4 + $0x38] sm:$0xff]  ;;  %v8084_v45 = vrot.slane %v1465_v35, %v7493_v47  ;;  %v8086_v7 = vpop.permute.xlu0 %3349  ;;  %v1155_v35 = vsub.f32 %v9970_v62, %v7922_v41 }
 0x3f4   :  { %9966 = vst [vmem:[#allocation50_spill] sm:$0xff] %v8086_v7  ;;  %v1570_v0 = vsub.f32 %v9968_v50, %v8071_v5  ;;  %v1588_v19 = vsub.f32 %v9969_v20, %v8081_v12  ;;  %v9974_v62 = vld [vmem:[#allocation73_spill] sm:$0xff] }
 0x3f5   :  { %v8047_v34 = vpop.permute.xlu1 %3055  ;;  %v1520_v1 = vadd.f32 %v1518_v25, %v1502_v31  ;;  %v8100_v31 = vrot.slane %v8078_v16, %v7413_v10  ;;  %v1157_v20 = vand.u32 2147483647, %v1155_v35 }
 0x3f6   :  { %9958 = vst [vmem:[#allocation74_spill] sm:$0xff] %v8047_v34  ;;  %3579 = vperm.xlu1 %6277, %v9943_v49   ;;  %v1119_v34 = vsub.f32 %v9961_v8, %v7900_v51 }
 0x3f7   :  { %v1538_v8 = vadd.f32 %v1536_v42, %v1520_v1  ;;  %v1572_v42 = vand.u32 2147483647, %v1570_v0  ;;  %v1590_v1 = vand.u32 2147483647, %v1588_v19  ;;  %v8111_v56 = vpop.permute.xlu0 %3805  ;;  %v8120_v0 = vrot.slane %v8078_v16, %v7431_v46 }
 0x3f8   :  { %v1121_v51 = vand.u32 2147483647, %v1119_v34  ;;  %9975 = vst [vmem:[#allocation112_spill] sm:$0xff] %v8111_v56 }
 0x3f9   :  { %v1556_v25 = vadd.f32 %v1554_v33, %v1538_v8 }
 0x3fa   :  { %v8066_v13 = vpop.permute.xlu1 %3069  ;;  %6278 = vset.pattern.permute.xlu1 %v9715_v53  ;;  %v1123_v36 = vadd.f32 %v1121_v51, %v1105_v59  ;;  %v1139_v59 = vand.u32 2147483647, %v1137_v52  ;;  %v9971_v51 = vld [vmem:[#allocation111_spill] sm:$0xff]  ;;  %v8116_v52 = vrot.slane %v8078_v16, %v7419_v37 }
 0x3fb   :  { %9964 = vst [vmem:[#allocation82_spill] sm:$0xff] %v8066_v13  ;;  %3597 = vperm.xlu1 %6278, %v9943_v49   ;;  %v1606_v55 = vsub.f32 %v9971_v51, %v8084_v45  ;;  %v1255_v13 = vsub.f32 %v9974_v62, %v7936_v30  ;;  %v1574_v33 = vadd.f32 %v1572_v42, %v1556_v25 }
 0x3fc   :  { %v1141_v7 = vadd.f32 %v1139_v59, %v1123_v36 }
 0x3fd   :  { %v1608_v36 = vand.u32 2147483647, %v1606_v55  ;;  %v1592_v19 = vadd.f32 %v1590_v1, %v1574_v33  ;;  %v1257_v59 = vand.u32 2147483647, %v1255_v13  ;;  %v9979_v55 = vld [vmem:[#allocation119_spill] sm:$0xff]  ;;  %v9981_v13 = vld [vmem:[#allocation26_spill] sm:$0xff] }
 0x3fe   :  { %v1159_v8 = vadd.f32 %v1157_v20, %v1141_v7  ;;  %v1742_v42 = vsub.f32 %v9979_v55, %v8120_v0  ;;  %v8135_v7 = vrot.slane %v8078_v16, %v7443_v38  ;;  %v1291_v20 = vsub.f32 %v9981_v13, %v7960_v15  ;;  %v5454_v15 = vld [vmem:[%s9613_s3 + $0xc0] sm:$0xff] }
 0x3ff   :  { %v8088_v34 = vpop.permute.xlu1 %3087  ;;  %6279 = vset.pattern.permute.xlu1 %v9718_v29  ;;  %v1610_v25 = vadd.f32 %v1608_v36, %v1592_v19  ;;  %v9983_v19 = vld [vmem:[#allocation8_spill] sm:$0xff]  ;;  %6107 = vmatprep.subr.msk.mxu0 %vm24_vm0, %v5454_v15  ;;  %v9986_v55 = vld [vmem:[#allocation94_spill] sm:$0xff] }
 0x400   :  { %9967 = vst [vmem:[#allocation85_spill] sm:$0xff] %v8088_v34  ;;  %3611 = vperm.xlu1 %6279, %v9935_v60   ;;  %v9973_v34 = vld [vmem:[#allocation57_spill] sm:$0xff]  ;;  %v1259_v56 = vadd.f32 %v1257_v59, %v1159_v8  ;;  %v1744_v36 = vand.u32 2147483647, %v1742_v42  ;;  %v8148_v8 = vrot.slane %v8078_v16, %v7457_v40  ;;  %v1309_v42 = vsub.f32 %v9986_v55, %v7968_v26 }
 0x401   :  { %v1706_v41 = vsub.f32 %v9973_v34, %v8100_v31  ;;  %v9976_v34 = vld [vmem:[#allocation117_spill] sm:$0xff]  ;;  %6108 = vmatpush3.xpose.msk.msra.mxu0 %vm24_vm0, %v5454_v15  ;;  %v6385_v15 = vld [vmem:[%s9612_s2 + $0x8] sm:$0xff] }
 0x402   :  { %v1724_v35 = vsub.f32 %v9976_v34, %v8116_v52 }
 0x403   :  { %v8104_v50 = vpop.permute.xlu1 %3091  ;;  %v1708_v62 = vand.u32 2147483647, %v1706_v41  ;;  %v8144_v41 = vrot.slane %v8078_v16, %v7453_v32 }
 0x404   :  { %9972 = vst [vmem:[#allocation42_spill] sm:$0xff] %v8104_v50  ;;  %6280 = vset.pattern.permute.xlu1 %v9736_v9  ;;  %v8131_v50 = vpop.permute.xlu0 %4027  ;;  %v1726_v1 = vand.u32 2147483647, %v1724_v35  ;;  %v9984_v35 = vld [vmem:[#allocation78_spill] sm:$0xff]  ;;  %6110 = vmatmul.mubr.msk.f32.vlgmr.msra.gmra.mrb[24].mxu0 %vm24_vm0, %v6385_v15 }
 0x405   :  { %3629 = vperm.xlu1 %6280, %v9935_v60   ;;  %v9978_v60 = vld [vmem:[#allocation75_spill] sm:$0xff]  ;;  %9980 = vst [vmem:[#allocation87_spill] sm:$0xff] %v8131_v50  ;;  %v1760_v59 = vsub.f32 %v9984_v35, %v8135_v7  ;;  %v1311_v35 = vand.u32 2147483647, %v1309_v42  ;;  %v9993_v42 = vld [vmem:[#allocation116_spill] sm:$0xff] }
 0x406   :  { %v1273_v51 = vsub.f32 %v9978_v60, %v7948_v11 }
 0x407   :  { %v1762_v26 = vand.u32 2147483647, %v1760_v59 }
 0x408   :  { %v8124_v30 = vpop.permute.xlu1 %3109  ;;  %v1275_v33 = vand.u32 2147483647, %v1273_v51  ;;  %v9985_v51 = vld [vmem:[#allocation123_spill] sm:$0xff]  ;;  %v8161_v13 = vpop.permute.xlu0 %4483 }
 0x409   :  { %9977 = vst [vmem:[#allocation44_spill] sm:$0xff] %v8124_v30  ;;  %3633 = vperm.xlu1 %6280, %v9943_v49   ;;  %v1710_v49 = vadd.f32 %v1708_v62, %v1610_v25  ;;  %v1778_v62 = vsub.f32 %v9985_v51, %v8144_v41  ;;  %v1293_v25 = vand.u32 2147483647, %v1291_v20  ;;  %9987 = vst [vmem:[#allocation89_spill] sm:$0xff] %v8161_v13 }
 0x40a   :  { %v1277_v34 = vadd.f32 %v1275_v33, %v1259_v56  ;;  %v9988_v33 = vld [vmem:[#allocation124_spill] sm:$0xff] }
 0x40b   :  { %v1728_v60 = vadd.f32 %v1726_v1, %v1710_v49  ;;  %v1796_v50 = vsub.f32 %v9988_v33, %v8148_v8  ;;  %v8172_v1 = vld [vmem:[%s9614_s4 + $0x40] sm:$0xff]  ;;  %v8177_v49 = vrot.slane %v8078_v16, %v7474_v58 }
 0x40c   :  { %v1295_v20 = vadd.f32 %v1293_v25, %v1277_v34  ;;  %v8187_v34 = vrot.slane %v8078_v16, %v7493_v47  ;;  %v8191_v55 = vrot.slane %v8172_v1, %v7413_v10  ;;  %v8195_v13 = vpop.permute.xlu0 %2015  ;;  %v9994_v16 = vld [vmem:[#allocation127_spill] sm:$0xff] }
 0x40d   :  { %v8139_v11 = vpop.permute.xlu1 %3123  ;;  %6281 = vset.pattern.permute.xlu1 %v9721_v14  ;;  %v1746_v56 = vadd.f32 %v1744_v36, %v1728_v60  ;;  %v1780_v36 = vand.u32 2147483647, %v1778_v62  ;;  %v9990_v60 = vld [vmem:[#allocation95_spill] sm:$0xff]  ;;  %v1798_v25 = vand.u32 2147483647, %v1796_v50  ;;  %9992 = vst [vmem:[#allocation47_spill] sm:$0xff] %v8195_v13 }
 0x40e   :  { %9982 = vst [vmem:[#allocation70_spill] sm:$0xff] %v8139_v11  ;;  %3733 = vperm.xlu1 %6281, %v9983_v19   ;;  %v1327_v51 = vsub.f32 %v9990_v60, %v7978_v4  ;;  %v1313_v33 = vadd.f32 %v1311_v35, %v1295_v20  ;;  %v1814_v4 = vsub.f32 %v9993_v42, %v8177_v49  ;;  %v9995_v50 = vld [vmem:[#allocation23_spill] sm:$0xff]  ;;  %v9996_v20 = vld [vmem:[#allocation128_spill] sm:$0xff]  ;;  %v9997_v11 = vld [vmem:[#allocation98_spill] sm:$0xff] }
 0x40f   :  { %v1764_v59 = vadd.f32 %v1762_v26, %v1746_v56  ;;  %v1832_v60 = vsub.f32 %v9994_v16, %v8187_v34  ;;  %v1345_v56 = vsub.f32 %v9995_v50, %v7987_v21  ;;  %v1932_v35 = vsub.f32 %v9996_v20, %v8191_v55 }
 0x410   :  { %v1329_v26 = vand.u32 2147483647, %v1327_v51  ;;  %v1363_v13 = vsub.f32 %v9997_v11, %v7993_v24  ;;  %v8209_v57 = vpop.permute.xlu0 %2237  ;;  %v8215_v42 = vrot.slane %v8172_v1, %v7419_v37  ;;  %v9999_v51 = vld [vmem:[#allocation99_spill] sm:$0xff] }
 0x411   :  { %v1782_v15 = vadd.f32 %v1780_v36, %v1764_v59  ;;  %v1816_v59 = vand.u32 2147483647, %v1814_v4  ;;  %v1834_v16 = vand.u32 2147483647, %v1832_v60  ;;  %v1347_v21 = vand.u32 2147483647, %v1345_v56 }
 0x412   :  { %v8166_v30 = vpop.permute.xlu1 %3141  ;;  %6282 = vset.pattern.permute.xlu1 %v9722_v22  ;;  %v1934_v11 = vand.u32 2147483647, %v1932_v35  ;;  %v8226_v4 = vrot.slane %v8172_v1, %v7443_v38  ;;  %v1365_v50 = vand.u32 2147483647, %v1363_v13  ;;  %v1950_v60 = vsub.f32 %v7660_v17, %v8215_v42  ;;  %v10006_v17 = vld [vmem:[#allocation102_spill] sm:$0xff] }
 0x413   :  { %9989 = vst [vmem:[#allocation46_spill] sm:$0xff] %v8166_v30  ;;  %3747 = vperm.xlu1 %6282, %v6777_v61   ;;  %v1800_v30 = vadd.f32 %v1798_v25, %v1782_v15  ;;  %v1381_v25 = vsub.f32 %v9999_v51, %v8012_v63  ;;  %v10002_v63 = vld [vmem:[#allocation131_spill] sm:$0xff] }
 0x415   :  { %v1818_v24 = vadd.f32 %v1816_v59, %v1800_v30  ;;  %v10004_v30 = vld [vmem:[#allocation55_spill] sm:$0xff]  ;;  %v1383_v59 = vand.u32 2147483647, %v1381_v25 }
 0x416   :  { %v8193_v62 = vpop.permute.xlu1 %3145  ;;  %v1481_v35 = vsub.f32 %v10004_v30, %v8021_v6  ;;  %v10007_v6 = vld [vmem:[#allocation103_spill] sm:$0xff] }
 0x417   :  { %9991 = vst [vmem:[#allocation10_spill] sm:$0xff] %v8193_v62  ;;  %6283 = vset.pattern.permute.xlu1 %v9728_v27  ;;  %v1331_v62 = vadd.f32 %v1329_v26, %v1313_v33  ;;  %v8222_v33 = vrot.slane %v8172_v1, %v7431_v46  ;;  %v8228_v26 = vpop.permute.xlu0 %2693  ;;  %v1836_v56 = vadd.f32 %v1834_v16, %v1818_v24  ;;  %v1952_v24 = vand.u32 2147483647, %v1950_v60 }
 0x418   :  { %3765 = vperm.xlu1 %6283, %v6777_v61   ;;  %10001 = vst [vmem:[#allocation93_spill] sm:$0xff] %v8228_v26  ;;  %v1499_v16 = vsub.f32 %v10006_v17, %v8024_v28  ;;  %v1517_v25 = vsub.f32 %v10007_v6, %v8045_v2  ;;  %v8257_v28 = vrot.slane %v8172_v1, %v7457_v40 }
 0x419   :  { %10000 = vst [vmem:[#allocation108_spill] sm:$0xff] %v8222_v33  ;;  %v1349_v15 = vadd.f32 %v1347_v21, %v1331_v62  ;;  %v1968_v20 = vsub.f32 %v10002_v63, %v8222_v33  ;;  %v1936_v13 = vadd.f32 %v1934_v11, %v1836_v56  ;;  %v10005_v62 = vld [vmem:[#allocation132_spill] sm:$0xff]  ;;  %v8246_v63 = vrot.slane %v8172_v1, %v7453_v32 }
 0x41a   :  { %v1986_v21 = vsub.f32 %v10005_v62, %v8226_v4  ;;  %v8261_v60 = vrot.slane %v8172_v1, %v7474_v58  ;;  %v1519_v62 = vand.u32 2147483647, %v1517_v25 }
 0x41b   :  { %v8211_v36 = vpop.permute.xlu1 %3163  ;;  %v1970_v26 = vand.u32 2147483647, %v1968_v20  ;;  %v8250_v30 = vpop.permute.xlu0 %2915  ;;  %v2004_v2 = vsub.f32 %v7864_v3, %v8246_v63  ;;  %v10010_v20 = vld [vmem:[#allocation135_spill] sm:$0xff]  ;;  %v10013_v3 = vld [vmem:[#allocation76_spill] sm:$0xff] }
 0x41c   :  { %9998 = vst [vmem:[#allocation91_spill] sm:$0xff] %v8211_v36  ;;  %3769 = vperm.xlu1 %6283, %v9983_v19   ;;  %v1367_v36 = vadd.f32 %v1365_v50, %v1349_v15  ;;  %10008 = vst [vmem:[#allocation5_spill] sm:$0xff] %v8250_v30  ;;  %v1954_v15 = vadd.f32 %v1952_v24, %v1936_v13  ;;  %v1988_v50 = vand.u32 2147483647, %v1986_v21  ;;  %v10012_v21 = vld [vmem:[#allocation136_spill] sm:$0xff]  ;;  %v10023_v30 = vld [vmem:[#allocation113_spill] sm:$0xff] }
 0x41d   :  { %v2040_v24 = vsub.f32 %v10012_v21, %v8261_v60  ;;  %v10016_v21 = vld [vmem:[#allocation107_spill] sm:$0xff] }
 0x41e   :  { %v1385_v33 = vadd.f32 %v1383_v59, %v1367_v36  ;;  %v1501_v36 = vand.u32 2147483647, %v1499_v16  ;;  %v1972_v56 = vadd.f32 %v1970_v26, %v1954_v15  ;;  %v8276_v16 = vld [vmem:[%s9614_s4 + $0x48] sm:$0xff]  ;;  %v1535_v26 = vsub.f32 %v10013_v3, %v8050_v39 }
 0x41f   :  { %v8282_v25 = vpop.permute.xlu0 %3371  ;;  %v8287_v15 = vrot.slane %v8172_v1, %v7493_v47  ;;  %v8293_v39 = vrot.slane %v8276_v16, %v7413_v10 }
 0x420   :  { %v8234_v51 = vpop.permute.xlu1 %3177  ;;  %6284 = vset.pattern.permute.xlu1 %v9713_v54  ;;  %v1990_v13 = vadd.f32 %v1988_v50, %v1972_v56  ;;  %10015 = vst [vmem:[#allocation161_spill] sm:$0xff] %v8282_v25  ;;  %v2006_v50 = vand.u32 2147483647, %v2004_v2  ;;  %v1537_v1 = vand.u32 2147483647, %v1535_v26  ;;  %v10018_v2 = vld [vmem:[#allocation41_spill] sm:$0xff] }
 0x421   :  { %10003 = vst [vmem:[#allocation48_spill] sm:$0xff] %v8234_v51  ;;  %3787 = vperm.xlu1 %6284, %v9983_v19   ;;  %v1483_v51 = vand.u32 2147483647, %v1481_v35  ;;  %v2022_v35 = vsub.f32 %v10010_v20, %v8257_v28  ;;  %v10021_v25 = vld [vmem:[#allocation140_spill] sm:$0xff]  ;;  %v10022_v26 = vld [vmem:[#allocation114_spill] sm:$0xff] }
 0x423   :  { %v1485_v59 = vadd.f32 %v1483_v51, %v1385_v33  ;;  %v10014_v33 = vld [vmem:[#allocation106_spill] sm:$0xff]  ;;  %v2024_v56 = vand.u32 2147483647, %v2022_v35  ;;  %v2058_v35 = vsub.f32 %v10018_v2, %v8287_v15 }
 0x424   :  { %v1553_v51 = vsub.f32 %v10014_v33, %v8053_v43  ;;  %v2042_v43 = vand.u32 2147483647, %v2040_v24  ;;  %v8306_v24 = vpop.permute.xlu0 %3593 }
 0x425   :  { %v8252_v11 = vpop.permute.xlu1 %3276  ;;  %6285 = vset.pattern.permute.xlu1 %v9731_v18  ;;  %v1503_v6 = vadd.f32 %v1501_v36, %v1485_v59  ;;  %v2008_v36 = vadd.f32 %v2006_v50, %v1990_v13  ;;  %v8297_v59 = vrot.slane %v8276_v16, %v7419_v37  ;;  %10020 = vst [vmem:[#allocation68_spill] sm:$0xff] %v8306_v24 }
 0x426   :  { %10009 = vst [vmem:[#allocation67_spill] sm:$0xff] %v8252_v11  ;;  %3801 = vperm.xlu1 %6285, %v6777_v61   ;;  %v1555_v33 = vand.u32 2147483647, %v1553_v51  ;;  %v1589_v51 = vsub.f32 %v10022_v26, %v8081_v12 }
 0x427   :  { %v1521_v20 = vadd.f32 %v1519_v62, %v1503_v6  ;;  %v10019_v62 = vld [vmem:[#allocation139_spill] sm:$0xff]  ;;  %v2176_v11 = vsub.f32 %v10021_v25, %v8297_v59 }
 0x428   :  { %v2158_v6 = vsub.f32 %v10019_v62, %v8293_v39 }
 0x429   :  { %v8268_v17 = vpop.permute.xlu1 %3281 }
 0x42a   :  { %10011 = vst [vmem:[#allocation96_spill] sm:$0xff] %v8268_v17  ;;  %6286 = vset.pattern.permute.xlu1 %v9715_v53  ;;  %v1571_v17 = vsub.f32 %v10016_v21, %v8071_v5  ;;  %v2026_v5 = vadd.f32 %v2024_v56, %v2008_v36  ;;  %v1539_v21 = vadd.f32 %v1537_v1, %v1521_v20  ;;  %v2060_v56 = vand.u32 2147483647, %v2058_v35  ;;  %v10025_v36 = vld [vmem:[#allocation115_spill] sm:$0xff] }
 0x42b   :  { %3819 = vperm.xlu1 %6286, %v6777_v61   ;;  %v1607_v53 = vsub.f32 %v10023_v30, %v8084_v45  ;;  %v2160_v20 = vand.u32 2147483647, %v2158_v6  ;;  %v1707_v12 = vsub.f32 %v10025_v36, %v8100_v31  ;;  %v2178_v30 = vand.u32 2147483647, %v2176_v11  ;;  %v10028_v31 = vld [vmem:[#allocation144_spill] sm:$0xff] }
 0x42c   :  { %v1573_v13 = vand.u32 2147483647, %v1571_v17  ;;  %v2044_v50 = vadd.f32 %v2042_v43, %v2026_v5  ;;  %v8319_v17 = vrot.slane %v8276_v16, %v7431_v46  ;;  %v8326_v43 = vrot.slane %v8276_v16, %v7443_v38  ;;  %v8332_v5 = vpop.permute.xlu0 %4049 }
 0x42d   :  { %v8330_v1 = vrot.slane %v8276_v16, %v7453_v32  ;;  %v1609_v35 = vand.u32 2147483647, %v1607_v53  ;;  %10026 = vst [vmem:[#allocation100_spill] sm:$0xff] %v8332_v5  ;;  %v10030_v53 = vld [vmem:[#allocation146_spill] sm:$0xff] }
 0x42e   :  { %v8299_v3 = vpop.permute.xlu1 %3299  ;;  %v2062_v45 = vadd.f32 %v2060_v56, %v2044_v50  ;;  %v2212_v6 = vsub.f32 %v10028_v31, %v8326_v43 }
 0x42f   :  { %10017 = vst [vmem:[#allocation97_spill] sm:$0xff] %v8299_v3  ;;  %3823 = vperm.xlu1 %6286, %v9983_v19   ;;  %v1557_v3 = vadd.f32 %v1555_v33, %v1539_v21  ;;  %v1591_v33 = vand.u32 2147483647, %v1589_v51  ;;  %v2230_v26 = vsub.f32 %v10030_v53, %v8330_v1  ;;  %v1725_v51 = vsub.f32 %v7640_v48, %v8116_v52  ;;  %v8362_v48 = vld [vmem:[%s9614_s4 + $0x50] sm:$0xff]  ;;  %v10036_v53 = vld [vmem:[#allocation151_spill] sm:$0xff] }
 0x430   :  { %v2162_v62 = vadd.f32 %v2160_v20, %v2062_v45  ;;  %v10031_v20 = vld [vmem:[#allocation120_spill] sm:$0xff]  ;;  %v8366_v52 = vrot.slane %v8276_v16, %v7474_v58 }
 0x431   :  { %v1575_v25 = vadd.f32 %v1573_v13, %v1557_v3  ;;  %v1709_v13 = vand.u32 2147483647, %v1707_v12  ;;  %v1743_v36 = vsub.f32 %v10031_v20, %v8120_v0  ;;  %v1727_v31 = vand.u32 2147483647, %v1725_v51 }
 0x432   :  { %v2180_v50 = vadd.f32 %v2178_v30, %v2162_v62  ;;  %v10033_v30 = vld [vmem:[#allocation122_spill] sm:$0xff]  ;;  %v8356_v62 = vpop.permute.xlu0 %4271  ;;  %v8379_v20 = vrot.slane %v8362_v48, %v7413_v10 }
 0x433   :  { %v8314_v2 = vpop.permute.xlu1 %3313  ;;  %6288 = vset.pattern.permute.xlu1 %v9718_v29  ;;  %v1593_v11 = vadd.f32 %v1591_v33, %v1575_v25  ;;  %v2214_v25 = vand.u32 2147483647, %v2212_v6  ;;  %v1761_v33 = vsub.f32 %v10033_v30, %v8135_v7  ;;  %10034 = vst [vmem:[#allocation27_spill] sm:$0xff] %v8356_v62  ;;  %v10035_v7 = vld [vmem:[#allocation13_spill] sm:$0xff]  ;;  %v1745_v6 = vand.u32 2147483647, %v1743_v36 }
 0x434   :  { %10024 = vst [vmem:[#allocation37_spill] sm:$0xff] %v8314_v2  ;;  %3841 = vperm.xlu1 %6288, %v9983_v19   ;;  %v10027_v19 = vld [vmem:[#allocation43_spill] sm:$0xff]  ;;  %v10039_v36 = vld [vmem:[#allocation12_spill] sm:$0xff] }
 0x435   :  { %v2194_v3 = vsub.f32 %v10027_v19, %v8319_v17  ;;  %v1611_v56 = vadd.f32 %v1609_v35, %v1593_v11  ;;  %v8350_v19 = vrot.slane %v8276_v16, %v7457_v40  ;;  %v2232_v35 = vand.u32 2147483647, %v2230_v26  ;;  %v10038_v30 = vld [vmem:[#allocation155_spill] sm:$0xff] }
 0x436   :  { %v1763_v26 = vand.u32 2147483647, %v1761_v33  ;;  %v8390_v5 = vpop.permute.xlu0 %4727  ;;  %v10042_v33 = vld [vmem:[#allocation61_spill] sm:$0xff] }
 0x437   :  { %v2196_v45 = vand.u32 2147483647, %v2194_v3  ;;  %v8370_v3 = vrot.slane %v8276_v16, %v7493_v47  ;;  %v2248_v11 = vsub.f32 %v8209_v57, %v8350_v19  ;;  %v1779_v57 = vsub.f32 %v7851_v44, %v8144_v41  ;;  %10041 = vst [vmem:[#allocation71_spill] sm:$0xff] %v8390_v5  ;;  %v10047_v5 = vld [vmem:[#allocation39_spill] sm:$0xff] }
 0x438   :  { %v8338_v21 = vpop.permute.xlu1 %3331  ;;  %6289 = vset.pattern.permute.xlu1 %v9736_v9 }
 0x439   :  { %10029 = vst [vmem:[#allocation101_spill] sm:$0xff] %v8338_v21  ;;  %3855 = vperm.xlu1 %6289, %v6777_v61   ;;  %v1711_v61 = vadd.f32 %v1709_v13, %v1611_v56  ;;  %v2198_v0 = vadd.f32 %v2196_v45, %v2180_v50  ;;  %v2266_v56 = vsub.f32 %v10036_v53, %v8366_v52  ;;  %v2250_v62 = vand.u32 2147483647, %v2248_v11 }
 0x43a   :  { %v2284_v51 = vsub.f32 %v10038_v30, %v8370_v3  ;;  %v1781_v11 = vand.u32 2147483647, %v1779_v57 }
 0x43b   :  { %v2216_v13 = vadd.f32 %v2214_v25, %v2198_v0  ;;  %v1729_v50 = vadd.f32 %v1727_v31, %v1711_v61  ;;  %v10040_v0 = vld [vmem:[#allocation125_spill] sm:$0xff]  ;;  %v2268_v61 = vand.u32 2147483647, %v2266_v56  ;;  %v2384_v31 = vsub.f32 %v10042_v33, %v8379_v20  ;;  %v10046_v33 = vld [vmem:[#allocation162_spill] sm:$0xff] }
 0x43c   :  { %v8352_v12 = vpop.permute.xlu1 %3335  ;;  %v1797_v53 = vsub.f32 %v10040_v0, %v8148_v8  ;;  %v2286_v41 = vand.u32 2147483647, %v2284_v51  ;;  %v8402_v8 = vrot.slane %v8362_v48, %v7431_v46 }
 0x43d   :  { %10032 = vst [vmem:[#allocation69_spill] sm:$0xff] %v8352_v12  ;;  %6290 = vset.pattern.permute.xlu1 %v9721_v14  ;;  %v2234_v16 = vadd.f32 %v2232_v35, %v2216_v13  ;;  %v1747_v25 = vadd.f32 %v1745_v6, %v1729_v50  ;;  %v10043_v13 = vld [vmem:[#allocation126_spill] sm:$0xff]  ;;  %v1833_v12 = vsub.f32 %v10047_v5, %v8187_v34 }
 0x43e   :  { %3954 = vperm.xlu1 %6290, %v10035_v7   ;;  %v1815_v30 = vsub.f32 %v10043_v13, %v8177_v49  ;;  %v1799_v56 = vand.u32 2147483647, %v1797_v53  ;;  %v10045_v49 = vld [vmem:[#allocation160_spill] sm:$0xff]  ;;  %v2420_v13 = vsub.f32 %v10046_v33, %v8402_v8  ;;  %v10048_v53 = vld [vmem:[#allocation129_spill] sm:$0xff] }
 0x43f   :  { %v1765_v35 = vadd.f32 %v1763_v26, %v1747_v25  ;;  %v2252_v44 = vadd.f32 %v2250_v62, %v2234_v16  ;;  %v8410_v62 = vpop.permute.xlu0 %2503  ;;  %v2386_v16 = vand.u32 2147483647, %v2384_v31  ;;  %v1933_v24 = vsub.f32 %v10048_v53, %v8191_v55 }
 0x440   :  { %v1817_v0 = vand.u32 2147483647, %v1815_v30  ;;  %v8432_v55 = vrot.slane %v8362_v48, %v7453_v32 }
 0x441   :  { %v8381_v45 = vpop.permute.xlu1 %3353  ;;  %v2270_v50 = vadd.f32 %v2268_v61, %v2252_v44  ;;  %v1783_v25 = vadd.f32 %v1781_v11, %v1765_v35  ;;  %v8423_v35 = vrot.slane %v8362_v48, %v7443_v38  ;;  %v10050_v44 = vld [vmem:[#allocation130_spill] sm:$0xff]  ;;  %v2422_v11 = vand.u32 2147483647, %v2420_v13 }
 0x442   :  { %10037 = vst [vmem:[#allocation104_spill] sm:$0xff] %v8381_v45  ;;  %3959 = vperm.xlu1 %6290, %v10039_v36   ;;  %v8398_v45 = vrot.slane %v8362_v48, %v7419_v37 }
 0x443   :  { %v2288_v51 = vadd.f32 %v2286_v41, %v2270_v50  ;;  %v1801_v57 = vadd.f32 %v1799_v56, %v1783_v25  ;;  %v1951_v41 = vsub.f32 %v10050_v44, %v8215_v42  ;;  %v8428_v34 = vpop.permute.xlu0 %2725  ;;  %v8436_v56 = vrot.slane %v8362_v48, %v7457_v40  ;;  %v8438_v50 = vpop.f32.mrb[22].mxu1  ;;  %v10054_v42 = vld [vmem:[#allocation86_spill] sm:$0xff] }
 0x444   :  { %v2402_v26 = vsub.f32 %v10045_v49, %v8398_v45  ;;  %10051 = vst [vmem:[#allocation28_spill] sm:$0xff] %v8438_v50  ;;  %v1835_v49 = vand.u32 2147483647, %v1833_v12  ;;  %v2438_v33 = vsub.f32 %v10054_v42, %v8423_v35  ;;  %v10056_v12 = vld [vmem:[#allocation165_spill] sm:$0xff] }
 0x445   :  { %v1819_v30 = vadd.f32 %v1817_v0, %v1801_v57  ;;  %v2388_v5 = vadd.f32 %v2386_v16, %v2288_v51  ;;  %v8442_v0 = vpop.f32.mrb[23].mxu1  ;;  %v2456_v16 = vsub.f32 %v7599_v23, %v8432_v55  ;;  %v1953_v13 = vand.u32 2147483647, %v1951_v41  ;;  %v10058_v42 = vld [vmem:[#allocation29_spill] sm:$0xff] }
 0x446   :  { %v8404_v6 = vpop.permute.xlu1 %3367  ;;  %6292 = vset.pattern.permute.xlu1 %v9722_v22  ;;  %v2404_v31 = vand.u32 2147483647, %v2402_v26  ;;  %v1935_v26 = vand.u32 2147483647, %v1933_v24  ;;  %10053 = vst [vmem:[#allocation34_spill] sm:$0xff] %v8442_v0  ;;  %5329 = vperm.xlu0 %6343, %v8442_v0   ;;  %v2474_v44 = vsub.f32 %v10056_v12, %v8436_v56  ;;  %v8460_v23 = vld [vmem:[%s9614_s4 + $0x58] sm:$0xff] }
 0x447   :  { %10044 = vst [vmem:[#allocation105_spill] sm:$0xff] %v8404_v6  ;;  %3977 = vperm.xlu1 %6292, %v10039_v36   ;;  %v1837_v51 = vadd.f32 %v1835_v49, %v1819_v30  ;;  %v8450_v53 = vpop.permute.xlu0 %3181  ;;  %v10059_v30 = vld [vmem:[#allocation133_spill] sm:$0xff]  ;;  %v2440_v49 = vand.u32 2147483647, %v2438_v33  ;;  %v10061_v12 = vld [vmem:[#allocation134_spill] sm:$0xff] }
 0x448   :  { %v2406_v57 = vadd.f32 %v2404_v31, %v2388_v5  ;;  %10055 = vst [vmem:[#allocation111_spill] sm:$0xff] %v8450_v53  ;;  %v1987_v41 = vsub.f32 %v10059_v30, %v8226_v4  ;;  %v8466_v53 = vrot.slane %v8362_v48, %v7474_v58  ;;  %v8477_v4 = vrot.slane %v8362_v48, %v7493_v47 }
 0x449   :  { %v1937_v5 = vadd.f32 %v1935_v26, %v1837_v51  ;;  %v10062_v26 = vld [vmem:[#allocation110_spill] sm:$0xff]  ;;  %v2476_v51 = vand.u32 2147483647, %v2474_v44 }
 0x44a   :  { %v2424_v24 = vadd.f32 %v2422_v11, %v2406_v57  ;;  %v2458_v11 = vand.u32 2147483647, %v2456_v16  ;;  %6347 = vset.pattern.permute.xlu0 %v9731_v18  ;;  %v8481_v16 = vrot.slane %v8460_v23, %v7413_v10 }
 0x44b   :  { %v8418_v61 = vpop.permute.xlu1 %3385  ;;  %6293 = vset.pattern.permute.xlu1 %v9728_v27  ;;  %4705 = vperm.xlu0 %6347, %v10062_v26   ;;  %v10066_v26 = vld [vmem:[#allocation20_spill] sm:$0xff] }
 0x44c   :  { %10049 = vst [vmem:[#allocation72_spill] sm:$0xff] %v8418_v61  ;;  %3991 = vperm.xlu1 %6293, %v10035_v7   ;;  %v2442_v33 = vadd.f32 %v2440_v49, %v2424_v24  ;;  %10063 = vst [vmem:[#allocation73_spill] sm:$0xff] %v8481_v16  ;;  %v2510_v61 = vsub.f32 %v10066_v26, %v8477_v4  ;;  %v10068_v24 = vld [vmem:[#allocation11_spill] sm:$0xff]  ;;  %v10071_v26 = vld [vmem:[#allocation137_spill] sm:$0xff] }
 0x44d   :  { %v10070_v49 = vld [vmem:[#allocation47_spill] sm:$0xff] }
 0x44f   :  { %v8440_v25 = vpop.permute.xlu1 %3389  ;;  %5161 = vperm.xlu0 %6347, %v10068_v24  }
 0x450   :  { %10052 = vst [vmem:[#allocation109_spill] sm:$0xff] %v8440_v25  ;;  %6294 = vset.pattern.permute.xlu1 %v9713_v54  ;;  %v10057_v25 = vld [vmem:[#allocation108_spill] sm:$0xff] }
 0x451   :  { %4009 = vperm.xlu1 %6294, %v10035_v7   ;;  %v1969_v31 = vsub.f32 %v10058_v42, %v10057_v25  ;;  %v1955_v25 = vadd.f32 %v1953_v13, %v1937_v5  ;;  %v2005_v42 = vsub.f32 %v10061_v12, %v8246_v63  ;;  %v8483_v13 = vpop.permute.xlu0 %3403  ;;  %v10065_v63 = vld [vmem:[#allocation121_spill] sm:$0xff]  ;;  %v2460_v12 = vadd.f32 %v2458_v11, %v2442_v33 }
 0x452   :  { %10064 = vst [vmem:[#allocation117_spill] sm:$0xff] %v8483_v13  ;;  %v2492_v5 = vsub.f32 %v10065_v63, %v8466_v53  ;;  %v2023_v11 = vsub.f32 %v10070_v49, %v8257_v28  ;;  %v2512_v63 = vand.u32 2147483647, %v2510_v61  ;;  %v8511_v28 = vrot.slane %v8460_v23, %v7431_v46  ;;  %v10076_v49 = vld [vmem:[#allocation54_spill] sm:$0xff] }
 0x453   :  { %v1971_v30 = vand.u32 2147483647, %v1969_v31  ;;  %v2007_v48 = vand.u32 2147483647, %v2005_v42  ;;  %v2478_v44 = vadd.f32 %v2476_v51, %v2460_v12  ;;  %v10069_v31 = vld [vmem:[#allocation9_spill] sm:$0xff]  ;;  %v10072_v51 = vld [vmem:[#allocation138_spill] sm:$0xff]  ;;  %5383 = vperm.xlu0 %6347, %v8442_v0  }
 0x454   :  { %v8468_v57 = vpop.permute.xlu1 %3407  ;;  %v2494_v42 = vand.u32 2147483647, %v2492_v5  ;;  %v2059_v12 = vsub.f32 %v10072_v51, %v8287_v15  ;;  %v10075_v61 = vmov 5   ;;  %v10077_v51 = vld [vmem:[#allocation56_spill] sm:$0xff] }
 0x455   :  { %10060 = vst [vmem:[#allocation57_spill] sm:$0xff] %v8468_v57  ;;  %4013 = vperm.xlu1 %6294, %v10039_v36   ;;  %v1989_v57 = vand.u32 2147483647, %v1987_v41  ;;  %v1973_v6 = vadd.f32 %v1971_v30, %v1955_v25  ;;  %v2610_v41 = vsub.f32 %v10069_v31, %v8481_v16  ;;  %v2041_v25 = vsub.f32 %v10071_v26, %v8261_v60  ;;  %v8506_v31 = vpop.permute.xlu0 %3859  ;;  %v10081_v16 = vld [vmem:[#allocation154_spill] sm:$0xff] }
 0x456   :  { %v8502_v30 = vrot.slane %v8460_v23, %v7419_v37  ;;  %10073 = vst [vmem:[#allocation119_spill] sm:$0xff] %v8506_v31  ;;  %v2061_v13 = vand.u32 2147483647, %v2059_v12 }
 0x457   :  { %v1991_v33 = vadd.f32 %v1989_v57, %v1973_v6  ;;  %v2496_v6 = vadd.f32 %v2494_v42, %v2478_v44  ;;  %v2612_v60 = vand.u32 2147483647, %v2610_v41  ;;  %v8515_v57 = vrot.slane %v8460_v23, %v7443_v38  ;;  %v10078_v41 = vld [vmem:[#allocation59_spill] sm:$0xff]  ;;  %6351 = vset.pattern.permute.xlu0 %v10075_v61 }
 0x458   :  { %v2043_v15 = vand.u32 2147483647, %v2041_v25  ;;  %v2646_v44 = vsub.f32 %v10077_v51, %v8511_v28  ;;  %v2159_v42 = vsub.f32 %v10078_v41, %v8293_v39  ;;  %4949 = vperm.xlu0 %6351, %v10081_v16  }
 0x459   :  { %v8489_v21 = vpop.permute.xlu1 %3502  ;;  %6295 = vset.pattern.permute.xlu1 %v9731_v18  ;;  %v2514_v26 = vadd.f32 %v2512_v63, %v2496_v6  ;;  %v10082_v63 = vld [vmem:[#allocation141_spill] sm:$0xff]  ;;  %v8535_v51 = vpop.permute.xlu0 %4081 }
 0x45a   :  { %10067 = vst [vmem:[#allocation75_spill] sm:$0xff] %v8489_v21  ;;  %4031 = vperm.xlu1 %6295, %v10039_v36   ;;  %v2009_v21 = vadd.f32 %v2007_v48, %v1991_v33  ;;  %v2025_v48 = vand.u32 2147483647, %v2023_v11  ;;  %v2628_v33 = vsub.f32 %v10076_v49, %v8502_v30  ;;  %v10079_v11 = vld [vmem:[#allocation58_spill] sm:$0xff]  ;;  %v2177_v6 = vsub.f32 %v10082_v63, %v8297_v59 }
 0x45b   :  { %v2664_v25 = vsub.f32 %v10079_v11, %v8515_v57  ;;  %10083 = vst [vmem:[#allocation78_spill] sm:$0xff] %v8535_v51  ;;  %v2648_v12 = vand.u32 2147483647, %v2646_v44  ;;  %v8547_v59 = vrot.slane %v8460_v23, %v7457_v40 }
 0x45c   :  { %v2027_v31 = vadd.f32 %v2025_v48, %v2009_v21  ;;  %v2630_v39 = vand.u32 2147483647, %v2628_v33  ;;  %v8540_v21 = vrot.slane %v8460_v23, %v7453_v32  ;;  %v8551_v33 = vrot.slane %v8460_v23, %v7474_v58  ;;  %5405 = vperm.xlu0 %6351, %v8438_v50   ;;  %v10104_v50 = vld [vmem:[#allocation53_spill] sm:$0xff] }
 0x45d   :  { %v2666_v41 = vand.u32 2147483647, %v2664_v25  ;;  %v2179_v44 = vand.u32 2147483647, %v2177_v6  ;;  %v8561_v63 = vpop.permute.xlu0 %4537  ;;  %v8569_v6 = vld [vmem:[%s9614_s4 + $0x60] sm:$0xff] }
 0x45e   :  { %v8517_v5 = vpop.permute.xlu1 %3521  ;;  %6296 = vset.pattern.permute.xlu1 %v10075_v61  ;;  %v2045_v49 = vadd.f32 %v2043_v15, %v2027_v31  ;;  %10088 = vst [vmem:[#allocation94_spill] sm:$0xff] %v8561_v63  ;;  %v10092_v63 = vld [vmem:[#allocation149_spill] sm:$0xff] }
 0x45f   :  { %10074 = vst [vmem:[#allocation26_spill] sm:$0xff] %v8517_v5  ;;  %4045 = vperm.xlu1 %6296, %v10035_v7   ;;  %v2614_v5 = vadd.f32 %v2612_v60, %v2514_v26  ;;  %v2161_v60 = vand.u32 2147483647, %v2159_v42  ;;  %v10084_v26 = vld [vmem:[#allocation142_spill] sm:$0xff] }
 0x460   :  { %v2063_v48 = vadd.f32 %v2061_v13, %v2045_v49  ;;  %v2195_v31 = vsub.f32 %v10084_v26, %v8319_v17  ;;  %v10087_v17 = vld [vmem:[#allocation30_spill] sm:$0xff]  ;;  %6354 = vset.pattern.permute.xlu0 %v9736_v9 }
 0x461   :  { %v2632_v15 = vadd.f32 %v2630_v39, %v2614_v5  ;;  %v2700_v49 = vsub.f32 %v10087_v17, %v8547_v59  ;;  %v10089_v26 = vld [vmem:[#allocation62_spill] sm:$0xff]  ;;  %5215 = vperm.xlu0 %6354, %v10068_v24  }
 0x462   :  { %v8530_v2 = vpop.permute.xlu1 %3525  ;;  %v2163_v5 = vadd.f32 %v2161_v60, %v2063_v48  ;;  %v2197_v25 = vand.u32 2147483647, %v2195_v31  ;;  %v2718_v16 = vsub.f32 %v10089_v26, %v8551_v33  ;;  %v10091_v60 = vld [vmem:[#allocation147_spill] sm:$0xff] }
 0x463   :  { %10080 = vst [vmem:[#allocation8_spill] sm:$0xff] %v8530_v2  ;;  %6297 = vset.pattern.permute.xlu1 %v9718_v29  ;;  %v2650_v42 = vadd.f32 %v2648_v12, %v2632_v15  ;;  %v10090_v12 = vld [vmem:[#allocation83_spill] sm:$0xff]  ;;  %v2231_v48 = vsub.f32 %v10091_v60, %v8330_v1  ;;  %v8588_v1 = vrot.slane %v8569_v6, %v7413_v10 }
 0x464   :  { %4063 = vperm.xlu1 %6297, %v10035_v7   ;;  %v10086_v7 = vld [vmem:[#allocation38_spill] sm:$0xff]  ;;  %v2213_v15 = vsub.f32 %v10090_v12, %v8326_v43  ;;  %v2249_v43 = vsub.f32 %v10092_v63, %v8350_v19  ;;  %v8594_v12 = vpop.permute.xlu0 %4759 }
 0x465   :  { %v2682_v13 = vsub.f32 %v10086_v7, %v8540_v21  ;;  %v2668_v39 = vadd.f32 %v2666_v41, %v2650_v42  ;;  %v2181_v7 = vadd.f32 %v2179_v44, %v2163_v5  ;;  %v8578_v41 = vrot.slane %v8460_v23, %v7493_v47  ;;  %10093 = vst [vmem:[#allocation124_spill] sm:$0xff] %v8594_v12  ;;  %v10097_v12 = vld [vmem:[#allocation118_spill] sm:$0xff] }
 0x466   :  { %v2702_v42 = vand.u32 2147483647, %v2700_v49  ;;  %v8592_v23 = vrot.slane %v8569_v6, %v7419_v37  ;;  %v2215_v49 = vand.u32 2147483647, %v2213_v15  ;;  %v2233_v5 = vand.u32 2147483647, %v2231_v48  ;;  %5437 = vperm.xlu0 %6354, %v8442_v0  }
 0x467   :  { %v8554_v11 = vpop.permute.xlu1 %3543  ;;  %v2684_v31 = vand.u32 2147483647, %v2682_v13  ;;  %v2199_v26 = vadd.f32 %v2197_v25, %v2181_v7  ;;  %v2720_v13 = vand.u32 2147483647, %v2718_v16  ;;  %v2736_v19 = vsub.f32 %v8428_v34, %v8578_v41  ;;  %v10094_v25 = vld [vmem:[#allocation22_spill] sm:$0xff] }
 0x468   :  { %10085 = vst [vmem:[#allocation123_spill] sm:$0xff] %v8554_v11  ;;  %4067 = vperm.xlu1 %6297, %v10039_v36   ;;  %v2836_v63 = vsub.f32 %v10094_v25, %v8588_v1  ;;  %v10095_v15 = vld [vmem:[#allocation6_spill] sm:$0xff]  ;;  %v2267_v0 = vsub.f32 %v10097_v12, %v8366_v52  ;;  %v8622_v52 = vrot.slane %v8569_v6, %v7443_v38 }
 0x469   :  { %v2686_v44 = vadd.f32 %v2684_v31, %v2668_v39  ;;  %v2217_v7 = vadd.f32 %v2215_v49, %v2199_v26  ;;  %v2251_v39 = vand.u32 2147483647, %v2249_v43  ;;  %v2854_v48 = vsub.f32 %v10095_v15, %v8592_v23  ;;  %v10096_v31 = vld [vmem:[#allocation81_spill] sm:$0xff]  ;;  %v2862_v15 = vpop.permute.xlu0 %2861 }
 0x46a   :  { %6358 = vset.pattern.permute.xlu0 %v9721_v14  ;;  %v2738_v26 = vand.u32 2147483647, %v2736_v19  ;;  %v8614_v43 = vrot.slane %v8569_v6, %v7431_v46  ;;  %v8626_v12 = vrot.slane %v8569_v6, %v7453_v32  ;;  %v2269_v19 = vand.u32 2147483647, %v2267_v0 }
 0x46b   :  { %v2235_v34 = vadd.f32 %v2233_v5, %v2217_v7  ;;  %v2856_v5 = vand.u32 2147483647, %v2854_v48  ;;  %v10102_v48 = vld [vmem:[#allocation65_spill] sm:$0xff]  ;;  %v2403_v0 = vsub.f32 %v10104_v50, %v8398_v45  ;;  %v8651_v45 = vld [vmem:[%s9614_s4 + $0x68] sm:$0xff] }
 0x46c   :  { %v8580_v17 = vpop.permute.xlu1 %3557  ;;  %6298 = vset.pattern.permute.xlu1 %v9736_v9 }
 0x46d   :  { %4085 = vperm.xlu1 %6298, %v10039_v36   ;;  %v2704_v36 = vadd.f32 %v2702_v42, %v2686_v44  ;;  %v10098_v42 = vld [vmem:[#allocation157_spill] sm:$0xff]  ;;  %v2253_v49 = vadd.f32 %v2251_v39, %v2235_v34  ;;  %v10101_v39 = vld [vmem:[#allocation24_spill] sm:$0xff] }
 0x46e   :  { %v2285_v44 = vsub.f32 %v10098_v42, %v8370_v3  ;;  %v2890_v34 = vsub.f32 %v10101_v39, %v8622_v52 }
 0x46f   :  { %v2722_v60 = vadd.f32 %v2720_v13, %v2704_v36  ;;  %v2838_v13 = vand.u32 2147483647, %v2836_v63  ;;  %v10099_v36 = vld [vmem:[#allocation159_spill] sm:$0xff]  ;;  %v2271_v42 = vadd.f32 %v2269_v19, %v2253_v49 }
 0x470   :  { %v2385_v25 = vsub.f32 %v10099_v36, %v8379_v20  ;;  %v2287_v63 = vand.u32 2147483647, %v2285_v44  ;;  %v2872_v20 = vsub.f32 %v2862_v15, %v8614_v43  ;;  %v10106_v15 = vld [vmem:[#allocation80_spill] sm:$0xff] }
 0x471   :  { %v8601_v16 = vpop.permute.xlu1 %3575  ;;  %6299 = vset.pattern.permute.xlu1 %v9721_v14  ;;  %v2740_v3 = vadd.f32 %v2738_v26, %v2722_v60  ;;  %v2908_v26 = vsub.f32 %v10102_v48, %v8626_v12 }
 0x472   :  { %4180 = vperm.xlu1 %6299, %v10096_v31   ;;  %v2387_v36 = vand.u32 2147483647, %v2385_v25  ;;  %v2289_v44 = vadd.f32 %v2287_v63, %v2271_v42  ;;  %v2874_v49 = vand.u32 2147483647, %v2872_v20  ;;  %v2892_v25 = vand.u32 2147483647, %v2890_v34 }
 0x473   :  { %v2840_v7 = vadd.f32 %v2838_v13, %v2740_v3  ;;  %v8644_v13 = vrot.slane %v8569_v6, %v7457_v40  ;;  %v8659_v63 = vrot.slane %v8569_v6, %v7493_v47  ;;  %v2405_v20 = vand.u32 2147483647, %v2403_v0  ;;  %v10110_v0 = vld [vmem:[#allocation77_spill] sm:$0xff] }
 0x474   :  { %v2389_v3 = vadd.f32 %v2387_v36, %v2289_v44  ;;  %v10109_v36 = vld [vmem:[#allocation36_spill] sm:$0xff] }
 0x475   :  { %v8618_v24 = vpop.permute.xlu1 %3579  ;;  %v2858_v60 = vadd.f32 %v2856_v5, %v2840_v7  ;;  %v10107_v5 = vld [vmem:[#allocation164_spill] sm:$0xff]  ;;  %v2962_v44 = vsub.f32 %v10110_v0, %v8659_v63 }
 0x476   :  { %10100 = vst [vmem:[#allocation95_spill] sm:$0xff] %v8618_v24  ;;  %6300 = vset.pattern.permute.xlu1 %v9722_v22  ;;  %v10105_v24 = vld [vmem:[#allocation163_spill] sm:$0xff]  ;;  %v2439_v19 = vsub.f32 %v10107_v5, %v8423_v35  ;;  %v10108_v35 = vld [vmem:[#allocation5_spill] sm:$0xff] }
 0x477   :  { %4199 = vperm.xlu1 %6300, %v10096_v31   ;;  %v2421_v11 = vsub.f32 %v10105_v24, %v8402_v8  ;;  %v8655_v8 = vrot.slane %v8569_v6, %v7474_v58  ;;  %v2876_v50 = vadd.f32 %v2874_v49, %v2858_v60  ;;  %v2910_v24 = vand.u32 2147483647, %v2908_v26  ;;  %v10111_v49 = vld [vmem:[#allocation18_spill] sm:$0xff] }
 0x478   :  { %v2926_v34 = vsub.f32 %v10108_v35, %v8644_v13  ;;  %v8671_v60 = vrot.slane %v8651_v45, %v7413_v10  ;;  %v2407_v6 = vadd.f32 %v2405_v20, %v2389_v3  ;;  %v2441_v26 = vand.u32 2147483647, %v2439_v19  ;;  %v10113_v3 = vld [vmem:[#allocation66_spill] sm:$0xff]  ;;  %v10114_v20 = vld [vmem:[#allocation51_spill] sm:$0xff] }
 0x479   :  { %v2423_v7 = vand.u32 2147483647, %v2421_v11  ;;  %v2894_v42 = vadd.f32 %v2892_v25, %v2876_v50  ;;  %v2944_v48 = vsub.f32 %v10109_v36, %v8655_v8  ;;  %v2457_v5 = vsub.f32 %v10111_v49, %v8432_v55  ;;  %v10112_v25 = vld [vmem:[#allocation166_spill] sm:$0xff] }
 0x47a   :  { %v8635_v51 = vpop.permute.xlu1 %3597  ;;  %v2475_v50 = vsub.f32 %v10112_v25, %v8436_v56  ;;  %v2928_v36 = vand.u32 2147483647, %v2926_v34  ;;  %v3062_v19 = vsub.f32 %v10113_v3, %v8671_v60  ;;  %v8689_v55 = vrot.slane %v8651_v45, %v7419_v37  ;;  %v8699_v3 = vpop.permute.xlu0 %3317 }
 0x47b   :  { %10103 = vst [vmem:[#allocation116_spill] sm:$0xff] %v8635_v51  ;;  %4203 = vperm.xlu1 %6300, %v10106_v15   ;;  %v2912_v11 = vadd.f32 %v2910_v24, %v2894_v42  ;;  %v2425_v35 = vadd.f32 %v2423_v7, %v2407_v6  ;;  %v2946_v51 = vand.u32 2147483647, %v2944_v48  ;;  %v2493_v42 = vsub.f32 %v10114_v20, %v8466_v53 }
 0x47c   :  { %v2964_v7 = vand.u32 2147483647, %v2962_v44  ;;  %v8693_v34 = vrot.slane %v8651_v45, %v7431_v46  ;;  %v2459_v48 = vand.u32 2147483647, %v2457_v5  ;;  %v2477_v6 = vand.u32 2147483647, %v2475_v50 }
 0x47d   :  { %v2443_v24 = vadd.f32 %v2441_v26, %v2425_v35  ;;  %v2930_v56 = vadd.f32 %v2928_v36, %v2912_v11  ;;  %v10115_v26 = vld [vmem:[#allocation82_spill] sm:$0xff]  ;;  %v2495_v25 = vand.u32 2147483647, %v2493_v42  ;;  %10117 = vst [vmem:[#allocation23_spill] sm:$0xff] %v8699_v3  ;;  %v3064_v11 = vand.u32 2147483647, %v3062_v19 }
 0x47e   :  { %v3080_v49 = vsub.f32 %v10115_v26, %v8689_v55  ;;  %v10118_v36 = vld [vmem:[#allocation85_spill] sm:$0xff] }
 0x47f   :  { %v8661_v39 = vpop.permute.xlu1 %3611  ;;  %6301 = vset.pattern.permute.xlu1 %v9728_v27  ;;  %v2948_v0 = vadd.f32 %v2946_v51, %v2930_v56  ;;  %v2461_v53 = vadd.f32 %v2459_v48, %v2443_v24  ;;  %v3098_v20 = vsub.f32 %v10118_v36, %v8693_v34  ;;  %v2511_v51 = vsub.f32 %v8410_v62, %v8477_v4  ;;  %v10119_v50 = vld [vmem:[#allocation73_spill] sm:$0xff]  ;;  %v10120_v56 = vld [vmem:[#allocation16_spill] sm:$0xff] }
 0x480   :  { %4221 = vperm.xlu1 %6301, %v10106_v15   ;;  %v2611_v26 = vsub.f32 %v10120_v56, %v10119_v50  ;;  %v8711_v24 = vrot.slane %v8651_v45, %v7443_v38  ;;  %v3082_v42 = vand.u32 2147483647, %v3080_v49  ;;  %v10121_v19 = vld [vmem:[#allocation17_spill] sm:$0xff]  ;;  %v8721_v62 = vrot.slane %v8651_v45, %v7453_v32  ;;  %v10124_v56 = vld [vmem:[#allocation70_spill] sm:$0xff] }
 0x481   :  { %v2966_v44 = vadd.f32 %v2964_v7, %v2948_v0  ;;  %v2479_v5 = vadd.f32 %v2477_v6, %v2461_v53  ;;  %v2629_v7 = vsub.f32 %v10121_v19, %v8502_v30  ;;  %v8715_v0 = vpop.permute.xlu0 %3539  ;;  %v3100_v6 = vand.u32 2147483647, %v3098_v20  ;;  %v10123_v30 = vld [vmem:[#allocation90_spill] sm:$0xff] }
 0x482   :  { %v8725_v53 = vrot.slane %v8651_v45, %v7457_v40  ;;  %v2513_v49 = vand.u32 2147483647, %v2511_v51  ;;  %v3134_v19 = vsub.f32 %v10124_v56, %v8721_v62  ;;  %v10127_v51 = vld [vmem:[#allocation45_spill] sm:$0xff]  ;;  %v10130_v56 = vld [vmem:[#allocation60_spill] sm:$0xff] }
 0x483   :  { %v2497_v48 = vadd.f32 %v2495_v25, %v2479_v5  ;;  %v3066_v4 = vadd.f32 %v3064_v11, %v2966_v44  ;;  %v2613_v25 = vand.u32 2147483647, %v2611_v26  ;;  %v3116_v5 = vsub.f32 %v10123_v30, %v8711_v24  ;;  %v10125_v11 = vld [vmem:[#allocation46_spill] sm:$0xff] }
 0x484   :  { %v8679_v2 = vpop.permute.xlu1 %3629  ;;  %6302 = vset.pattern.permute.xlu1 %v9713_v54  ;;  %v3152_v44 = vsub.f32 %v10125_v11, %v8725_v53  ;;  %v2647_v26 = vsub.f32 %v10127_v51, %v8511_v28  ;;  %v8751_v30 = vrot.slane %v8651_v45, %v7474_v58  ;;  %v2683_v11 = vsub.f32 %v10130_v56, %v8540_v21 }
 0x485   :  { %4235 = vperm.xlu1 %6302, %v10096_v31   ;;  %v3084_v50 = vadd.f32 %v3082_v42, %v3066_v4  ;;  %v8742_v42 = vld [vmem:[%s9614_s4 + $0x70] sm:$0xff] }
 0x486   :  { %v8761_v51 = vrot.slane %v8742_v42, %v7413_v10 }
 0x487   :  { %v3102_v3 = vadd.f32 %v3100_v6, %v3084_v50  ;;  %v8746_v6 = vpop.permute.xlu0 %3995  ;;  %v3136_v50 = vand.u32 2147483647, %v3134_v19 }
 0x488   :  { %v8697_v35 = vpop.permute.xlu1 %3633  ;;  %10129 = vst [vmem:[#allocation99_spill] sm:$0xff] %v8746_v6 }
 0x489   :  { %10116 = vst [vmem:[#allocation127_spill] sm:$0xff] %v8697_v35  ;;  %6303 = vset.pattern.permute.xlu1 %v9731_v18  ;;  %v2631_v35 = vand.u32 2147483647, %v2629_v7 }
 0x48a   :  { %4253 = vperm.xlu1 %6303, %v10096_v31  }
 0x48d   :  { %v8717_v36 = vpop.permute.xlu1 %3733 }
 0x48e   :  { %10122 = vst [vmem:[#allocation128_spill] sm:$0xff] %v8717_v36  ;;  %4257 = vperm.xlu1 %6303, %v10106_v15   ;;  %v2515_v36 = vadd.f32 %v2513_v49, %v2497_v48  ;;  %v10128_v48 = vld [vmem:[#allocation25_spill] sm:$0xff]  ;;  %v3118_v49 = vand.u32 2147483647, %v3116_v5  ;;  %v2649_v5 = vand.u32 2147483647, %v2647_v26 }
 0x48f   :  { %v2665_v7 = vsub.f32 %v10128_v48, %v8515_v57  ;;  %v3154_v57 = vand.u32 2147483647, %v3152_v44  ;;  %v2685_v44 = vand.u32 2147483647, %v2683_v11  ;;  %v10135_v26 = vld [vmem:[#allocation67_spill] sm:$0xff] }
 0x490   :  { %v2615_v4 = vadd.f32 %v2613_v25, %v2515_v36  ;;  %v8757_v36 = vrot.slane %v8651_v45, %v7493_v47  ;;  %v3120_v25 = vadd.f32 %v3118_v49, %v3102_v3  ;;  %v8771_v49 = vpop.permute.xlu0 %4217 }
 0x491   :  { %v2667_v48 = vand.u32 2147483647, %v2665_v7  ;;  %10134 = vst [vmem:[#allocation55_spill] sm:$0xff] %v8771_v49  ;;  %v3288_v7 = vsub.f32 %v10135_v26, %v8761_v51 }
 0x492   :  { %v8734_v20 = vpop.permute.xlu1 %3747  ;;  %6304 = vset.pattern.permute.xlu1 %v10075_v61  ;;  %v2633_v28 = vadd.f32 %v2631_v35, %v2615_v4  ;;  %v10132_v35 = vld [vmem:[#allocation150_spill] sm:$0xff]  ;;  %v3138_v21 = vadd.f32 %v3136_v50, %v3120_v25  ;;  %v10133_v4 = vld [vmem:[#allocation48_spill] sm:$0xff] }
 0x493   :  { %10126 = vst [vmem:[#allocation98_spill] sm:$0xff] %v8734_v20  ;;  %4275 = vperm.xlu1 %6304, %v10106_v15   ;;  %v3170_v19 = vsub.f32 %v10132_v35, %v8751_v30  ;;  %v3188_v45 = vsub.f32 %v10133_v4, %v8757_v36  ;;  %v10137_v35 = vld [vmem:[#allocation7_spill] sm:$0xff] }
 0x494   :  { %v2651_v3 = vadd.f32 %v2649_v5, %v2633_v28  ;;  %v3156_v56 = vadd.f32 %v3154_v57, %v3138_v21  ;;  %v2719_v50 = vsub.f32 %v10137_v35, %v8551_v33  ;;  %v8783_v28 = vrot.slane %v8742_v42, %v7419_v37  ;;  %v10139_v5 = vld [vmem:[#allocation31_spill] sm:$0xff] }
 0x495   :  { %v3172_v4 = vand.u32 2147483647, %v3170_v19  ;;  %v3190_v11 = vand.u32 2147483647, %v3188_v45  ;;  %v2737_v21 = vsub.f32 %v10139_v5, %v8578_v41  ;;  %v8791_v33 = vrot.slane %v8742_v42, %v7431_v46  ;;  %v10144_v35 = vld [vmem:[#allocation63_spill] sm:$0xff] }
 0x496   :  { %v2669_v20 = vadd.f32 %v2667_v48, %v2651_v3  ;;  %v8795_v48 = vrot.slane %v8742_v42, %v7443_v38  ;;  %v2721_v45 = vand.u32 2147483647, %v2719_v50  ;;  %v8797_v3 = vpop.permute.xlu0 %4673  ;;  %v10145_v50 = vld [vmem:[#allocation101_spill] sm:$0xff] }
 0x497   :  { %v8763_v6 = vpop.permute.xlu1 %3765  ;;  %6305 = vset.pattern.permute.xlu1 %v9718_v29  ;;  %10140 = vst [vmem:[#allocation102_spill] sm:$0xff] %v8797_v3  ;;  %v2739_v5 = vand.u32 2147483647, %v2737_v21 }
 0x498   :  { %10131 = vst [vmem:[#allocation131_spill] sm:$0xff] %v8763_v6  ;;  %4289 = vperm.xlu1 %6305, %v10096_v31   ;;  %v10136_v6 = vld [vmem:[#allocation93_spill] sm:$0xff]  ;;  %v2687_v57 = vadd.f32 %v2685_v44, %v2669_v20  ;;  %v10141_v20 = vld [vmem:[#allocation15_spill] sm:$0xff]  ;;  %v3342_v3 = vsub.f32 %v10145_v50, %v8795_v48 }
 0x499   :  { %v2701_v29 = vsub.f32 %v10136_v6, %v8547_v59  ;;  %v3174_v59 = vadd.f32 %v3172_v4, %v3156_v56  ;;  %v3290_v6 = vand.u32 2147483647, %v3288_v7  ;;  %v3306_v44 = vsub.f32 %v10141_v20, %v8783_v28  ;;  %v10146_v20 = vld [vmem:[#allocation33_spill] sm:$0xff] }
 0x49a   :  { %v2837_v7 = vsub.f32 %v10144_v35, %v8588_v1 }
 0x49b   :  { %v8779_v25 = vpop.permute.xlu1 %3769  ;;  %v2703_v19 = vand.u32 2147483647, %v2701_v29  ;;  %v3192_v41 = vadd.f32 %v3190_v11, %v3174_v59  ;;  %v2855_v11 = vsub.f32 %v10146_v20, %v8592_v23  ;;  %v3308_v59 = vand.u32 2147483647, %v3306_v44 }
 0x49c   :  { %10138 = vst [vmem:[#allocation132_spill] sm:$0xff] %v8779_v25  ;;  %6306 = vset.pattern.permute.xlu1 %v9736_v9  ;;  %v2839_v49 = vand.u32 2147483647, %v2837_v7  ;;  %v8825_v23 = vrot.slane %v8742_v42, %v7457_v40  ;;  %v8829_v44 = vrot.slane %v8742_v42, %v7474_v58  ;;  %v10153_v7 = vld [vmem:[#allocation105_spill] sm:$0xff] }
 0x49d   :  { %4307 = vperm.xlu1 %6306, %v10096_v31   ;;  %v10142_v31 = vld [vmem:[#allocation37_spill] sm:$0xff]  ;;  %v2705_v4 = vadd.f32 %v2703_v19, %v2687_v57  ;;  %v3292_v29 = vadd.f32 %v3290_v6, %v3192_v41  ;;  %v10147_v57 = vld [vmem:[#allocation64_spill] sm:$0xff]  ;;  %v2857_v41 = vand.u32 2147483647, %v2855_v11 }
 0x49e   :  { %v3324_v56 = vsub.f32 %v10142_v31, %v8791_v33  ;;  %v8814_v31 = vrot.slane %v8742_v42, %v7453_v32  ;;  %v2873_v21 = vsub.f32 %v10147_v57, %v8614_v43  ;;  %10149 = vst [vmem:[#allocation136_spill] sm:$0xff] %v8825_v23  ;;  %10150 = vst [vmem:[#allocation76_spill] sm:$0xff] %v8829_v44  ;;  %v10152_v43 = vld [vmem:[#allocation50_spill] sm:$0xff]  ;;  %v10155_v57 = vld [vmem:[#allocation88_spill] sm:$0xff] }
 0x49f   :  { %v2723_v25 = vadd.f32 %v2721_v45, %v2705_v4  ;;  %v3310_v19 = vadd.f32 %v3308_v59, %v3292_v29  ;;  %v3344_v45 = vand.u32 2147483647, %v3342_v3  ;;  %v3378_v4 = vsub.f32 %v10153_v7, %v8825_v23  ;;  %v10154_v29 = vld [vmem:[#allocation72_spill] sm:$0xff] }
 0x4a0   :  { %v8803_v26 = vpop.permute.xlu1 %3787  ;;  %v2875_v50 = vand.u32 2147483647, %v2873_v21  ;;  %v3396_v3 = vsub.f32 %v10154_v29, %v8829_v44  ;;  %v2891_v11 = vsub.f32 %v10155_v57, %v8622_v52  ;;  %v10159_v29 = vld [vmem:[#allocation52_spill] sm:$0xff] }
 0x4a1   :  { %10143 = vst [vmem:[#allocation103_spill] sm:$0xff] %v8803_v26  ;;  %4311 = vperm.xlu1 %6306, %v10106_v15   ;;  %v3326_v26 = vand.u32 2147483647, %v3324_v56  ;;  %v2741_v1 = vadd.f32 %v2739_v5, %v2723_v25  ;;  %v8818_v15 = vpop.permute.xlu0 %4895  ;;  %v10151_v25 = vld [vmem:[#allocation49_spill] sm:$0xff]  ;;  %v3360_v56 = vsub.f32 %v10152_v43, %v8814_v31  ;;  %v3380_v7 = vand.u32 2147483647, %v3378_v4 }
 0x4a2   :  { %10148 = vst [vmem:[#allocation135_spill] sm:$0xff] %v8818_v15  ;;  %v2927_v57 = vsub.f32 %v10159_v29, %v8644_v13  ;;  %v10161_v13 = vld [vmem:[#allocation117_spill] sm:$0xff] }
 0x4a3   :  { %v3328_v35 = vadd.f32 %v3326_v26, %v3310_v19  ;;  %v2841_v5 = vadd.f32 %v2839_v49, %v2741_v1  ;;  %v8846_v26 = vld [vmem:[%s9614_s4 + $0x78] sm:$0xff]  ;;  %v10156_v49 = vld [vmem:[#allocation35_spill] sm:$0xff]  ;;  %v3362_v43 = vand.u32 2147483647, %v3360_v56 }
 0x4a4   :  { %v2909_v1 = vsub.f32 %v10156_v49, %v8626_v12  ;;  %v8865_v12 = vrot.slane %v8846_v26, %v7419_v37 }
 0x4a5   :  { %v8820_v6 = vpop.permute.xlu1 %3801  ;;  %6307 = vset.pattern.permute.xlu1 %v9721_v14  ;;  %v3346_v20 = vadd.f32 %v3344_v45, %v3328_v35  ;;  %v2859_v19 = vadd.f32 %v2857_v41, %v2841_v5  ;;  %v8850_v21 = vpop.permute.xlu0 %3507  ;;  %v10158_v45 = vld [vmem:[#allocation152_spill] sm:$0xff]  ;;  %v8855_v35 = vrot.slane %v8742_v42, %v7493_v47  ;;  %v8861_v41 = vrot.slane %v8846_v26, %v7413_v10 }
 0x4a6   :  { %4411 = vperm.xlu1 %6307, %v10151_v25   ;;  %10157 = vst [vmem:[#allocation106_spill] sm:$0xff] %v8850_v21  ;;  %v2893_v5 = vand.u32 2147483647, %v2891_v11  ;;  %v2911_v42 = vand.u32 2147483647, %v2909_v1  ;;  %v10164_v1 = vld [vmem:[#allocation148_spill] sm:$0xff] }
 0x4a7   :  { %v2877_v52 = vadd.f32 %v2875_v50, %v2859_v19  ;;  %v3364_v15 = vadd.f32 %v3362_v43, %v3346_v20  ;;  %v3414_v4 = vsub.f32 %v10161_v13, %v8855_v35  ;;  %v10162_v20 = vld [vmem:[#allocation75_spill] sm:$0xff]  ;;  %v2929_v43 = vand.u32 2147483647, %v2927_v57  ;;  %v10167_v57 = vld [vmem:[#allocation74_spill] sm:$0xff] }
 0x4a8   :  { %v2945_v21 = vsub.f32 %v10164_v1, %v8655_v8  ;;  %v8896_v8 = vrot.slane %v8846_v26, %v7443_v38  ;;  %v10170_v1 = vld [vmem:[#allocation42_spill] sm:$0xff] }
 0x4a9   :  { %v8869_v49 = vpop.permute.xlu0 %3728  ;;  %v3382_v50 = vadd.f32 %v3380_v7, %v3364_v15  ;;  %v2895_v19 = vadd.f32 %v2893_v5, %v2877_v52  ;;  %v3416_v15 = vand.u32 2147483647, %v3414_v4  ;;  %v8887_v7 = vrot.slane %v8846_v26, %v7431_v46 }
 0x4aa   :  { %v8838_v59 = vpop.permute.xlu1 %3819  ;;  %6308 = vset.pattern.permute.xlu1 %v9722_v22  ;;  %v3398_v22 = vand.u32 2147483647, %v3396_v3  ;;  %v3514_v3 = vsub.f32 %v10162_v20, %v8861_v41  ;;  %v2947_v4 = vand.u32 2147483647, %v2945_v21 }
 0x4ab   :  { %4425 = vperm.xlu1 %6308, %v10158_v45   ;;  %v2913_v44 = vadd.f32 %v2911_v42, %v2895_v19  ;;  %v8900_v42 = vrot.slane %v8846_v26, %v7453_v32 }
 0x4ac   :  { %v3400_v29 = vadd.f32 %v3398_v22, %v3382_v50  ;;  %v3516_v52 = vand.u32 2147483647, %v3514_v3 }
 0x4ad   :  { %v2931_v22 = vadd.f32 %v2929_v43, %v2913_v44  ;;  %v8892_v5 = vpop.permute.xlu0 %4185  ;;  %v3550_v44 = vsub.f32 %v8715_v0, %v8887_v7  ;;  %v3586_v21 = vsub.f32 %v8601_v16, %v8900_v42 }
 0x4ae   :  { %v8867_v56 = vpop.permute.xlu1 %3823  ;;  %10168 = vst [vmem:[#allocation139_spill] sm:$0xff] %v8892_v5  ;;  %v10178_v5 = vld [vmem:[#allocation91_spill] sm:$0xff] }
 0x4af   :  { %10160 = vst [vmem:[#allocation107_spill] sm:$0xff] %v8867_v56  ;;  %6309 = vset.pattern.permute.xlu1 %v9728_v27  ;;  %v10163_v56 = vld [vmem:[#allocation26_spill] sm:$0xff]  ;;  %v10165_v27 = vld [vmem:[#allocation79_spill] sm:$0xff]  ;;  %v2949_v19 = vadd.f32 %v2947_v4, %v2931_v22  ;;  %v3552_v22 = vand.u32 2147483647, %v3550_v44  ;;  %v8938_v44 = vrot.slane %v8846_v26, %v7493_v47 }
 0x4b0   :  { %4443 = vperm.xlu1 %6309, %v10158_v45   ;;  %v3532_v11 = vsub.f32 %v10163_v56, %v8865_v12  ;;  %v2963_v23 = vsub.f32 %v10165_v27, %v8659_v63  ;;  %v3063_v56 = vsub.f32 %v10167_v57, %v8671_v60  ;;  %v3418_v27 = vadd.f32 %v3416_v15, %v3400_v29 }
 0x4b1   :  { %v3568_v60 = vsub.f32 %v8580_v17, %v8896_v8  ;;  %v3099_v15 = vsub.f32 %v10170_v1, %v8693_v34  ;;  %v8916_v17 = vpop.permute.xlu0 %4406  ;;  %v8934_v34 = vld [vmem:[%s9614_s4 + $0x80] sm:$0xff] }
 0x4b2   :  { %v3534_v63 = vand.u32 2147483647, %v3532_v11  ;;  %v2965_v50 = vand.u32 2147483647, %v2963_v23  ;;  %v3518_v20 = vadd.f32 %v3516_v52, %v3418_v27  ;;  %v3065_v43 = vand.u32 2147483647, %v3063_v56 }
 0x4b3   :  { %v8883_v13 = vpop.permute.xlu1 %3841  ;;  %v10169_v23 = vld [vmem:[#allocation32_spill] sm:$0xff]  ;;  %10171 = vst [vmem:[#allocation140_spill] sm:$0xff] %v8916_v17  ;;  %v8920_v52 = vrot.slane %v8846_v26, %v7457_v40  ;;  %v3570_v57 = vand.u32 2147483647, %v3568_v60 }
 0x4b4   :  { %10166 = vst [vmem:[#allocation41_spill] sm:$0xff] %v8883_v13  ;;  %4447 = vperm.xlu1 %6309, %v10151_v25   ;;  %v3536_v29 = vadd.f32 %v3534_v63, %v3518_v20  ;;  %v3081_v11 = vsub.f32 %v10169_v23, %v8689_v55  ;;  %v2967_v0 = vadd.f32 %v2965_v50, %v2949_v19  ;;  %v10172_v27 = vld [vmem:[#allocation44_spill] sm:$0xff]  ;;  %v3588_v50 = vand.u32 2147483647, %v3586_v21 }
 0x4b5   :  { %v3117_v63 = vsub.f32 %v10172_v27, %v8711_v24  ;;  %v8929_v55 = vrot.slane %v8846_v26, %v7474_v58  ;;  %v3101_v20 = vand.u32 2147483647, %v3099_v15  ;;  %v10173_v60 = vld [vmem:[#allocation68_spill] sm:$0xff]  ;;  %v8949_v21 = vpop.permute.xlu0 %4863 }
 0x4b6   :  { %v3067_v56 = vadd.f32 %v3065_v43, %v2967_v0  ;;  %v3554_v4 = vadd.f32 %v3552_v22, %v3536_v29  ;;  %v3083_v24 = vand.u32 2147483647, %v3081_v11  ;;  %v3604_v19 = vsub.f32 %v10173_v60, %v8920_v52  ;;  %10174 = vst [vmem:[#allocation114_spill] sm:$0xff] %v8949_v21  ;;  %v8956_v11 = vld [vmem:[%s9610_s0] sm:$0xff] }
 0x4b7   :  { %v3622_v23 = vsub.f32 %v8661_v39, %v8929_v55  ;;  %v3119_v1 = vand.u32 2147483647, %v3117_v63  ;;  %v8947_v29 = vrot.slane %v8934_v34, %v7413_v10  ;;  %v3640_v22 = vsub.f32 %v8679_v2, %v8938_v44 }
 0x4b8   :  { %v8906_v3 = vpop.permute.xlu1 %3855  ;;  %6310 = vset.pattern.permute.xlu1 %v9713_v54  ;;  %v3572_v43 = vadd.f32 %v3570_v57, %v3554_v4  ;;  %v3085_v0 = vadd.f32 %v3083_v24, %v3067_v56  ;;  %v5686_v39 = vand.u32 2147483647, %v8956_v11  ;;  %v8965_v57 = vld [vmem:[%s9610_s0 + $0x8] sm:$0xff]  ;;  %v10176_v56 = vld [vmem:[#allocation40_spill] sm:$0xff]  ;;  %v10177_v4 = vld [vmem:[#allocation10_spill] sm:$0xff] }
 0x4b9   :  { %4465 = vperm.xlu1 %6310, %v10151_v25   ;;  %v3135_v27 = vsub.f32 %v10176_v56, %v8721_v62  ;;  %v3153_v24 = vsub.f32 %v10177_v4, %v8725_v53  ;;  %v5687_v2 = vand.u32 2147483647, %v8965_v57  ;;  %v3606_v60 = vand.u32 2147483647, %v3604_v19 }
 0x4ba   :  { %v3590_v15 = vadd.f32 %v3588_v50, %v3572_v43  ;;  %v3103_v63 = vadd.f32 %v3101_v20, %v3085_v0  ;;  %v8975_v50 = vrot.slane %v8934_v34, %v7419_v37  ;;  %v3624_v43 = vand.u32 2147483647, %v3622_v23 }
 0x4bb   :  { %v5688_v21 = vsub.f32 0.0, %v5686_v39  ;;  %v3740_v62 = vsub.f32 %v8869_v49, %v8947_v29  ;;  %v5689_v20 = vsub.f32 0.0, %v5687_v2  ;;  %v3642_v0 = vand.u32 2147483647, %v3640_v22  ;;  %v8987_v39 = vpop.permute.xlu0 %5084  ;;  %v10181_v49 = vld [vmem:[#allocation98_spill] sm:$0xff] }
 0x4bc   :  { %v3121_v17 = vadd.f32 %v3119_v1, %v3103_v63  ;;  %v3608_v53 = vadd.f32 %v3606_v60, %v3590_v15  ;;  %v8983_v56 = vrot.slane %v8934_v34, %v7431_v46  ;;  %v3137_v19 = vand.u32 2147483647, %v3135_v27  ;;  %10180 = vst [vmem:[#allocation43_spill] sm:$0xff] %v8987_v39  ;;  %v10182_v60 = vld [vmem:[#allocation131_spill] sm:$0xff] }
 0x4bd   :  { %v8924_v16 = vpop.permute.xlu1 %3954  ;;  %6311 = vset.pattern.permute.xlu1 %v9731_v18  ;;  %v5690_v13 = vmul.f32 1.442695, %v5688_v21  ;;  %v3155_v23 = vand.u32 2147483647, %v3153_v24  ;;  %v3758_v1 = vsub.f32 %v10181_v49, %v8975_v50  ;;  %v3742_v63 = vand.u32 2147483647, %v3740_v62 }
 0x4be   :  { %4479 = vperm.xlu1 %6311, %v10158_v45   ;;  %v3139_v15 = vadd.f32 %v3137_v19, %v3121_v17  ;;  %v3776_v21 = vsub.f32 %v10182_v60, %v8983_v56  ;;  %v10183_v27 = vld [vmem:[#allocation111_spill] sm:$0xff]  ;;  %v10186_v62 = vld [vmem:[#allocation97_spill] sm:$0xff]  ;;  %v9010_v19 = vrot.slane %v8934_v34, %v7453_v32 }
 0x4bf   :  { %6371 = vpow2.f32 %v5690_v13  ;;  %v3189_v24 = vsub.f32 %v10183_v27, %v8757_v36  ;;  %v9003_v13 = vrot.slane %v8934_v34, %v7443_v38  ;;  %v3760_v17 = vand.u32 2147483647, %v3758_v1  ;;  %v3784_v36 = vpop.permute.xlu0 %3783 }
 0x4c0   :  { %v3157_v39 = vadd.f32 %v3155_v23, %v3139_v15  ;;  %v9014_v23 = vrot.slane %v8934_v34, %v7457_v40 }
 0x4c1   :  { %v8951_v26 = vpop.permute.xlu1 %3959  ;;  %v3794_v49 = vsub.f32 %v3784_v36, %v9003_v13 }
 0x4c2   :  { %10175 = vst [vmem:[#allocation113_spill] sm:$0xff] %v8951_v26  ;;  %6313 = vset.pattern.permute.xlu1 %v10075_v61  ;;  %v3171_v26 = vsub.f32 %v10178_v5, %v8751_v30  ;;  %v5692_v30 = vmul.f32 1.442695, %v5689_v20  ;;  %v3626_v5 = vadd.f32 %v3624_v43, %v3608_v53  ;;  %v10185_v53 = vmov 6  }
 0x4c3   :  { %4497 = vperm.xlu1 %6313, %v10158_v45  }
 0x4c4   :  { %v3173_v22 = vand.u32 2147483647, %v3171_v26  ;;  %6373 = vpow2.f32 %v5692_v30  ;;  %v3644_v2 = vadd.f32 %v3642_v0, %v3626_v5  ;;  %v3307_v0 = vsub.f32 %v10186_v62, %v8783_v28 }
 0x4c5   :  { %v3191_v30 = vand.u32 2147483647, %v3189_v24  ;;  %v3796_v62 = vand.u32 2147483647, %v3794_v49 }
 0x4c6   :  { %v8985_v4 = vpop.permute.xlu1 %3977  ;;  %v3175_v26 = vadd.f32 %v3173_v22, %v3157_v39  ;;  %v3812_v39 = vsub.f32 %v8820_v6, %v9010_v19  ;;  %v3309_v15 = vand.u32 2147483647, %v3307_v0  ;;  %v10187_v6 = vld [vmem:[#allocation23_spill] sm:$0xff] }
 0x4c7   :  { %10179 = vst [vmem:[#allocation115_spill] sm:$0xff] %v8985_v4  ;;  %4501 = vperm.xlu1 %6313, %v10151_v25   ;;  %v10184_v4 = vld [vmem:[#allocation96_spill] sm:$0xff]  ;;  %v3325_v27 = vsub.f32 %v10187_v6, %v8791_v33 }
 0x4c8   :  { %v3289_v20 = vsub.f32 %v10184_v4, %v8761_v51  ;;  %v3744_v51 = vadd.f32 %v3742_v63, %v3644_v2  ;;  %v3778_v4 = vand.u32 2147483647, %v3776_v21  ;;  %v3193_v1 = vadd.f32 %v3191_v30, %v3175_v26  ;;  %v9028_v21 = vld [vmem:[%s9614_s4 + $0x88] sm:$0xff]  ;;  %v10192_v33 = vld [vmem:[#allocation104_spill] sm:$0xff] }
 0x4c9   :  { %v6372_v22 = vpop.eup %6371  ;;  %v3830_v2 = vsub.f32 %v8838_v59, %v9014_v23  ;;  %v3814_v59 = vand.u32 2147483647, %v3812_v39  ;;  %v3361_v30 = vsub.f32 %v10192_v33, %v8814_v31  ;;  %v9049_v49 = vrot.slane %v9028_v21, %v7413_v10 }
 0x4ca   :  { %v3291_v5 = vand.u32 2147483647, %v3289_v20  ;;  %v10188_v20 = vld [vmem:[#allocation69_spill] sm:$0xff]  ;;  %v5694_v26 = vadd.f32 1.0, %v6372_v22  ;;  %v3327_v39 = vand.u32 2147483647, %v3325_v27 }
 0x4cb   :  { %v8998_v43 = vpop.permute.xlu1 %3991  ;;  %6314 = vset.pattern.permute.xlu1 %v10185_v53  ;;  %10193 = vst [vmem:[#allocation122_spill] sm:$0xff] %v9049_v49  ;;  %v3966_v27 = vsub.f32 %v8924_v16, %v9049_v49  ;;  %v10204_v16 = vld [vmem:[#allocation57_spill] sm:$0xff] }
 0x4cc   :  { %4519 = vperm.xlu1 %6314, %v10151_v25   ;;  %v3762_v25 = vadd.f32 %v3760_v17, %v3744_v51  ;;  %v3293_v24 = vadd.f32 %v3291_v5, %v3193_v1  ;;  %v3343_v17 = vsub.f32 %v10188_v20, %v8795_v48  ;;  %v9042_v51 = vrot.slane %v8934_v34, %v7493_v47  ;;  %v10198_v20 = vld [vmem:[#allocation84_spill] sm:$0xff] }
 0x4cd   :  { %6375 = vlog2.f32 %v5694_v26  ;;  %v3832_v5 = vand.u32 2147483647, %v3830_v2  ;;  %v10200_v26 = vld [vmem:[#allocation161_spill] sm:$0xff] }
 0x4ce   :  { %v3780_v63 = vadd.f32 %v3778_v4, %v3762_v25  ;;  %v6374_v60 = vpop.eup %6373  ;;  %10191 = vst [vmem:[#allocation120_spill] sm:$0xff] %v9042_v51  ;;  %v3311_v4 = vadd.f32 %v3309_v15, %v3293_v24  ;;  %v10194_v25 = vld [vmem:[#allocation110_spill] sm:$0xff]  ;;  %v3345_v1 = vand.u32 2147483647, %v3343_v17  ;;  %v3866_v31 = vsub.f32 %v8906_v3, %v9042_v51  ;;  %v10199_v17 = vld [vmem:[#allocation136_spill] sm:$0xff]  ;;  %v10202_v3 = vld [vmem:[#allocation109_spill] sm:$0xff] }
 0x4cf   :  { %v5695_v36 = vadd.f32 1.0, %v6374_v60  ;;  %v3363_v60 = vand.u32 2147483647, %v3361_v30 }
 0x4d0   :  { %v9019_v28 = vpop.permute.xlu1 %4009  ;;  %6315 = vset.pattern.permute.xlu1 %v9736_v9  ;;  %v3798_v48 = vadd.f32 %v3796_v62, %v3780_v63  ;;  %v9058_v63 = vrot.slane %v9028_v21, %v7419_v37  ;;  %v3329_v2 = vadd.f32 %v3327_v39, %v3311_v4  ;;  %v3379_v62 = vsub.f32 %v10200_v26, %v10199_v17  ;;  %v10203_v4 = vld [vmem:[#allocation21_spill] sm:$0xff] }
 0x4d1   :  { %4533 = vperm.xlu1 %6315, %v10158_v45   ;;  %v9036_v45 = vrot.slane %v8934_v34, %v7474_v58  ;;  %6377 = vlog2.f32 %v5695_v36  ;;  %v10195_v34 = vld [vmem:[#allocation158_spill] sm:$0xff]  ;;  %v10201_v36 = vld [vmem:[#allocation76_spill] sm:$0xff] }
 0x4d2   :  { %v3816_v22 = vadd.f32 %v3814_v59, %v3798_v48  ;;  %10196 = vst [vmem:[#allocation13_spill] sm:$0xff] %v9058_v63  ;;  %v3347_v59 = vadd.f32 %v3345_v1, %v3329_v2  ;;  %v3397_v33 = vsub.f32 %v10202_v3, %v10201_v36  ;;  %v3984_v30 = vsub.f32 %v10203_v4, %v9058_v63 }
 0x4d3   :  { %10189 = vst [vmem:[#allocation144_spill] sm:$0xff] %v9036_v45  ;;  %v3848_v15 = vsub.f32 %v10195_v34, %v9036_v45  ;;  %v3868_v34 = vand.u32 2147483647, %v3866_v31  ;;  %v9079_v1 = vrot.slane %v9028_v21, %v7443_v38  ;;  %v5682_v31 = vsub.f32 0.0, %v8956_v11 }
 0x4d4   :  { %v9038_v0 = vpop.permute.xlu1 %4013  ;;  %v3834_v24 = vadd.f32 %v3832_v5, %v3816_v22  ;;  %v3365_v39 = vadd.f32 %v3363_v60, %v3347_v59  ;;  %v9073_v5 = vrot.slane %v9028_v21, %v7431_v46  ;;  %v3415_v22 = vsub.f32 %v10204_v16, %v8855_v35  ;;  %v10206_v59 = vld [vmem:[#allocation106_spill] sm:$0xff] }
 0x4d5   :  { %10190 = vst [vmem:[#allocation146_spill] sm:$0xff] %v9038_v0  ;;  %6316 = vset.pattern.permute.xlu1 %v9721_v14  ;;  %v3850_v48 = vand.u32 2147483647, %v3848_v15  ;;  %v3968_v0 = vand.u32 2147483647, %v3966_v27  ;;  %v10205_v15 = vmov 1   ;;  %v3515_v36 = vsub.f32 %v10206_v59, %v8861_v41 }
 0x4d6   :  { %4632 = vperm.xlu1 %6316, %v10194_v25   ;;  %v3381_v60 = vand.u32 2147483647, %v3379_v62  ;;  %v3399_v26 = vand.u32 2147483647, %v3397_v33  ;;  %v5683_v35 = vsub.f32 0.0, %v8965_v57  ;;  %v4002_v3 = vsub.f32 %v8998_v43, %v9073_v5  ;;  %v10207_v14 = vld [vmem:[#allocation8_spill] sm:$0xff] }
 0x4d7   :  { %v6376_v17 = vpop.eup %6375  ;;  %v3417_v63 = vand.u32 2147483647, %v3415_v22  ;;  %v4020_v33 = vsub.f32 %v9019_v28, %v9079_v1  ;;  %v3986_v59 = vand.u32 2147483647, %v3984_v30  ;;  %v10208_v45 = vmov 2  }
 0x4d8   :  { %v5697_v4 = vmul.f32 0.6931472, %v6376_v17  ;;  %v3383_v16 = vadd.f32 %v3381_v60, %v3365_v39  ;;  %v9100_v39 = vrot.slane %v9028_v21, %v7453_v32  ;;  %v4004_v28 = vand.u32 2147483647, %v4002_v3 }
 0x4d9   :  { %v9060_v6 = vpop.permute.xlu1 %4031  ;;  %v4022_v17 = vand.u32 2147483647, %v4020_v33  ;;  %v9113_v60 = vrot.slane %v9028_v21, %v7474_v58  ;;  %v10211_v33 = vld [vmem:[#allocation92_spill] sm:$0xff] }
 0x4da   :  { %10197 = vst [vmem:[#allocation151_spill] sm:$0xff] %v9060_v6  ;;  %4637 = vperm.xlu1 %6316, %v10198_v20   ;;  %v3852_v6 = vadd.f32 %v3850_v48, %v3834_v24  ;;  %v5684_v48 = vmax.f32 %v5682_v31, 0.0  ;;  %v3401_v51 = vadd.f32 %v3399_v26, %v3383_v16 }
 0x4db   :  { %v6378_v24 = vpop.eup %6377 }
 0x4dc   :  { %v3870_v27 = vadd.f32 %v3868_v34, %v3852_v6  ;;  %v5699_v49 = vmul.f32 0.6931472, %v6378_v24  ;;  %v9091_v41 = vadd.f32 %v5697_v4, %v5684_v48  ;;  %v3533_v6 = vsub.f32 %v10207_v14, %v8865_v12  ;;  %v10209_v12 = vld [vmem:[#allocation123_spill] sm:$0xff] }
 0x4dd   :  { %v3419_v22 = vadd.f32 %v3417_v63, %v3401_v51  ;;  %v3517_v14 = vand.u32 2147483647, %v3515_v36  ;;  %v3551_v31 = vsub.f32 %v10209_v12, %v8887_v7  ;;  %v10210_v51 = vld [vmem:[#allocation87_spill] sm:$0xff]  ;;  %v9132_v12 = vrot.slane %v9028_v21, %v7493_v47 }
 0x4de   :  { %v4046_v2 = vpop.permute.xlu1 %4045  ;;  %6317 = vset.pattern.permute.xlu1 %v10205_v15  ;;  %v5685_v15 = vmax.f32 %v5683_v35, 0.0  ;;  %v3970_v62 = vadd.f32 %v3968_v0, %v3870_v27  ;;  %v9104_v0 = vrot.slane %v9028_v21, %v7457_v40  ;;  %v5704_v30 = vsub.f32 0.0, %v9091_v41  ;;  %v9117_v27 = vpop.f32.mrb[24].mxu0 }
 0x4df   :  { %4655 = vperm.xlu1 %6317, %v10198_v20   ;;  %v3535_v35 = vand.u32 2147483647, %v3533_v6  ;;  %v4038_v63 = vsub.f32 %v10210_v51, %v9100_v39  ;;  %5541 = vperm.xlu0 %6358, %v9117_v27   ;;  %v3519_v48 = vadd.f32 %v3517_v14, %v3419_v22  ;;  %v3553_v4 = vand.u32 2147483647, %v3551_v31  ;;  %v10213_v31 = vld [vmem:[#allocation116_spill] sm:$0xff] }
 0x4e0   :  { %v9096_v43 = vadd.f32 %v5699_v49, %v5685_v15  ;;  %v3988_v15 = vadd.f32 %v3986_v59, %v3970_v62  ;;  %v5706_v26 = vmul.f32 1.442695, %v5704_v30  ;;  %v4056_v7 = vsub.f32 %v4046_v2, %v9104_v0 }
 0x4e1   :  { %v3569_v59 = vsub.f32 %v10211_v33, %v8896_v8  ;;  %v3537_v6 = vadd.f32 %v3535_v35, %v3519_v48  ;;  %v4040_v30 = vand.u32 2147483647, %v4038_v63  ;;  %v10215_v35 = vld [vmem:[#allocation78_spill] sm:$0xff] }
 0x4e2   :  { %v5705_v49 = vsub.f32 0.0, %v9096_v43  ;;  %v4006_v36 = vadd.f32 %v4004_v28, %v3988_v15  ;;  %6379 = vpow2.f32 %v5706_v26  ;;  %v10212_v28 = vld [vmem:[#allocation95_spill] sm:$0xff]  ;;  %v4058_v22 = vand.u32 2147483647, %v4056_v7 }
 0x4e3   :  { %v4064_v34 = vpop.permute.xlu1 %4063  ;;  %6318 = vset.pattern.permute.xlu1 %v10208_v45  ;;  %v3587_v2 = vsub.f32 %v10212_v28, %v8900_v42  ;;  %6359 = vset.pattern.permute.xlu0 %v10208_v45  ;;  %v3555_v8 = vadd.f32 %v3553_v4, %v3537_v6  ;;  %v10214_v42 = vld [vmem:[#allocation28_spill] sm:$0xff] }
 0x4e4   :  { %4669 = vperm.xlu1 %6318, %v10194_v25   ;;  %v5708_v3 = vmul.f32 1.442695, %v5705_v49  ;;  %v4024_v16 = vadd.f32 %v4022_v17, %v4006_v36  ;;  %v4074_v62 = vsub.f32 %v4064_v34, %v9113_v60  ;;  %v9140_v34 = vld [vmem:[%s9614_s4 + $0x90] sm:$0xff]  ;;  %v3605_v49 = vsub.f32 %v10213_v31, %v8920_v52  ;;  %5351 = vperm.xlu0 %6359, %v10214_v42  }
 0x4e5   :  { %v3571_v17 = vand.u32 2147483647, %v3569_v59  ;;  %v3589_v26 = vand.u32 2147483647, %v3587_v2  ;;  %v9150_v51 = vrot.slane %v9140_v34, %v7431_v46  ;;  %v9154_v63 = vrot.slane %v9140_v34, %v7413_v10  ;;  %v10216_v2 = vld [vmem:[#allocation156_spill] sm:$0xff] }
 0x4e6   :  { %6381 = vpow2.f32 %v5708_v3  ;;  %v4042_v21 = vadd.f32 %v4040_v30, %v4024_v16  ;;  %v4076_v15 = vand.u32 2147483647, %v4074_v62  ;;  %v4092_v3 = vsub.f32 %v10215_v35, %v9132_v12 }
 0x4e7   :  { %v9115_v24 = vpop.permute.xlu1 %4067  ;;  %v3573_v36 = vadd.f32 %v3571_v17, %v3555_v8  ;;  %v3607_v7 = vand.u32 2147483647, %v3605_v49  ;;  %v9161_v6 = vrot.slane %v9140_v34, %v7419_v37  ;;  %v3623_v30 = vsub.f32 %v10216_v2, %v8929_v55  ;;  %v10217_v8 = vld [vmem:[#allocation55_spill] sm:$0xff] }
 0x4e8   :  { %6319 = vset.pattern.permute.xlu1 %v9713_v54  ;;  %v4060_v52 = vadd.f32 %v4058_v22, %v4042_v21  ;;  %v4094_v22 = vand.u32 2147483647, %v4092_v3  ;;  %v4228_v31 = vsub.f32 %v10217_v8, %v9150_v51  ;;  %v5702_v3 = vadd.f32 %v9091_v41, %v8956_v11 }
 0x4e9   :  { %4687 = vperm.xlu1 %6319, %v10194_v25   ;;  %v3591_v59 = vadd.f32 %v3589_v26, %v3573_v36 }
 0x4ea   :  { %v4078_v16 = vadd.f32 %v4076_v15, %v4060_v52  ;;  %v10218_v52 = vld [vmem:[#allocation127_spill] sm:$0xff] }
 0x4eb   :  { %v3609_v21 = vadd.f32 %v3607_v7, %v3591_v59  ;;  %v3641_v26 = vsub.f32 %v10218_v52, %v8938_v44  ;;  %v5703_v44 = vadd.f32 %v9096_v43, %v8965_v57 }
 0x4ec   :  { %v9134_v14 = vpop.permute.xlu1 %4085  ;;  %v6380_v4 = vpop.eup %6379  ;;  %v4096_v36 = vadd.f32 %v4094_v22, %v4078_v16 }
 0x4ed   :  { %4691 = vperm.xlu1 %6319, %v10198_v20   ;;  %v5710_v28 = vsub.f32 1.0, %v6380_v4  ;;  %v5712_v17 = vmul.f32 %v6380_v4, %v6380_v4  ;;  %v10219_v4 = vld [vmem:[#allocation128_spill] sm:$0xff]  ;;  %v3643_v52 = vand.u32 2147483647, %v3641_v26 }
 0x4ee   :  { %v3741_v59 = vsub.f32 %v10219_v4, %v8947_v29  ;;  %v10221_v26 = vld [vmem:[#allocation132_spill] sm:$0xff] }
 0x4ef   :  { %v5714_v35 = vmul.f32 %v5710_v28, %v5710_v28 }
 0x4f0   :  { %v6382_v33 = vpop.eup %6381 }
 0x4f1   :  { %v4181_v48 = vpop.permute.xlu1 %4180  ;;  %6320 = vset.pattern.permute.xlu1 %v9731_v18  ;;  %v5711_v49 = vsub.f32 1.0, %v6382_v33  ;;  %v5713_v42 = vmul.f32 %v6382_v33, %v6382_v33  ;;  %v5716_v7 = vmul.f32 0.25, %v5714_v35  ;;  %v4230_v35 = vand.u32 2147483647, %v4228_v31 }
 0x4f2   :  { %v4192_v62 = vsub.f32 %v4181_v48, %v9154_v63  ;;  %4709 = vperm.xlu1 %6320, %v10198_v20  }
 0x4f3   :  { %v5715_v46 = vmul.f32 %v5711_v49, %v5711_v49  ;;  %v5721_v28 = vmul.f32 0.75, %v5713_v42  ;;  %v5718_v22 = vmul.f32 %v5716_v7, %v9091_v41  ;;  %v3625_v49 = vand.u32 2147483647, %v3623_v30 }
 0x4f4   :  { %v4194_v15 = vand.u32 2147483647, %v4192_v62  ;;  %v5720_v62 = vmul.f32 0.75, %v5712_v17  ;;  %v3743_v41 = vand.u32 2147483647, %v3741_v59 }
 0x4f5   :  { %v5717_v16 = vmul.f32 0.25, %v5715_v46  ;;  %v5723_v17 = vmul.f32 %v5721_v28, %v5703_v44  ;;  %v5726_v46 = vld [vmem:[%s9611_s1] sm:$0xf]  ;;  %v3627_v57 = vadd.f32 %v3625_v49, %v3609_v21  ;;  %v10225_v49 = vld [vmem:[#allocation144_spill] sm:$0xff] }
 0x4f6   :  { %v4200_v48 = vpop.permute.xlu1 %4199  ;;  %6321 = vset.pattern.permute.xlu1 %v10075_v61  ;;  %v4196_v2 = vadd.f32 %v4194_v15, %v4096_v36  ;;  %v5722_v8 = vmul.f32 %v5720_v62, %v5702_v3  ;;  %6112 = vmatprep.subr.msk.mxu1 %vm5734_vm1, %v5726_v46  ;;  %v3777_v36 = vsub.f32 %v10221_v26, %v8983_v56  ;;  %v10222_v3 = vld [vmem:[#allocation103_spill] sm:$0xff] }
 0x4f7   :  { %v4210_v55 = vsub.f32 %v4200_v48, %v9161_v6  ;;  %4723 = vperm.xlu1 %6321, %v10194_v25   ;;  %v5719_v11 = vmul.f32 %v5717_v16, %v9096_v43  ;;  %6113 = vmatpush3.msk.msra.mxu1 %vm5734_vm1, %v5726_v46  ;;  %v10220_v43 = vld [vmem:[#allocation19_spill] sm:$0xff]  ;;  %v3645_v15 = vadd.f32 %v3643_v52, %v3627_v57  ;;  %v10226_v52 = vld [vmem:[#allocation41_spill] sm:$0xff] }
 0x4f8   :  { %v5724_v29 = vsub.f32 %v5718_v22, %v5722_v8  ;;  %v3759_v31 = vsub.f32 %v10220_v43, %v8975_v50  ;;  %v9198_v62 = vrot.slane %v9140_v34, %v7443_v38  ;;  %v9203_v56 = vrot.slane %v9140_v34, %v7457_v40 }
 0x4f9   :  { %v4212_v33 = vand.u32 2147483647, %v4210_v55  ;;  %v5725_v42 = vsub.f32 %v5719_v11, %v5723_v17  ;;  %v3745_v21 = vadd.f32 %v3743_v41, %v3645_v15  ;;  %v9213_v22 = vrot.slane %v9140_v34, %v7453_v32 }
 0x4fa   :  { %v9179_v48 = vpop.permute.xlu1 %4203  ;;  %6114 = vmatprep.mubr.msk.f32.mxu1 %vm5727_vm2, %v5724_v29  ;;  %v3761_v7 = vand.u32 2147483647, %v3759_v31  ;;  %v3849_v11 = vsub.f32 %v10226_v52, %v10225_v49  ;;  %v10228_v29 = vmov 0  }
 0x4fb   :  { %v4214_v37 = vadd.f32 %v4212_v33, %v4196_v2  ;;  %6323 = vset.pattern.permute.xlu1 %v10185_v53  ;;  %6115 = vmatmul.mubr.msk.f32.vlgmr.msra.gmra.mrb[24].mxu1 %vm5727_vm2, %v5725_v42  ;;  %v10224_v2 = vld [vmem:[#allocation107_spill] sm:$0xff] }
 0x4fc   :  { %4741 = vperm.xlu1 %6323, %v10194_v25   ;;  %v3795_v25 = vsub.f32 %v10222_v3, %v9003_v13  ;;  %v3763_v50 = vadd.f32 %v3761_v7, %v3745_v21  ;;  %v10223_v13 = vld [vmem:[#allocation112_spill] sm:$0xff]  ;;  %v3831_v33 = vsub.f32 %v10224_v2, %v9014_v23  ;;  %v10229_v23 = vld [vmem:[#allocation154_spill] sm:$0xff]  ;;  %v3851_v43 = vand.u32 2147483647, %v3849_v11 }
 0x4fd   :  { %v4232_v30 = vadd.f32 %v4230_v35, %v4214_v37  ;;  %v3779_v37 = vand.u32 2147483647, %v3777_v36  ;;  %v3813_v16 = vsub.f32 %v10223_v13, %v9010_v19  ;;  %v10227_v35 = vld [vmem:[#allocation27_spill] sm:$0xff]  ;;  %v9222_v36 = vpop.permute.xlu0 %4239  ;;  %v10230_v3 = vld [vmem:[#allocation120_spill] sm:$0xff]  ;;  %v10234_v13 = vmov 1  }
 0x4fe   :  { %v3797_v4 = vand.u32 2147483647, %v3795_v25  ;;  %v4282_v46 = vsub.f32 %v10227_v35, %v9203_v56  ;;  %v3833_v57 = vand.u32 2147483647, %v3831_v33  ;;  %v10231_v25 = vld [vmem:[#allocation119_spill] sm:$0xff]  ;;  %v10237_v35 = vld [vmem:[#allocation153_spill] sm:$0xff] }
 0x4ff   :  { %v9191_v55 = vpop.permute.xlu1 %4221  ;;  %v3781_v28 = vadd.f32 %v3779_v37, %v3763_v50  ;;  %v3815_v19 = vand.u32 2147483647, %v3813_v16  ;;  %v3867_v7 = vsub.f32 %v10231_v25, %v10230_v3  ;;  %v10232_v50 = vld [vmem:[#allocation122_spill] sm:$0xff] }
 0x500   :  { %4745 = vperm.xlu1 %6323, %v10198_v20   ;;  %v4284_v26 = vand.u32 2147483647, %v4282_v46 }
 0x501   :  { %v3799_v8 = vadd.f32 %v3797_v4, %v3781_v28  ;;  %v10233_v4 = vld [vmem:[#allocation113_spill] sm:$0xff]  ;;  %v10236_v28 = vld [vmem:[#allocation115_spill] sm:$0xff]  ;;  %v3869_v49 = vand.u32 2147483647, %v3867_v7 }
 0x503   :  { %v3817_v42 = vadd.f32 %v3815_v19, %v3799_v8  ;;  %v9236_v8 = vpop.f32.mrb[25].mxu0  ;;  %v10238_v19 = vld [vmem:[#allocation99_spill] sm:$0xff] }
 0x504   :  { %v4236_v59 = vpop.permute.xlu1 %4235  ;;  %6325 = vset.pattern.permute.xlu1 %v9736_v9  ;;  %5573 = vperm.xlu0 %6359, %v9236_v8  }
 0x505   :  { %v4246_v44 = vsub.f32 %v4236_v59, %v9198_v62  ;;  %4763 = vperm.xlu1 %6325, %v10198_v20   ;;  %v3835_v37 = vadd.f32 %v3833_v57, %v3817_v42  ;;  %v3967_v59 = vsub.f32 %v10233_v4, %v10232_v50  ;;  %v4003_v57 = vsub.f32 %v10238_v19, %v9073_v5  ;;  %v10239_v42 = vld [vmem:[#allocation146_spill] sm:$0xff] }
 0x507   :  { %v4248_v17 = vand.u32 2147483647, %v4246_v44  ;;  %v3853_v16 = vadd.f32 %v3851_v43, %v3835_v37  ;;  %v3969_v52 = vand.u32 2147483647, %v3967_v59  ;;  %v4021_v43 = vsub.f32 %v10239_v42, %v9079_v1 }
 0x508   :  { %6363 = vset.pattern.permute.xlu0 %v9713_v54  ;;  %v4005_v5 = vand.u32 2147483647, %v4003_v57  ;;  %v4229_v42 = vsub.f32 %v9191_v55, %v9150_v51 }
 0x509   :  { %v4254_v20 = vpop.permute.xlu1 %4253  ;;  %6326 = vset.pattern.permute.xlu1 %v10228_v29  ;;  %v4250_v31 = vadd.f32 %v4248_v17, %v4232_v30  ;;  %v10235_v30 = vld [vmem:[#allocation13_spill] sm:$0xff]  ;;  %v9241_v17 = vpop.permute.xlu0 %4461  ;;  %v3871_v46 = vadd.f32 %v3869_v49, %v3853_v16  ;;  %5595 = vperm.xlu0 %6363, %v9117_v27   ;;  %v4023_v7 = vand.u32 2147483647, %v4021_v43 }
 0x50a   :  { %v4264_v41 = vsub.f32 %v4254_v20, %v9213_v22  ;;  %4858 = vperm.xlu1 %6326, %v10229_v23   ;;  %v3985_v2 = vsub.f32 %v10236_v28, %v10235_v30  ;;  %v4093_v28 = vsub.f32 %v9134_v14, %v9132_v12  ;;  %v4211_v14 = vsub.f32 %v9179_v48, %v9161_v6 }
 0x50b   :  { %v4247_v6 = vsub.f32 %v9222_v36, %v9198_v62  ;;  %v9304_v62 = vrot.slane %v9140_v34, %v7474_v58 }
 0x50c   :  { %v4266_v15 = vand.u32 2147483647, %v4264_v41  ;;  %v3987_v20 = vand.u32 2147483647, %v3985_v2  ;;  %v3971_v41 = vadd.f32 %v3969_v52, %v3871_v46  ;;  %v4095_v46 = vand.u32 2147483647, %v4093_v28 }
 0x50d   :  { %v9224_v21 = vpop.permute.xlu1 %4257  ;;  %v9256_v25 = vpop.permute.xlu0 %4917  ;;  %6365 = vset.pattern.permute.xlu0 %v10075_v61 }
 0x50e   :  { %v4268_v44 = vadd.f32 %v4266_v15, %v4250_v31  ;;  %6327 = vset.pattern.permute.xlu1 %v10234_v13  ;;  %v3989_v15 = vadd.f32 %v3987_v20, %v3971_v41  ;;  %5627 = vperm.xlu0 %6365, %v9236_v8  }
 0x50f   :  { %4877 = vperm.xlu1 %6327, %v10229_v23  }
 0x510   :  { %v9234_v33 = vadd.f32 %v4284_v26, %v4268_v44  ;;  %v10240_v26 = vld [vmem:[#allocation151_spill] sm:$0xff]  ;;  %v4007_v1 = vadd.f32 %v4005_v5, %v3989_v15  ;;  %v4075_v44 = vsub.f32 %v9115_v24, %v9113_v60  ;;  %v4265_v5 = vsub.f32 %v9224_v21, %v9213_v22 }
 0x511   :  { %v4039_v3 = vsub.f32 %v10240_v26, %v9100_v39  ;;  %v10241_v39 = vld [vmem:[#allocation100_spill] sm:$0xff]  ;;  %v9268_v16 = vpop.permute.xlu0 %5139 }
 0x512   :  { %v9238_v11 = vpop.permute.xlu1 %4275  ;;  %v4057_v4 = vsub.f32 %v10241_v39, %v9104_v0  ;;  %v4025_v59 = vadd.f32 %v4023_v7, %v4007_v1  ;;  %6368 = vset.pattern.permute.xlu0 %v10185_v53  ;;  %v4077_v52 = vand.u32 2147483647, %v4075_v44  ;;  %v10242_v0 = vld [vmem:[#allocation139_spill] sm:$0xff]  ;;  %v4267_v36 = vand.u32 2147483647, %v4265_v5 }
 0x513   :  { %4881 = vperm.xlu1 %6327, %v10237_v35   ;;  %v4041_v37 = vand.u32 2147483647, %v4039_v3  ;;  %5649 = vperm.xlu0 %6368, %v9117_v27   ;;  %v4193_v60 = vsub.f32 %v10242_v0, %v9154_v63  ;;  %v4213_v63 = vand.u32 2147483647, %v4211_v14  ;;  %v4231_v3 = vand.u32 2147483647, %v4229_v42 }
 0x514   :  { %v4059_v49 = vand.u32 2147483647, %v4057_v4  ;;  %v4283_v1 = vsub.f32 %v9238_v11, %v9203_v56  ;;  %v9308_v4 = vrot.slane %v9140_v34, %v7493_v47  ;;  %v4403_v56 = vld [vmem:[%s9614_s4 + $0x98] sm:$0xff] }
 0x515   :  { %v4043_v30 = vadd.f32 %v4041_v37, %v4025_v59  ;;  %v4294_v20 = vpop.permute.xlu0 %4293  ;;  %v4195_v57 = vand.u32 2147483647, %v4193_v60  ;;  %v4249_v37 = vand.u32 2147483647, %v4247_v6  ;;  %v9318_v59 = vrot.slane %v4403_v56, %v7413_v10 }
 0x516   :  { %v4285_v21 = vand.u32 2147483647, %v4283_v1  ;;  %v4301_v44 = vsub.f32 %v4294_v20, %v9304_v62  ;;  %v9335_v6 = vrot.slane %v4403_v56, %v7453_v32  ;;  %v10246_v1 = vld [vmem:[#allocation14_spill] sm:$0xff] }
 0x517   :  { %v9249_v31 = vpop.permute.xlu1 %4289  ;;  %6329 = vset.pattern.permute.xlu1 %v10208_v45  ;;  %v4061_v24 = vadd.f32 %v4059_v49, %v4043_v30  ;;  %6370 = vset.pattern.permute.xlu0 %v9736_v9 }
 0x518   :  { %4899 = vperm.xlu1 %6329, %v10237_v35   ;;  %v4303_v0 = vand.u32 2147483647, %v4301_v44 }
 0x519   :  { %v4079_v12 = vadd.f32 %v4077_v52, %v4061_v24  ;;  %v9284_v43 = vpop.permute.xlu0 %4515  ;;  %v10243_v24 = vld [vmem:[#allocation143_spill] sm:$0xff] }
 0x51b   :  { %v4097_v41 = vadd.f32 %v4095_v46, %v4079_v12  ;;  %v4435_v46 = vrot.slane %v4403_v56, %v10243_v24 }
 0x51c   :  { %v9259_v50 = vpop.permute.xlu1 %4307  ;;  %6330 = vset.pattern.permute.xlu1 %v9713_v54 }
 0x51d   :  { %4913 = vperm.xlu1 %6330, %v10229_v23   ;;  %v4197_v26 = vadd.f32 %v4195_v57, %v4097_v41  ;;  %v9294_v7 = vpop.permute.xlu0 %4971  ;;  %v10244_v57 = vld [vmem:[#allocation145_spill] sm:$0xff] }
 0x51e   :  { %v4453_v41 = vrot.slane %v4403_v56, %v10244_v57 }
 0x51f   :  { %v4215_v48 = vadd.f32 %v4213_v63, %v4197_v26 }
 0x520   :  { %v4312_v2 = vpop.permute.xlu1 %4311 }
 0x521   :  { %6331 = vset.pattern.permute.xlu1 %v9731_v18  ;;  %v4233_v55 = vadd.f32 %v4231_v3, %v4215_v48  ;;  %v9314_v11 = vpop.permute.xlu0 %5193  ;;  %v4319_v28 = vsub.f32 %v4312_v2, %v9308_v4  ;;  %v9330_v2 = vrot.slane %v4403_v56, %v7443_v38 }
 0x522   :  { %4931 = vperm.xlu1 %6331, %v10229_v23  }
 0x523   :  { %v4251_v22 = vadd.f32 %v4249_v37, %v4233_v55  ;;  %v4321_v60 = vand.u32 2147483647, %v4319_v28 }
 0x525   :  { %v4412_v19 = vpop.permute.xlu1 %4411  ;;  %v4269_v30 = vadd.f32 %v4267_v36, %v4251_v22  ;;  %v4430_v12 = vpop.permute.xlu0 %4429  ;;  %v10247_v22 = vld [vmem:[#allocation89_spill] sm:$0xff] }
 0x526   :  { %4935 = vperm.xlu1 %6331, %v10237_v35   ;;  %v4419_v49 = vsub.f32 %v4412_v19, %v9318_v59  ;;  %v4437_v19 = vsub.f32 %v4430_v12, %v4435_v46  ;;  %v4300_v12 = vsub.f32 %v9249_v31, %v9304_v62  ;;  %v10249_v31 = vld [vmem:[#allocation140_spill] sm:$0xff] }
 0x527   :  { %v4287_v34 = vadd.f32 %v4285_v21, %v4269_v30  ;;  %v4491_v21 = vsub.f32 %v10247_v22, %v9335_v6  ;;  %v4418_v62 = vsub.f32 %v10249_v31, %v9318_v59  ;;  %v9375_v59 = vld [vmem:[%s9614_s4 + $0xa0] sm:$0xff] }
 0x528   :  { %v4421_v14 = vand.u32 2147483647, %v4419_v49  ;;  %v4439_v48 = vand.u32 2147483647, %v4437_v19 }
 0x52a   :  { %v9286_v15 = vpop.permute.xlu1 %4425  ;;  %6332 = vset.pattern.permute.xlu1 %v10075_v61 }
 0x52b   :  { %4953 = vperm.xlu1 %6332, %v10237_v35  }
 0x52f   :  { %v9296_v51 = vpop.permute.xlu1 %4443  ;;  %6333 = vset.pattern.permute.xlu1 %v10185_v53 }
 0x530   :  { %4967 = vperm.xlu1 %6333, %v10229_v23  }
 0x533   :  { %v4448_v39 = vpop.permute.xlu1 %4447 }
 0x534   :  { %6334 = vset.pattern.permute.xlu1 %v9736_v9  ;;  %v4455_v63 = vsub.f32 %v4448_v39, %v4453_v41  ;;  %v9342_v39 = vrot.slane %v4403_v56, %v7457_v40 }
 0x535   :  { %4985 = vperm.xlu1 %6334, %v10229_v23   ;;  %v4305_v23 = vadd.f32 %v4303_v0, %v4287_v34  ;;  %v9349_v34 = vrot.slane %v4403_v56, %v7493_v47  ;;  %v9353_v0 = vrot.slane %v4403_v56, %v7474_v58  ;;  %v4302_v56 = vand.u32 2147483647, %v4300_v12 }
 0x536   :  { %v4457_v5 = vand.u32 2147483647, %v4455_v63  ;;  %v4472_v12 = vsub.f32 %v9241_v17, %v9330_v2 }
 0x537   :  { %v4323_v20 = vadd.f32 %v4321_v60, %v4305_v23 }
 0x538   :  { %v4466_v52 = vpop.permute.xlu1 %4465 }
 0x539   :  { %4989 = vperm.xlu1 %6334, %v10237_v35   ;;  %v10245_v35 = vld [vmem:[#allocation11_spill] sm:$0xff]  ;;  %v4423_v26 = vadd.f32 %v4421_v14, %v4323_v20  ;;  %v4473_v3 = vsub.f32 %v4466_v52, %v9330_v2  ;;  %v4493_v52 = vand.u32 2147483647, %v4491_v21  ;;  %v10248_v14 = vld [vmem:[#allocation94_spill] sm:$0xff] }
 0x53a   :  { %v4545_v20 = vsub.f32 %v10248_v14, %v9349_v34 }
 0x53b   :  { %v4441_v37 = vadd.f32 %v4439_v48, %v4423_v26  ;;  %v4475_v36 = vand.u32 2147483647, %v4473_v3  ;;  %v4318_v26 = vsub.f32 %v9259_v50, %v9308_v4  ;;  %v4420_v50 = vand.u32 2147483647, %v4418_v62 }
 0x53d   :  { %v9326_v42 = vpop.permute.xlu1 %4479  ;;  %6336 = vset.pattern.permute.xlu1 %v10228_v29  ;;  %v4459_v44 = vadd.f32 %v4457_v5, %v4441_v37  ;;  %v4547_v5 = vand.u32 2147483647, %v4545_v20  ;;  %v4320_v22 = vand.u32 2147483647, %v4318_v26 }
 0x53e   :  { %5089 = vperm.xlu1 %6336, %v10245_v35   ;;  %v4490_v14 = vsub.f32 %v9326_v42, %v9335_v6 }
 0x53f   :  { %v4477_v49 = vadd.f32 %v4475_v36, %v4459_v44  ;;  %v4304_v44 = vadd.f32 %v4302_v56, %v9234_v33  ;;  %v4643_v33 = vrot.slane %v9375_v59, %v7413_v10  ;;  %v4652_v56 = vpop.permute.xlu0 %4651 }
 0x540   :  { %v4492_v17 = vand.u32 2147483647, %v4490_v14 }
 0x541   :  { %v4495_v19 = vadd.f32 %v4493_v52, %v4477_v49  ;;  %v4322_v4 = vadd.f32 %v4320_v22, %v4304_v44 }
 0x542   :  { %v9337_v55 = vpop.permute.xlu1 %4497  ;;  %6337 = vset.pattern.permute.xlu1 %v10234_v13 }
 0x543   :  { %5103 = vperm.xlu1 %6337, %v10246_v1  }
 0x546   :  { %v4502_v30 = vpop.permute.xlu1 %4501 }
 0x547   :  { %v4509_v28 = vsub.f32 %v4502_v30, %v9342_v39  ;;  %6338 = vset.pattern.permute.xlu1 %v10208_v45  ;;  %v4436_v30 = vsub.f32 %v9286_v15, %v4435_v46 }
 0x548   :  { %5121 = vperm.xlu1 %6338, %v10246_v1  }
 0x549   :  { %v4511_v60 = vand.u32 2147483647, %v4509_v28  ;;  %v4454_v28 = vsub.f32 %v9296_v51, %v4453_v41  ;;  %v4438_v52 = vand.u32 2147483647, %v4436_v30  ;;  %v4679_v51 = vrot.slane %v9375_v59, %v10244_v57 }
 0x54b   :  { %v4520_v23 = vpop.permute.xlu1 %4519  ;;  %v4513_v3 = vadd.f32 %v4511_v60, %v4495_v19  ;;  %v4422_v60 = vadd.f32 %v4420_v50, %v4322_v4  ;;  %v4456_v15 = vand.u32 2147483647, %v4454_v28  ;;  %v4508_v19 = vsub.f32 %v9337_v55, %v9342_v39  ;;  %v9397_v4 = vpop.permute.xlu0 %5107 }
 0x54c   :  { %v4527_v63 = vsub.f32 %v4520_v23, %v9353_v0  ;;  %5125 = vperm.xlu1 %6338, %v10245_v35   ;;  %v4526_v55 = vsub.f32 %v9284_v43, %v9353_v0 }
 0x54d   :  { %v4440_v23 = vadd.f32 %v4438_v52, %v4422_v60  ;;  %v4510_v6 = vand.u32 2147483647, %v4508_v19  ;;  %v10251_v19 = vld [vmem:[#allocation34_spill] sm:$0xff] }
 0x54e   :  { %v4529_v48 = vand.u32 2147483647, %v4527_v63  ;;  %v4661_v63 = vrot.slane %v9375_v59, %v10243_v24 }
 0x54f   :  { %v4458_v20 = vadd.f32 %v4456_v15, %v4440_v23 }
 0x550   :  { %v4531_v37 = vadd.f32 %v4529_v48, %v4513_v3  ;;  %v4534_v36 = vpop.permute.xlu1 %4533  ;;  %6340 = vset.pattern.permute.xlu1 %v9713_v54  ;;  %v10250_v3 = vld [vmem:[#allocation102_spill] sm:$0xff] }
 0x551   :  { %5143 = vperm.xlu1 %6340, %v10245_v35   ;;  %v4681_v48 = vsub.f32 %v10250_v3, %v4679_v51  ;;  %v4544_v44 = vsub.f32 %v4534_v36, %v9349_v34  ;;  %v4697_v34 = vrot.slane %v9375_v59, %v7443_v38  ;;  %v9404_v36 = vpop.permute.xlu0 %5329 }
 0x552   :  { %v4549_v21 = vadd.f32 %v4547_v5, %v4531_v37  ;;  %v4474_v37 = vand.u32 2147483647, %v4472_v12 }
 0x553   :  { %v4683_v22 = vand.u32 2147483647, %v4681_v48  ;;  %v4546_v15 = vand.u32 2147483647, %v4544_v44 }
 0x554   :  { %v4476_v42 = vadd.f32 %v4474_v37, %v4458_v20  ;;  %v4733_v20 = vrot.slane %v9375_v59, %v7457_v40 }
 0x555   :  { %v4633_v49 = vpop.permute.xlu1 %4632  ;;  %6341 = vset.pattern.permute.xlu1 %v9731_v18 }
 0x556   :  { %5157 = vperm.xlu1 %6341, %v10246_v1   ;;  %v4494_v39 = vadd.f32 %v4492_v17, %v4476_v42  ;;  %v4644_v52 = vsub.f32 %v4633_v49, %v4643_v33  ;;  %v10252_v17 = vld [vmem:[#allocation71_spill] sm:$0xff] }
 0x558   :  { %v4512_v28 = vadd.f32 %v4510_v6, %v4494_v39  ;;  %v4646_v0 = vand.u32 2147483647, %v4644_v52  ;;  %v10253_v6 = vld [vmem:[#allocation28_spill] sm:$0xff]  ;;  %v4769_v52 = vrot.slane %v9375_v59, %v7493_v47 }
 0x559   :  { %v4638_v46 = vpop.permute.xlu1 %4637 }
 0x55a   :  { %v4645_v41 = vsub.f32 %v4638_v46, %v4643_v33  ;;  %6342 = vset.pattern.permute.xlu1 %v10075_v61 }
 0x55b   :  { %5175 = vperm.xlu1 %6342, %v10246_v1  }
 0x55c   :  { %v4647_v26 = vand.u32 2147483647, %v4645_v41  ;;  %v4662_v41 = vsub.f32 %v4652_v56, %v4661_v63 }
 0x55e   :  { %v4656_v5 = vpop.permute.xlu1 %4655  ;;  %v4649_v31 = vadd.f32 %v4647_v26, %v4549_v21  ;;  %v4528_v21 = vand.u32 2147483647, %v4526_v55  ;;  %v4664_v26 = vand.u32 2147483647, %v4662_v41 }
 0x55f   :  { %v4663_v2 = vsub.f32 %v4656_v5, %v4661_v63  ;;  %5179 = vperm.xlu1 %6342, %v10245_v35   ;;  %v4706_v63 = vpop.permute.xlu0 %4705 }
 0x560   :  { %v4530_v43 = vadd.f32 %v4528_v21, %v4512_v28 }
 0x561   :  { %v4665_v62 = vand.u32 2147483647, %v4663_v2  ;;  %v4735_v2 = vsub.f32 %v10252_v17, %v4733_v20 }
 0x562   :  { %v4548_v12 = vadd.f32 %v4546_v15, %v4530_v43 }
 0x563   :  { %v4667_v30 = vadd.f32 %v4665_v62, %v4649_v31  ;;  %v4670_v50 = vpop.permute.xlu1 %4669  ;;  %6344 = vset.pattern.permute.xlu1 %v10185_v53  ;;  %v4737_v39 = vand.u32 2147483647, %v4735_v2 }
 0x564   :  { %5197 = vperm.xlu1 %6344, %v10245_v35   ;;  %v4680_v35 = vsub.f32 %v4670_v50, %v4679_v51  ;;  %v4648_v49 = vadd.f32 %v4646_v0, %v4548_v12  ;;  %v9425_v12 = vld [vmem:[%s9614_s4 + $0xa8] sm:$0xff] }
 0x565   :  { %v4685_v60 = vadd.f32 %v4683_v22, %v4667_v30 }
 0x566   :  { %v4682_v3 = vand.u32 2147483647, %v4680_v35  ;;  %v4666_v56 = vadd.f32 %v4664_v26, %v4648_v49 }
 0x568   :  { %v4688_v46 = vpop.permute.xlu1 %4687  ;;  %6345 = vset.pattern.permute.xlu1 %v9736_v9  ;;  %v4684_v62 = vadd.f32 %v4682_v3, %v4666_v56  ;;  %v10255_v3 = vld [vmem:[#allocation114_spill] sm:$0xff] }
 0x569   :  { %5211 = vperm.xlu1 %6345, %v10246_v1   ;;  %v4698_v33 = vsub.f32 %v4688_v46, %v4697_v34  ;;  %v4715_v1 = vrot.slane %v9375_v59, %v7453_v32 }
 0x56b   :  { %v4700_v51 = vand.u32 2147483647, %v4698_v33  ;;  %v4716_v31 = vsub.f32 %v4706_v63, %v4715_v1 }
 0x56c   :  { %v4692_v23 = vpop.permute.xlu1 %4691 }
 0x56d   :  { %v4699_v14 = vsub.f32 %v4692_v23, %v4697_v34  ;;  %6346 = vset.pattern.permute.xlu1 %v10228_v29  ;;  %v4702_v55 = vadd.f32 %v4700_v51, %v4684_v62  ;;  %v4718_v50 = vand.u32 2147483647, %v4716_v31  ;;  %v10254_v34 = vld [vmem:[#allocation124_spill] sm:$0xff]  ;;  %v4905_v31 = vrot.slane %v9425_v12, %v10244_v57 }
 0x56e   :  { %5310 = vperm.xlu1 %6346, %v10251_v19   ;;  %v4770_v41 = vsub.f32 %v10254_v34, %v4769_v52  ;;  %v4887_v62 = vrot.slane %v9425_v12, %v10243_v24 }
 0x56f   :  { %v4701_v48 = vand.u32 2147483647, %v4699_v14  ;;  %v4720_v15 = vadd.f32 %v4718_v50, %v4702_v55 }
 0x570   :  { %v4772_v33 = vand.u32 2147483647, %v4770_v41 }
 0x571   :  { %v4703_v5 = vadd.f32 %v4701_v48, %v4685_v60  ;;  %v4710_v37 = vpop.permute.xlu1 %4709  ;;  %v4751_v60 = vrot.slane %v9375_v59, %v7474_v58  ;;  %v4869_v59 = vrot.slane %v9425_v12, %v7413_v10 }
 0x572   :  { %v4717_v42 = vsub.f32 %v4710_v37, %v4715_v1  ;;  %5315 = vperm.xlu1 %6346, %v10253_v6  }
 0x573   :  { %v4871_v48 = vsub.f32 %v10255_v3, %v4869_v59 }
 0x574   :  { %v4719_v22 = vand.u32 2147483647, %v4717_v42 }
 0x576   :  { %v4721_v44 = vadd.f32 %v4719_v22, %v4703_v5  ;;  %v4724_v30 = vpop.permute.xlu1 %4723  ;;  %6348 = vset.pattern.permute.xlu1 %v10234_v13  ;;  %v4873_v5 = vand.u32 2147483647, %v4871_v48 }
 0x577   :  { %v4734_v28 = vsub.f32 %v4724_v30, %v4733_v20  ;;  %5333 = vperm.xlu1 %6348, %v10253_v6   ;;  %v10256_v30 = vld [vmem:[#allocation135_spill] sm:$0xff] }
 0x578   :  { %v4739_v21 = vadd.f32 %v4737_v39, %v4721_v44  ;;  %v4906_v50 = vsub.f32 %v10256_v30, %v4905_v31 }
 0x579   :  { %v4736_v46 = vand.u32 2147483647, %v4734_v28 }
 0x57b   :  { %v4738_v43 = vadd.f32 %v4736_v46, %v4720_v15  ;;  %v4742_v0 = vpop.permute.xlu1 %4741  ;;  %6349 = vset.pattern.permute.xlu1 %v10208_v45 }
 0x57c   :  { %v4752_v35 = vsub.f32 %v4742_v0, %v4751_v60  ;;  %5347 = vperm.xlu1 %6349, %v10251_v19  }
 0x57e   :  { %v4754_v23 = vand.u32 2147483647, %v4752_v35 }
 0x57f   :  { %v4746_v49 = vpop.permute.xlu1 %4745 }
 0x580   :  { %v4756_v14 = vadd.f32 %v4754_v23, %v4738_v43  ;;  %v4753_v20 = vsub.f32 %v4746_v49, %v4751_v60  ;;  %6350 = vset.pattern.permute.xlu1 %v9713_v54 }
 0x581   :  { %5365 = vperm.xlu1 %6350, %v10251_v19  }
 0x582   :  { %v4755_v26 = vand.u32 2147483647, %v4753_v20  ;;  %v4774_v1 = vadd.f32 %v4772_v33, %v4756_v14  ;;  %v9449_v14 = vpop.permute.xlu0 %5161 }
 0x584   :  { %v4757_v63 = vadd.f32 %v4755_v26, %v4739_v21  ;;  %v4764_v56 = vpop.permute.xlu1 %4763  ;;  %v4908_v21 = vand.u32 2147483647, %v4906_v50 }
 0x585   :  { %v4771_v51 = vsub.f32 %v4764_v56, %v4769_v52  ;;  %5369 = vperm.xlu1 %6350, %v10253_v6  }
 0x586   :  { %v9457_v56 = vpop.permute.xlu0 %5383 }
 0x587   :  { %v4773_v37 = vand.u32 2147483647, %v4771_v51 }
 0x589   :  { %v4775_v17 = vadd.f32 %v4773_v37, %v4757_v63  ;;  %v4859_v2 = vpop.permute.xlu1 %4858  ;;  %6352 = vset.pattern.permute.xlu1 %v9731_v18 }
 0x58a   :  { %v4870_v42 = vsub.f32 %v4859_v2, %v4869_v59  ;;  %5387 = vperm.xlu1 %6352, %v10253_v6   ;;  %v4923_v59 = vrot.slane %v9425_v12, %v7443_v38  ;;  %v4959_v2 = vrot.slane %v9425_v12, %v7457_v40 }
 0x58b   :  { %v4875_v22 = vadd.f32 %v4873_v5, %v4775_v17 }
 0x58c   :  { %v4872_v55 = vand.u32 2147483647, %v4870_v42  ;;  %v4925_v48 = vsub.f32 %v9256_v25, %v4923_v59  ;;  %v4950_v25 = vpop.permute.xlu0 %4949 }
 0x58e   :  { %v4874_v39 = vadd.f32 %v4872_v55, %v4774_v1  ;;  %v4878_v44 = vpop.permute.xlu1 %4877  ;;  %6353 = vset.pattern.permute.xlu1 %v10075_v61  ;;  %v4927_v37 = vand.u32 2147483647, %v4925_v48  ;;  %v4960_v55 = vsub.f32 %v4950_v25, %v4959_v2 }
 0x58f   :  { %v4888_v28 = vsub.f32 %v4878_v44, %v4887_v62  ;;  %5401 = vperm.xlu1 %6353, %v10251_v19   ;;  %v9467_v44 = vld [vmem:[%s9614_s4 + $0xb0] sm:$0xff] }
 0x591   :  { %v4890_v52 = vand.u32 2147483647, %v4888_v28  ;;  %v4962_v28 = vand.u32 2147483647, %v4960_v55 }
 0x592   :  { %v4882_v60 = vpop.permute.xlu1 %4881 }
 0x593   :  { %v4892_v15 = vadd.f32 %v4890_v52, %v4874_v39  ;;  %v4889_v46 = vsub.f32 %v4882_v60, %v4887_v62  ;;  %6355 = vset.pattern.permute.xlu1 %v10185_v53  ;;  %v5095_v60 = vrot.slane %v9467_v44, %v7413_v10 }
 0x594   :  { %5419 = vperm.xlu1 %6355, %v10251_v19   ;;  %v4941_v19 = vrot.slane %v9425_v12, %v7453_v32 }
 0x595   :  { %v4891_v43 = vand.u32 2147483647, %v4889_v46  ;;  %v4910_v0 = vadd.f32 %v4908_v21, %v4892_v15  ;;  %v4995_v21 = vrot.slane %v9425_v12, %v7493_v47 }
 0x597   :  { %v4893_v34 = vadd.f32 %v4891_v43, %v4875_v22  ;;  %v4900_v41 = vpop.permute.xlu1 %4899 }
 0x598   :  { %v4907_v35 = vsub.f32 %v4900_v41, %v4905_v31  ;;  %5423 = vperm.xlu1 %6355, %v10253_v6  }
 0x59a   :  { %v4909_v23 = vand.u32 2147483647, %v4907_v35 }
 0x59c   :  { %v4911_v49 = vadd.f32 %v4909_v23, %v4893_v34  ;;  %v4914_v33 = vpop.permute.xlu1 %4913  ;;  %6356 = vset.pattern.permute.xlu1 %v9736_v9  ;;  %v10257_v34 = vld [vmem:[#allocation43_spill] sm:$0xff] }
 0x59d   :  { %v4924_v20 = vsub.f32 %v4914_v33, %v4923_v59  ;;  %5441 = vperm.xlu1 %6356, %v10253_v6   ;;  %v5096_v41 = vsub.f32 %v10257_v34, %v5095_v60 }
 0x59f   :  { %v4926_v26 = vand.u32 2147483647, %v4924_v20 }
 0x5a1   :  { %v4928_v1 = vadd.f32 %v4926_v26, %v4910_v0  ;;  %v4932_v3 = vpop.permute.xlu1 %4931  ;;  %6357 = vset.pattern.permute.xlu1 %v10228_v29  ;;  %v4929_v29 = vadd.f32 %v4927_v37, %v4911_v49  ;;  %v5098_v49 = vand.u32 2147483647, %v5096_v41 }
 0x5a2   :  { %v4942_v63 = vsub.f32 %v4932_v3, %v4941_v19  ;;  %5536 = vperm.xlu1 %6357, %v9236_v8  }
 0x5a4   :  { %v4944_v51 = vand.u32 2147483647, %v4942_v63  ;;  %v5113_v63 = vrot.slane %v9467_v44, %v10243_v24 }
 0x5a5   :  { %v4936_v5 = vpop.permute.xlu1 %4935 }
 0x5a6   :  { %v4946_v17 = vadd.f32 %v4944_v51, %v4928_v1  ;;  %v4943_v6 = vsub.f32 %v4936_v5, %v4941_v19  ;;  %6360 = vset.pattern.permute.xlu1 %v10234_v13  ;;  %v4977_v13 = vrot.slane %v9425_v12, %v7474_v58  ;;  %v5115_v25 = vsub.f32 %v9397_v4, %v5113_v63 }
 0x5a7   :  { %5555 = vperm.xlu1 %6360, %v9236_v8  }
 0x5a8   :  { %v4945_v42 = vand.u32 2147483647, %v4943_v6  ;;  %v4964_v15 = vadd.f32 %v4962_v28, %v4946_v17  ;;  %v5131_v17 = vrot.slane %v9467_v44, %v10244_v57  ;;  %v5117_v55 = vand.u32 2147483647, %v5115_v25 }
 0x5aa   :  { %v4947_v31 = vadd.f32 %v4945_v42, %v4929_v29  ;;  %v4954_v62 = vpop.permute.xlu1 %4953 }
 0x5ab   :  { %v4961_v22 = vsub.f32 %v4954_v62, %v4959_v2  ;;  %5559 = vperm.xlu1 %6360, %v9117_v27  }
 0x5ad   :  { %v4963_v39 = vand.u32 2147483647, %v4961_v22 }
 0x5af   :  { %v4965_v30 = vadd.f32 %v4963_v39, %v4947_v31  ;;  %v4968_v50 = vpop.permute.xlu1 %4967  ;;  %6361 = vset.pattern.permute.xlu1 %v10208_v45  ;;  %v4979_v45 = vsub.f32 %v9294_v7, %v4977_v13 }
 0x5b0   :  { %v4978_v52 = vsub.f32 %v4968_v50, %v4977_v13  ;;  %5577 = vperm.xlu1 %6361, %v9117_v27  }
 0x5b1   :  { %v4981_v33 = vand.u32 2147483647, %v4979_v45 }
 0x5b2   :  { %v4980_v46 = vand.u32 2147483647, %v4978_v52 }
 0x5b3   :  { %v4983_v12 = vadd.f32 %v4981_v33, %v4965_v30  ;;  %v9511_v33 = vpop.permute.xlu0 %5405 }
 0x5b4   :  { %v4982_v43 = vadd.f32 %v4980_v46, %v4964_v15  ;;  %v4986_v0 = vpop.permute.xlu1 %4985  ;;  %6362 = vset.pattern.permute.xlu1 %v9713_v54 }
 0x5b5   :  { %v4996_v35 = vsub.f32 %v4986_v0, %v4995_v21  ;;  %5591 = vperm.xlu1 %6362, %v9236_v8  }
 0x5b7   :  { %v4998_v23 = vand.u32 2147483647, %v4996_v35 }
 0x5b8   :  { %v4990_v59 = vpop.permute.xlu1 %4989 }
 0x5b9   :  { %v5000_v20 = vadd.f32 %v4998_v23, %v4982_v43  ;;  %v4997_v19 = vsub.f32 %v4990_v59, %v4995_v21  ;;  %6364 = vset.pattern.permute.xlu1 %v9731_v18  ;;  %v5149_v18 = vrot.slane %v9467_v44, %v7443_v38 }
 0x5ba   :  { %5609 = vperm.xlu1 %6364, %v9236_v8  }
 0x5bb   :  { %v4999_v26 = vand.u32 2147483647, %v4997_v19  ;;  %v5100_v54 = vadd.f32 %v5098_v49, %v5000_v20  ;;  %v5150_v42 = vsub.f32 %v9268_v16, %v5149_v18  ;;  %v5167_v19 = vrot.slane %v9467_v44, %v7453_v32 }
 0x5bd   :  { %v5001_v1 = vadd.f32 %v4999_v26, %v4983_v12  ;;  %v5090_v3 = vpop.permute.xlu1 %5089  ;;  %v5152_v22 = vand.u32 2147483647, %v5150_v42  ;;  %v5185_v12 = vrot.slane %v9467_v44, %v7457_v40 }
 0x5be   :  { %v5097_v48 = vsub.f32 %v5090_v3, %v5095_v60  ;;  %5613 = vperm.xlu1 %6364, %v9117_v27  }
 0x5c0   :  { %v5099_v7 = vand.u32 2147483647, %v5097_v48  ;;  %v9524_v48 = vld [vmem:[%s9614_s4 + $0xb8] sm:$0xff] }
 0x5c2   :  { %v5101_v51 = vadd.f32 %v5099_v7, %v5001_v1  ;;  %v5104_v5 = vpop.permute.xlu1 %5103  ;;  %6366 = vset.pattern.permute.xlu1 %v10075_v61  ;;  %v5216_v1 = vpop.permute.xlu0 %5215  ;;  %v5203_v7 = vrot.slane %v9467_v44, %v7474_v58 }
 0x5c3   :  { %v5114_v37 = vsub.f32 %v5104_v5, %v5113_v63  ;;  %5631 = vperm.xlu1 %6366, %v9117_v27  }
 0x5c4   :  { %v5119_v30 = vadd.f32 %v5117_v55, %v5101_v51  ;;  %v5169_v51 = vsub.f32 %v9449_v14, %v5167_v19 }
 0x5c5   :  { %v5116_v6 = vand.u32 2147483647, %v5114_v37  ;;  %v5221_v37 = vrot.slane %v9467_v44, %v7493_v47  ;;  %v5339_v44 = vrot.slane %v9524_v48, %v10243_v24 }
 0x5c7   :  { %v5118_v2 = vadd.f32 %v5116_v6, %v5100_v54  ;;  %v5122_v29 = vpop.permute.xlu1 %5121  ;;  %6367 = vset.pattern.permute.xlu1 %v10185_v53  ;;  %v9533_v6 = vpop.permute.xlu0 %5437 }
 0x5c8   :  { %v5132_v31 = vsub.f32 %v5122_v29, %v5131_v17  ;;  %5645 = vperm.xlu1 %6367, %v9236_v8   ;;  %v5204_v29 = vsub.f32 %v9314_v11, %v5203_v7  ;;  %v5357_v11 = vrot.slane %v9524_v48, %v10244_v57 }
 0x5ca   :  { %v5134_v61 = vand.u32 2147483647, %v5132_v31 }
 0x5cb   :  { %v5126_v62 = vpop.permute.xlu1 %5125 }
 0x5cc   :  { %v5136_v39 = vadd.f32 %v5134_v61, %v5118_v2  ;;  %v5133_v13 = vsub.f32 %v5126_v62, %v5131_v17  ;;  %6369 = vset.pattern.permute.xlu1 %v9736_v9  ;;  %v5321_v2 = vrot.slane %v9524_v48, %v7413_v10  ;;  %v5171_v61 = vand.u32 2147483647, %v5169_v51 }
 0x5cd   :  { %5663 = vperm.xlu1 %6369, %v9236_v8  }
 0x5ce   :  { %v5135_v50 = vand.u32 2147483647, %v5133_v13  ;;  %v5154_v53 = vadd.f32 %v5152_v22, %v5136_v39  ;;  %v9499_v4 = vpop.f32.mrb[24].mxu1  ;;  %v5206_v39 = vand.u32 2147483647, %v5204_v29 }
 0x5cf   :  { %v9501_v60 = vpop.f32.mrb[25].mxu1 }
 0x5d0   :  { %v5137_v28 = vadd.f32 %v5135_v50, %v5119_v30  ;;  %v5144_v16 = vpop.permute.xlu1 %5143 }
 0x5d1   :  { %v5151_v52 = vsub.f32 %v5144_v16, %v5149_v18  ;;  %5667 = vperm.xlu1 %6369, %v9117_v27   ;;  %v5223_v16 = vsub.f32 %v5216_v1, %v5221_v37 }
 0x5d3   :  { %v5153_v21 = vand.u32 2147483647, %v5151_v52 }
 0x5d5   :  { %v5155_v15 = vadd.f32 %v5153_v21, %v5137_v28  ;;  %v5158_v46 = vpop.permute.xlu1 %5157  ;;  %v9542_v28 = vpop.permute.xlu0 %5541 }
 0x5d6   :  { %v5168_v26 = vsub.f32 %v5158_v46, %v5167_v19 }
 0x5d7   :  { %v5173_v13 = vadd.f32 %v5171_v61, %v5155_v15 }
 0x5d8   :  { %v5170_v63 = vand.u32 2147483647, %v5168_v26 }
 0x5d9   :  { %v5352_v26 = vpop.permute.xlu0 %5351 }
 0x5da   :  { %v5176_v43 = vpop.permute.xlu1 %5175  ;;  %v5172_v42 = vadd.f32 %v5170_v63, %v5154_v53  ;;  %v5375_v53 = vrot.slane %v9524_v48, %v7443_v38  ;;  %v5393_v63 = vrot.slane %v9524_v48, %v7453_v32 }
 0x5db   :  { %v5186_v3 = vsub.f32 %v5176_v43, %v5185_v12 }
 0x5dd   :  { %v5188_v18 = vand.u32 2147483647, %v5186_v3 }
 0x5de   :  { %v5180_v0 = vpop.permute.xlu1 %5179 }
 0x5df   :  { %v5187_v17 = vsub.f32 %v5180_v0, %v5185_v12  ;;  %v5190_v62 = vadd.f32 %v5188_v18, %v5172_v42  ;;  %v5340_v0 = vsub.f32 %v9404_v36, %v5339_v44  ;;  %v5225_v12 = vand.u32 2147483647, %v5223_v16 }
 0x5e1   :  { %v5189_v14 = vand.u32 2147483647, %v5187_v17  ;;  %v5208_v21 = vadd.f32 %v5206_v39, %v5190_v62  ;;  %v5411_v17 = vrot.slane %v9524_v48, %v7457_v40 }
 0x5e3   :  { %v5198_v9 = vpop.permute.xlu1 %5197  ;;  %v5191_v52 = vadd.f32 %v5189_v14, %v5173_v13 }
 0x5e4   :  { %v5205_v25 = vsub.f32 %v5198_v9, %v5203_v7 }
 0x5e6   :  { %v5207_v30 = vand.u32 2147483647, %v5205_v25  ;;  %v5394_v25 = vsub.f32 %v9457_v56, %v5393_v63  ;;  %v5447_v56 = vrot.slane %v9524_v48, %v7493_v47 }
 0x5e8   :  { %v5212_v34 = vpop.permute.xlu1 %5211  ;;  %v5209_v15 = vadd.f32 %v5207_v30, %v5191_v52 }
 0x5e9   :  { %v5222_v31 = vsub.f32 %v5212_v34, %v5221_v37 }
 0x5ea   :  { %v5227_v37 = vadd.f32 %v5225_v12, %v5209_v15 }
 0x5eb   :  { %v5224_v50 = vand.u32 2147483647, %v5222_v31 }
 0x5ed   :  { %v5311_v8 = vpop.permute.xlu1 %5310  ;;  %v5226_v34 = vadd.f32 %v5224_v50, %v5208_v21 }
 0x5ee   :  { %v5322_v22 = vsub.f32 %v5311_v8, %v5321_v2 }
 0x5f0   :  { %v5324_v46 = vand.u32 2147483647, %v5322_v22 }
 0x5f1   :  { %v5316_v41 = vpop.permute.xlu1 %5315 }
 0x5f2   :  { %v5323_v43 = vsub.f32 %v5316_v41, %v5321_v2  ;;  %v5326_v1 = vadd.f32 %v5324_v46, %v5226_v34  ;;  %v5342_v41 = vand.u32 2147483647, %v5340_v0 }
 0x5f4   :  { %v5325_v3 = vand.u32 2147483647, %v5323_v43  ;;  %v5344_v29 = vadd.f32 %v5342_v41, %v5326_v1 }
 0x5f6   :  { %v5334_v45 = vpop.permute.xlu1 %5333  ;;  %v5327_v2 = vadd.f32 %v5325_v3, %v5227_v37 }
 0x5f7   :  { %v5341_v8 = vsub.f32 %v5334_v45, %v5339_v44  ;;  %v5359_v45 = vsub.f32 %v5352_v26, %v5357_v11  ;;  %v9567_v44 = vld [vmem:[%s9614_s4 + $0xc0] sm:$0xff]  ;;  %s6418_s4 = smov [#allocation2]  }
 0x5f8   :  { %v5565_v52 = vrot.slane %v9567_v44, %v10243_v24  ;;  %s5820_s28 = sshll.u32 %s6418_s4, 4  ;;  %s5821_s28 = int_to_ptr.vmem [resolvable:$true] %s5820_s28 }
 0x5f9   :  { %v5343_v36 = vand.u32 2147483647, %v5341_v8  ;;  %v5361_v39 = vand.u32 2147483647, %v5359_v45  ;;  %s6386_s29 = scalar_lea.vmem %s5821_s28, 256  ;;  %p6391_p1 = scmp.lt.s32.totalorder %s5821_s28, %s5821_s28 }
 0x5fa   :  { %p6387_p0 = scmp.ne.s32.totalorder %s5821_s28, %s6386_s29  ;;  %p6392_p2 = scmp.lt.s32.totalorder %s6386_s29, %s6386_s29 }
 0x5fb   :  { %v5348_v35 = vpop.permute.xlu1 %5347  ;;  %v5345_v31 = vadd.f32 %v5343_v36, %v5327_v2 }
 0x5fc   :  { %v5358_v19 = vsub.f32 %v5348_v35, %v5357_v11  ;;  %v5429_v35 = vrot.slane %v9524_v48, %v7474_v58  ;;  %v5448_v48 = vsub.f32 %v9533_v6, %v5447_v56  ;;  %p6393_p3 = por %p6392_p2, %p6391_p1 }
 0x5fd   :  { %v5363_v16 = vadd.f32 %v5361_v39, %v5345_v31 }
 0x5fe   :  { %v5360_v18 = vand.u32 2147483647, %v5358_v19  ;;  %v5574_v19 = vpop.permute.xlu0 %5573  ;;  %p6394_p4 = pnand %p6393_p3, %p6387_p0 }
 0x600   :  { %v9503_v23 = vpop.permute.xlu1 %5365  ;;  %v5362_v61 = vadd.f32 %v5360_v18, %v5344_v29 }
 0x601   :  { %v5376_v7 = vsub.f32 %v9503_v23, %v5375_v53 }
 0x603   :  { %v5378_v42 = vand.u32 2147483647, %v5376_v7  ;;  %v5450_v7 = vand.u32 2147483647, %v5448_v48 }
 0x604   :  { %v9505_v59 = vpop.permute.xlu1 %5369 }
 0x605   :  { %v5377_v23 = vsub.f32 %v9505_v59, %v5375_v53  ;;  %v5380_v13 = vadd.f32 %v5378_v42, %v5362_v61  ;;  %v5396_v59 = vand.u32 2147483647, %v5394_v25  ;;  %v5547_v53 = vrot.slane %v9567_v44, %v7413_v10 }
 0x607   :  { %v5379_v30 = vand.u32 2147483647, %v5377_v23  ;;  %v5398_v43 = vadd.f32 %v5396_v59, %v5380_v13  ;;  %v5549_v3 = vsub.f32 %v9542_v28, %v5547_v53 }
 0x609   :  { %v9507_v27 = vpop.permute.xlu1 %5387  ;;  %v5381_v46 = vadd.f32 %v5379_v30, %v5363_v16  ;;  %v5551_v28 = vand.u32 2147483647, %v5549_v3 }
 0x60a   :  { %v5395_v62 = vsub.f32 %v9507_v27, %v5393_v63 }
 0x60c   :  { %v5397_v11 = vand.u32 2147483647, %v5395_v62 }
 0x60e   :  { %v9509_v49 = vpop.permute.xlu1 %5401  ;;  %v5399_v15 = vadd.f32 %v5397_v11, %v5381_v46 }
 0x60f   :  { %v5412_v14 = vsub.f32 %v9509_v49, %v5411_v17  ;;  %v5413_v49 = vsub.f32 %v9511_v33, %v5411_v17 }
 0x611   :  { %v5414_v27 = vand.u32 2147483647, %v5412_v14  ;;  %v5415_v12 = vand.u32 2147483647, %v5413_v49 }
 0x613   :  { %v9513_v20 = vpop.permute.xlu1 %5419  ;;  %v5416_v34 = vadd.f32 %v5414_v27, %v5398_v43  ;;  %v5417_v6 = vadd.f32 %v5415_v12, %v5399_v15  ;;  %v5673_v43 = vrot.slane %v9567_v44, %v7493_v47 }
 0x614   :  { %v5430_v50 = vsub.f32 %v9513_v20, %v5429_v35 }
 0x616   :  { %v5432_v0 = vand.u32 2147483647, %v5430_v50 }
 0x617   :  { %v9519_v54 = vpop.permute.xlu1 %5423 }
 0x618   :  { %v5431_v20 = vsub.f32 %v9519_v54, %v5429_v35  ;;  %v5434_v10 = vadd.f32 %v5432_v0, %v5416_v34  ;;  %v5583_v54 = vrot.slane %v9567_v44, %v10244_v57  ;;  %v5596_v35 = vpop.permute.xlu0 %5595 }
 0x61a   :  { %v5433_v26 = vand.u32 2147483647, %v5431_v20  ;;  %v5452_v36 = vadd.f32 %v5450_v7, %v5434_v10  ;;  %v5584_v45 = vsub.f32 %v5574_v19, %v5583_v54 }
 0x61c   :  { %v9529_v5 = vpop.permute.xlu1 %5441  ;;  %v5435_v37 = vadd.f32 %v5433_v26, %v5417_v6  ;;  %v5628_v13 = vpop.permute.xlu0 %5627 }
 0x61d   :  { %v5449_v8 = vsub.f32 %v9529_v5, %v5447_v56  ;;  %v5601_v5 = vrot.slane %v9567_v44, %v7443_v38  ;;  %v5586_v38 = vand.u32 2147483647, %v5584_v45 }
 0x61f   :  { %v5451_v63 = vand.u32 2147483647, %v5449_v8 }
 0x620   :  { %v5650_v0 = vpop.permute.xlu0 %5649 }
 0x621   :  { %v9538_v55 = vpop.permute.xlu1 %5536  ;;  %v5453_v57 = vadd.f32 %v5451_v63, %v5435_v37 }
 0x622   :  { %v5548_v33 = vsub.f32 %v9538_v55, %v5547_v53  ;;  %v5619_v55 = vrot.slane %v9567_v44, %v7453_v32  ;;  %v5637_v32 = vrot.slane %v9567_v44, %v7457_v40 }
 0x623   :  { %v5553_v62 = vadd.f32 %v5551_v28, %v5453_v57 }
 0x624   :  { %v5550_v41 = vand.u32 2147483647, %v5548_v33  ;;  %v5638_v16 = vsub.f32 %v5628_v13, %v5637_v32 }
 0x626   :  { %v9549_v9 = vpop.permute.xlu1 %5555  ;;  %v5552_v2 = vadd.f32 %v5550_v41, %v5452_v36  ;;  %v5640_v20 = vand.u32 2147483647, %v5638_v16 }
 0x627   :  { %v5566_v24 = vsub.f32 %v9549_v9, %v5565_v52 }
 0x629   :  { %v5568_v18 = vand.u32 2147483647, %v5566_v24 }
 0x62a   :  { %v9554_v51 = vpop.permute.xlu1 %5559 }
 0x62b   :  { %v5567_v9 = vsub.f32 %v9554_v51, %v5565_v52  ;;  %v5570_v23 = vadd.f32 %v5568_v18, %v5552_v2  ;;  %v5603_v51 = vsub.f32 %v5596_v35, %v5601_v5 }
 0x62d   :  { %v5569_v25 = vand.u32 2147483647, %v5567_v9  ;;  %v5588_v50 = vadd.f32 %v5586_v38, %v5570_v23 }
 0x62f   :  { %v5578_v22 = vpop.permute.xlu1 %5577  ;;  %v5571_v30 = vadd.f32 %v5569_v25, %v5553_v62 }
 0x630   :  { %v5585_v29 = vsub.f32 %v5578_v22, %v5583_v54  ;;  %v5655_v22 = vrot.slane %v9567_v44, %v7474_v58 }
 0x632   :  { %v5587_v14 = vand.u32 2147483647, %v5585_v29  ;;  %v5657_v33 = vsub.f32 %v5650_v0, %v5655_v22 }
 0x634   :  { %v5592_v21 = vpop.permute.xlu1 %5591  ;;  %v5589_v11 = vadd.f32 %v5587_v14, %v5571_v30  ;;  %v5659_v3 = vand.u32 2147483647, %v5657_v33 }
 0x635   :  { %v5602_v42 = vsub.f32 %v5592_v21, %v5601_v5  ;;  %v5605_v21 = vand.u32 2147483647, %v5603_v51 }
 0x637   :  { %v5604_v39 = vand.u32 2147483647, %v5602_v42  ;;  %v5607_v48 = vadd.f32 %v5605_v21, %v5589_v11 }
 0x639   :  { %v5610_v1 = vpop.permute.xlu1 %5609  ;;  %v5606_v27 = vadd.f32 %v5604_v39, %v5588_v50 }
 0x63a   :  { %v5620_v31 = vsub.f32 %v5610_v1, %v5619_v55 }
 0x63c   :  { %v5622_v56 = vand.u32 2147483647, %v5620_v31 }
 0x63d   :  { %v5614_v17 = vpop.permute.xlu1 %5613 }
 0x63e   :  { %v5621_v59 = vsub.f32 %v5614_v17, %v5619_v55  ;;  %v5624_v40 = vadd.f32 %v5622_v56, %v5606_v27 }
 0x640   :  { %v5623_v46 = vand.u32 2147483647, %v5621_v59  ;;  %v5642_v19 = vadd.f32 %v5640_v20, %v5624_v40 }
 0x642   :  { %v5632_v61 = vpop.permute.xlu1 %5631  ;;  %v5625_v58 = vadd.f32 %v5623_v46, %v5607_v48 }
 0x643   :  { %v5639_v49 = vsub.f32 %v5632_v61, %v5637_v32 }
 0x645   :  { %v5641_v15 = vand.u32 2147483647, %v5639_v49 }
 0x647   :  { %v5646_v53 = vpop.permute.xlu1 %5645  ;;  %v5643_v10 = vadd.f32 %v5641_v15, %v5625_v58 }
 0x648   :  { %v5656_v52 = vsub.f32 %v5646_v53, %v5655_v22 }
 0x649   :  { %v5661_v63 = vadd.f32 %v5659_v3, %v5643_v10 }
 0x64a   :  { %v5658_v34 = vand.u32 2147483647, %v5656_v52 }
 0x64c   :  { %v5664_v8 = vpop.permute.xlu1 %5663  ;;  %v5660_v26 = vadd.f32 %v5658_v34, %v5642_v19 }
 0x64d   :  { %v5674_v12 = vsub.f32 %v5664_v8, %v5673_v43 }
 0x64f   :  { %v5676_v24 = vand.u32 2147483647, %v5674_v12 }
 0x650   :  { %v5668_v1 = vpop.permute.xlu1 %5667 }
 0x651   :  { %v5675_v54 = vsub.f32 %v5668_v1, %v5673_v43  ;;  %v5678_v7 = vadd.f32 %v5676_v24, %v5660_v26 }
 0x653   :  { %v5677_v6 = vand.u32 2147483647, %v5675_v54  ;;  %v5805_v47 = vadd.f32 %v9501_v60, %v5678_v7 }
 0x655   :  { %v5679_v44 = vadd.f32 %v5677_v6, %v5661_v63  ;;  %5813 = vst [vmem:[#allocation2] sm:$0xff] %v5805_v47 }
 0x657   :  { %v5810_v41 = vadd.f32 %v9499_v4, %v5679_v44 }
 0x659   :  { %5814 = vst [vmem:[#allocation2 + $0x8] sm:$0xff] %v5810_v41 }
 0x65a   :  { %6397 = shalt.err (!%p6394_p4)
}
 0x65b   :  { %s6398_s7 = scalar_lea.hbm %s9615_s5, 256 }
 0x65c   :  { %p6399_p5 = scmp.ne.s32.totalorder %s9615_s5, %s6398_s7  ;;  %p6402_p6 = scmp.lt.u32.totalorder %s6398_s7, %s9615_s5 }
 0x65e   :  { %p6404_p7 = pnand %p6402_p6, %p6399_p5 }
 0x660   :  { %6407 = shalt.err (!%p6404_p7)
}
 0x661   :  { %s6419_s12 = smov 128   ;;  %s6420_s13 = smov 8  }
 0x662   :  { %5826 = dma.vmem_to_hbm [thread:$0]  %s5821_s28, 256, %s9615_s5, [#allocation3], %s6419_s12, %s6419_s12, %s6420_s13  }
 0x663   :  { %6408 = dma.done.wait [#allocation3], 256  }
 0x664   :  { %6409 = vsyncadd [#allocation3], 4294967040 }
 0x665   :  { %5830 = vsyncpa [#allocation3], 1 }

</bundles_post_ra>
